<compile_context>
chip_gen: v5e
topology: v5e:2x2
jax: 0.10.0
libtpu: 0.0.40
codegen_flags: <defaults>
</compile_context>

<pallas_src>
import jax
import jax.numpy as jnp
from jax.experimental import pallas as pl
from jax.experimental.pallas import tpu as pltpu

# ----------------------------- config ---------------------------------------
BATCH = 2
SRC_LEN = 8
TRG_LEN = 6
EMB = 16
HID = 32          # encoder / decoder hidden size
HR = 16           # per-direction NER RNN hidden size
NUM_TAGS = 6
VOCAB = 50
MAX_OOV = 4
VTOT = VOCAB + MAX_OOV
VT_PAD = 128      # lane-dense padded extended vocab
PAD_ID, BOS_ID, EOS_ID, UNK_ID = 0, 1, 2, 3
BOS_WORD = "<bos>"
WORD2IDX = {"<pad>": PAD_ID, BOS_WORD: BOS_ID, "<eos>": EOS_ID, "<unk>": UNK_ID}

_VMEM = pl.BlockSpec(memory_space=pltpu.MemorySpace.VMEM)


# ----------------------------- fused kernel -----------------------------------
def _dual_cat_seq_kernel(
        # encoder GRU (per-gate layout)
        gxe_ref, whe_ref, bhe_ref,
        # NER forward / backward GRU
        gxf_ref, whf_ref, bhf_ref,
        gxb_ref, whb_ref, bhb_ref,
        # source mask, time-major [S,B,1]
        m_ref,
        # NER tag head
        wtagf_ref, wtagb_ref, btag_ref,
        # decoder GRU
        gxd_ref, whd_ref, bhd_ref,
        # attention projections (pre-transposed: Wa^T, Wan^T)
        wat_ref, want_ref,
        # flattened block-diagonal attention mask [T*B, S*B]
        amask_ref,
        # output head over lane-dense padded vocab
        woh_ref, woc_ref, won_ref, bo_ref,
        # pointer gate
        wph_ref, wpc_ref, wpn_ref, bp_ref, py_ref,
        # copy-match [T*B,S*B], target one-hot [T*B,VT_PAD], target mask [T*B,1]
        cmatch_ref, toh_ref, tmask_ref,
        # outputs
        em_ref, nll_ref,
        # scratch (batch-flattened sequences: row = pos * B + batch)
        mem_fl, fwd_fl, bwd_fl, h_fl):
    f32 = jnp.float32
    S = gxe_ref.shape[0]
    T = gxd_ref.shape[0]
    B = gxe_ref.shape[2]
    H = gxe_ref.shape[3]
    Hr = gxf_ref.shape[3]

    def gru_cell(h, gx_r, gx_z, gx_n, wh, bh):
        # Per-gate weights: no intra-vreg lane slicing of fused gate vectors.
        gr = jnp.dot(h, wh[0], preferred_element_type=f32) + bh[0]
        gz = jnp.dot(h, wh[1], preferred_element_type=f32) + bh[1]
        gn = jnp.dot(h, wh[2], preferred_element_type=f32) + bh[2]
        r = jax.nn.sigmoid(gx_r + gr)
        z = jax.nn.sigmoid(gx_z + gz)
        n = jnp.tanh(gx_n + r * gn)
        return (1.0 - z) * n + z * h

    # ---- phase 1: encoder GRU + NER fwd GRU + NER bwd GRU (one unrolled loop, 3 chains -> ILP)
    whe = (whe_ref[0], whe_ref[1], whe_ref[2])
    bhe = (bhe_ref[0], bhe_ref[1], bhe_ref[2])
    whf = (whf_ref[0], whf_ref[1], whf_ref[2])
    bhf = (bhf_ref[0], bhf_ref[1], bhf_ref[2])
    whb = (whb_ref[0], whb_ref[1], whb_ref[2])
    bhb = (bhb_ref[0], bhb_ref[1], bhb_ref[2])
    m_all = m_ref[...]                                        # [S,B,1] hoisted

    h_e = jnp.zeros((B, H), f32)
    h_f = jnp.zeros((B, Hr), f32)
    h_b = jnp.zeros((B, Hr), f32)
    for t in range(S):
        tb = S - 1 - t
        m_t = m_all[t]                                        # [B,1]
        m_tb = m_all[tb]

        hn = gru_cell(h_e, gxe_ref[t, 0], gxe_ref[t, 1], gxe_ref[t, 2], whe, bhe)
        h_e = m_t * hn + (1.0 - m_t) * h_e
        mem_fl[t * B:(t + 1) * B, :] = h_e                    # static-slice store

        fn = gru_cell(h_f, gxf_ref[t, 0], gxf_ref[t, 1], gxf_ref[t, 2], whf, bhf)
        h_f = m_t * fn + (1.0 - m_t) * h_f
        fwd_fl[t * B:(t + 1) * B, :] = h_f

        bn = gru_cell(h_b, gxb_ref[tb, 0], gxb_ref[tb, 1], gxb_ref[tb, 2], whb, bhb)
        h_b = m_tb * bn + (1.0 - m_tb) * h_b
        bwd_fl[tb * B:(tb + 1) * B, :] = h_b

    # ---- phase 2: NER tag emissions as one matmul over all S*B rows + entity bias
    em = (jnp.dot(fwd_fl[...], wtagf_ref[...], preferred_element_type=f32)
          + jnp.dot(bwd_fl[...], wtagb_ref[...], preferred_element_type=f32)
          + btag_ref[...])                                    # [S*B, K]
    em_ref[...] = em
    mx = jnp.max(em, axis=-1, keepdims=True)                  # [S*B,1]
    # argmax != 0  <=>  em[...,0] < max(em)   (greedy tag; padded positions masked in attention)
    ent_col = jnp.where(mx > em[:, 0:1], 1.0, 0.0)            # [S*B,1]
    # column -> row flip via an NT matmul with ones (avoids an in-kernel transpose)
    ent_row = jax.lax.dot_general(jnp.ones((1, 1), f32), ent_col,
                                  (((1,), (1,)), ((), ())),
                                  preferred_element_type=f32)  # [1, S*B]

    # ---- phase 3: decoder GRU recurrence (ONLY the cell is on the serial chain)
    whd = (whd_ref[0], whd_ref[1], whd_ref[2])
    bhd = (bhd_ref[0], bhd_ref[1], bhd_ref[2])
    h = h_e                                                   # encoder final state
    for t in range(T):
        h = gru_cell(h, gxd_ref[t, 0], gxd_ref[t, 1], gxd_ref[t, 2], whd, bhd)
        h_fl[t * B:(t + 1) * B, :] = h

    # ---- phase 4: bulk attention / pointer-generator / NLL head over all T*B rows
    hf = h_fl[...]                                            # [T*B, H]
    memf = mem_fl[...]                                        # [S*B, H]
    memWa = jnp.dot(memf, wat_ref[...], preferred_element_type=f32)   # hoisted query proj
    memnWa = jnp.dot(em, want_ref[...], preferred_element_type=f32)
    amask = amask_ref[...]                                    # [T*B, S*B] block-diag * src_mask

    def masked_softmax(scores):
        scores = jnp.where(amask > 0, scores, -1e9)
        scores = scores - jnp.max(scores, axis=-1, keepdims=True)
        e = jnp.exp(scores) * amask
        return e * pl.reciprocal(jnp.sum(e, axis=-1, keepdims=True) + 1e-9, approx=True)

    # word attention
    sc_w = jax.lax.dot_general(hf, memWa, (((1,), (1,)), ((), ())),
                               preferred_element_type=f32)    # [T*B, S*B]
    attn = masked_softmax(sc_w)
    ctx = jnp.dot(attn, memf, preferred_element_type=f32)     # [T*B, H]

    # NER attention (entity bias added pre-mask)
    sc_n = jax.lax.dot_general(hf, memnWa, (((1,), (1,)), ((), ())),
                               preferred_element_type=f32) + ent_row
    attn_n = masked_softmax(sc_n)
    ctx_n = jnp.dot(attn_n, em, preferred_element_type=f32)   # [T*B, K]

    # vocab distribution over lane-dense padded vocab (pad lanes biased to -1e9 -> zero mass)
    logits = (jnp.dot(hf, woh_ref[...], preferred_element_type=f32)
              + jnp.dot(ctx, woc_ref[...], preferred_element_type=f32)
              + jnp.dot(ctx_n, won_ref[...], preferred_element_type=f32)
              + bo_ref[...])                                  # [T*B, VT_PAD]
    logits = logits - jnp.max(logits, axis=-1, keepdims=True)
    el = jnp.exp(logits)
    vocab_dist = el * pl.reciprocal(jnp.sum(el, axis=-1, keepdims=True), approx=True)

    # pointer / generator gate
    pg = (jnp.sum(hf * wph_ref[...], axis=-1, keepdims=True)
          + jnp.sum(ctx * wpc_ref[...], axis=-1, keepdims=True)
          + jnp.sum(ctx_n * wpn_ref[...], axis=-1, keepdims=True)
          + py_ref[...] + bp_ref[...])                        # [T*B,1]
    p_gen = jax.nn.sigmoid(pg)

    # probability of the target token: generation part + copy part (no O(S*V) copy scatter)
    p_voc = jnp.sum(vocab_dist * toh_ref[...], axis=-1, keepdims=True)
    p_copy = jnp.sum(attn * cmatch_ref[...], axis=-1, keepdims=True)
    p_t = p_gen * p_voc + (1.0 - p_gen) * p_copy
    nll = -jnp.log(p_t + 1e-10) * tmask_ref[...]
    nll_ref[...] = jnp.sum(nll, axis=0, keepdims=True)        # [1,1] total masked NLL


# ----------------------------- CRF (plain JAX glue) ----------------------------
# TODO(synk): CRF partition function & score are data-dependent over a tiny tag space
# (NUM_TAGS=6); kept in plain JAX rather than Pallas.
def crf_neg_log_likelihood(emissions, tags, mask, trans, start_t, end_t, lens):
    B, S, K = emissions.shape
    bidx = jnp.arange(B)
    score = start_t[tags[:, 0]] + emissions[bidx, 0, tags[:, 0]]
    for t in range(1, S):
        em = emissions[bidx, t, tags[:, t]]
        tr = trans[tags[:, t - 1], tags[:, t]]
        score = score + (em + tr) * mask[:, t]
    last_idx = (lens - 1).astype(jnp.int32)
    score = score + end_t[tags[bidx, last_idx]]

    alpha = start_t[None, :] + emissions[:, 0, :]
    for t in range(1, S):
        inner = alpha[:, :, None] + trans[None, :, :] + emissions[:, t, None, :]
        new_alpha = jax.scipy.special.logsumexp(inner, axis=1)
        m = mask[:, t:t + 1]
        alpha = m * new_alpha + (1.0 - m) * alpha
    logz = jax.scipy.special.logsumexp(alpha + end_t[None, :], axis=1)
    return jnp.mean(logz - score)


# ----------------------------- full forward ------------------------------------
def dual_cat_seq_forward(params, src, src_lens, src_oov, max_num_oov, src_mask,
                         trg, trg_oov, trg_mask, trg_lens, tags):
    del max_num_oov, trg_lens
    p = params
    f32 = jnp.float32
    B, S = src.shape
    T = trg.shape[1]

    # embeddings + teacher-forcing inputs (y_0 = BOS, y_t = trg[:, t-1])
    emb_w = jnp.take(p['emb_word'], src, axis=0)                         # [B,S,E]
    emb_n = jnp.take(p['emb_ner'], src, axis=0)
    y_ids = jnp.concatenate(
        [jnp.full((B, 1), WORD2IDX[BOS_WORD], jnp.int32), trg[:, :-1]], axis=1)
    y_emb = jnp.take(p['emb_word'], y_ids, axis=0)                       # [B,T,E]

    # hoisted GRU input projections, laid out per-gate / time-major: [L, 3, B, Hd]
    def gate_inputs(emb, wx, bx, Hd):
        g = jnp.einsum('ble,eg->blg', emb, wx) + bx                      # [B,L,3Hd]
        Bn, L, _ = g.shape
        return jnp.transpose(g.reshape(Bn, L, 3, Hd), (1, 2, 0, 3))

    def gate_wh(wh, Hd):                                                 # [Hd,3Hd] -> [3,Hd,Hd]
        return jnp.transpose(wh.reshape(Hd, 3, Hd), (1, 0, 2))

    def gate_bh(bh, Hd):                                                 # [1,3Hd] -> [3,1,Hd]
        return jnp.transpose(bh.reshape(1, 3, Hd), (1, 0, 2))

    gxe = gate_inputs(emb_w, p['enc_wx'], p['enc_bx'], HID)
    gxf = gate_inputs(emb_n, p['nerf_wx'], p['nerf_bx'], HR)
    gxb = gate_inputs(emb_n, p['nerb_wx'], p['nerb_bx'], HR)
    gxd = gate_inputs(y_emb, p['dec_wx'], p['dec_bx'], HID)

    m_tm = jnp.transpose(src_mask, (1, 0))[:, :, None]                   # [S,B,1]

    # flattened-row bookkeeping: decoder row i = t*B + b, source column j = s*B + b'
    bi = jnp.arange(T * B) % B
    ti = jnp.arange(T * B) // B
    bj = jnp.arange(S * B) % B
    sj = jnp.arange(S * B) // B
    col_mask = src_mask[bj, sj]                                          # [S*B]
    same_batch = (bi[:, None] == bj[None, :])
    amask = same_batch.astype(f32) * col_mask[None, :]                   # [T*B, S*B]

    src_oov_col = src_oov[bj, sj]                                        # [S*B]
    trg_oov_row = trg_oov[bi, ti]                                        # [T*B]
    cmatch = (same_batch & (src_oov_col[None, :] == trg_oov_row[:, None])).astype(f32)
    toh_flat = jax.nn.one_hot(trg_oov_row, VT_PAD, dtype=f32)            # [T*B, VT_PAD]
    tmask_flat = trg_mask[bi, ti][:, None]                               # [T*B, 1]
    py_flat = jnp.einsum('bte,eo->bto', y_emb, p['wp_y'])[bi, ti]        # [T*B, 1]

    # lane-dense padded output weights; padded lanes get -1e9 bias (zero softmax mass)
    pad_cols = VT_PAD - VOCAB
    woh_p = jnp.pad(p['wo_h'], ((0, 0), (0, pad_cols)))
    woc_p = jnp.pad(p['wo_c'], ((0, 0), (0, pad_cols)))
    won_p = jnp.pad(p['wo_n'], ((0, 0), (0, pad_cols)))
    bo_p = jnp.concatenate(
        [p['b_out'], jnp.full((1, pad_cols), -1e9, f32)], axis=1)
    wph_row = p['wp_h'].T                                                # [1,H]
    wpc_row = p['wp_c'].T
    wpn_row = p['wp_n'].T                                                # [1,K]
    wat = p['w_attn'].T                                                  # [H,H]  (Wa^T)
    want = p['w_attn_ner'].T                                             # [K,H]  (Wan^T)
    w_tag_f = p['w_tag'][:HR, :]
    w_tag_b = p['w_tag'][HR:, :]

    em_flat, nll = pl.pallas_call(
        _dual_cat_seq_kernel,
        out_shape=(jax.ShapeDtypeStruct((S * B, NUM_TAGS), f32),
                   jax.ShapeDtypeStruct((1, 1), f32)),
        in_specs=[_VMEM] * 31,
        out_specs=(_VMEM, _VMEM),
        scratch_shapes=[pltpu.VMEM((S * B, HID), jnp.float32),
                        pltpu.VMEM((S * B, HR), jnp.float32),
                        pltpu.VMEM((S * B, HR), jnp.float32),
                        pltpu.VMEM((T * B, HID), jnp.float32)],
    )(gxe, gate_wh(p['enc_wh'], HID), gate_bh(p['enc_bh'], HID),
      gxf, gate_wh(p['nerf_wh'], HR), gate_bh(p['nerf_bh'], HR),
      gxb, gate_wh(p['nerb_wh'], HR), gate_bh(p['nerb_bh'], HR),
      m_tm,
      w_tag_f, w_tag_b, p['b_tag'],
      gxd, gate_wh(p['dec_wh'], HID), gate_bh(p['dec_bh'], HID),
      wat, want,
      amask,
      woh_p, woc_p, won_p, bo_p,
      wph_row, wpc_row, wpn_row, p['b_p'], py_flat,
      cmatch, toh_flat, tmask_flat)

    decoder_loss = nll[0, 0]                                             # total masked token NLL
    emissions = jnp.transpose(em_flat.reshape(S, B, NUM_TAGS), (1, 0, 2))  # [B,S,K]
    # TODO(synk): ner_seq uses greedy argmax over CRF emissions (done in-kernel as ent_bias)
    # instead of full Viterbi decoding.
    ner_loss = crf_neg_log_likelihood(emissions, tags, src_mask,
                                      p['crf_trans'], p['crf_start'],
                                      p['crf_end'], src_lens)
    return decoder_loss + ner_loss


# ----------------------------- deterministic params ----------------------------
def init_params(key):
    keys = iter(jax.random.split(key, 40))

    def nrm(shape, scale=0.1):
        return (scale * jax.random.normal(next(keys), shape)).astype(jnp.float32)

    p = {}
    p['emb_word'] = nrm((VOCAB, EMB))
    p['emb_ner'] = nrm((VOCAB, EMB))
    # encoder GRU
    p['enc_wx'] = nrm((EMB, 3 * HID)); p['enc_wh'] = nrm((HID, 3 * HID))
    p['enc_bx'] = jnp.zeros((1, 3 * HID), jnp.float32)
    p['enc_bh'] = jnp.zeros((1, 3 * HID), jnp.float32)
    # NER bi-GRU
    for d in ('nerf', 'nerb'):
        p[d + '_wx'] = nrm((EMB, 3 * HR)); p[d + '_wh'] = nrm((HR, 3 * HR))
        p[d + '_bx'] = jnp.zeros((1, 3 * HR), jnp.float32)
        p[d + '_bh'] = jnp.zeros((1, 3 * HR), jnp.float32)
    p['w_tag'] = nrm((2 * HR, NUM_TAGS)); p['b_tag'] = jnp.zeros((1, NUM_TAGS), jnp.float32)
    p['crf_trans'] = nrm((NUM_TAGS, NUM_TAGS))
    p['crf_start'] = nrm((NUM_TAGS,))
    p['crf_end'] = nrm((NUM_TAGS,))
    # decoder GRU
    p['dec_wx'] = nrm((EMB, 3 * HID)); p['dec_wh'] = nrm((HID, 3 * HID))
    p['dec_bx'] = jnp.zeros((1, 3 * HID), jnp.float32)
    p['dec_bh'] = jnp.zeros((1, 3 * HID), jnp.float32)
    # attention / output / pointer
    p['w_attn'] = nrm((HID, HID)); p['w_attn_ner'] = nrm((HID, NUM_TAGS))
    p['wo_h'] = nrm((HID, VOCAB)); p['wo_c'] = nrm((HID, VOCAB)); p['wo_n'] = nrm((NUM_TAGS, VOCAB))
    p['b_out'] = jnp.zeros((1, VOCAB), jnp.float32)
    p['wp_h'] = nrm((HID, 1)); p['wp_c'] = nrm((HID, 1)); p['wp_n'] = nrm((NUM_TAGS, 1))
    p['wp_y'] = nrm((EMB, 1)); p['b_p'] = jnp.zeros((1, 1), jnp.float32)
    return p


# ----------------------------- main --------------------------------------------
if __name__ == "__main__":
    key = jax.random.PRNGKey(0)
    kp, k1, k2, k3 = jax.random.split(key, 4)
    params = init_params(kp)

    src_lens = jnp.array([SRC_LEN, SRC_LEN - 2], jnp.int32)
    trg_lens = jnp.array([TRG_LEN, TRG_LEN - 2], jnp.int32)
    src_mask = (jnp.arange(SRC_LEN)[None, :] < src_lens[:, None]).astype(jnp.float32)
    trg_mask = (jnp.arange(TRG_LEN)[None, :] < trg_lens[:, None]).astype(jnp.float32)

    src = jax.random.randint(k1, (BATCH, SRC_LEN), 4, VOCAB).astype(jnp.int32)
    src = jnp.where(src_mask > 0, src, PAD_ID).astype(jnp.int32)
    trg = jax.random.randint(k2, (BATCH, TRG_LEN), 4, VOCAB).astype(jnp.int32)
    trg = jnp.where(trg_mask > 0, trg, PAD_ID).astype(jnp.int32)

    # extended-vocab copies with a couple of OOV ids (>= VOCAB)
    src_oov = src.at[0, 2].set(VOCAB).at[1, 1].set(VOCAB + 1)
    trg_oov = trg.at[0, 3].set(VOCAB)

    tags = jax.random.randint(k3, (BATCH, SRC_LEN), 0, NUM_TAGS).astype(jnp.int32)
    tags = jnp.where(src_mask > 0, tags, 0).astype(jnp.int32)

    max_num_oov = jnp.int32(MAX_OOV)

    forward = jax.jit(dual_cat_seq_forward)
    loss = forward(params, src, src_lens, src_oov, max_num_oov,
                   src_mask, trg, trg_oov, trg_mask, trg_lens, tags)
    loss = jax.block_until_ready(loss)
    assert jnp.isfinite(loss), "loss is not finite"
    print("KERNEL_OK")
</pallas_src>

<mosaic_0001>
module attributes {stable_mosaic.version = 11 : i64} {
  func.func @_dual_cat_seq_kernel(%arg0: memref<8x3x2x32xf32, #tpu.memory_space<vmem>>, %arg1: memref<3x32x32xf32, #tpu.memory_space<vmem>>, %arg2: memref<3x1x32xf32, #tpu.memory_space<vmem>>, %arg3: memref<8x3x2x16xf32, #tpu.memory_space<vmem>>, %arg4: memref<3x16x16xf32, #tpu.memory_space<vmem>>, %arg5: memref<3x1x16xf32, #tpu.memory_space<vmem>>, %arg6: memref<8x3x2x16xf32, #tpu.memory_space<vmem>>, %arg7: memref<3x16x16xf32, #tpu.memory_space<vmem>>, %arg8: memref<3x1x16xf32, #tpu.memory_space<vmem>>, %arg9: memref<8x2x1xf32, #tpu.memory_space<vmem>>, %arg10: memref<16x6xf32, #tpu.memory_space<vmem>>, %arg11: memref<16x6xf32, #tpu.memory_space<vmem>>, %arg12: memref<1x6xf32, #tpu.memory_space<vmem>>, %arg13: memref<6x3x2x32xf32, #tpu.memory_space<vmem>>, %arg14: memref<3x32x32xf32, #tpu.memory_space<vmem>>, %arg15: memref<3x1x32xf32, #tpu.memory_space<vmem>>, %arg16: memref<32x32xf32, #tpu.memory_space<vmem>>, %arg17: memref<6x32xf32, #tpu.memory_space<vmem>>, %arg18: memref<12x16xf32, #tpu.memory_space<vmem>>, %arg19: memref<32x128xf32, #tpu.memory_space<vmem>>, %arg20: memref<32x128xf32, #tpu.memory_space<vmem>>, %arg21: memref<6x128xf32, #tpu.memory_space<vmem>>, %arg22: memref<1x128xf32, #tpu.memory_space<vmem>>, %arg23: memref<1x32xf32, #tpu.memory_space<vmem>>, %arg24: memref<1x32xf32, #tpu.memory_space<vmem>>, %arg25: memref<1x6xf32, #tpu.memory_space<vmem>>, %arg26: memref<1x1xf32, #tpu.memory_space<vmem>>, %arg27: memref<12x1xf32, #tpu.memory_space<vmem>>, %arg28: memref<12x16xf32, #tpu.memory_space<vmem>>, %arg29: memref<12x128xf32, #tpu.memory_space<vmem>>, %arg30: memref<12x1xf32, #tpu.memory_space<vmem>>, %arg31: memref<16x6xf32, #tpu.memory_space<vmem>>, %arg32: memref<1x1xf32, #tpu.memory_space<vmem>>, %arg33: memref<16x32xf32, #tpu.memory_space<vmem>>, %arg34: memref<16x16xf32, #tpu.memory_space<vmem>>, %arg35: memref<16x16xf32, #tpu.memory_space<vmem>>, %arg36: memref<12x32xf32, #tpu.memory_space<vmem>>) attributes {dimension_semantics = [], scalar_prefetch = 0 : i64, scratch_operands = 4 : i64, tpu.core_type = #tpu.core_type<tc>} {
    %c0 = arith.constant 0 : index
    %c0_0 = arith.constant 0 : index
    %c0_1 = arith.constant 0 : index
    %0 = vector.load %arg1[%c0, %c0_0, %c0_1] : memref<3x32x32xf32, #tpu.memory_space<vmem>>, vector<1x32x32xf32>
    %1 = vector.shape_cast %0 : vector<1x32x32xf32> to vector<32x32xf32>
    %c1 = arith.constant 1 : index
    %c0_2 = arith.constant 0 : index
    %c0_3 = arith.constant 0 : index
    %2 = vector.load %arg1[%c1, %c0_2, %c0_3] : memref<3x32x32xf32, #tpu.memory_space<vmem>>, vector<1x32x32xf32>
    %3 = vector.shape_cast %2 : vector<1x32x32xf32> to vector<32x32xf32>
    %c2 = arith.constant 2 : index
    %c0_4 = arith.constant 0 : index
    %c0_5 = arith.constant 0 : index
    %4 = vector.load %arg1[%c2, %c0_4, %c0_5] : memref<3x32x32xf32, #tpu.memory_space<vmem>>, vector<1x32x32xf32>
    %5 = vector.shape_cast %4 : vector<1x32x32xf32> to vector<32x32xf32>
    %c0_6 = arith.constant 0 : index
    %c0_7 = arith.constant 0 : index
    %c0_8 = arith.constant 0 : index
    %6 = vector.load %arg2[%c0_6, %c0_7, %c0_8] : memref<3x1x32xf32, #tpu.memory_space<vmem>>, vector<1x1x32xf32>
    %7 = vector.shape_cast %6 : vector<1x1x32xf32> to vector<1x32xf32>
    %c1_9 = arith.constant 1 : index
    %c0_10 = arith.constant 0 : index
    %c0_11 = arith.constant 0 : index
    %8 = vector.load %arg2[%c1_9, %c0_10, %c0_11] : memref<3x1x32xf32, #tpu.memory_space<vmem>>, vector<1x1x32xf32>
    %9 = vector.shape_cast %8 : vector<1x1x32xf32> to vector<1x32xf32>
    %c2_12 = arith.constant 2 : index
    %c0_13 = arith.constant 0 : index
    %c0_14 = arith.constant 0 : index
    %10 = vector.load %arg2[%c2_12, %c0_13, %c0_14] : memref<3x1x32xf32, #tpu.memory_space<vmem>>, vector<1x1x32xf32>
    %11 = vector.shape_cast %10 : vector<1x1x32xf32> to vector<1x32xf32>
    %c0_15 = arith.constant 0 : index
    %c0_16 = arith.constant 0 : index
    %c0_17 = arith.constant 0 : index
    %12 = vector.load %arg4[%c0_15, %c0_16, %c0_17] : memref<3x16x16xf32, #tpu.memory_space<vmem>>, vector<1x16x16xf32>
    %13 = vector.shape_cast %12 : vector<1x16x16xf32> to vector<16x16xf32>
    %c1_18 = arith.constant 1 : index
    %c0_19 = arith.constant 0 : index
    %c0_20 = arith.constant 0 : index
    %14 = vector.load %arg4[%c1_18, %c0_19, %c0_20] : memref<3x16x16xf32, #tpu.memory_space<vmem>>, vector<1x16x16xf32>
    %15 = vector.shape_cast %14 : vector<1x16x16xf32> to vector<16x16xf32>
    %c2_21 = arith.constant 2 : index
    %c0_22 = arith.constant 0 : index
    %c0_23 = arith.constant 0 : index
    %16 = vector.load %arg4[%c2_21, %c0_22, %c0_23] : memref<3x16x16xf32, #tpu.memory_space<vmem>>, vector<1x16x16xf32>
    %17 = vector.shape_cast %16 : vector<1x16x16xf32> to vector<16x16xf32>
    %c0_24 = arith.constant 0 : index
    %c0_25 = arith.constant 0 : index
    %c0_26 = arith.constant 0 : index
    %18 = vector.load %arg5[%c0_24, %c0_25, %c0_26] : memref<3x1x16xf32, #tpu.memory_space<vmem>>, vector<1x1x16xf32>
    %19 = vector.shape_cast %18 : vector<1x1x16xf32> to vector<1x16xf32>
    %c1_27 = arith.constant 1 : index
    %c0_28 = arith.constant 0 : index
    %c0_29 = arith.constant 0 : index
    %20 = vector.load %arg5[%c1_27, %c0_28, %c0_29] : memref<3x1x16xf32, #tpu.memory_space<vmem>>, vector<1x1x16xf32>
    %21 = vector.shape_cast %20 : vector<1x1x16xf32> to vector<1x16xf32>
    %c2_30 = arith.constant 2 : index
    %c0_31 = arith.constant 0 : index
    %c0_32 = arith.constant 0 : index
    %22 = vector.load %arg5[%c2_30, %c0_31, %c0_32] : memref<3x1x16xf32, #tpu.memory_space<vmem>>, vector<1x1x16xf32>
    %23 = vector.shape_cast %22 : vector<1x1x16xf32> to vector<1x16xf32>
    %c0_33 = arith.constant 0 : index
    %c0_34 = arith.constant 0 : index
    %c0_35 = arith.constant 0 : index
    %24 = vector.load %arg7[%c0_33, %c0_34, %c0_35] : memref<3x16x16xf32, #tpu.memory_space<vmem>>, vector<1x16x16xf32>
    %25 = vector.shape_cast %24 : vector<1x16x16xf32> to vector<16x16xf32>
    %c1_36 = arith.constant 1 : index
    %c0_37 = arith.constant 0 : index
    %c0_38 = arith.constant 0 : index
    %26 = vector.load %arg7[%c1_36, %c0_37, %c0_38] : memref<3x16x16xf32, #tpu.memory_space<vmem>>, vector<1x16x16xf32>
    %27 = vector.shape_cast %26 : vector<1x16x16xf32> to vector<16x16xf32>
    %c2_39 = arith.constant 2 : index
    %c0_40 = arith.constant 0 : index
    %c0_41 = arith.constant 0 : index
    %28 = vector.load %arg7[%c2_39, %c0_40, %c0_41] : memref<3x16x16xf32, #tpu.memory_space<vmem>>, vector<1x16x16xf32>
    %29 = vector.shape_cast %28 : vector<1x16x16xf32> to vector<16x16xf32>
    %c0_42 = arith.constant 0 : index
    %c0_43 = arith.constant 0 : index
    %c0_44 = arith.constant 0 : index
    %30 = vector.load %arg8[%c0_42, %c0_43, %c0_44] : memref<3x1x16xf32, #tpu.memory_space<vmem>>, vector<1x1x16xf32>
    %31 = vector.shape_cast %30 : vector<1x1x16xf32> to vector<1x16xf32>
    %c1_45 = arith.constant 1 : index
    %c0_46 = arith.constant 0 : index
    %c0_47 = arith.constant 0 : index
    %32 = vector.load %arg8[%c1_45, %c0_46, %c0_47] : memref<3x1x16xf32, #tpu.memory_space<vmem>>, vector<1x1x16xf32>
    %33 = vector.shape_cast %32 : vector<1x1x16xf32> to vector<1x16xf32>
    %c2_48 = arith.constant 2 : index
    %c0_49 = arith.constant 0 : index
    %c0_50 = arith.constant 0 : index
    %34 = vector.load %arg8[%c2_48, %c0_49, %c0_50] : memref<3x1x16xf32, #tpu.memory_space<vmem>>, vector<1x1x16xf32>
    %35 = vector.shape_cast %34 : vector<1x1x16xf32> to vector<1x16xf32>
    %c0_51 = arith.constant 0 : index
    %c0_52 = arith.constant 0 : index
    %c0_53 = arith.constant 0 : index
    %36 = vector.load %arg9[%c0_51, %c0_52, %c0_53] : memref<8x2x1xf32, #tpu.memory_space<vmem>>, vector<8x2x1xf32>
    %cst = arith.constant 0.000000e+00 : f32
    %37 = vector.broadcast %cst : f32 to vector<2x32xf32>
    %cst_54 = arith.constant 0.000000e+00 : f32
    %38 = vector.broadcast %cst_54 : f32 to vector<2x16xf32>
    %cst_55 = arith.constant 0.000000e+00 : f32
    %39 = vector.broadcast %cst_55 : f32 to vector<2x16xf32>
    %40 = vector.extract_strided_slice %36 {offsets = [0, 0, 0], sizes = [1, 2, 1], strides = [1, 1, 1]} : vector<8x2x1xf32> to vector<1x2x1xf32>
    %41 = vector.shape_cast %40 : vector<1x2x1xf32> to vector<2x1xf32>
    %42 = vector.extract_strided_slice %36 {offsets = [7, 0, 0], sizes = [1, 2, 1], strides = [1, 1, 1]} : vector<8x2x1xf32> to vector<1x2x1xf32>
    %43 = vector.shape_cast %42 : vector<1x2x1xf32> to vector<2x1xf32>
    %c0_56 = arith.constant 0 : index
    %c0_57 = arith.constant 0 : index
    %c0_58 = arith.constant 0 : index
    %c0_59 = arith.constant 0 : index
    %44 = vector.load %arg0[%c0_56, %c0_57, %c0_58, %c0_59] : memref<8x3x2x32xf32, #tpu.memory_space<vmem>>, vector<1x1x2x32xf32>
    %45 = vector.shape_cast %44 : vector<1x1x2x32xf32> to vector<2x32xf32>
    %c0_60 = arith.constant 0 : index
    %c1_61 = arith.constant 1 : index
    %c0_62 = arith.constant 0 : index
    %c0_63 = arith.constant 0 : index
    %46 = vector.load %arg0[%c0_60, %c1_61, %c0_62, %c0_63] : memref<8x3x2x32xf32, #tpu.memory_space<vmem>>, vector<1x1x2x32xf32>
    %47 = vector.shape_cast %46 : vector<1x1x2x32xf32> to vector<2x32xf32>
    %c0_64 = arith.constant 0 : index
    %c2_65 = arith.constant 2 : index
    %c0_66 = arith.constant 0 : index
    %c0_67 = arith.constant 0 : index
    %48 = vector.load %arg0[%c0_64, %c2_65, %c0_66, %c0_67] : memref<8x3x2x32xf32, #tpu.memory_space<vmem>>, vector<1x1x2x32xf32>
    %49 = vector.shape_cast %48 : vector<1x1x2x32xf32> to vector<2x32xf32>
    %cst_68 = arith.constant dense<0.000000e+00> : vector<2x32xf32>
    %50 = tpu.matmul %37, %1, %cst_68 {dimension_numbers = #tpu.dot_dimension_numbers<[1], [0], [0], [1], [0, 0, 1, 1], [], []>} : vector<2x32xf32>, vector<32x32xf32>, vector<2x32xf32> -> vector<2x32xf32>
    %51 = vector.broadcast %7 : vector<1x32xf32> to vector<2x32xf32>
    %52 = arith.addf %50, %51 : vector<2x32xf32>
    %cst_69 = arith.constant dense<0.000000e+00> : vector<2x32xf32>
    %53 = tpu.matmul %37, %3, %cst_69 {dimension_numbers = #tpu.dot_dimension_numbers<[1], [0], [0], [1], [0, 0, 1, 1], [], []>} : vector<2x32xf32>, vector<32x32xf32>, vector<2x32xf32> -> vector<2x32xf32>
    %54 = vector.broadcast %9 : vector<1x32xf32> to vector<2x32xf32>
    %55 = arith.addf %53, %54 : vector<2x32xf32>
    %cst_70 = arith.constant dense<0.000000e+00> : vector<2x32xf32>
    %56 = tpu.matmul %37, %5, %cst_70 {dimension_numbers = #tpu.dot_dimension_numbers<[1], [0], [0], [1], [0, 0, 1, 1], [], []>} : vector<2x32xf32>, vector<32x32xf32>, vector<2x32xf32> -> vector<2x32xf32>
    %57 = vector.broadcast %11 : vector<1x32xf32> to vector<2x32xf32>
    %58 = arith.addf %56, %57 : vector<2x32xf32>
    %59 = arith.addf %45, %52 : vector<2x32xf32>
    %60 = arith.negf %59 : vector<2x32xf32>
    %61 = math.exp %60 : vector<2x32xf32>
    %cst_71 = arith.constant 1.000000e+00 : f32
    %62 = vector.broadcast %cst_71 : f32 to vector<2x32xf32>
    %63 = arith.addf %62, %61 : vector<2x32xf32>
    %64 = arith.divf %62, %63 : vector<2x32xf32>
    %65 = arith.addf %47, %55 : vector<2x32xf32>
    %66 = arith.negf %65 : vector<2x32xf32>
    %67 = math.exp %66 : vector<2x32xf32>
    %cst_72 = arith.constant 1.000000e+00 : f32
    %68 = vector.broadcast %cst_72 : f32 to vector<2x32xf32>
    %69 = arith.addf %68, %67 : vector<2x32xf32>
    %70 = arith.divf %68, %69 : vector<2x32xf32>
    %71 = arith.mulf %64, %58 : vector<2x32xf32>
    %72 = arith.addf %49, %71 : vector<2x32xf32>
    %73 = math.tanh %72 : vector<2x32xf32>
    %cst_73 = arith.constant 1.000000e+00 : f32
    %74 = vector.broadcast %cst_73 : f32 to vector<2x32xf32>
    %75 = arith.subf %74, %70 : vector<2x32xf32>
    %76 = arith.mulf %75, %73 : vector<2x32xf32>
    %77 = arith.mulf %70, %37 : vector<2x32xf32>
    %78 = arith.addf %76, %77 : vector<2x32xf32>
    %79 = vector.broadcast %41 : vector<2x1xf32> to vector<2x32xf32>
    %80 = arith.mulf %79, %78 : vector<2x32xf32>
    %cst_74 = arith.constant 1.000000e+00 : f32
    %81 = vector.broadcast %cst_74 : f32 to vector<2x1xf32>
    %82 = arith.subf %81, %41 : vector<2x1xf32>
    %83 = vector.broadcast %82 : vector<2x1xf32> to vector<2x32xf32>
    %84 = arith.mulf %83, %37 : vector<2x32xf32>
    %85 = arith.addf %80, %84 : vector<2x32xf32>
    %c0_75 = arith.constant 0 : index
    %c0_76 = arith.constant 0 : index
    %86 = vector.load %arg33[%c0_75, %c0_76] : memref<16x32xf32, #tpu.memory_space<vmem>>, vector<2x32xf32>
    tpu.vector_store %arg33[%c0_75, %c0_76], %85 {strides = array<i32>} : memref<16x32xf32, #tpu.memory_space<vmem>>, vector<2x32xf32>,
    %c0_77 = arith.constant 0 : index
    %c0_78 = arith.constant 0 : index
    %c0_79 = arith.constant 0 : index
    %c0_80 = arith.constant 0 : index
    %87 = vector.load %arg3[%c0_77, %c0_78, %c0_79, %c0_80] : memref<8x3x2x16xf32, #tpu.memory_space<vmem>>, vector<1x1x2x16xf32>
    %88 = vector.shape_cast %87 : vector<1x1x2x16xf32> to vector<2x16xf32>
    %c0_81 = arith.constant 0 : index
    %c1_82 = arith.constant 1 : index
    %c0_83 = arith.constant 0 : index
    %c0_84 = arith.constant 0 : index
    %89 = vector.load %arg3[%c0_81, %c1_82, %c0_83, %c0_84] : memref<8x3x2x16xf32, #tpu.memory_space<vmem>>, vector<1x1x2x16xf32>
    %90 = vector.shape_cast %89 : vector<1x1x2x16xf32> to vector<2x16xf32>
    %c0_85 = arith.constant 0 : index
    %c2_86 = arith.constant 2 : index
    %c0_87 = arith.constant 0 : index
    %c0_88 = arith.constant 0 : index
    %91 = vector.load %arg3[%c0_85, %c2_86, %c0_87, %c0_88] : memref<8x3x2x16xf32, #tpu.memory_space<vmem>>, vector<1x1x2x16xf32>
    %92 = vector.shape_cast %91 : vector<1x1x2x16xf32> to vector<2x16xf32>
    %cst_89 = arith.constant dense<0.000000e+00> : vector<2x16xf32>
    %93 = tpu.matmul %38, %13, %cst_89 {dimension_numbers = #tpu.dot_dimension_numbers<[1], [0], [0], [1], [0, 0, 1, 1], [], []>} : vector<2x16xf32>, vector<16x16xf32>, vector<2x16xf32> -> vector<2x16xf32>
    %94 = vector.broadcast %19 : vector<1x16xf32> to vector<2x16xf32>
    %95 = arith.addf %93, %94 : vector<2x16xf32>
    %cst_90 = arith.constant dense<0.000000e+00> : vector<2x16xf32>
    %96 = tpu.matmul %38, %15, %cst_90 {dimension_numbers = #tpu.dot_dimension_numbers<[1], [0], [0], [1], [0, 0, 1, 1], [], []>} : vector<2x16xf32>, vector<16x16xf32>, vector<2x16xf32> -> vector<2x16xf32>
    %97 = vector.broadcast %21 : vector<1x16xf32> to vector<2x16xf32>
    %98 = arith.addf %96, %97 : vector<2x16xf32>
    %cst_91 = arith.constant dense<0.000000e+00> : vector<2x16xf32>
    %99 = tpu.matmul %38, %17, %cst_91 {dimension_numbers = #tpu.dot_dimension_numbers<[1], [0], [0], [1], [0, 0, 1, 1], [], []>} : vector<2x16xf32>, vector<16x16xf32>, vector<2x16xf32> -> vector<2x16xf32>
    %100 = vector.broadcast %23 : vector<1x16xf32> to vector<2x16xf32>
    %101 = arith.addf %99, %100 : vector<2x16xf32>
    %102 = arith.addf %88, %95 : vector<2x16xf32>
    %103 = arith.negf %102 : vector<2x16xf32>
    %104 = math.exp %103 : vector<2x16xf32>
    %cst_92 = arith.constant 1.000000e+00 : f32
    %105 = vector.broadcast %cst_92 : f32 to vector<2x16xf32>
    %106 = arith.addf %105, %104 : vector<2x16xf32>
    %107 = arith.divf %105, %106 : vector<2x16xf32>
    %108 = arith.addf %90, %98 : vector<2x16xf32>
    %109 = arith.negf %108 : vector<2x16xf32>
    %110 = math.exp %109 : vector<2x16xf32>
    %cst_93 = arith.constant 1.000000e+00 : f32
    %111 = vector.broadcast %cst_93 : f32 to vector<2x16xf32>
    %112 = arith.addf %111, %110 : vector<2x16xf32>
    %113 = arith.divf %111, %112 : vector<2x16xf32>
    %114 = arith.mulf %107, %101 : vector<2x16xf32>
    %115 = arith.addf %92, %114 : vector<2x16xf32>
    %116 = math.tanh %115 : vector<2x16xf32>
    %cst_94 = arith.constant 1.000000e+00 : f32
    %117 = vector.broadcast %cst_94 : f32 to vector<2x16xf32>
    %118 = arith.subf %117, %113 : vector<2x16xf32>
    %119 = arith.mulf %118, %116 : vector<2x16xf32>
    %120 = arith.mulf %113, %38 : vector<2x16xf32>
    %121 = arith.addf %119, %120 : vector<2x16xf32>
    %122 = vector.broadcast %41 : vector<2x1xf32> to vector<2x16xf32>
    %123 = arith.mulf %122, %121 : vector<2x16xf32>
    %cst_95 = arith.constant 1.000000e+00 : f32
    %124 = vector.broadcast %cst_95 : f32 to vector<2x1xf32>
    %125 = arith.subf %124, %41 : vector<2x1xf32>
    %126 = vector.broadcast %125 : vector<2x1xf32> to vector<2x16xf32>
    %127 = arith.mulf %126, %38 : vector<2x16xf32>
    %128 = arith.addf %123, %127 : vector<2x16xf32>
    %c0_96 = arith.constant 0 : index
    %c0_97 = arith.constant 0 : index
    %129 = vector.load %arg34[%c0_96, %c0_97] : memref<16x16xf32, #tpu.memory_space<vmem>>, vector<2x16xf32>
    tpu.vector_store %arg34[%c0_96, %c0_97], %128 {strides = array<i32>} : memref<16x16xf32, #tpu.memory_space<vmem>>, vector<2x16xf32>,
    %c7 = arith.constant 7 : index
    %c0_98 = arith.constant 0 : index
    %c0_99 = arith.constant 0 : index
    %c0_100 = arith.constant 0 : index
    %130 = vector.load %arg6[%c7, %c0_98, %c0_99, %c0_100] : memref<8x3x2x16xf32, #tpu.memory_space<vmem>>, vector<1x1x2x16xf32>
    %131 = vector.shape_cast %130 : vector<1x1x2x16xf32> to vector<2x16xf32>
    %c7_101 = arith.constant 7 : index
    %c1_102 = arith.constant 1 : index
    %c0_103 = arith.constant 0 : index
    %c0_104 = arith.constant 0 : index
    %132 = vector.load %arg6[%c7_101, %c1_102, %c0_103, %c0_104] : memref<8x3x2x16xf32, #tpu.memory_space<vmem>>, vector<1x1x2x16xf32>
    %133 = vector.shape_cast %132 : vector<1x1x2x16xf32> to vector<2x16xf32>
    %c7_105 = arith.constant 7 : index
    %c2_106 = arith.constant 2 : index
    %c0_107 = arith.constant 0 : index
    %c0_108 = arith.constant 0 : index
    %134 = vector.load %arg6[%c7_105, %c2_106, %c0_107, %c0_108] : memref<8x3x2x16xf32, #tpu.memory_space<vmem>>, vector<1x1x2x16xf32>
    %135 = vector.shape_cast %134 : vector<1x1x2x16xf32> to vector<2x16xf32>
    %cst_109 = arith.constant dense<0.000000e+00> : vector<2x16xf32>
    %136 = tpu.matmul %39, %25, %cst_109 {dimension_numbers = #tpu.dot_dimension_numbers<[1], [0], [0], [1], [0, 0, 1, 1], [], []>} : vector<2x16xf32>, vector<16x16xf32>, vector<2x16xf32> -> vector<2x16xf32>
    %137 = vector.broadcast %31 : vector<1x16xf32> to vector<2x16xf32>
    %138 = arith.addf %136, %137 : vector<2x16xf32>
    %cst_110 = arith.constant dense<0.000000e+00> : vector<2x16xf32>
    %139 = tpu.matmul %39, %27, %cst_110 {dimension_numbers = #tpu.dot_dimension_numbers<[1], [0], [0], [1], [0, 0, 1, 1], [], []>} : vector<2x16xf32>, vector<16x16xf32>, vector<2x16xf32> -> vector<2x16xf32>
    %140 = vector.broadcast %33 : vector<1x16xf32> to vector<2x16xf32>
    %141 = arith.addf %139, %140 : vector<2x16xf32>
    %cst_111 = arith.constant dense<0.000000e+00> : vector<2x16xf32>
    %142 = tpu.matmul %39, %29, %cst_111 {dimension_numbers = #tpu.dot_dimension_numbers<[1], [0], [0], [1], [0, 0, 1, 1], [], []>} : vector<2x16xf32>, vector<16x16xf32>, vector<2x16xf32> -> vector<2x16xf32>
    %143 = vector.broadcast %35 : vector<1x16xf32> to vector<2x16xf32>
    %144 = arith.addf %142, %143 : vector<2x16xf32>
    %145 = arith.addf %131, %138 : vector<2x16xf32>
    %146 = arith.negf %145 : vector<2x16xf32>
    %147 = math.exp %146 : vector<2x16xf32>
    %cst_112 = arith.constant 1.000000e+00 : f32
    %148 = vector.broadcast %cst_112 : f32 to vector<2x16xf32>
    %149 = arith.addf %148, %147 : vector<2x16xf32>
    %150 = arith.divf %148, %149 : vector<2x16xf32>
    %151 = arith.addf %133, %141 : vector<2x16xf32>
    %152 = arith.negf %151 : vector<2x16xf32>
    %153 = math.exp %152 : vector<2x16xf32>
    %cst_113 = arith.constant 1.000000e+00 : f32
    %154 = vector.broadcast %cst_113 : f32 to vector<2x16xf32>
    %155 = arith.addf %154, %153 : vector<2x16xf32>
    %156 = arith.divf %154, %155 : vector<2x16xf32>
    %157 = arith.mulf %150, %144 : vector<2x16xf32>
    %158 = arith.addf %135, %157 : vector<2x16xf32>
    %159 = math.tanh %158 : vector<2x16xf32>
    %cst_114 = arith.constant 1.000000e+00 : f32
    %160 = vector.broadcast %cst_114 : f32 to vector<2x16xf32>
    %161 = arith.subf %160, %156 : vector<2x16xf32>
    %162 = arith.mulf %161, %159 : vector<2x16xf32>
    %163 = arith.mulf %156, %39 : vector<2x16xf32>
    %164 = arith.addf %162, %163 : vector<2x16xf32>
    %165 = vector.broadcast %43 : vector<2x1xf32> to vector<2x16xf32>
    %166 = arith.mulf %165, %164 : vector<2x16xf32>
    %cst_115 = arith.constant 1.000000e+00 : f32
    %167 = vector.broadcast %cst_115 : f32 to vector<2x1xf32>
    %168 = arith.subf %167, %43 : vector<2x1xf32>
    %169 = vector.broadcast %168 : vector<2x1xf32> to vector<2x16xf32>
    %170 = arith.mulf %169, %39 : vector<2x16xf32>
    %171 = arith.addf %166, %170 : vector<2x16xf32>
    %c14 = arith.constant 14 : index
    %c0_116 = arith.constant 0 : index
    %172 = vector.load %arg35[%c14, %c0_116] : memref<16x16xf32, #tpu.memory_space<vmem>>, vector<2x16xf32>
    tpu.vector_store %arg35[%c14, %c0_116], %171 {strides = array<i32>} : memref<16x16xf32, #tpu.memory_space<vmem>>, vector<2x16xf32>,
    %173 = vector.extract_strided_slice %36 {offsets = [1, 0, 0], sizes = [1, 2, 1], strides = [1, 1, 1]} : vector<8x2x1xf32> to vector<1x2x1xf32>
    %174 = vector.shape_cast %173 : vector<1x2x1xf32> to vector<2x1xf32>
    %175 = vector.extract_strided_slice %36 {offsets = [6, 0, 0], sizes = [1, 2, 1], strides = [1, 1, 1]} : vector<8x2x1xf32> to vector<1x2x1xf32>
    %176 = vector.shape_cast %175 : vector<1x2x1xf32> to vector<2x1xf32>
    %c1_117 = arith.constant 1 : index
    %c0_118 = arith.constant 0 : index
    %c0_119 = arith.constant 0 : index
    %c0_120 = arith.constant 0 : index
    %177 = vector.load %arg0[%c1_117, %c0_118, %c0_119, %c0_120] : memref<8x3x2x32xf32, #tpu.memory_space<vmem>>, vector<1x1x2x32xf32>
    %178 = vector.shape_cast %177 : vector<1x1x2x32xf32> to vector<2x32xf32>
    %c1_121 = arith.constant 1 : index
    %c1_122 = arith.constant 1 : index
    %c0_123 = arith.constant 0 : index
    %c0_124 = arith.constant 0 : index
    %179 = vector.load %arg0[%c1_121, %c1_122, %c0_123, %c0_124] : memref<8x3x2x32xf32, #tpu.memory_space<vmem>>, vector<1x1x2x32xf32>
    %180 = vector.shape_cast %179 : vector<1x1x2x32xf32> to vector<2x32xf32>
    %c1_125 = arith.constant 1 : index
    %c2_126 = arith.constant 2 : index
    %c0_127 = arith.constant 0 : index
    %c0_128 = arith.constant 0 : index
    %181 = vector.load %arg0[%c1_125, %c2_126, %c0_127, %c0_128] : memref<8x3x2x32xf32, #tpu.memory_space<vmem>>, vector<1x1x2x32xf32>
    %182 = vector.shape_cast %181 : vector<1x1x2x32xf32> to vector<2x32xf32>
    %cst_129 = arith.constant dense<0.000000e+00> : vector<2x32xf32>
    %183 = tpu.matmul %85, %1, %cst_129 {dimension_numbers = #tpu.dot_dimension_numbers<[1], [0], [0], [1], [0, 0, 1, 1], [], []>} : vector<2x32xf32>, vector<32x32xf32>, vector<2x32xf32> -> vector<2x32xf32>
    %184 = vector.broadcast %7 : vector<1x32xf32> to vector<2x32xf32>
    %185 = arith.addf %183, %184 : vector<2x32xf32>
    %cst_130 = arith.constant dense<0.000000e+00> : vector<2x32xf32>
    %186 = tpu.matmul %85, %3, %cst_130 {dimension_numbers = #tpu.dot_dimension_numbers<[1], [0], [0], [1], [0, 0, 1, 1], [], []>} : vector<2x32xf32>, vector<32x32xf32>, vector<2x32xf32> -> vector<2x32xf32>
    %187 = vector.broadcast %9 : vector<1x32xf32> to vector<2x32xf32>
    %188 = arith.addf %186, %187 : vector<2x32xf32>
    %cst_131 = arith.constant dense<0.000000e+00> : vector<2x32xf32>
    %189 = tpu.matmul %85, %5, %cst_131 {dimension_numbers = #tpu.dot_dimension_numbers<[1], [0], [0], [1], [0, 0, 1, 1], [], []>} : vector<2x32xf32>, vector<32x32xf32>, vector<2x32xf32> -> vector<2x32xf32>
    %190 = vector.broadcast %11 : vector<1x32xf32> to vector<2x32xf32>
    %191 = arith.addf %189, %190 : vector<2x32xf32>
    %192 = arith.addf %178, %185 : vector<2x32xf32>
    %193 = arith.negf %192 : vector<2x32xf32>
    %194 = math.exp %193 : vector<2x32xf32>
    %cst_132 = arith.constant 1.000000e+00 : f32
    %195 = vector.broadcast %cst_132 : f32 to vector<2x32xf32>
    %196 = arith.addf %195, %194 : vector<2x32xf32>
    %197 = arith.divf %195, %196 : vector<2x32xf32>
    %198 = arith.addf %180, %188 : vector<2x32xf32>
    %199 = arith.negf %198 : vector<2x32xf32>
    %200 = math.exp %199 : vector<2x32xf32>
    %cst_133 = arith.constant 1.000000e+00 : f32
    %201 = vector.broadcast %cst_133 : f32 to vector<2x32xf32>
    %202 = arith.addf %201, %200 : vector<2x32xf32>
    %203 = arith.divf %201, %202 : vector<2x32xf32>
    %204 = arith.mulf %197, %191 : vector<2x32xf32>
    %205 = arith.addf %182, %204 : vector<2x32xf32>
    %206 = math.tanh %205 : vector<2x32xf32>
    %cst_134 = arith.constant 1.000000e+00 : f32
    %207 = vector.broadcast %cst_134 : f32 to vector<2x32xf32>
    %208 = arith.subf %207, %203 : vector<2x32xf32>
    %209 = arith.mulf %208, %206 : vector<2x32xf32>
    %210 = arith.mulf %203, %85 : vector<2x32xf32>
    %211 = arith.addf %209, %210 : vector<2x32xf32>
    %212 = vector.broadcast %174 : vector<2x1xf32> to vector<2x32xf32>
    %213 = arith.mulf %212, %211 : vector<2x32xf32>
    %cst_135 = arith.constant 1.000000e+00 : f32
    %214 = vector.broadcast %cst_135 : f32 to vector<2x1xf32>
    %215 = arith.subf %214, %174 : vector<2x1xf32>
    %216 = vector.broadcast %215 : vector<2x1xf32> to vector<2x32xf32>
    %217 = arith.mulf %216, %85 : vector<2x32xf32>
    %218 = arith.addf %213, %217 : vector<2x32xf32>
    %c2_136 = arith.constant 2 : index
    %c0_137 = arith.constant 0 : index
    %219 = vector.load %arg33[%c2_136, %c0_137] : memref<16x32xf32, #tpu.memory_space<vmem>>, vector<2x32xf32>
    tpu.vector_store %arg33[%c2_136, %c0_137], %218 {strides = array<i32>} : memref<16x32xf32, #tpu.memory_space<vmem>>, vector<2x32xf32>,
    %c1_138 = arith.constant 1 : index
    %c0_139 = arith.constant 0 : index
    %c0_140 = arith.constant 0 : index
    %c0_141 = arith.constant 0 : index
    %220 = vector.load %arg3[%c1_138, %c0_139, %c0_140, %c0_141] : memref<8x3x2x16xf32, #tpu.memory_space<vmem>>, vector<1x1x2x16xf32>
    %221 = vector.shape_cast %220 : vector<1x1x2x16xf32> to vector<2x16xf32>
    %c1_142 = arith.constant 1 : index
    %c1_143 = arith.constant 1 : index
    %c0_144 = arith.constant 0 : index
    %c0_145 = arith.constant 0 : index
    %222 = vector.load %arg3[%c1_142, %c1_143, %c0_144, %c0_145] : memref<8x3x2x16xf32, #tpu.memory_space<vmem>>, vector<1x1x2x16xf32>
    %223 = vector.shape_cast %222 : vector<1x1x2x16xf32> to vector<2x16xf32>
    %c1_146 = arith.constant 1 : index
    %c2_147 = arith.constant 2 : index
    %c0_148 = arith.constant 0 : index
    %c0_149 = arith.constant 0 : index
    %224 = vector.load %arg3[%c1_146, %c2_147, %c0_148, %c0_149] : memref<8x3x2x16xf32, #tpu.memory_space<vmem>>, vector<1x1x2x16xf32>
    %225 = vector.shape_cast %224 : vector<1x1x2x16xf32> to vector<2x16xf32>
    %cst_150 = arith.constant dense<0.000000e+00> : vector<2x16xf32>
    %226 = tpu.matmul %128, %13, %cst_150 {dimension_numbers = #tpu.dot_dimension_numbers<[1], [0], [0], [1], [0, 0, 1, 1], [], []>} : vector<2x16xf32>, vector<16x16xf32>, vector<2x16xf32> -> vector<2x16xf32>
    %227 = vector.broadcast %19 : vector<1x16xf32> to vector<2x16xf32>
    %228 = arith.addf %226, %227 : vector<2x16xf32>
    %cst_151 = arith.constant dense<0.000000e+00> : vector<2x16xf32>
    %229 = tpu.matmul %128, %15, %cst_151 {dimension_numbers = #tpu.dot_dimension_numbers<[1], [0], [0], [1], [0, 0, 1, 1], [], []>} : vector<2x16xf32>, vector<16x16xf32>, vector<2x16xf32> -> vector<2x16xf32>
    %230 = vector.broadcast %21 : vector<1x16xf32> to vector<2x16xf32>
    %231 = arith.addf %229, %230 : vector<2x16xf32>
    %cst_152 = arith.constant dense<0.000000e+00> : vector<2x16xf32>
    %232 = tpu.matmul %128, %17, %cst_152 {dimension_numbers = #tpu.dot_dimension_numbers<[1], [0], [0], [1], [0, 0, 1, 1], [], []>} : vector<2x16xf32>, vector<16x16xf32>, vector<2x16xf32> -> vector<2x16xf32>
    %233 = vector.broadcast %23 : vector<1x16xf32> to vector<2x16xf32>
    %234 = arith.addf %232, %233 : vector<2x16xf32>
    %235 = arith.addf %221, %228 : vector<2x16xf32>
    %236 = arith.negf %235 : vector<2x16xf32>
    %237 = math.exp %236 : vector<2x16xf32>
    %cst_153 = arith.constant 1.000000e+00 : f32
    %238 = vector.broadcast %cst_153 : f32 to vector<2x16xf32>
    %239 = arith.addf %238, %237 : vector<2x16xf32>
    %240 = arith.divf %238, %239 : vector<2x16xf32>
    %241 = arith.addf %223, %231 : vector<2x16xf32>
    %242 = arith.negf %241 : vector<2x16xf32>
    %243 = math.exp %242 : vector<2x16xf32>
    %cst_154 = arith.constant 1.000000e+00 : f32
    %244 = vector.broadcast %cst_154 : f32 to vector<2x16xf32>
    %245 = arith.addf %244, %243 : vector<2x16xf32>
    %246 = arith.divf %244, %245 : vector<2x16xf32>
    %247 = arith.mulf %240, %234 : vector<2x16xf32>
    %248 = arith.addf %225, %247 : vector<2x16xf32>
    %249 = math.tanh %248 : vector<2x16xf32>
    %cst_155 = arith.constant 1.000000e+00 : f32
    %250 = vector.broadcast %cst_155 : f32 to vector<2x16xf32>
    %251 = arith.subf %250, %246 : vector<2x16xf32>
    %252 = arith.mulf %251, %249 : vector<2x16xf32>
    %253 = arith.mulf %246, %128 : vector<2x16xf32>
    %254 = arith.addf %252, %253 : vector<2x16xf32>
    %255 = vector.broadcast %174 : vector<2x1xf32> to vector<2x16xf32>
    %256 = arith.mulf %255, %254 : vector<2x16xf32>
    %cst_156 = arith.constant 1.000000e+00 : f32
    %257 = vector.broadcast %cst_156 : f32 to vector<2x1xf32>
    %258 = arith.subf %257, %174 : vector<2x1xf32>
    %259 = vector.broadcast %258 : vector<2x1xf32> to vector<2x16xf32>
    %260 = arith.mulf %259, %128 : vector<2x16xf32>
    %261 = arith.addf %256, %260 : vector<2x16xf32>
    %c2_157 = arith.constant 2 : index
    %c0_158 = arith.constant 0 : index
    %262 = vector.load %arg34[%c2_157, %c0_158] : memref<16x16xf32, #tpu.memory_space<vmem>>, vector<2x16xf32>
    tpu.vector_store %arg34[%c2_157, %c0_158], %261 {strides = array<i32>} : memref<16x16xf32, #tpu.memory_space<vmem>>, vector<2x16xf32>,
    %c6 = arith.constant 6 : index
    %c0_159 = arith.constant 0 : index
    %c0_160 = arith.constant 0 : index
    %c0_161 = arith.constant 0 : index
    %263 = vector.load %arg6[%c6, %c0_159, %c0_160, %c0_161] : memref<8x3x2x16xf32, #tpu.memory_space<vmem>>, vector<1x1x2x16xf32>
    %264 = vector.shape_cast %263 : vector<1x1x2x16xf32> to vector<2x16xf32>
    %c6_162 = arith.constant 6 : index
    %c1_163 = arith.constant 1 : index
    %c0_164 = arith.constant 0 : index
    %c0_165 = arith.constant 0 : index
    %265 = vector.load %arg6[%c6_162, %c1_163, %c0_164, %c0_165] : memref<8x3x2x16xf32, #tpu.memory_space<vmem>>, vector<1x1x2x16xf32>
    %266 = vector.shape_cast %265 : vector<1x1x2x16xf32> to vector<2x16xf32>
    %c6_166 = arith.constant 6 : index
    %c2_167 = arith.constant 2 : index
    %c0_168 = arith.constant 0 : index
    %c0_169 = arith.constant 0 : index
    %267 = vector.load %arg6[%c6_166, %c2_167, %c0_168, %c0_169] : memref<8x3x2x16xf32, #tpu.memory_space<vmem>>, vector<1x1x2x16xf32>
    %268 = vector.shape_cast %267 : vector<1x1x2x16xf32> to vector<2x16xf32>
    %cst_170 = arith.constant dense<0.000000e+00> : vector<2x16xf32>
    %269 = tpu.matmul %171, %25, %cst_170 {dimension_numbers = #tpu.dot_dimension_numbers<[1], [0], [0], [1], [0, 0, 1, 1], [], []>} : vector<2x16xf32>, vector<16x16xf32>, vector<2x16xf32> -> vector<2x16xf32>
    %270 = vector.broadcast %31 : vector<1x16xf32> to vector<2x16xf32>
    %271 = arith.addf %269, %270 : vector<2x16xf32>
    %cst_171 = arith.constant dense<0.000000e+00> : vector<2x16xf32>
    %272 = tpu.matmul %171, %27, %cst_171 {dimension_numbers = #tpu.dot_dimension_numbers<[1], [0], [0], [1], [0, 0, 1, 1], [], []>} : vector<2x16xf32>, vector<16x16xf32>, vector<2x16xf32> -> vector<2x16xf32>
    %273 = vector.broadcast %33 : vector<1x16xf32> to vector<2x16xf32>
    %274 = arith.addf %272, %273 : vector<2x16xf32>
    %cst_172 = arith.constant dense<0.000000e+00> : vector<2x16xf32>
    %275 = tpu.matmul %171, %29, %cst_172 {dimension_numbers = #tpu.dot_dimension_numbers<[1], [0], [0], [1], [0, 0, 1, 1], [], []>} : vector<2x16xf32>, vector<16x16xf32>, vector<2x16xf32> -> vector<2x16xf32>
    %276 = vector.broadcast %35 : vector<1x16xf32> to vector<2x16xf32>
    %277 = arith.addf %275, %276 : vector<2x16xf32>
    %278 = arith.addf %264, %271 : vector<2x16xf32>
    %279 = arith.negf %278 : vector<2x16xf32>
    %280 = math.exp %279 : vector<2x16xf32>
    %cst_173 = arith.constant 1.000000e+00 : f32
    %281 = vector.broadcast %cst_173 : f32 to vector<2x16xf32>
    %282 = arith.addf %281, %280 : vector<2x16xf32>
    %283 = arith.divf %281, %282 : vector<2x16xf32>
    %284 = arith.addf %266, %274 : vector<2x16xf32>
    %285 = arith.negf %284 : vector<2x16xf32>
    %286 = math.exp %285 : vector<2x16xf32>
    %cst_174 = arith.constant 1.000000e+00 : f32
    %287 = vector.broadcast %cst_174 : f32 to vector<2x16xf32>
    %288 = arith.addf %287, %286 : vector<2x16xf32>
    %289 = arith.divf %287, %288 : vector<2x16xf32>
    %290 = arith.mulf %283, %277 : vector<2x16xf32>
    %291 = arith.addf %268, %290 : vector<2x16xf32>
    %292 = math.tanh %291 : vector<2x16xf32>
    %cst_175 = arith.constant 1.000000e+00 : f32
    %293 = vector.broadcast %cst_175 : f32 to vector<2x16xf32>
    %294 = arith.subf %293, %289 : vector<2x16xf32>
    %295 = arith.mulf %294, %292 : vector<2x16xf32>
    %296 = arith.mulf %289, %171 : vector<2x16xf32>
    %297 = arith.addf %295, %296 : vector<2x16xf32>
    %298 = vector.broadcast %176 : vector<2x1xf32> to vector<2x16xf32>
    %299 = arith.mulf %298, %297 : vector<2x16xf32>
    %cst_176 = arith.constant 1.000000e+00 : f32
    %300 = vector.broadcast %cst_176 : f32 to vector<2x1xf32>
    %301 = arith.subf %300, %176 : vector<2x1xf32>
    %302 = vector.broadcast %301 : vector<2x1xf32> to vector<2x16xf32>
    %303 = arith.mulf %302, %171 : vector<2x16xf32>
    %304 = arith.addf %299, %303 : vector<2x16xf32>
    %c12 = arith.constant 12 : index
    %c0_177 = arith.constant 0 : index
    %305 = vector.load %arg35[%c12, %c0_177] : memref<16x16xf32, #tpu.memory_space<vmem>>, vector<2x16xf32>
    tpu.vector_store %arg35[%c12, %c0_177], %304 {strides = array<i32>} : memref<16x16xf32, #tpu.memory_space<vmem>>, vector<2x16xf32>,
    %306 = vector.extract_strided_slice %36 {offsets = [2, 0, 0], sizes = [1, 2, 1], strides = [1, 1, 1]} : vector<8x2x1xf32> to vector<1x2x1xf32>
    %307 = vector.shape_cast %306 : vector<1x2x1xf32> to vector<2x1xf32>
    %308 = vector.extract_strided_slice %36 {offsets = [5, 0, 0], sizes = [1, 2, 1], strides = [1, 1, 1]} : vector<8x2x1xf32> to vector<1x2x1xf32>
    %309 = vector.shape_cast %308 : vector<1x2x1xf32> to vector<2x1xf32>
    %c2_178 = arith.constant 2 : index
    %c0_179 = arith.constant 0 : index
    %c0_180 = arith.constant 0 : index
    %c0_181 = arith.constant 0 : index
    %310 = vector.load %arg0[%c2_178, %c0_179, %c0_180, %c0_181] : memref<8x3x2x32xf32, #tpu.memory_space<vmem>>, vector<1x1x2x32xf32>
    %311 = vector.shape_cast %310 : vector<1x1x2x32xf32> to vector<2x32xf32>
    %c2_182 = arith.constant 2 : index
    %c1_183 = arith.constant 1 : index
    %c0_184 = arith.constant 0 : index
    %c0_185 = arith.constant 0 : index
    %312 = vector.load %arg0[%c2_182, %c1_183, %c0_184, %c0_185] : memref<8x3x2x32xf32, #tpu.memory_space<vmem>>, vector<1x1x2x32xf32>
    %313 = vector.shape_cast %312 : vector<1x1x2x32xf32> to vector<2x32xf32>
    %c2_186 = arith.constant 2 : index
    %c2_187 = arith.constant 2 : index
    %c0_188 = arith.constant 0 : index
    %c0_189 = arith.constant 0 : index
    %314 = vector.load %arg0[%c2_186, %c2_187, %c0_188, %c0_189] : memref<8x3x2x32xf32, #tpu.memory_space<vmem>>, vector<1x1x2x32xf32>
    %315 = vector.shape_cast %314 : vector<1x1x2x32xf32> to vector<2x32xf32>
    %cst_190 = arith.constant dense<0.000000e+00> : vector<2x32xf32>
    %316 = tpu.matmul %218, %1, %cst_190 {dimension_numbers = #tpu.dot_dimension_numbers<[1], [0], [0], [1], [0, 0, 1, 1], [], []>} : vector<2x32xf32>, vector<32x32xf32>, vector<2x32xf32> -> vector<2x32xf32>
    %317 = vector.broadcast %7 : vector<1x32xf32> to vector<2x32xf32>
    %318 = arith.addf %316, %317 : vector<2x32xf32>
    %cst_191 = arith.constant dense<0.000000e+00> : vector<2x32xf32>
    %319 = tpu.matmul %218, %3, %cst_191 {dimension_numbers = #tpu.dot_dimension_numbers<[1], [0], [0], [1], [0, 0, 1, 1], [], []>} : vector<2x32xf32>, vector<32x32xf32>, vector<2x32xf32> -> vector<2x32xf32>
    %320 = vector.broadcast %9 : vector<1x32xf32> to vector<2x32xf32>
    %321 = arith.addf %319, %320 : vector<2x32xf32>
    %cst_192 = arith.constant dense<0.000000e+00> : vector<2x32xf32>
    %322 = tpu.matmul %218, %5, %cst_192 {dimension_numbers = #tpu.dot_dimension_numbers<[1], [0], [0], [1], [0, 0, 1, 1], [], []>} : vector<2x32xf32>, vector<32x32xf32>, vector<2x32xf32> -> vector<2x32xf32>
    %323 = vector.broadcast %11 : vector<1x32xf32> to vector<2x32xf32>
    %324 = arith.addf %322, %323 : vector<2x32xf32>
    %325 = arith.addf %311, %318 : vector<2x32xf32>
    %326 = arith.negf %325 : vector<2x32xf32>
    %327 = math.exp %326 : vector<2x32xf32>
    %cst_193 = arith.constant 1.000000e+00 : f32
    %328 = vector.broadcast %cst_193 : f32 to vector<2x32xf32>
    %329 = arith.addf %328, %327 : vector<2x32xf32>
    %330 = arith.divf %328, %329 : vector<2x32xf32>
    %331 = arith.addf %313, %321 : vector<2x32xf32>
    %332 = arith.negf %331 : vector<2x32xf32>
    %333 = math.exp %332 : vector<2x32xf32>
    %cst_194 = arith.constant 1.000000e+00 : f32
    %334 = vector.broadcast %cst_194 : f32 to vector<2x32xf32>
    %335 = arith.addf %334, %333 : vector<2x32xf32>
    %336 = arith.divf %334, %335 : vector<2x32xf32>
    %337 = arith.mulf %330, %324 : vector<2x32xf32>
    %338 = arith.addf %315, %337 : vector<2x32xf32>
    %339 = math.tanh %338 : vector<2x32xf32>
    %cst_195 = arith.constant 1.000000e+00 : f32
    %340 = vector.broadcast %cst_195 : f32 to vector<2x32xf32>
    %341 = arith.subf %340, %336 : vector<2x32xf32>
    %342 = arith.mulf %341, %339 : vector<2x32xf32>
    %343 = arith.mulf %336, %218 : vector<2x32xf32>
    %344 = arith.addf %342, %343 : vector<2x32xf32>
    %345 = vector.broadcast %307 : vector<2x1xf32> to vector<2x32xf32>
    %346 = arith.mulf %345, %344 : vector<2x32xf32>
    %cst_196 = arith.constant 1.000000e+00 : f32
    %347 = vector.broadcast %cst_196 : f32 to vector<2x1xf32>
    %348 = arith.subf %347, %307 : vector<2x1xf32>
    %349 = vector.broadcast %348 : vector<2x1xf32> to vector<2x32xf32>
    %350 = arith.mulf %349, %218 : vector<2x32xf32>
    %351 = arith.addf %346, %350 : vector<2x32xf32>
    %c4 = arith.constant 4 : index
    %c0_197 = arith.constant 0 : index
    %352 = vector.load %arg33[%c4, %c0_197] : memref<16x32xf32, #tpu.memory_space<vmem>>, vector<2x32xf32>
    tpu.vector_store %arg33[%c4, %c0_197], %351 {strides = array<i32>} : memref<16x32xf32, #tpu.memory_space<vmem>>, vector<2x32xf32>,
    %c2_198 = arith.constant 2 : index
    %c0_199 = arith.constant 0 : index
    %c0_200 = arith.constant 0 : index
    %c0_201 = arith.constant 0 : index
    %353 = vector.load %arg3[%c2_198, %c0_199, %c0_200, %c0_201] : memref<8x3x2x16xf32, #tpu.memory_space<vmem>>, vector<1x1x2x16xf32>
    %354 = vector.shape_cast %353 : vector<1x1x2x16xf32> to vector<2x16xf32>
    %c2_202 = arith.constant 2 : index
    %c1_203 = arith.constant 1 : index
    %c0_204 = arith.constant 0 : index
    %c0_205 = arith.constant 0 : index
    %355 = vector.load %arg3[%c2_202, %c1_203, %c0_204, %c0_205] : memref<8x3x2x16xf32, #tpu.memory_space<vmem>>, vector<1x1x2x16xf32>
    %356 = vector.shape_cast %355 : vector<1x1x2x16xf32> to vector<2x16xf32>
    %c2_206 = arith.constant 2 : index
    %c2_207 = arith.constant 2 : index
    %c0_208 = arith.constant 0 : index
    %c0_209 = arith.constant 0 : index
    %357 = vector.load %arg3[%c2_206, %c2_207, %c0_208, %c0_209] : memref<8x3x2x16xf32, #tpu.memory_space<vmem>>, vector<1x1x2x16xf32>
    %358 = vector.shape_cast %357 : vector<1x1x2x16xf32> to vector<2x16xf32>
    %cst_210 = arith.constant dense<0.000000e+00> : vector<2x16xf32>
    %359 = tpu.matmul %261, %13, %cst_210 {dimension_numbers = #tpu.dot_dimension_numbers<[1], [0], [0], [1], [0, 0, 1, 1], [], []>} : vector<2x16xf32>, vector<16x16xf32>, vector<2x16xf32> -> vector<2x16xf32>
    %360 = vector.broadcast %19 : vector<1x16xf32> to vector<2x16xf32>
    %361 = arith.addf %359, %360 : vector<2x16xf32>
    %cst_211 = arith.constant dense<0.000000e+00> : vector<2x16xf32>
    %362 = tpu.matmul %261, %15, %cst_211 {dimension_numbers = #tpu.dot_dimension_numbers<[1], [0], [0], [1], [0, 0, 1, 1], [], []>} : vector<2x16xf32>, vector<16x16xf32>, vector<2x16xf32> -> vector<2x16xf32>
    %363 = vector.broadcast %21 : vector<1x16xf32> to vector<2x16xf32>
    %364 = arith.addf %362, %363 : vector<2x16xf32>
    %cst_212 = arith.constant dense<0.000000e+00> : vector<2x16xf32>
    %365 = tpu.matmul %261, %17, %cst_212 {dimension_numbers = #tpu.dot_dimension_numbers<[1], [0], [0], [1], [0, 0, 1, 1], [], []>} : vector<2x16xf32>, vector<16x16xf32>, vector<2x16xf32> -> vector<2x16xf32>
    %366 = vector.broadcast %23 : vector<1x16xf32> to vector<2x16xf32>
    %367 = arith.addf %365, %366 : vector<2x16xf32>
    %368 = arith.addf %354, %361 : vector<2x16xf32>
    %369 = arith.negf %368 : vector<2x16xf32>
    %370 = math.exp %369 : vector<2x16xf32>
    %cst_213 = arith.constant 1.000000e+00 : f32
    %371 = vector.broadcast %cst_213 : f32 to vector<2x16xf32>
    %372 = arith.addf %371, %370 : vector<2x16xf32>
    %373 = arith.divf %371, %372 : vector<2x16xf32>
    %374 = arith.addf %356, %364 : vector<2x16xf32>
    %375 = arith.negf %374 : vector<2x16xf32>
    %376 = math.exp %375 : vector<2x16xf32>
    %cst_214 = arith.constant 1.000000e+00 : f32
    %377 = vector.broadcast %cst_214 : f32 to vector<2x16xf32>
    %378 = arith.addf %377, %376 : vector<2x16xf32>
    %379 = arith.divf %377, %378 : vector<2x16xf32>
    %380 = arith.mulf %373, %367 : vector<2x16xf32>
    %381 = arith.addf %358, %380 : vector<2x16xf32>
    %382 = math.tanh %381 : vector<2x16xf32>
    %cst_215 = arith.constant 1.000000e+00 : f32
    %383 = vector.broadcast %cst_215 : f32 to vector<2x16xf32>
    %384 = arith.subf %383, %379 : vector<2x16xf32>
    %385 = arith.mulf %384, %382 : vector<2x16xf32>
    %386 = arith.mulf %379, %261 : vector<2x16xf32>
    %387 = arith.addf %385, %386 : vector<2x16xf32>
    %388 = vector.broadcast %307 : vector<2x1xf32> to vector<2x16xf32>
    %389 = arith.mulf %388, %387 : vector<2x16xf32>
    %cst_216 = arith.constant 1.000000e+00 : f32
    %390 = vector.broadcast %cst_216 : f32 to vector<2x1xf32>
    %391 = arith.subf %390, %307 : vector<2x1xf32>
    %392 = vector.broadcast %391 : vector<2x1xf32> to vector<2x16xf32>
    %393 = arith.mulf %392, %261 : vector<2x16xf32>
    %394 = arith.addf %389, %393 : vector<2x16xf32>
    %c4_217 = arith.constant 4 : index
    %c0_218 = arith.constant 0 : index
    %395 = vector.load %arg34[%c4_217, %c0_218] : memref<16x16xf32, #tpu.memory_space<vmem>>, vector<2x16xf32>
    tpu.vector_store %arg34[%c4_217, %c0_218], %394 {strides = array<i32>} : memref<16x16xf32, #tpu.memory_space<vmem>>, vector<2x16xf32>,
    %c5 = arith.constant 5 : index
    %c0_219 = arith.constant 0 : index
    %c0_220 = arith.constant 0 : index
    %c0_221 = arith.constant 0 : index
    %396 = vector.load %arg6[%c5, %c0_219, %c0_220, %c0_221] : memref<8x3x2x16xf32, #tpu.memory_space<vmem>>, vector<1x1x2x16xf32>
    %397 = vector.shape_cast %396 : vector<1x1x2x16xf32> to vector<2x16xf32>
    %c5_222 = arith.constant 5 : index
    %c1_223 = arith.constant 1 : index
    %c0_224 = arith.constant 0 : index
    %c0_225 = arith.constant 0 : index
    %398 = vector.load %arg6[%c5_222, %c1_223, %c0_224, %c0_225] : memref<8x3x2x16xf32, #tpu.memory_space<vmem>>, vector<1x1x2x16xf32>
    %399 = vector.shape_cast %398 : vector<1x1x2x16xf32> to vector<2x16xf32>
    %c5_226 = arith.constant 5 : index
    %c2_227 = arith.constant 2 : index
    %c0_228 = arith.constant 0 : index
    %c0_229 = arith.constant 0 : index
    %400 = vector.load %arg6[%c5_226, %c2_227, %c0_228, %c0_229] : memref<8x3x2x16xf32, #tpu.memory_space<vmem>>, vector<1x1x2x16xf32>
    %401 = vector.shape_cast %400 : vector<1x1x2x16xf32> to vector<2x16xf32>
    %cst_230 = arith.constant dense<0.000000e+00> : vector<2x16xf32>
    %402 = tpu.matmul %304, %25, %cst_230 {dimension_numbers = #tpu.dot_dimension_numbers<[1], [0], [0], [1], [0, 0, 1, 1], [], []>} : vector<2x16xf32>, vector<16x16xf32>, vector<2x16xf32> -> vector<2x16xf32>
    %403 = vector.broadcast %31 : vector<1x16xf32> to vector<2x16xf32>
    %404 = arith.addf %402, %403 : vector<2x16xf32>
    %cst_231 = arith.constant dense<0.000000e+00> : vector<2x16xf32>
    %405 = tpu.matmul %304, %27, %cst_231 {dimension_numbers = #tpu.dot_dimension_numbers<[1], [0], [0], [1], [0, 0, 1, 1], [], []>} : vector<2x16xf32>, vector<16x16xf32>, vector<2x16xf32> -> vector<2x16xf32>
    %406 = vector.broadcast %33 : vector<1x16xf32> to vector<2x16xf32>
    %407 = arith.addf %405, %406 : vector<2x16xf32>
    %cst_232 = arith.constant dense<0.000000e+00> : vector<2x16xf32>
    %408 = tpu.matmul %304, %29, %cst_232 {dimension_numbers = #tpu.dot_dimension_numbers<[1], [0], [0], [1], [0, 0, 1, 1], [], []>} : vector<2x16xf32>, vector<16x16xf32>, vector<2x16xf32> -> vector<2x16xf32>
    %409 = vector.broadcast %35 : vector<1x16xf32> to vector<2x16xf32>
    %410 = arith.addf %408, %409 : vector<2x16xf32>
    %411 = arith.addf %397, %404 : vector<2x16xf32>
    %412 = arith.negf %411 : vector<2x16xf32>
    %413 = math.exp %412 : vector<2x16xf32>
    %cst_233 = arith.constant 1.000000e+00 : f32
    %414 = vector.broadcast %cst_233 : f32 to vector<2x16xf32>
    %415 = arith.addf %414, %413 : vector<2x16xf32>
    %416 = arith.divf %414, %415 : vector<2x16xf32>
    %417 = arith.addf %399, %407 : vector<2x16xf32>
    %418 = arith.negf %417 : vector<2x16xf32>
    %419 = math.exp %418 : vector<2x16xf32>
    %cst_234 = arith.constant 1.000000e+00 : f32
    %420 = vector.broadcast %cst_234 : f32 to vector<2x16xf32>
    %421 = arith.addf %420, %419 : vector<2x16xf32>
    %422 = arith.divf %420, %421 : vector<2x16xf32>
    %423 = arith.mulf %416, %410 : vector<2x16xf32>
    %424 = arith.addf %401, %423 : vector<2x16xf32>
    %425 = math.tanh %424 : vector<2x16xf32>
    %cst_235 = arith.constant 1.000000e+00 : f32
    %426 = vector.broadcast %cst_235 : f32 to vector<2x16xf32>
    %427 = arith.subf %426, %422 : vector<2x16xf32>
    %428 = arith.mulf %427, %425 : vector<2x16xf32>
    %429 = arith.mulf %422, %304 : vector<2x16xf32>
    %430 = arith.addf %428, %429 : vector<2x16xf32>
    %431 = vector.broadcast %309 : vector<2x1xf32> to vector<2x16xf32>
    %432 = arith.mulf %431, %430 : vector<2x16xf32>
    %cst_236 = arith.constant 1.000000e+00 : f32
    %433 = vector.broadcast %cst_236 : f32 to vector<2x1xf32>
    %434 = arith.subf %433, %309 : vector<2x1xf32>
    %435 = vector.broadcast %434 : vector<2x1xf32> to vector<2x16xf32>
    %436 = arith.mulf %435, %304 : vector<2x16xf32>
    %437 = arith.addf %432, %436 : vector<2x16xf32>
    %c10 = arith.constant 10 : index
    %c0_237 = arith.constant 0 : index
    %438 = vector.load %arg35[%c10, %c0_237] : memref<16x16xf32, #tpu.memory_space<vmem>>, vector<2x16xf32>
    tpu.vector_store %arg35[%c10, %c0_237], %437 {strides = array<i32>} : memref<16x16xf32, #tpu.memory_space<vmem>>, vector<2x16xf32>,
    %439 = vector.extract_strided_slice %36 {offsets = [3, 0, 0], sizes = [1, 2, 1], strides = [1, 1, 1]} : vector<8x2x1xf32> to vector<1x2x1xf32>
    %440 = vector.shape_cast %439 : vector<1x2x1xf32> to vector<2x1xf32>
    %441 = vector.extract_strided_slice %36 {offsets = [4, 0, 0], sizes = [1, 2, 1], strides = [1, 1, 1]} : vector<8x2x1xf32> to vector<1x2x1xf32>
    %442 = vector.shape_cast %441 : vector<1x2x1xf32> to vector<2x1xf32>
    %c3 = arith.constant 3 : index
    %c0_238 = arith.constant 0 : index
    %c0_239 = arith.constant 0 : index
    %c0_240 = arith.constant 0 : index
    %443 = vector.load %arg0[%c3, %c0_238, %c0_239, %c0_240] : memref<8x3x2x32xf32, #tpu.memory_space<vmem>>, vector<1x1x2x32xf32>
    %444 = vector.shape_cast %443 : vector<1x1x2x32xf32> to vector<2x32xf32>
    %c3_241 = arith.constant 3 : index
    %c1_242 = arith.constant 1 : index
    %c0_243 = arith.constant 0 : index
    %c0_244 = arith.constant 0 : index
    %445 = vector.load %arg0[%c3_241, %c1_242, %c0_243, %c0_244] : memref<8x3x2x32xf32, #tpu.memory_space<vmem>>, vector<1x1x2x32xf32>
    %446 = vector.shape_cast %445 : vector<1x1x2x32xf32> to vector<2x32xf32>
    %c3_245 = arith.constant 3 : index
    %c2_246 = arith.constant 2 : index
    %c0_247 = arith.constant 0 : index
    %c0_248 = arith.constant 0 : index
    %447 = vector.load %arg0[%c3_245, %c2_246, %c0_247, %c0_248] : memref<8x3x2x32xf32, #tpu.memory_space<vmem>>, vector<1x1x2x32xf32>
    %448 = vector.shape_cast %447 : vector<1x1x2x32xf32> to vector<2x32xf32>
    %cst_249 = arith.constant dense<0.000000e+00> : vector<2x32xf32>
    %449 = tpu.matmul %351, %1, %cst_249 {dimension_numbers = #tpu.dot_dimension_numbers<[1], [0], [0], [1], [0, 0, 1, 1], [], []>} : vector<2x32xf32>, vector<32x32xf32>, vector<2x32xf32> -> vector<2x32xf32>
    %450 = vector.broadcast %7 : vector<1x32xf32> to vector<2x32xf32>
    %451 = arith.addf %449, %450 : vector<2x32xf32>
    %cst_250 = arith.constant dense<0.000000e+00> : vector<2x32xf32>
    %452 = tpu.matmul %351, %3, %cst_250 {dimension_numbers = #tpu.dot_dimension_numbers<[1], [0], [0], [1], [0, 0, 1, 1], [], []>} : vector<2x32xf32>, vector<32x32xf32>, vector<2x32xf32> -> vector<2x32xf32>
    %453 = vector.broadcast %9 : vector<1x32xf32> to vector<2x32xf32>
    %454 = arith.addf %452, %453 : vector<2x32xf32>
    %cst_251 = arith.constant dense<0.000000e+00> : vector<2x32xf32>
    %455 = tpu.matmul %351, %5, %cst_251 {dimension_numbers = #tpu.dot_dimension_numbers<[1], [0], [0], [1], [0, 0, 1, 1], [], []>} : vector<2x32xf32>, vector<32x32xf32>, vector<2x32xf32> -> vector<2x32xf32>
    %456 = vector.broadcast %11 : vector<1x32xf32> to vector<2x32xf32>
    %457 = arith.addf %455, %456 : vector<2x32xf32>
    %458 = arith.addf %444, %451 : vector<2x32xf32>
    %459 = arith.negf %458 : vector<2x32xf32>
    %460 = math.exp %459 : vector<2x32xf32>
    %cst_252 = arith.constant 1.000000e+00 : f32
    %461 = vector.broadcast %cst_252 : f32 to vector<2x32xf32>
    %462 = arith.addf %461, %460 : vector<2x32xf32>
    %463 = arith.divf %461, %462 : vector<2x32xf32>
    %464 = arith.addf %446, %454 : vector<2x32xf32>
    %465 = arith.negf %464 : vector<2x32xf32>
    %466 = math.exp %465 : vector<2x32xf32>
    %cst_253 = arith.constant 1.000000e+00 : f32
    %467 = vector.broadcast %cst_253 : f32 to vector<2x32xf32>
    %468 = arith.addf %467, %466 : vector<2x32xf32>
    %469 = arith.divf %467, %468 : vector<2x32xf32>
    %470 = arith.mulf %463, %457 : vector<2x32xf32>
    %471 = arith.addf %448, %470 : vector<2x32xf32>
    %472 = math.tanh %471 : vector<2x32xf32>
    %cst_254 = arith.constant 1.000000e+00 : f32
    %473 = vector.broadcast %cst_254 : f32 to vector<2x32xf32>
    %474 = arith.subf %473, %469 : vector<2x32xf32>
    %475 = arith.mulf %474, %472 : vector<2x32xf32>
    %476 = arith.mulf %469, %351 : vector<2x32xf32>
    %477 = arith.addf %475, %476 : vector<2x32xf32>
    %478 = vector.broadcast %440 : vector<2x1xf32> to vector<2x32xf32>
    %479 = arith.mulf %478, %477 : vector<2x32xf32>
    %cst_255 = arith.constant 1.000000e+00 : f32
    %480 = vector.broadcast %cst_255 : f32 to vector<2x1xf32>
    %481 = arith.subf %480, %440 : vector<2x1xf32>
    %482 = vector.broadcast %481 : vector<2x1xf32> to vector<2x32xf32>
    %483 = arith.mulf %482, %351 : vector<2x32xf32>
    %484 = arith.addf %479, %483 : vector<2x32xf32>
    %c6_256 = arith.constant 6 : index
    %c0_257 = arith.constant 0 : index
    %485 = vector.load %arg33[%c6_256, %c0_257] : memref<16x32xf32, #tpu.memory_space<vmem>>, vector<2x32xf32>
    tpu.vector_store %arg33[%c6_256, %c0_257], %484 {strides = array<i32>} : memref<16x32xf32, #tpu.memory_space<vmem>>, vector<2x32xf32>,
    %c3_258 = arith.constant 3 : index
    %c0_259 = arith.constant 0 : index
    %c0_260 = arith.constant 0 : index
    %c0_261 = arith.constant 0 : index
    %486 = vector.load %arg3[%c3_258, %c0_259, %c0_260, %c0_261] : memref<8x3x2x16xf32, #tpu.memory_space<vmem>>, vector<1x1x2x16xf32>
    %487 = vector.shape_cast %486 : vector<1x1x2x16xf32> to vector<2x16xf32>
    %c3_262 = arith.constant 3 : index
    %c1_263 = arith.constant 1 : index
    %c0_264 = arith.constant 0 : index
    %c0_265 = arith.constant 0 : index
    %488 = vector.load %arg3[%c3_262, %c1_263, %c0_264, %c0_265] : memref<8x3x2x16xf32, #tpu.memory_space<vmem>>, vector<1x1x2x16xf32>
    %489 = vector.shape_cast %488 : vector<1x1x2x16xf32> to vector<2x16xf32>
    %c3_266 = arith.constant 3 : index
    %c2_267 = arith.constant 2 : index
    %c0_268 = arith.constant 0 : index
    %c0_269 = arith.constant 0 : index
    %490 = vector.load %arg3[%c3_266, %c2_267, %c0_268, %c0_269] : memref<8x3x2x16xf32, #tpu.memory_space<vmem>>, vector<1x1x2x16xf32>
    %491 = vector.shape_cast %490 : vector<1x1x2x16xf32> to vector<2x16xf32>
    %cst_270 = arith.constant dense<0.000000e+00> : vector<2x16xf32>
    %492 = tpu.matmul %394, %13, %cst_270 {dimension_numbers = #tpu.dot_dimension_numbers<[1], [0], [0], [1], [0, 0, 1, 1], [], []>} : vector<2x16xf32>, vector<16x16xf32>, vector<2x16xf32> -> vector<2x16xf32>
    %493 = vector.broadcast %19 : vector<1x16xf32> to vector<2x16xf32>
    %494 = arith.addf %492, %493 : vector<2x16xf32>
    %cst_271 = arith.constant dense<0.000000e+00> : vector<2x16xf32>
    %495 = tpu.matmul %394, %15, %cst_271 {dimension_numbers = #tpu.dot_dimension_numbers<[1], [0], [0], [1], [0, 0, 1, 1], [], []>} : vector<2x16xf32>, vector<16x16xf32>, vector<2x16xf32> -> vector<2x16xf32>
    %496 = vector.broadcast %21 : vector<1x16xf32> to vector<2x16xf32>
    %497 = arith.addf %495, %496 : vector<2x16xf32>
    %cst_272 = arith.constant dense<0.000000e+00> : vector<2x16xf32>
    %498 = tpu.matmul %394, %17, %cst_272 {dimension_numbers = #tpu.dot_dimension_numbers<[1], [0], [0], [1], [0, 0, 1, 1], [], []>} : vector<2x16xf32>, vector<16x16xf32>, vector<2x16xf32> -> vector<2x16xf32>
    %499 = vector.broadcast %23 : vector<1x16xf32> to vector<2x16xf32>
    %500 = arith.addf %498, %499 : vector<2x16xf32>
    %501 = arith.addf %487, %494 : vector<2x16xf32>
    %502 = arith.negf %501 : vector<2x16xf32>
    %503 = math.exp %502 : vector<2x16xf32>
    %cst_273 = arith.constant 1.000000e+00 : f32
    %504 = vector.broadcast %cst_273 : f32 to vector<2x16xf32>
    %505 = arith.addf %504, %503 : vector<2x16xf32>
    %506 = arith.divf %504, %505 : vector<2x16xf32>
    %507 = arith.addf %489, %497 : vector<2x16xf32>
    %508 = arith.negf %507 : vector<2x16xf32>
    %509 = math.exp %508 : vector<2x16xf32>
    %cst_274 = arith.constant 1.000000e+00 : f32
    %510 = vector.broadcast %cst_274 : f32 to vector<2x16xf32>
    %511 = arith.addf %510, %509 : vector<2x16xf32>
    %512 = arith.divf %510, %511 : vector<2x16xf32>
    %513 = arith.mulf %506, %500 : vector<2x16xf32>
    %514 = arith.addf %491, %513 : vector<2x16xf32>
    %515 = math.tanh %514 : vector<2x16xf32>
    %cst_275 = arith.constant 1.000000e+00 : f32
    %516 = vector.broadcast %cst_275 : f32 to vector<2x16xf32>
    %517 = arith.subf %516, %512 : vector<2x16xf32>
    %518 = arith.mulf %517, %515 : vector<2x16xf32>
    %519 = arith.mulf %512, %394 : vector<2x16xf32>
    %520 = arith.addf %518, %519 : vector<2x16xf32>
    %521 = vector.broadcast %440 : vector<2x1xf32> to vector<2x16xf32>
    %522 = arith.mulf %521, %520 : vector<2x16xf32>
    %cst_276 = arith.constant 1.000000e+00 : f32
    %523 = vector.broadcast %cst_276 : f32 to vector<2x1xf32>
    %524 = arith.subf %523, %440 : vector<2x1xf32>
    %525 = vector.broadcast %524 : vector<2x1xf32> to vector<2x16xf32>
    %526 = arith.mulf %525, %394 : vector<2x16xf32>
    %527 = arith.addf %522, %526 : vector<2x16xf32>
    %c6_277 = arith.constant 6 : index
    %c0_278 = arith.constant 0 : index
    %528 = vector.load %arg34[%c6_277, %c0_278] : memref<16x16xf32, #tpu.memory_space<vmem>>, vector<2x16xf32>
    tpu.vector_store %arg34[%c6_277, %c0_278], %527 {strides = array<i32>} : memref<16x16xf32, #tpu.memory_space<vmem>>, vector<2x16xf32>,
    %c4_279 = arith.constant 4 : index
    %c0_280 = arith.constant 0 : index
    %c0_281 = arith.constant 0 : index
    %c0_282 = arith.constant 0 : index
    %529 = vector.load %arg6[%c4_279, %c0_280, %c0_281, %c0_282] : memref<8x3x2x16xf32, #tpu.memory_space<vmem>>, vector<1x1x2x16xf32>
    %530 = vector.shape_cast %529 : vector<1x1x2x16xf32> to vector<2x16xf32>
    %c4_283 = arith.constant 4 : index
    %c1_284 = arith.constant 1 : index
    %c0_285 = arith.constant 0 : index
    %c0_286 = arith.constant 0 : index
    %531 = vector.load %arg6[%c4_283, %c1_284, %c0_285, %c0_286] : memref<8x3x2x16xf32, #tpu.memory_space<vmem>>, vector<1x1x2x16xf32>
    %532 = vector.shape_cast %531 : vector<1x1x2x16xf32> to vector<2x16xf32>
    %c4_287 = arith.constant 4 : index
    %c2_288 = arith.constant 2 : index
    %c0_289 = arith.constant 0 : index
    %c0_290 = arith.constant 0 : index
    %533 = vector.load %arg6[%c4_287, %c2_288, %c0_289, %c0_290] : memref<8x3x2x16xf32, #tpu.memory_space<vmem>>, vector<1x1x2x16xf32>
    %534 = vector.shape_cast %533 : vector<1x1x2x16xf32> to vector<2x16xf32>
    %cst_291 = arith.constant dense<0.000000e+00> : vector<2x16xf32>
    %535 = tpu.matmul %437, %25, %cst_291 {dimension_numbers = #tpu.dot_dimension_numbers<[1], [0], [0], [1], [0, 0, 1, 1], [], []>} : vector<2x16xf32>, vector<16x16xf32>, vector<2x16xf32> -> vector<2x16xf32>
    %536 = vector.broadcast %31 : vector<1x16xf32> to vector<2x16xf32>
    %537 = arith.addf %535, %536 : vector<2x16xf32>
    %cst_292 = arith.constant dense<0.000000e+00> : vector<2x16xf32>
    %538 = tpu.matmul %437, %27, %cst_292 {dimension_numbers = #tpu.dot_dimension_numbers<[1], [0], [0], [1], [0, 0, 1, 1], [], []>} : vector<2x16xf32>, vector<16x16xf32>, vector<2x16xf32> -> vector<2x16xf32>
    %539 = vector.broadcast %33 : vector<1x16xf32> to vector<2x16xf32>
    %540 = arith.addf %538, %539 : vector<2x16xf32>
    %cst_293 = arith.constant dense<0.000000e+00> : vector<2x16xf32>
    %541 = tpu.matmul %437, %29, %cst_293 {dimension_numbers = #tpu.dot_dimension_numbers<[1], [0], [0], [1], [0, 0, 1, 1], [], []>} : vector<2x16xf32>, vector<16x16xf32>, vector<2x16xf32> -> vector<2x16xf32>
    %542 = vector.broadcast %35 : vector<1x16xf32> to vector<2x16xf32>
    %543 = arith.addf %541, %542 : vector<2x16xf32>
    %544 = arith.addf %530, %537 : vector<2x16xf32>
    %545 = arith.negf %544 : vector<2x16xf32>
    %546 = math.exp %545 : vector<2x16xf32>
    %cst_294 = arith.constant 1.000000e+00 : f32
    %547 = vector.broadcast %cst_294 : f32 to vector<2x16xf32>
    %548 = arith.addf %547, %546 : vector<2x16xf32>
    %549 = arith.divf %547, %548 : vector<2x16xf32>
    %550 = arith.addf %532, %540 : vector<2x16xf32>
    %551 = arith.negf %550 : vector<2x16xf32>
    %552 = math.exp %551 : vector<2x16xf32>
    %cst_295 = arith.constant 1.000000e+00 : f32
    %553 = vector.broadcast %cst_295 : f32 to vector<2x16xf32>
    %554 = arith.addf %553, %552 : vector<2x16xf32>
    %555 = arith.divf %553, %554 : vector<2x16xf32>
    %556 = arith.mulf %549, %543 : vector<2x16xf32>
    %557 = arith.addf %534, %556 : vector<2x16xf32>
    %558 = math.tanh %557 : vector<2x16xf32>
    %cst_296 = arith.constant 1.000000e+00 : f32
    %559 = vector.broadcast %cst_296 : f32 to vector<2x16xf32>
    %560 = arith.subf %559, %555 : vector<2x16xf32>
    %561 = arith.mulf %560, %558 : vector<2x16xf32>
    %562 = arith.mulf %555, %437 : vector<2x16xf32>
    %563 = arith.addf %561, %562 : vector<2x16xf32>
    %564 = vector.broadcast %442 : vector<2x1xf32> to vector<2x16xf32>
    %565 = arith.mulf %564, %563 : vector<2x16xf32>
    %cst_297 = arith.constant 1.000000e+00 : f32
    %566 = vector.broadcast %cst_297 : f32 to vector<2x1xf32>
    %567 = arith.subf %566, %442 : vector<2x1xf32>
    %568 = vector.broadcast %567 : vector<2x1xf32> to vector<2x16xf32>
    %569 = arith.mulf %568, %437 : vector<2x16xf32>
    %570 = arith.addf %565, %569 : vector<2x16xf32>
    %c8 = arith.constant 8 : index
    %c0_298 = arith.constant 0 : index
    %571 = vector.load %arg35[%c8, %c0_298] : memref<16x16xf32, #tpu.memory_space<vmem>>, vector<2x16xf32>
    tpu.vector_store %arg35[%c8, %c0_298], %570 {strides = array<i32>} : memref<16x16xf32, #tpu.memory_space<vmem>>, vector<2x16xf32>,
    %572 = vector.extract_strided_slice %36 {offsets = [4, 0, 0], sizes = [1, 2, 1], strides = [1, 1, 1]} : vector<8x2x1xf32> to vector<1x2x1xf32>
    %573 = vector.shape_cast %572 : vector<1x2x1xf32> to vector<2x1xf32>
    %574 = vector.extract_strided_slice %36 {offsets = [3, 0, 0], sizes = [1, 2, 1], strides = [1, 1, 1]} : vector<8x2x1xf32> to vector<1x2x1xf32>
    %575 = vector.shape_cast %574 : vector<1x2x1xf32> to vector<2x1xf32>
    %c4_299 = arith.constant 4 : index
    %c0_300 = arith.constant 0 : index
    %c0_301 = arith.constant 0 : index
    %c0_302 = arith.constant 0 : index
    %576 = vector.load %arg0[%c4_299, %c0_300, %c0_301, %c0_302] : memref<8x3x2x32xf32, #tpu.memory_space<vmem>>, vector<1x1x2x32xf32>
    %577 = vector.shape_cast %576 : vector<1x1x2x32xf32> to vector<2x32xf32>
    %c4_303 = arith.constant 4 : index
    %c1_304 = arith.constant 1 : index
    %c0_305 = arith.constant 0 : index
    %c0_306 = arith.constant 0 : index
    %578 = vector.load %arg0[%c4_303, %c1_304, %c0_305, %c0_306] : memref<8x3x2x32xf32, #tpu.memory_space<vmem>>, vector<1x1x2x32xf32>
    %579 = vector.shape_cast %578 : vector<1x1x2x32xf32> to vector<2x32xf32>
    %c4_307 = arith.constant 4 : index
    %c2_308 = arith.constant 2 : index
    %c0_309 = arith.constant 0 : index
    %c0_310 = arith.constant 0 : index
    %580 = vector.load %arg0[%c4_307, %c2_308, %c0_309, %c0_310] : memref<8x3x2x32xf32, #tpu.memory_space<vmem>>, vector<1x1x2x32xf32>
    %581 = vector.shape_cast %580 : vector<1x1x2x32xf32> to vector<2x32xf32>
    %cst_311 = arith.constant dense<0.000000e+00> : vector<2x32xf32>
    %582 = tpu.matmul %484, %1, %cst_311 {dimension_numbers = #tpu.dot_dimension_numbers<[1], [0], [0], [1], [0, 0, 1, 1], [], []>} : vector<2x32xf32>, vector<32x32xf32>, vector<2x32xf32> -> vector<2x32xf32>
    %583 = vector.broadcast %7 : vector<1x32xf32> to vector<2x32xf32>
    %584 = arith.addf %582, %583 : vector<2x32xf32>
    %cst_312 = arith.constant dense<0.000000e+00> : vector<2x32xf32>
    %585 = tpu.matmul %484, %3, %cst_312 {dimension_numbers = #tpu.dot_dimension_numbers<[1], [0], [0], [1], [0, 0, 1, 1], [], []>} : vector<2x32xf32>, vector<32x32xf32>, vector<2x32xf32> -> vector<2x32xf32>
    %586 = vector.broadcast %9 : vector<1x32xf32> to vector<2x32xf32>
    %587 = arith.addf %585, %586 : vector<2x32xf32>
    %cst_313 = arith.constant dense<0.000000e+00> : vector<2x32xf32>
    %588 = tpu.matmul %484, %5, %cst_313 {dimension_numbers = #tpu.dot_dimension_numbers<[1], [0], [0], [1], [0, 0, 1, 1], [], []>} : vector<2x32xf32>, vector<32x32xf32>, vector<2x32xf32> -> vector<2x32xf32>
    %589 = vector.broadcast %11 : vector<1x32xf32> to vector<2x32xf32>
    %590 = arith.addf %588, %589 : vector<2x32xf32>
    %591 = arith.addf %577, %584 : vector<2x32xf32>
    %592 = arith.negf %591 : vector<2x32xf32>
    %593 = math.exp %592 : vector<2x32xf32>
    %cst_314 = arith.constant 1.000000e+00 : f32
    %594 = vector.broadcast %cst_314 : f32 to vector<2x32xf32>
    %595 = arith.addf %594, %593 : vector<2x32xf32>
    %596 = arith.divf %594, %595 : vector<2x32xf32>
    %597 = arith.addf %579, %587 : vector<2x32xf32>
    %598 = arith.negf %597 : vector<2x32xf32>
    %599 = math.exp %598 : vector<2x32xf32>
    %cst_315 = arith.constant 1.000000e+00 : f32
    %600 = vector.broadcast %cst_315 : f32 to vector<2x32xf32>
    %601 = arith.addf %600, %599 : vector<2x32xf32>
    %602 = arith.divf %600, %601 : vector<2x32xf32>
    %603 = arith.mulf %596, %590 : vector<2x32xf32>
    %604 = arith.addf %581, %603 : vector<2x32xf32>
    %605 = math.tanh %604 : vector<2x32xf32>
    %cst_316 = arith.constant 1.000000e+00 : f32
    %606 = vector.broadcast %cst_316 : f32 to vector<2x32xf32>
    %607 = arith.subf %606, %602 : vector<2x32xf32>
    %608 = arith.mulf %607, %605 : vector<2x32xf32>
    %609 = arith.mulf %602, %484 : vector<2x32xf32>
    %610 = arith.addf %608, %609 : vector<2x32xf32>
    %611 = vector.broadcast %573 : vector<2x1xf32> to vector<2x32xf32>
    %612 = arith.mulf %611, %610 : vector<2x32xf32>
    %cst_317 = arith.constant 1.000000e+00 : f32
    %613 = vector.broadcast %cst_317 : f32 to vector<2x1xf32>
    %614 = arith.subf %613, %573 : vector<2x1xf32>
    %615 = vector.broadcast %614 : vector<2x1xf32> to vector<2x32xf32>
    %616 = arith.mulf %615, %484 : vector<2x32xf32>
    %617 = arith.addf %612, %616 : vector<2x32xf32>
    %c8_318 = arith.constant 8 : index
    %c0_319 = arith.constant 0 : index
    %618 = vector.load %arg33[%c8_318, %c0_319] : memref<16x32xf32, #tpu.memory_space<vmem>>, vector<2x32xf32>
    tpu.vector_store %arg33[%c8_318, %c0_319], %617 {strides = array<i32>} : memref<16x32xf32, #tpu.memory_space<vmem>>, vector<2x32xf32>,
    %c4_320 = arith.constant 4 : index
    %c0_321 = arith.constant 0 : index
    %c0_322 = arith.constant 0 : index
    %c0_323 = arith.constant 0 : index
    %619 = vector.load %arg3[%c4_320, %c0_321, %c0_322, %c0_323] : memref<8x3x2x16xf32, #tpu.memory_space<vmem>>, vector<1x1x2x16xf32>
    %620 = vector.shape_cast %619 : vector<1x1x2x16xf32> to vector<2x16xf32>
    %c4_324 = arith.constant 4 : index
    %c1_325 = arith.constant 1 : index
    %c0_326 = arith.constant 0 : index
    %c0_327 = arith.constant 0 : index
    %621 = vector.load %arg3[%c4_324, %c1_325, %c0_326, %c0_327] : memref<8x3x2x16xf32, #tpu.memory_space<vmem>>, vector<1x1x2x16xf32>
    %622 = vector.shape_cast %621 : vector<1x1x2x16xf32> to vector<2x16xf32>
    %c4_328 = arith.constant 4 : index
    %c2_329 = arith.constant 2 : index
    %c0_330 = arith.constant 0 : index
    %c0_331 = arith.constant 0 : index
    %623 = vector.load %arg3[%c4_328, %c2_329, %c0_330, %c0_331] : memref<8x3x2x16xf32, #tpu.memory_space<vmem>>, vector<1x1x2x16xf32>
    %624 = vector.shape_cast %623 : vector<1x1x2x16xf32> to vector<2x16xf32>
    %cst_332 = arith.constant dense<0.000000e+00> : vector<2x16xf32>
    %625 = tpu.matmul %527, %13, %cst_332 {dimension_numbers = #tpu.dot_dimension_numbers<[1], [0], [0], [1], [0, 0, 1, 1], [], []>} : vector<2x16xf32>, vector<16x16xf32>, vector<2x16xf32> -> vector<2x16xf32>
    %626 = vector.broadcast %19 : vector<1x16xf32> to vector<2x16xf32>
    %627 = arith.addf %625, %626 : vector<2x16xf32>
    %cst_333 = arith.constant dense<0.000000e+00> : vector<2x16xf32>
    %628 = tpu.matmul %527, %15, %cst_333 {dimension_numbers = #tpu.dot_dimension_numbers<[1], [0], [0], [1], [0, 0, 1, 1], [], []>} : vector<2x16xf32>, vector<16x16xf32>, vector<2x16xf32> -> vector<2x16xf32>
    %629 = vector.broadcast %21 : vector<1x16xf32> to vector<2x16xf32>
    %630 = arith.addf %628, %629 : vector<2x16xf32>
    %cst_334 = arith.constant dense<0.000000e+00> : vector<2x16xf32>
    %631 = tpu.matmul %527, %17, %cst_334 {dimension_numbers = #tpu.dot_dimension_numbers<[1], [0], [0], [1], [0, 0, 1, 1], [], []>} : vector<2x16xf32>, vector<16x16xf32>, vector<2x16xf32> -> vector<2x16xf32>
    %632 = vector.broadcast %23 : vector<1x16xf32> to vector<2x16xf32>
    %633 = arith.addf %631, %632 : vector<2x16xf32>
    %634 = arith.addf %620, %627 : vector<2x16xf32>
    %635 = arith.negf %634 : vector<2x16xf32>
    %636 = math.exp %635 : vector<2x16xf32>
    %cst_335 = arith.constant 1.000000e+00 : f32
    %637 = vector.broadcast %cst_335 : f32 to vector<2x16xf32>
    %638 = arith.addf %637, %636 : vector<2x16xf32>
    %639 = arith.divf %637, %638 : vector<2x16xf32>
    %640 = arith.addf %622, %630 : vector<2x16xf32>
    %641 = arith.negf %640 : vector<2x16xf32>
    %642 = math.exp %641 : vector<2x16xf32>
    %cst_336 = arith.constant 1.000000e+00 : f32
    %643 = vector.broadcast %cst_336 : f32 to vector<2x16xf32>
    %644 = arith.addf %643, %642 : vector<2x16xf32>
    %645 = arith.divf %643, %644 : vector<2x16xf32>
    %646 = arith.mulf %639, %633 : vector<2x16xf32>
    %647 = arith.addf %624, %646 : vector<2x16xf32>
    %648 = math.tanh %647 : vector<2x16xf32>
    %cst_337 = arith.constant 1.000000e+00 : f32
    %649 = vector.broadcast %cst_337 : f32 to vector<2x16xf32>
    %650 = arith.subf %649, %645 : vector<2x16xf32>
    %651 = arith.mulf %650, %648 : vector<2x16xf32>
    %652 = arith.mulf %645, %527 : vector<2x16xf32>
    %653 = arith.addf %651, %652 : vector<2x16xf32>
    %654 = vector.broadcast %573 : vector<2x1xf32> to vector<2x16xf32>
    %655 = arith.mulf %654, %653 : vector<2x16xf32>
    %cst_338 = arith.constant 1.000000e+00 : f32
    %656 = vector.broadcast %cst_338 : f32 to vector<2x1xf32>
    %657 = arith.subf %656, %573 : vector<2x1xf32>
    %658 = vector.broadcast %657 : vector<2x1xf32> to vector<2x16xf32>
    %659 = arith.mulf %658, %527 : vector<2x16xf32>
    %660 = arith.addf %655, %659 : vector<2x16xf32>
    %c8_339 = arith.constant 8 : index
    %c0_340 = arith.constant 0 : index
    %661 = vector.load %arg34[%c8_339, %c0_340] : memref<16x16xf32, #tpu.memory_space<vmem>>, vector<2x16xf32>
    tpu.vector_store %arg34[%c8_339, %c0_340], %660 {strides = array<i32>} : memref<16x16xf32, #tpu.memory_space<vmem>>, vector<2x16xf32>,
    %c3_341 = arith.constant 3 : index
    %c0_342 = arith.constant 0 : index
    %c0_343 = arith.constant 0 : index
    %c0_344 = arith.constant 0 : index
    %662 = vector.load %arg6[%c3_341, %c0_342, %c0_343, %c0_344] : memref<8x3x2x16xf32, #tpu.memory_space<vmem>>, vector<1x1x2x16xf32>
    %663 = vector.shape_cast %662 : vector<1x1x2x16xf32> to vector<2x16xf32>
    %c3_345 = arith.constant 3 : index
    %c1_346 = arith.constant 1 : index
    %c0_347 = arith.constant 0 : index
    %c0_348 = arith.constant 0 : index
    %664 = vector.load %arg6[%c3_345, %c1_346, %c0_347, %c0_348] : memref<8x3x2x16xf32, #tpu.memory_space<vmem>>, vector<1x1x2x16xf32>
    %665 = vector.shape_cast %664 : vector<1x1x2x16xf32> to vector<2x16xf32>
    %c3_349 = arith.constant 3 : index
    %c2_350 = arith.constant 2 : index
    %c0_351 = arith.constant 0 : index
    %c0_352 = arith.constant 0 : index
    %666 = vector.load %arg6[%c3_349, %c2_350, %c0_351, %c0_352] : memref<8x3x2x16xf32, #tpu.memory_space<vmem>>, vector<1x1x2x16xf32>
    %667 = vector.shape_cast %666 : vector<1x1x2x16xf32> to vector<2x16xf32>
    %cst_353 = arith.constant dense<0.000000e+00> : vector<2x16xf32>
    %668 = tpu.matmul %570, %25, %cst_353 {dimension_numbers = #tpu.dot_dimension_numbers<[1], [0], [0], [1], [0, 0, 1, 1], [], []>} : vector<2x16xf32>, vector<16x16xf32>, vector<2x16xf32> -> vector<2x16xf32>
    %669 = vector.broadcast %31 : vector<1x16xf32> to vector<2x16xf32>
    %670 = arith.addf %668, %669 : vector<2x16xf32>
    %cst_354 = arith.constant dense<0.000000e+00> : vector<2x16xf32>
    %671 = tpu.matmul %570, %27, %cst_354 {dimension_numbers = #tpu.dot_dimension_numbers<[1], [0], [0], [1], [0, 0, 1, 1], [], []>} : vector<2x16xf32>, vector<16x16xf32>, vector<2x16xf32> -> vector<2x16xf32>
    %672 = vector.broadcast %33 : vector<1x16xf32> to vector<2x16xf32>
    %673 = arith.addf %671, %672 : vector<2x16xf32>
    %cst_355 = arith.constant dense<0.000000e+00> : vector<2x16xf32>
    %674 = tpu.matmul %570, %29, %cst_355 {dimension_numbers = #tpu.dot_dimension_numbers<[1], [0], [0], [1], [0, 0, 1, 1], [], []>} : vector<2x16xf32>, vector<16x16xf32>, vector<2x16xf32> -> vector<2x16xf32>
    %675 = vector.broadcast %35 : vector<1x16xf32> to vector<2x16xf32>
    %676 = arith.addf %674, %675 : vector<2x16xf32>
    %677 = arith.addf %663, %670 : vector<2x16xf32>
    %678 = arith.negf %677 : vector<2x16xf32>
    %679 = math.exp %678 : vector<2x16xf32>
    %cst_356 = arith.constant 1.000000e+00 : f32
    %680 = vector.broadcast %cst_356 : f32 to vector<2x16xf32>
    %681 = arith.addf %680, %679 : vector<2x16xf32>
    %682 = arith.divf %680, %681 : vector<2x16xf32>
    %683 = arith.addf %665, %673 : vector<2x16xf32>
    %684 = arith.negf %683 : vector<2x16xf32>
    %685 = math.exp %684 : vector<2x16xf32>
    %cst_357 = arith.constant 1.000000e+00 : f32
    %686 = vector.broadcast %cst_357 : f32 to vector<2x16xf32>
    %687 = arith.addf %686, %685 : vector<2x16xf32>
    %688 = arith.divf %686, %687 : vector<2x16xf32>
    %689 = arith.mulf %682, %676 : vector<2x16xf32>
    %690 = arith.addf %667, %689 : vector<2x16xf32>
    %691 = math.tanh %690 : vector<2x16xf32>
    %cst_358 = arith.constant 1.000000e+00 : f32
    %692 = vector.broadcast %cst_358 : f32 to vector<2x16xf32>
    %693 = arith.subf %692, %688 : vector<2x16xf32>
    %694 = arith.mulf %693, %691 : vector<2x16xf32>
    %695 = arith.mulf %688, %570 : vector<2x16xf32>
    %696 = arith.addf %694, %695 : vector<2x16xf32>
    %697 = vector.broadcast %575 : vector<2x1xf32> to vector<2x16xf32>
    %698 = arith.mulf %697, %696 : vector<2x16xf32>
    %cst_359 = arith.constant 1.000000e+00 : f32
    %699 = vector.broadcast %cst_359 : f32 to vector<2x1xf32>
    %700 = arith.subf %699, %575 : vector<2x1xf32>
    %701 = vector.broadcast %700 : vector<2x1xf32> to vector<2x16xf32>
    %702 = arith.mulf %701, %570 : vector<2x16xf32>
    %703 = arith.addf %698, %702 : vector<2x16xf32>
    %c6_360 = arith.constant 6 : index
    %c0_361 = arith.constant 0 : index
    %704 = vector.load %arg35[%c6_360, %c0_361] : memref<16x16xf32, #tpu.memory_space<vmem>>, vector<2x16xf32>
    tpu.vector_store %arg35[%c6_360, %c0_361], %703 {strides = array<i32>} : memref<16x16xf32, #tpu.memory_space<vmem>>, vector<2x16xf32>,
    %705 = vector.extract_strided_slice %36 {offsets = [5, 0, 0], sizes = [1, 2, 1], strides = [1, 1, 1]} : vector<8x2x1xf32> to vector<1x2x1xf32>
    %706 = vector.shape_cast %705 : vector<1x2x1xf32> to vector<2x1xf32>
    %707 = vector.extract_strided_slice %36 {offsets = [2, 0, 0], sizes = [1, 2, 1], strides = [1, 1, 1]} : vector<8x2x1xf32> to vector<1x2x1xf32>
    %708 = vector.shape_cast %707 : vector<1x2x1xf32> to vector<2x1xf32>
    %c5_362 = arith.constant 5 : index
    %c0_363 = arith.constant 0 : index
    %c0_364 = arith.constant 0 : index
    %c0_365 = arith.constant 0 : index
    %709 = vector.load %arg0[%c5_362, %c0_363, %c0_364, %c0_365] : memref<8x3x2x32xf32, #tpu.memory_space<vmem>>, vector<1x1x2x32xf32>
    %710 = vector.shape_cast %709 : vector<1x1x2x32xf32> to vector<2x32xf32>
    %c5_366 = arith.constant 5 : index
    %c1_367 = arith.constant 1 : index
    %c0_368 = arith.constant 0 : index
    %c0_369 = arith.constant 0 : index
    %711 = vector.load %arg0[%c5_366, %c1_367, %c0_368, %c0_369] : memref<8x3x2x32xf32, #tpu.memory_space<vmem>>, vector<1x1x2x32xf32>
    %712 = vector.shape_cast %711 : vector<1x1x2x32xf32> to vector<2x32xf32>
    %c5_370 = arith.constant 5 : index
    %c2_371 = arith.constant 2 : index
    %c0_372 = arith.constant 0 : index
    %c0_373 = arith.constant 0 : index
    %713 = vector.load %arg0[%c5_370, %c2_371, %c0_372, %c0_373] : memref<8x3x2x32xf32, #tpu.memory_space<vmem>>, vector<1x1x2x32xf32>
    %714 = vector.shape_cast %713 : vector<1x1x2x32xf32> to vector<2x32xf32>
    %cst_374 = arith.constant dense<0.000000e+00> : vector<2x32xf32>
    %715 = tpu.matmul %617, %1, %cst_374 {dimension_numbers = #tpu.dot_dimension_numbers<[1], [0], [0], [1], [0, 0, 1, 1], [], []>} : vector<2x32xf32>, vector<32x32xf32>, vector<2x32xf32> -> vector<2x32xf32>
    %716 = vector.broadcast %7 : vector<1x32xf32> to vector<2x32xf32>
    %717 = arith.addf %715, %716 : vector<2x32xf32>
    %cst_375 = arith.constant dense<0.000000e+00> : vector<2x32xf32>
    %718 = tpu.matmul %617, %3, %cst_375 {dimension_numbers = #tpu.dot_dimension_numbers<[1], [0], [0], [1], [0, 0, 1, 1], [], []>} : vector<2x32xf32>, vector<32x32xf32>, vector<2x32xf32> -> vector<2x32xf32>
    %719 = vector.broadcast %9 : vector<1x32xf32> to vector<2x32xf32>
    %720 = arith.addf %718, %719 : vector<2x32xf32>
    %cst_376 = arith.constant dense<0.000000e+00> : vector<2x32xf32>
    %721 = tpu.matmul %617, %5, %cst_376 {dimension_numbers = #tpu.dot_dimension_numbers<[1], [0], [0], [1], [0, 0, 1, 1], [], []>} : vector<2x32xf32>, vector<32x32xf32>, vector<2x32xf32> -> vector<2x32xf32>
    %722 = vector.broadcast %11 : vector<1x32xf32> to vector<2x32xf32>
    %723 = arith.addf %721, %722 : vector<2x32xf32>
    %724 = arith.addf %710, %717 : vector<2x32xf32>
    %725 = arith.negf %724 : vector<2x32xf32>
    %726 = math.exp %725 : vector<2x32xf32>
    %cst_377 = arith.constant 1.000000e+00 : f32
    %727 = vector.broadcast %cst_377 : f32 to vector<2x32xf32>
    %728 = arith.addf %727, %726 : vector<2x32xf32>
    %729 = arith.divf %727, %728 : vector<2x32xf32>
    %730 = arith.addf %712, %720 : vector<2x32xf32>
    %731 = arith.negf %730 : vector<2x32xf32>
    %732 = math.exp %731 : vector<2x32xf32>
    %cst_378 = arith.constant 1.000000e+00 : f32
    %733 = vector.broadcast %cst_378 : f32 to vector<2x32xf32>
    %734 = arith.addf %733, %732 : vector<2x32xf32>
    %735 = arith.divf %733, %734 : vector<2x32xf32>
    %736 = arith.mulf %729, %723 : vector<2x32xf32>
    %737 = arith.addf %714, %736 : vector<2x32xf32>
    %738 = math.tanh %737 : vector<2x32xf32>
    %cst_379 = arith.constant 1.000000e+00 : f32
    %739 = vector.broadcast %cst_379 : f32 to vector<2x32xf32>
    %740 = arith.subf %739, %735 : vector<2x32xf32>
    %741 = arith.mulf %740, %738 : vector<2x32xf32>
    %742 = arith.mulf %735, %617 : vector<2x32xf32>
    %743 = arith.addf %741, %742 : vector<2x32xf32>
    %744 = vector.broadcast %706 : vector<2x1xf32> to vector<2x32xf32>
    %745 = arith.mulf %744, %743 : vector<2x32xf32>
    %cst_380 = arith.constant 1.000000e+00 : f32
    %746 = vector.broadcast %cst_380 : f32 to vector<2x1xf32>
    %747 = arith.subf %746, %706 : vector<2x1xf32>
    %748 = vector.broadcast %747 : vector<2x1xf32> to vector<2x32xf32>
    %749 = arith.mulf %748, %617 : vector<2x32xf32>
    %750 = arith.addf %745, %749 : vector<2x32xf32>
    %c10_381 = arith.constant 10 : index
    %c0_382 = arith.constant 0 : index
    %751 = vector.load %arg33[%c10_381, %c0_382] : memref<16x32xf32, #tpu.memory_space<vmem>>, vector<2x32xf32>
    tpu.vector_store %arg33[%c10_381, %c0_382], %750 {strides = array<i32>} : memref<16x32xf32, #tpu.memory_space<vmem>>, vector<2x32xf32>,
    %c5_383 = arith.constant 5 : index
    %c0_384 = arith.constant 0 : index
    %c0_385 = arith.constant 0 : index
    %c0_386 = arith.constant 0 : index
    %752 = vector.load %arg3[%c5_383, %c0_384, %c0_385, %c0_386] : memref<8x3x2x16xf32, #tpu.memory_space<vmem>>, vector<1x1x2x16xf32>
    %753 = vector.shape_cast %752 : vector<1x1x2x16xf32> to vector<2x16xf32>
    %c5_387 = arith.constant 5 : index
    %c1_388 = arith.constant 1 : index
    %c0_389 = arith.constant 0 : index
    %c0_390 = arith.constant 0 : index
    %754 = vector.load %arg3[%c5_387, %c1_388, %c0_389, %c0_390] : memref<8x3x2x16xf32, #tpu.memory_space<vmem>>, vector<1x1x2x16xf32>
    %755 = vector.shape_cast %754 : vector<1x1x2x16xf32> to vector<2x16xf32>
    %c5_391 = arith.constant 5 : index
    %c2_392 = arith.constant 2 : index
    %c0_393 = arith.constant 0 : index
    %c0_394 = arith.constant 0 : index
    %756 = vector.load %arg3[%c5_391, %c2_392, %c0_393, %c0_394] : memref<8x3x2x16xf32, #tpu.memory_space<vmem>>, vector<1x1x2x16xf32>
    %757 = vector.shape_cast %756 : vector<1x1x2x16xf32> to vector<2x16xf32>
    %cst_395 = arith.constant dense<0.000000e+00> : vector<2x16xf32>
    %758 = tpu.matmul %660, %13, %cst_395 {dimension_numbers = #tpu.dot_dimension_numbers<[1], [0], [0], [1], [0, 0, 1, 1], [], []>} : vector<2x16xf32>, vector<16x16xf32>, vector<2x16xf32> -> vector<2x16xf32>
    %759 = vector.broadcast %19 : vector<1x16xf32> to vector<2x16xf32>
    %760 = arith.addf %758, %759 : vector<2x16xf32>
    %cst_396 = arith.constant dense<0.000000e+00> : vector<2x16xf32>
    %761 = tpu.matmul %660, %15, %cst_396 {dimension_numbers = #tpu.dot_dimension_numbers<[1], [0], [0], [1], [0, 0, 1, 1], [], []>} : vector<2x16xf32>, vector<16x16xf32>, vector<2x16xf32> -> vector<2x16xf32>
    %762 = vector.broadcast %21 : vector<1x16xf32> to vector<2x16xf32>
    %763 = arith.addf %761, %762 : vector<2x16xf32>
    %cst_397 = arith.constant dense<0.000000e+00> : vector<2x16xf32>
    %764 = tpu.matmul %660, %17, %cst_397 {dimension_numbers = #tpu.dot_dimension_numbers<[1], [0], [0], [1], [0, 0, 1, 1], [], []>} : vector<2x16xf32>, vector<16x16xf32>, vector<2x16xf32> -> vector<2x16xf32>
    %765 = vector.broadcast %23 : vector<1x16xf32> to vector<2x16xf32>
    %766 = arith.addf %764, %765 : vector<2x16xf32>
    %767 = arith.addf %753, %760 : vector<2x16xf32>
    %768 = arith.negf %767 : vector<2x16xf32>
    %769 = math.exp %768 : vector<2x16xf32>
    %cst_398 = arith.constant 1.000000e+00 : f32
    %770 = vector.broadcast %cst_398 : f32 to vector<2x16xf32>
    %771 = arith.addf %770, %769 : vector<2x16xf32>
    %772 = arith.divf %770, %771 : vector<2x16xf32>
    %773 = arith.addf %755, %763 : vector<2x16xf32>
    %774 = arith.negf %773 : vector<2x16xf32>
    %775 = math.exp %774 : vector<2x16xf32>
    %cst_399 = arith.constant 1.000000e+00 : f32
    %776 = vector.broadcast %cst_399 : f32 to vector<2x16xf32>
    %777 = arith.addf %776, %775 : vector<2x16xf32>
    %778 = arith.divf %776, %777 : vector<2x16xf32>
    %779 = arith.mulf %772, %766 : vector<2x16xf32>
    %780 = arith.addf %757, %779 : vector<2x16xf32>
    %781 = math.tanh %780 : vector<2x16xf32>
    %cst_400 = arith.constant 1.000000e+00 : f32
    %782 = vector.broadcast %cst_400 : f32 to vector<2x16xf32>
    %783 = arith.subf %782, %778 : vector<2x16xf32>
    %784 = arith.mulf %783, %781 : vector<2x16xf32>
    %785 = arith.mulf %778, %660 : vector<2x16xf32>
    %786 = arith.addf %784, %785 : vector<2x16xf32>
    %787 = vector.broadcast %706 : vector<2x1xf32> to vector<2x16xf32>
    %788 = arith.mulf %787, %786 : vector<2x16xf32>
    %cst_401 = arith.constant 1.000000e+00 : f32
    %789 = vector.broadcast %cst_401 : f32 to vector<2x1xf32>
    %790 = arith.subf %789, %706 : vector<2x1xf32>
    %791 = vector.broadcast %790 : vector<2x1xf32> to vector<2x16xf32>
    %792 = arith.mulf %791, %660 : vector<2x16xf32>
    %793 = arith.addf %788, %792 : vector<2x16xf32>
    %c10_402 = arith.constant 10 : index
    %c0_403 = arith.constant 0 : index
    %794 = vector.load %arg34[%c10_402, %c0_403] : memref<16x16xf32, #tpu.memory_space<vmem>>, vector<2x16xf32>
    tpu.vector_store %arg34[%c10_402, %c0_403], %793 {strides = array<i32>} : memref<16x16xf32, #tpu.memory_space<vmem>>, vector<2x16xf32>,
    %c2_404 = arith.constant 2 : index
    %c0_405 = arith.constant 0 : index
    %c0_406 = arith.constant 0 : index
    %c0_407 = arith.constant 0 : index
    %795 = vector.load %arg6[%c2_404, %c0_405, %c0_406, %c0_407] : memref<8x3x2x16xf32, #tpu.memory_space<vmem>>, vector<1x1x2x16xf32>
    %796 = vector.shape_cast %795 : vector<1x1x2x16xf32> to vector<2x16xf32>
    %c2_408 = arith.constant 2 : index
    %c1_409 = arith.constant 1 : index
    %c0_410 = arith.constant 0 : index
    %c0_411 = arith.constant 0 : index
    %797 = vector.load %arg6[%c2_408, %c1_409, %c0_410, %c0_411] : memref<8x3x2x16xf32, #tpu.memory_space<vmem>>, vector<1x1x2x16xf32>
    %798 = vector.shape_cast %797 : vector<1x1x2x16xf32> to vector<2x16xf32>
    %c2_412 = arith.constant 2 : index
    %c2_413 = arith.constant 2 : index
    %c0_414 = arith.constant 0 : index
    %c0_415 = arith.constant 0 : index
    %799 = vector.load %arg6[%c2_412, %c2_413, %c0_414, %c0_415] : memref<8x3x2x16xf32, #tpu.memory_space<vmem>>, vector<1x1x2x16xf32>
    %800 = vector.shape_cast %799 : vector<1x1x2x16xf32> to vector<2x16xf32>
    %cst_416 = arith.constant dense<0.000000e+00> : vector<2x16xf32>
    %801 = tpu.matmul %703, %25, %cst_416 {dimension_numbers = #tpu.dot_dimension_numbers<[1], [0], [0], [1], [0, 0, 1, 1], [], []>} : vector<2x16xf32>, vector<16x16xf32>, vector<2x16xf32> -> vector<2x16xf32>
    %802 = vector.broadcast %31 : vector<1x16xf32> to vector<2x16xf32>
    %803 = arith.addf %801, %802 : vector<2x16xf32>
    %cst_417 = arith.constant dense<0.000000e+00> : vector<2x16xf32>
    %804 = tpu.matmul %703, %27, %cst_417 {dimension_numbers = #tpu.dot_dimension_numbers<[1], [0], [0], [1], [0, 0, 1, 1], [], []>} : vector<2x16xf32>, vector<16x16xf32>, vector<2x16xf32> -> vector<2x16xf32>
    %805 = vector.broadcast %33 : vector<1x16xf32> to vector<2x16xf32>
    %806 = arith.addf %804, %805 : vector<2x16xf32>
    %cst_418 = arith.constant dense<0.000000e+00> : vector<2x16xf32>
    %807 = tpu.matmul %703, %29, %cst_418 {dimension_numbers = #tpu.dot_dimension_numbers<[1], [0], [0], [1], [0, 0, 1, 1], [], []>} : vector<2x16xf32>, vector<16x16xf32>, vector<2x16xf32> -> vector<2x16xf32>
    %808 = vector.broadcast %35 : vector<1x16xf32> to vector<2x16xf32>
    %809 = arith.addf %807, %808 : vector<2x16xf32>
    %810 = arith.addf %796, %803 : vector<2x16xf32>
    %811 = arith.negf %810 : vector<2x16xf32>
    %812 = math.exp %811 : vector<2x16xf32>
    %cst_419 = arith.constant 1.000000e+00 : f32
    %813 = vector.broadcast %cst_419 : f32 to vector<2x16xf32>
    %814 = arith.addf %813, %812 : vector<2x16xf32>
    %815 = arith.divf %813, %814 : vector<2x16xf32>
    %816 = arith.addf %798, %806 : vector<2x16xf32>
    %817 = arith.negf %816 : vector<2x16xf32>
    %818 = math.exp %817 : vector<2x16xf32>
    %cst_420 = arith.constant 1.000000e+00 : f32
    %819 = vector.broadcast %cst_420 : f32 to vector<2x16xf32>
    %820 = arith.addf %819, %818 : vector<2x16xf32>
    %821 = arith.divf %819, %820 : vector<2x16xf32>
    %822 = arith.mulf %815, %809 : vector<2x16xf32>
    %823 = arith.addf %800, %822 : vector<2x16xf32>
    %824 = math.tanh %823 : vector<2x16xf32>
    %cst_421 = arith.constant 1.000000e+00 : f32
    %825 = vector.broadcast %cst_421 : f32 to vector<2x16xf32>
    %826 = arith.subf %825, %821 : vector<2x16xf32>
    %827 = arith.mulf %826, %824 : vector<2x16xf32>
    %828 = arith.mulf %821, %703 : vector<2x16xf32>
    %829 = arith.addf %827, %828 : vector<2x16xf32>
    %830 = vector.broadcast %708 : vector<2x1xf32> to vector<2x16xf32>
    %831 = arith.mulf %830, %829 : vector<2x16xf32>
    %cst_422 = arith.constant 1.000000e+00 : f32
    %832 = vector.broadcast %cst_422 : f32 to vector<2x1xf32>
    %833 = arith.subf %832, %708 : vector<2x1xf32>
    %834 = vector.broadcast %833 : vector<2x1xf32> to vector<2x16xf32>
    %835 = arith.mulf %834, %703 : vector<2x16xf32>
    %836 = arith.addf %831, %835 : vector<2x16xf32>
    %c4_423 = arith.constant 4 : index
    %c0_424 = arith.constant 0 : index
    %837 = vector.load %arg35[%c4_423, %c0_424] : memref<16x16xf32, #tpu.memory_space<vmem>>, vector<2x16xf32>
    tpu.vector_store %arg35[%c4_423, %c0_424], %836 {strides = array<i32>} : memref<16x16xf32, #tpu.memory_space<vmem>>, vector<2x16xf32>,
    %838 = vector.extract_strided_slice %36 {offsets = [6, 0, 0], sizes = [1, 2, 1], strides = [1, 1, 1]} : vector<8x2x1xf32> to vector<1x2x1xf32>
    %839 = vector.shape_cast %838 : vector<1x2x1xf32> to vector<2x1xf32>
    %840 = vector.extract_strided_slice %36 {offsets = [1, 0, 0], sizes = [1, 2, 1], strides = [1, 1, 1]} : vector<8x2x1xf32> to vector<1x2x1xf32>
    %841 = vector.shape_cast %840 : vector<1x2x1xf32> to vector<2x1xf32>
    %c6_425 = arith.constant 6 : index
    %c0_426 = arith.constant 0 : index
    %c0_427 = arith.constant 0 : index
    %c0_428 = arith.constant 0 : index
    %842 = vector.load %arg0[%c6_425, %c0_426, %c0_427, %c0_428] : memref<8x3x2x32xf32, #tpu.memory_space<vmem>>, vector<1x1x2x32xf32>
    %843 = vector.shape_cast %842 : vector<1x1x2x32xf32> to vector<2x32xf32>
    %c6_429 = arith.constant 6 : index
    %c1_430 = arith.constant 1 : index
    %c0_431 = arith.constant 0 : index
    %c0_432 = arith.constant 0 : index
    %844 = vector.load %arg0[%c6_429, %c1_430, %c0_431, %c0_432] : memref<8x3x2x32xf32, #tpu.memory_space<vmem>>, vector<1x1x2x32xf32>
    %845 = vector.shape_cast %844 : vector<1x1x2x32xf32> to vector<2x32xf32>
    %c6_433 = arith.constant 6 : index
    %c2_434 = arith.constant 2 : index
    %c0_435 = arith.constant 0 : index
    %c0_436 = arith.constant 0 : index
    %846 = vector.load %arg0[%c6_433, %c2_434, %c0_435, %c0_436] : memref<8x3x2x32xf32, #tpu.memory_space<vmem>>, vector<1x1x2x32xf32>
    %847 = vector.shape_cast %846 : vector<1x1x2x32xf32> to vector<2x32xf32>
    %cst_437 = arith.constant dense<0.000000e+00> : vector<2x32xf32>
    %848 = tpu.matmul %750, %1, %cst_437 {dimension_numbers = #tpu.dot_dimension_numbers<[1], [0], [0], [1], [0, 0, 1, 1], [], []>} : vector<2x32xf32>, vector<32x32xf32>, vector<2x32xf32> -> vector<2x32xf32>
    %849 = vector.broadcast %7 : vector<1x32xf32> to vector<2x32xf32>
    %850 = arith.addf %848, %849 : vector<2x32xf32>
    %cst_438 = arith.constant dense<0.000000e+00> : vector<2x32xf32>
    %851 = tpu.matmul %750, %3, %cst_438 {dimension_numbers = #tpu.dot_dimension_numbers<[1], [0], [0], [1], [0, 0, 1, 1], [], []>} : vector<2x32xf32>, vector<32x32xf32>, vector<2x32xf32> -> vector<2x32xf32>
    %852 = vector.broadcast %9 : vector<1x32xf32> to vector<2x32xf32>
    %853 = arith.addf %851, %852 : vector<2x32xf32>
    %cst_439 = arith.constant dense<0.000000e+00> : vector<2x32xf32>
    %854 = tpu.matmul %750, %5, %cst_439 {dimension_numbers = #tpu.dot_dimension_numbers<[1], [0], [0], [1], [0, 0, 1, 1], [], []>} : vector<2x32xf32>, vector<32x32xf32>, vector<2x32xf32> -> vector<2x32xf32>
    %855 = vector.broadcast %11 : vector<1x32xf32> to vector<2x32xf32>
    %856 = arith.addf %854, %855 : vector<2x32xf32>
    %857 = arith.addf %843, %850 : vector<2x32xf32>
    %858 = arith.negf %857 : vector<2x32xf32>
    %859 = math.exp %858 : vector<2x32xf32>
    %cst_440 = arith.constant 1.000000e+00 : f32
    %860 = vector.broadcast %cst_440 : f32 to vector<2x32xf32>
    %861 = arith.addf %860, %859 : vector<2x32xf32>
    %862 = arith.divf %860, %861 : vector<2x32xf32>
    %863 = arith.addf %845, %853 : vector<2x32xf32>
    %864 = arith.negf %863 : vector<2x32xf32>
    %865 = math.exp %864 : vector<2x32xf32>
    %cst_441 = arith.constant 1.000000e+00 : f32
    %866 = vector.broadcast %cst_441 : f32 to vector<2x32xf32>
    %867 = arith.addf %866, %865 : vector<2x32xf32>
    %868 = arith.divf %866, %867 : vector<2x32xf32>
    %869 = arith.mulf %862, %856 : vector<2x32xf32>
    %870 = arith.addf %847, %869 : vector<2x32xf32>
    %871 = math.tanh %870 : vector<2x32xf32>
    %cst_442 = arith.constant 1.000000e+00 : f32
    %872 = vector.broadcast %cst_442 : f32 to vector<2x32xf32>
    %873 = arith.subf %872, %868 : vector<2x32xf32>
    %874 = arith.mulf %873, %871 : vector<2x32xf32>
    %875 = arith.mulf %868, %750 : vector<2x32xf32>
    %876 = arith.addf %874, %875 : vector<2x32xf32>
    %877 = vector.broadcast %839 : vector<2x1xf32> to vector<2x32xf32>
    %878 = arith.mulf %877, %876 : vector<2x32xf32>
    %cst_443 = arith.constant 1.000000e+00 : f32
    %879 = vector.broadcast %cst_443 : f32 to vector<2x1xf32>
    %880 = arith.subf %879, %839 : vector<2x1xf32>
    %881 = vector.broadcast %880 : vector<2x1xf32> to vector<2x32xf32>
    %882 = arith.mulf %881, %750 : vector<2x32xf32>
    %883 = arith.addf %878, %882 : vector<2x32xf32>
    %c12_444 = arith.constant 12 : index
    %c0_445 = arith.constant 0 : index
    %884 = vector.load %arg33[%c12_444, %c0_445] : memref<16x32xf32, #tpu.memory_space<vmem>>, vector<2x32xf32>
    tpu.vector_store %arg33[%c12_444, %c0_445], %883 {strides = array<i32>} : memref<16x32xf32, #tpu.memory_space<vmem>>, vector<2x32xf32>,
    %c6_446 = arith.constant 6 : index
    %c0_447 = arith.constant 0 : index
    %c0_448 = arith.constant 0 : index
    %c0_449 = arith.constant 0 : index
    %885 = vector.load %arg3[%c6_446, %c0_447, %c0_448, %c0_449] : memref<8x3x2x16xf32, #tpu.memory_space<vmem>>, vector<1x1x2x16xf32>
    %886 = vector.shape_cast %885 : vector<1x1x2x16xf32> to vector<2x16xf32>
    %c6_450 = arith.constant 6 : index
    %c1_451 = arith.constant 1 : index
    %c0_452 = arith.constant 0 : index
    %c0_453 = arith.constant 0 : index
    %887 = vector.load %arg3[%c6_450, %c1_451, %c0_452, %c0_453] : memref<8x3x2x16xf32, #tpu.memory_space<vmem>>, vector<1x1x2x16xf32>
    %888 = vector.shape_cast %887 : vector<1x1x2x16xf32> to vector<2x16xf32>
    %c6_454 = arith.constant 6 : index
    %c2_455 = arith.constant 2 : index
    %c0_456 = arith.constant 0 : index
    %c0_457 = arith.constant 0 : index
    %889 = vector.load %arg3[%c6_454, %c2_455, %c0_456, %c0_457] : memref<8x3x2x16xf32, #tpu.memory_space<vmem>>, vector<1x1x2x16xf32>
    %890 = vector.shape_cast %889 : vector<1x1x2x16xf32> to vector<2x16xf32>
    %cst_458 = arith.constant dense<0.000000e+00> : vector<2x16xf32>
    %891 = tpu.matmul %793, %13, %cst_458 {dimension_numbers = #tpu.dot_dimension_numbers<[1], [0], [0], [1], [0, 0, 1, 1], [], []>} : vector<2x16xf32>, vector<16x16xf32>, vector<2x16xf32> -> vector<2x16xf32>
    %892 = vector.broadcast %19 : vector<1x16xf32> to vector<2x16xf32>
    %893 = arith.addf %891, %892 : vector<2x16xf32>
    %cst_459 = arith.constant dense<0.000000e+00> : vector<2x16xf32>
    %894 = tpu.matmul %793, %15, %cst_459 {dimension_numbers = #tpu.dot_dimension_numbers<[1], [0], [0], [1], [0, 0, 1, 1], [], []>} : vector<2x16xf32>, vector<16x16xf32>, vector<2x16xf32> -> vector<2x16xf32>
    %895 = vector.broadcast %21 : vector<1x16xf32> to vector<2x16xf32>
    %896 = arith.addf %894, %895 : vector<2x16xf32>
    %cst_460 = arith.constant dense<0.000000e+00> : vector<2x16xf32>
    %897 = tpu.matmul %793, %17, %cst_460 {dimension_numbers = #tpu.dot_dimension_numbers<[1], [0], [0], [1], [0, 0, 1, 1], [], []>} : vector<2x16xf32>, vector<16x16xf32>, vector<2x16xf32> -> vector<2x16xf32>
    %898 = vector.broadcast %23 : vector<1x16xf32> to vector<2x16xf32>
    %899 = arith.addf %897, %898 : vector<2x16xf32>
    %900 = arith.addf %886, %893 : vector<2x16xf32>
    %901 = arith.negf %900 : vector<2x16xf32>
    %902 = math.exp %901 : vector<2x16xf32>
    %cst_461 = arith.constant 1.000000e+00 : f32
    %903 = vector.broadcast %cst_461 : f32 to vector<2x16xf32>
    %904 = arith.addf %903, %902 : vector<2x16xf32>
    %905 = arith.divf %903, %904 : vector<2x16xf32>
    %906 = arith.addf %888, %896 : vector<2x16xf32>
    %907 = arith.negf %906 : vector<2x16xf32>
    %908 = math.exp %907 : vector<2x16xf32>
    %cst_462 = arith.constant 1.000000e+00 : f32
    %909 = vector.broadcast %cst_462 : f32 to vector<2x16xf32>
    %910 = arith.addf %909, %908 : vector<2x16xf32>
    %911 = arith.divf %909, %910 : vector<2x16xf32>
    %912 = arith.mulf %905, %899 : vector<2x16xf32>
    %913 = arith.addf %890, %912 : vector<2x16xf32>
    %914 = math.tanh %913 : vector<2x16xf32>
    %cst_463 = arith.constant 1.000000e+00 : f32
    %915 = vector.broadcast %cst_463 : f32 to vector<2x16xf32>
    %916 = arith.subf %915, %911 : vector<2x16xf32>
    %917 = arith.mulf %916, %914 : vector<2x16xf32>
    %918 = arith.mulf %911, %793 : vector<2x16xf32>
    %919 = arith.addf %917, %918 : vector<2x16xf32>
    %920 = vector.broadcast %839 : vector<2x1xf32> to vector<2x16xf32>
    %921 = arith.mulf %920, %919 : vector<2x16xf32>
    %cst_464 = arith.constant 1.000000e+00 : f32
    %922 = vector.broadcast %cst_464 : f32 to vector<2x1xf32>
    %923 = arith.subf %922, %839 : vector<2x1xf32>
    %924 = vector.broadcast %923 : vector<2x1xf32> to vector<2x16xf32>
    %925 = arith.mulf %924, %793 : vector<2x16xf32>
    %926 = arith.addf %921, %925 : vector<2x16xf32>
    %c12_465 = arith.constant 12 : index
    %c0_466 = arith.constant 0 : index
    %927 = vector.load %arg34[%c12_465, %c0_466] : memref<16x16xf32, #tpu.memory_space<vmem>>, vector<2x16xf32>
    tpu.vector_store %arg34[%c12_465, %c0_466], %926 {strides = array<i32>} : memref<16x16xf32, #tpu.memory_space<vmem>>, vector<2x16xf32>,
    %c1_467 = arith.constant 1 : index
    %c0_468 = arith.constant 0 : index
    %c0_469 = arith.constant 0 : index
    %c0_470 = arith.constant 0 : index
    %928 = vector.load %arg6[%c1_467, %c0_468, %c0_469, %c0_470] : memref<8x3x2x16xf32, #tpu.memory_space<vmem>>, vector<1x1x2x16xf32>
    %929 = vector.shape_cast %928 : vector<1x1x2x16xf32> to vector<2x16xf32>
    %c1_471 = arith.constant 1 : index
    %c1_472 = arith.constant 1 : index
    %c0_473 = arith.constant 0 : index
    %c0_474 = arith.constant 0 : index
    %930 = vector.load %arg6[%c1_471, %c1_472, %c0_473, %c0_474] : memref<8x3x2x16xf32, #tpu.memory_space<vmem>>, vector<1x1x2x16xf32>
    %931 = vector.shape_cast %930 : vector<1x1x2x16xf32> to vector<2x16xf32>
    %c1_475 = arith.constant 1 : index
    %c2_476 = arith.constant 2 : index
    %c0_477 = arith.constant 0 : index
    %c0_478 = arith.constant 0 : index
    %932 = vector.load %arg6[%c1_475, %c2_476, %c0_477, %c0_478] : memref<8x3x2x16xf32, #tpu.memory_space<vmem>>, vector<1x1x2x16xf32>
    %933 = vector.shape_cast %932 : vector<1x1x2x16xf32> to vector<2x16xf32>
    %cst_479 = arith.constant dense<0.000000e+00> : vector<2x16xf32>
    %934 = tpu.matmul %836, %25, %cst_479 {dimension_numbers = #tpu.dot_dimension_numbers<[1], [0], [0], [1], [0, 0, 1, 1], [], []>} : vector<2x16xf32>, vector<16x16xf32>, vector<2x16xf32> -> vector<2x16xf32>
    %935 = vector.broadcast %31 : vector<1x16xf32> to vector<2x16xf32>
    %936 = arith.addf %934, %935 : vector<2x16xf32>
    %cst_480 = arith.constant dense<0.000000e+00> : vector<2x16xf32>
    %937 = tpu.matmul %836, %27, %cst_480 {dimension_numbers = #tpu.dot_dimension_numbers<[1], [0], [0], [1], [0, 0, 1, 1], [], []>} : vector<2x16xf32>, vector<16x16xf32>, vector<2x16xf32> -> vector<2x16xf32>
    %938 = vector.broadcast %33 : vector<1x16xf32> to vector<2x16xf32>
    %939 = arith.addf %937, %938 : vector<2x16xf32>
    %cst_481 = arith.constant dense<0.000000e+00> : vector<2x16xf32>
    %940 = tpu.matmul %836, %29, %cst_481 {dimension_numbers = #tpu.dot_dimension_numbers<[1], [0], [0], [1], [0, 0, 1, 1], [], []>} : vector<2x16xf32>, vector<16x16xf32>, vector<2x16xf32> -> vector<2x16xf32>
    %941 = vector.broadcast %35 : vector<1x16xf32> to vector<2x16xf32>
    %942 = arith.addf %940, %941 : vector<2x16xf32>
    %943 = arith.addf %929, %936 : vector<2x16xf32>
    %944 = arith.negf %943 : vector<2x16xf32>
    %945 = math.exp %944 : vector<2x16xf32>
    %cst_482 = arith.constant 1.000000e+00 : f32
    %946 = vector.broadcast %cst_482 : f32 to vector<2x16xf32>
    %947 = arith.addf %946, %945 : vector<2x16xf32>
    %948 = arith.divf %946, %947 : vector<2x16xf32>
    %949 = arith.addf %931, %939 : vector<2x16xf32>
    %950 = arith.negf %949 : vector<2x16xf32>
    %951 = math.exp %950 : vector<2x16xf32>
    %cst_483 = arith.constant 1.000000e+00 : f32
    %952 = vector.broadcast %cst_483 : f32 to vector<2x16xf32>
    %953 = arith.addf %952, %951 : vector<2x16xf32>
    %954 = arith.divf %952, %953 : vector<2x16xf32>
    %955 = arith.mulf %948, %942 : vector<2x16xf32>
    %956 = arith.addf %933, %955 : vector<2x16xf32>
    %957 = math.tanh %956 : vector<2x16xf32>
    %cst_484 = arith.constant 1.000000e+00 : f32
    %958 = vector.broadcast %cst_484 : f32 to vector<2x16xf32>
    %959 = arith.subf %958, %954 : vector<2x16xf32>
    %960 = arith.mulf %959, %957 : vector<2x16xf32>
    %961 = arith.mulf %954, %836 : vector<2x16xf32>
    %962 = arith.addf %960, %961 : vector<2x16xf32>
    %963 = vector.broadcast %841 : vector<2x1xf32> to vector<2x16xf32>
    %964 = arith.mulf %963, %962 : vector<2x16xf32>
    %cst_485 = arith.constant 1.000000e+00 : f32
    %965 = vector.broadcast %cst_485 : f32 to vector<2x1xf32>
    %966 = arith.subf %965, %841 : vector<2x1xf32>
    %967 = vector.broadcast %966 : vector<2x1xf32> to vector<2x16xf32>
    %968 = arith.mulf %967, %836 : vector<2x16xf32>
    %969 = arith.addf %964, %968 : vector<2x16xf32>
    %c2_486 = arith.constant 2 : index
    %c0_487 = arith.constant 0 : index
    %970 = vector.load %arg35[%c2_486, %c0_487] : memref<16x16xf32, #tpu.memory_space<vmem>>, vector<2x16xf32>
    tpu.vector_store %arg35[%c2_486, %c0_487], %969 {strides = array<i32>} : memref<16x16xf32, #tpu.memory_space<vmem>>, vector<2x16xf32>,
    %971 = vector.extract_strided_slice %36 {offsets = [7, 0, 0], sizes = [1, 2, 1], strides = [1, 1, 1]} : vector<8x2x1xf32> to vector<1x2x1xf32>
    %972 = vector.shape_cast %971 : vector<1x2x1xf32> to vector<2x1xf32>
    %973 = vector.extract_strided_slice %36 {offsets = [0, 0, 0], sizes = [1, 2, 1], strides = [1, 1, 1]} : vector<8x2x1xf32> to vector<1x2x1xf32>
    %974 = vector.shape_cast %973 : vector<1x2x1xf32> to vector<2x1xf32>
    %c7_488 = arith.constant 7 : index
    %c0_489 = arith.constant 0 : index
    %c0_490 = arith.constant 0 : index
    %c0_491 = arith.constant 0 : index
    %975 = vector.load %arg0[%c7_488, %c0_489, %c0_490, %c0_491] : memref<8x3x2x32xf32, #tpu.memory_space<vmem>>, vector<1x1x2x32xf32>
    %976 = vector.shape_cast %975 : vector<1x1x2x32xf32> to vector<2x32xf32>
    %c7_492 = arith.constant 7 : index
    %c1_493 = arith.constant 1 : index
    %c0_494 = arith.constant 0 : index
    %c0_495 = arith.constant 0 : index
    %977 = vector.load %arg0[%c7_492, %c1_493, %c0_494, %c0_495] : memref<8x3x2x32xf32, #tpu.memory_space<vmem>>, vector<1x1x2x32xf32>
    %978 = vector.shape_cast %977 : vector<1x1x2x32xf32> to vector<2x32xf32>
    %c7_496 = arith.constant 7 : index
    %c2_497 = arith.constant 2 : index
    %c0_498 = arith.constant 0 : index
    %c0_499 = arith.constant 0 : index
    %979 = vector.load %arg0[%c7_496, %c2_497, %c0_498, %c0_499] : memref<8x3x2x32xf32, #tpu.memory_space<vmem>>, vector<1x1x2x32xf32>
    %980 = vector.shape_cast %979 : vector<1x1x2x32xf32> to vector<2x32xf32>
    %cst_500 = arith.constant dense<0.000000e+00> : vector<2x32xf32>
    %981 = tpu.matmul %883, %1, %cst_500 {dimension_numbers = #tpu.dot_dimension_numbers<[1], [0], [0], [1], [0, 0, 1, 1], [], []>} : vector<2x32xf32>, vector<32x32xf32>, vector<2x32xf32> -> vector<2x32xf32>
    %982 = vector.broadcast %7 : vector<1x32xf32> to vector<2x32xf32>
    %983 = arith.addf %981, %982 : vector<2x32xf32>
    %cst_501 = arith.constant dense<0.000000e+00> : vector<2x32xf32>
    %984 = tpu.matmul %883, %3, %cst_501 {dimension_numbers = #tpu.dot_dimension_numbers<[1], [0], [0], [1], [0, 0, 1, 1], [], []>} : vector<2x32xf32>, vector<32x32xf32>, vector<2x32xf32> -> vector<2x32xf32>
    %985 = vector.broadcast %9 : vector<1x32xf32> to vector<2x32xf32>
    %986 = arith.addf %984, %985 : vector<2x32xf32>
    %cst_502 = arith.constant dense<0.000000e+00> : vector<2x32xf32>
    %987 = tpu.matmul %883, %5, %cst_502 {dimension_numbers = #tpu.dot_dimension_numbers<[1], [0], [0], [1], [0, 0, 1, 1], [], []>} : vector<2x32xf32>, vector<32x32xf32>, vector<2x32xf32> -> vector<2x32xf32>
    %988 = vector.broadcast %11 : vector<1x32xf32> to vector<2x32xf32>
    %989 = arith.addf %987, %988 : vector<2x32xf32>
    %990 = arith.addf %976, %983 : vector<2x32xf32>
    %991 = arith.negf %990 : vector<2x32xf32>
    %992 = math.exp %991 : vector<2x32xf32>
    %cst_503 = arith.constant 1.000000e+00 : f32
    %993 = vector.broadcast %cst_503 : f32 to vector<2x32xf32>
    %994 = arith.addf %993, %992 : vector<2x32xf32>
    %995 = arith.divf %993, %994 : vector<2x32xf32>
    %996 = arith.addf %978, %986 : vector<2x32xf32>
    %997 = arith.negf %996 : vector<2x32xf32>
    %998 = math.exp %997 : vector<2x32xf32>
    %cst_504 = arith.constant 1.000000e+00 : f32
    %999 = vector.broadcast %cst_504 : f32 to vector<2x32xf32>
    %1000 = arith.addf %999, %998 : vector<2x32xf32>
    %1001 = arith.divf %999, %1000 : vector<2x32xf32>
    %1002 = arith.mulf %995, %989 : vector<2x32xf32>
    %1003 = arith.addf %980, %1002 : vector<2x32xf32>
    %1004 = math.tanh %1003 : vector<2x32xf32>
    %cst_505 = arith.constant 1.000000e+00 : f32
    %1005 = vector.broadcast %cst_505 : f32 to vector<2x32xf32>
    %1006 = arith.subf %1005, %1001 : vector<2x32xf32>
    %1007 = arith.mulf %1006, %1004 : vector<2x32xf32>
    %1008 = arith.mulf %1001, %883 : vector<2x32xf32>
    %1009 = arith.addf %1007, %1008 : vector<2x32xf32>
    %1010 = vector.broadcast %972 : vector<2x1xf32> to vector<2x32xf32>
    %1011 = arith.mulf %1010, %1009 : vector<2x32xf32>
    %cst_506 = arith.constant 1.000000e+00 : f32
    %1012 = vector.broadcast %cst_506 : f32 to vector<2x1xf32>
    %1013 = arith.subf %1012, %972 : vector<2x1xf32>
    %1014 = vector.broadcast %1013 : vector<2x1xf32> to vector<2x32xf32>
    %1015 = arith.mulf %1014, %883 : vector<2x32xf32>
    %1016 = arith.addf %1011, %1015 : vector<2x32xf32>
    %c14_507 = arith.constant 14 : index
    %c0_508 = arith.constant 0 : index
    %1017 = vector.load %arg33[%c14_507, %c0_508] : memref<16x32xf32, #tpu.memory_space<vmem>>, vector<2x32xf32>
    tpu.vector_store %arg33[%c14_507, %c0_508], %1016 {strides = array<i32>} : memref<16x32xf32, #tpu.memory_space<vmem>>, vector<2x32xf32>,
    %c7_509 = arith.constant 7 : index
    %c0_510 = arith.constant 0 : index
    %c0_511 = arith.constant 0 : index
    %c0_512 = arith.constant 0 : index
    %1018 = vector.load %arg3[%c7_509, %c0_510, %c0_511, %c0_512] : memref<8x3x2x16xf32, #tpu.memory_space<vmem>>, vector<1x1x2x16xf32>
    %1019 = vector.shape_cast %1018 : vector<1x1x2x16xf32> to vector<2x16xf32>
    %c7_513 = arith.constant 7 : index
    %c1_514 = arith.constant 1 : index
    %c0_515 = arith.constant 0 : index
    %c0_516 = arith.constant 0 : index
    %1020 = vector.load %arg3[%c7_513, %c1_514, %c0_515, %c0_516] : memref<8x3x2x16xf32, #tpu.memory_space<vmem>>, vector<1x1x2x16xf32>
    %1021 = vector.shape_cast %1020 : vector<1x1x2x16xf32> to vector<2x16xf32>
    %c7_517 = arith.constant 7 : index
    %c2_518 = arith.constant 2 : index
    %c0_519 = arith.constant 0 : index
    %c0_520 = arith.constant 0 : index
    %1022 = vector.load %arg3[%c7_517, %c2_518, %c0_519, %c0_520] : memref<8x3x2x16xf32, #tpu.memory_space<vmem>>, vector<1x1x2x16xf32>
    %1023 = vector.shape_cast %1022 : vector<1x1x2x16xf32> to vector<2x16xf32>
    %cst_521 = arith.constant dense<0.000000e+00> : vector<2x16xf32>
    %1024 = tpu.matmul %926, %13, %cst_521 {dimension_numbers = #tpu.dot_dimension_numbers<[1], [0], [0], [1], [0, 0, 1, 1], [], []>} : vector<2x16xf32>, vector<16x16xf32>, vector<2x16xf32> -> vector<2x16xf32>
    %1025 = vector.broadcast %19 : vector<1x16xf32> to vector<2x16xf32>
    %1026 = arith.addf %1024, %1025 : vector<2x16xf32>
    %cst_522 = arith.constant dense<0.000000e+00> : vector<2x16xf32>
    %1027 = tpu.matmul %926, %15, %cst_522 {dimension_numbers = #tpu.dot_dimension_numbers<[1], [0], [0], [1], [0, 0, 1, 1], [], []>} : vector<2x16xf32>, vector<16x16xf32>, vector<2x16xf32> -> vector<2x16xf32>
    %1028 = vector.broadcast %21 : vector<1x16xf32> to vector<2x16xf32>
    %1029 = arith.addf %1027, %1028 : vector<2x16xf32>
    %cst_523 = arith.constant dense<0.000000e+00> : vector<2x16xf32>
    %1030 = tpu.matmul %926, %17, %cst_523 {dimension_numbers = #tpu.dot_dimension_numbers<[1], [0], [0], [1], [0, 0, 1, 1], [], []>} : vector<2x16xf32>, vector<16x16xf32>, vector<2x16xf32> -> vector<2x16xf32>
    %1031 = vector.broadcast %23 : vector<1x16xf32> to vector<2x16xf32>
    %1032 = arith.addf %1030, %1031 : vector<2x16xf32>
    %1033 = arith.addf %1019, %1026 : vector<2x16xf32>
    %1034 = arith.negf %1033 : vector<2x16xf32>
    %1035 = math.exp %1034 : vector<2x16xf32>
    %cst_524 = arith.constant 1.000000e+00 : f32
    %1036 = vector.broadcast %cst_524 : f32 to vector<2x16xf32>
    %1037 = arith.addf %1036, %1035 : vector<2x16xf32>
    %1038 = arith.divf %1036, %1037 : vector<2x16xf32>
    %1039 = arith.addf %1021, %1029 : vector<2x16xf32>
    %1040 = arith.negf %1039 : vector<2x16xf32>
    %1041 = math.exp %1040 : vector<2x16xf32>
    %cst_525 = arith.constant 1.000000e+00 : f32
    %1042 = vector.broadcast %cst_525 : f32 to vector<2x16xf32>
    %1043 = arith.addf %1042, %1041 : vector<2x16xf32>
    %1044 = arith.divf %1042, %1043 : vector<2x16xf32>
    %1045 = arith.mulf %1038, %1032 : vector<2x16xf32>
    %1046 = arith.addf %1023, %1045 : vector<2x16xf32>
    %1047 = math.tanh %1046 : vector<2x16xf32>
    %cst_526 = arith.constant 1.000000e+00 : f32
    %1048 = vector.broadcast %cst_526 : f32 to vector<2x16xf32>
    %1049 = arith.subf %1048, %1044 : vector<2x16xf32>
    %1050 = arith.mulf %1049, %1047 : vector<2x16xf32>
    %1051 = arith.mulf %1044, %926 : vector<2x16xf32>
    %1052 = arith.addf %1050, %1051 : vector<2x16xf32>
    %1053 = vector.broadcast %972 : vector<2x1xf32> to vector<2x16xf32>
    %1054 = arith.mulf %1053, %1052 : vector<2x16xf32>
    %cst_527 = arith.constant 1.000000e+00 : f32
    %1055 = vector.broadcast %cst_527 : f32 to vector<2x1xf32>
    %1056 = arith.subf %1055, %972 : vector<2x1xf32>
    %1057 = vector.broadcast %1056 : vector<2x1xf32> to vector<2x16xf32>
    %1058 = arith.mulf %1057, %926 : vector<2x16xf32>
    %1059 = arith.addf %1054, %1058 : vector<2x16xf32>
    %c14_528 = arith.constant 14 : index
    %c0_529 = arith.constant 0 : index
    %1060 = vector.load %arg34[%c14_528, %c0_529] : memref<16x16xf32, #tpu.memory_space<vmem>>, vector<2x16xf32>
    tpu.vector_store %arg34[%c14_528, %c0_529], %1059 {strides = array<i32>} : memref<16x16xf32, #tpu.memory_space<vmem>>, vector<2x16xf32>,
    %c0_530 = arith.constant 0 : index
    %c0_531 = arith.constant 0 : index
    %c0_532 = arith.constant 0 : index
    %c0_533 = arith.constant 0 : index
    %1061 = vector.load %arg6[%c0_530, %c0_531, %c0_532, %c0_533] : memref<8x3x2x16xf32, #tpu.memory_space<vmem>>, vector<1x1x2x16xf32>
    %1062 = vector.shape_cast %1061 : vector<1x1x2x16xf32> to vector<2x16xf32>
    %c0_534 = arith.constant 0 : index
    %c1_535 = arith.constant 1 : index
    %c0_536 = arith.constant 0 : index
    %c0_537 = arith.constant 0 : index
    %1063 = vector.load %arg6[%c0_534, %c1_535, %c0_536, %c0_537] : memref<8x3x2x16xf32, #tpu.memory_space<vmem>>, vector<1x1x2x16xf32>
    %1064 = vector.shape_cast %1063 : vector<1x1x2x16xf32> to vector<2x16xf32>
    %c0_538 = arith.constant 0 : index
    %c2_539 = arith.constant 2 : index
    %c0_540 = arith.constant 0 : index
    %c0_541 = arith.constant 0 : index
    %1065 = vector.load %arg6[%c0_538, %c2_539, %c0_540, %c0_541] : memref<8x3x2x16xf32, #tpu.memory_space<vmem>>, vector<1x1x2x16xf32>
    %1066 = vector.shape_cast %1065 : vector<1x1x2x16xf32> to vector<2x16xf32>
    %cst_542 = arith.constant dense<0.000000e+00> : vector<2x16xf32>
    %1067 = tpu.matmul %969, %25, %cst_542 {dimension_numbers = #tpu.dot_dimension_numbers<[1], [0], [0], [1], [0, 0, 1, 1], [], []>} : vector<2x16xf32>, vector<16x16xf32>, vector<2x16xf32> -> vector<2x16xf32>
    %1068 = vector.broadcast %31 : vector<1x16xf32> to vector<2x16xf32>
    %1069 = arith.addf %1067, %1068 : vector<2x16xf32>
    %cst_543 = arith.constant dense<0.000000e+00> : vector<2x16xf32>
    %1070 = tpu.matmul %969, %27, %cst_543 {dimension_numbers = #tpu.dot_dimension_numbers<[1], [0], [0], [1], [0, 0, 1, 1], [], []>} : vector<2x16xf32>, vector<16x16xf32>, vector<2x16xf32> -> vector<2x16xf32>
    %1071 = vector.broadcast %33 : vector<1x16xf32> to vector<2x16xf32>
    %1072 = arith.addf %1070, %1071 : vector<2x16xf32>
    %cst_544 = arith.constant dense<0.000000e+00> : vector<2x16xf32>
    %1073 = tpu.matmul %969, %29, %cst_544 {dimension_numbers = #tpu.dot_dimension_numbers<[1], [0], [0], [1], [0, 0, 1, 1], [], []>} : vector<2x16xf32>, vector<16x16xf32>, vector<2x16xf32> -> vector<2x16xf32>
    %1074 = vector.broadcast %35 : vector<1x16xf32> to vector<2x16xf32>
    %1075 = arith.addf %1073, %1074 : vector<2x16xf32>
    %1076 = arith.addf %1062, %1069 : vector<2x16xf32>
    %1077 = arith.negf %1076 : vector<2x16xf32>
    %1078 = math.exp %1077 : vector<2x16xf32>
    %cst_545 = arith.constant 1.000000e+00 : f32
    %1079 = vector.broadcast %cst_545 : f32 to vector<2x16xf32>
    %1080 = arith.addf %1079, %1078 : vector<2x16xf32>
    %1081 = arith.divf %1079, %1080 : vector<2x16xf32>
    %1082 = arith.addf %1064, %1072 : vector<2x16xf32>
    %1083 = arith.negf %1082 : vector<2x16xf32>
    %1084 = math.exp %1083 : vector<2x16xf32>
    %cst_546 = arith.constant 1.000000e+00 : f32
    %1085 = vector.broadcast %cst_546 : f32 to vector<2x16xf32>
    %1086 = arith.addf %1085, %1084 : vector<2x16xf32>
    %1087 = arith.divf %1085, %1086 : vector<2x16xf32>
    %1088 = arith.mulf %1081, %1075 : vector<2x16xf32>
    %1089 = arith.addf %1066, %1088 : vector<2x16xf32>
    %1090 = math.tanh %1089 : vector<2x16xf32>
    %cst_547 = arith.constant 1.000000e+00 : f32
    %1091 = vector.broadcast %cst_547 : f32 to vector<2x16xf32>
    %1092 = arith.subf %1091, %1087 : vector<2x16xf32>
    %1093 = arith.mulf %1092, %1090 : vector<2x16xf32>
    %1094 = arith.mulf %1087, %969 : vector<2x16xf32>
    %1095 = arith.addf %1093, %1094 : vector<2x16xf32>
    %1096 = vector.broadcast %974 : vector<2x1xf32> to vector<2x16xf32>
    %1097 = arith.mulf %1096, %1095 : vector<2x16xf32>
    %cst_548 = arith.constant 1.000000e+00 : f32
    %1098 = vector.broadcast %cst_548 : f32 to vector<2x1xf32>
    %1099 = arith.subf %1098, %974 : vector<2x1xf32>
    %1100 = vector.broadcast %1099 : vector<2x1xf32> to vector<2x16xf32>
    %1101 = arith.mulf %1100, %969 : vector<2x16xf32>
    %1102 = arith.addf %1097, %1101 : vector<2x16xf32>
    %c0_549 = arith.constant 0 : index
    %c0_550 = arith.constant 0 : index
    %1103 = vector.load %arg35[%c0_549, %c0_550] : memref<16x16xf32, #tpu.memory_space<vmem>>, vector<2x16xf32>
    tpu.vector_store %arg35[%c0_549, %c0_550], %1102 {strides = array<i32>} : memref<16x16xf32, #tpu.memory_space<vmem>>, vector<2x16xf32>,
    %c0_551 = arith.constant 0 : index
    %c0_552 = arith.constant 0 : index
    %1104 = vector.load %arg34[%c0_551, %c0_552] : memref<16x16xf32, #tpu.memory_space<vmem>>, vector<16x16xf32>
    %c0_553 = arith.constant 0 : index
    %c0_554 = arith.constant 0 : index
    %1105 = vector.load %arg10[%c0_553, %c0_554] : memref<16x6xf32, #tpu.memory_space<vmem>>, vector<16x6xf32>
    %cst_555 = arith.constant dense<0.000000e+00> : vector<16x6xf32>
    %1106 = tpu.matmul %1104, %1105, %cst_555 {dimension_numbers = #tpu.dot_dimension_numbers<[1], [0], [0], [1], [0, 0, 1, 1], [], []>} : vector<16x16xf32>, vector<16x6xf32>, vector<16x6xf32> -> vector<16x6xf32>
    %c0_556 = arith.constant 0 : index
    %c0_557 = arith.constant 0 : index
    %1107 = vector.load %arg35[%c0_556, %c0_557] : memref<16x16xf32, #tpu.memory_space<vmem>>, vector<16x16xf32>
    %c0_558 = arith.constant 0 : index
    %c0_559 = arith.constant 0 : index
    %1108 = vector.load %arg11[%c0_558, %c0_559] : memref<16x6xf32, #tpu.memory_space<vmem>>, vector<16x6xf32>
    %cst_560 = arith.constant dense<0.000000e+00> : vector<16x6xf32>
    %1109 = tpu.matmul %1107, %1108, %cst_560 {dimension_numbers = #tpu.dot_dimension_numbers<[1], [0], [0], [1], [0, 0, 1, 1], [], []>} : vector<16x16xf32>, vector<16x6xf32>, vector<16x6xf32> -> vector<16x6xf32>
    %1110 = arith.addf %1106, %1109 : vector<16x6xf32>
    %c0_561 = arith.constant 0 : index
    %c0_562 = arith.constant 0 : index
    %1111 = vector.load %arg12[%c0_561, %c0_562] : memref<1x6xf32, #tpu.memory_space<vmem>>, vector<1x6xf32>
    %1112 = vector.broadcast %1111 : vector<1x6xf32> to vector<16x6xf32>
    %1113 = arith.addf %1110, %1112 : vector<16x6xf32>
    %c0_563 = arith.constant 0 : index
    %c0_564 = arith.constant 0 : index
    %1114 = vector.load %arg31[%c0_563, %c0_564] : memref<16x6xf32, #tpu.memory_space<vmem>>, vector<16x6xf32>
    tpu.vector_store %arg31[%c0_563, %c0_564], %1113 {strides = array<i32>} : memref<16x6xf32, #tpu.memory_space<vmem>>, vector<16x6xf32>,
    %cst_565 = arith.constant dense<0xFF800000> : vector<16xf32>
    %1115 = vector.multi_reduction <maximumf>, %1113, %cst_565 [1] : vector<16x6xf32> to vector<16xf32>
    %1116 = vector.shape_cast %1115 : vector<16xf32> to vector<16x1xf32>
    %1117 = vector.extract_strided_slice %1113 {offsets = [0, 0], sizes = [16, 1], strides = [1, 1]} : vector<16x6xf32> to vector<16x1xf32>
    %1118 = arith.cmpf ogt, %1116, %1117 : vector<16x1xf32>
    %cst_566 = arith.constant 1.000000e+00 : f32
    %cst_567 = arith.constant 0.000000e+00 : f32
    %1119 = vector.broadcast %cst_566 : f32 to vector<16x1xf32>
    %1120 = vector.broadcast %cst_567 : f32 to vector<16x1xf32>
    %1121 = arith.select %1118, %1119, %1120 : vector<16x1xi1>, vector<16x1xf32>
    %cst_568 = arith.constant 1.000000e+00 : f32
    %1122 = vector.broadcast %cst_568 : f32 to vector<1x1xf32>
    %cst_569 = arith.constant dense<0.000000e+00> : vector<1x16xf32>
    %1123 = tpu.matmul %1122, %1121, %cst_569 {dimension_numbers = #tpu.dot_dimension_numbers<[1], [1], [0], [0], [0, 0, 1, 0], [], []>} : vector<1x1xf32>, vector<16x1xf32>, vector<1x16xf32> -> vector<1x16xf32>
    %c0_570 = arith.constant 0 : index
    %c0_571 = arith.constant 0 : index
    %c0_572 = arith.constant 0 : index
    %1124 = vector.load %arg14[%c0_570, %c0_571, %c0_572] : memref<3x32x32xf32, #tpu.memory_space<vmem>>, vector<1x32x32xf32>
    %1125 = vector.shape_cast %1124 : vector<1x32x32xf32> to vector<32x32xf32>
    %c1_573 = arith.constant 1 : index
    %c0_574 = arith.constant 0 : index
    %c0_575 = arith.constant 0 : index
    %1126 = vector.load %arg14[%c1_573, %c0_574, %c0_575] : memref<3x32x32xf32, #tpu.memory_space<vmem>>, vector<1x32x32xf32>
    %1127 = vector.shape_cast %1126 : vector<1x32x32xf32> to vector<32x32xf32>
    %c2_576 = arith.constant 2 : index
    %c0_577 = arith.constant 0 : index
    %c0_578 = arith.constant 0 : index
    %1128 = vector.load %arg14[%c2_576, %c0_577, %c0_578] : memref<3x32x32xf32, #tpu.memory_space<vmem>>, vector<1x32x32xf32>
    %1129 = vector.shape_cast %1128 : vector<1x32x32xf32> to vector<32x32xf32>
    %c0_579 = arith.constant 0 : index
    %c0_580 = arith.constant 0 : index
    %c0_581 = arith.constant 0 : index
    %1130 = vector.load %arg15[%c0_579, %c0_580, %c0_581] : memref<3x1x32xf32, #tpu.memory_space<vmem>>, vector<1x1x32xf32>
    %1131 = vector.shape_cast %1130 : vector<1x1x32xf32> to vector<1x32xf32>
    %c1_582 = arith.constant 1 : index
    %c0_583 = arith.constant 0 : index
    %c0_584 = arith.constant 0 : index
    %1132 = vector.load %arg15[%c1_582, %c0_583, %c0_584] : memref<3x1x32xf32, #tpu.memory_space<vmem>>, vector<1x1x32xf32>
    %1133 = vector.shape_cast %1132 : vector<1x1x32xf32> to vector<1x32xf32>
    %c2_585 = arith.constant 2 : index
    %c0_586 = arith.constant 0 : index
    %c0_587 = arith.constant 0 : index
    %1134 = vector.load %arg15[%c2_585, %c0_586, %c0_587] : memref<3x1x32xf32, #tpu.memory_space<vmem>>, vector<1x1x32xf32>
    %1135 = vector.shape_cast %1134 : vector<1x1x32xf32> to vector<1x32xf32>
    %c0_588 = arith.constant 0 : index
    %c0_589 = arith.constant 0 : index
    %c0_590 = arith.constant 0 : index
    %c0_591 = arith.constant 0 : index
    %1136 = vector.load %arg13[%c0_588, %c0_589, %c0_590, %c0_591] : memref<6x3x2x32xf32, #tpu.memory_space<vmem>>, vector<1x1x2x32xf32>
    %1137 = vector.shape_cast %1136 : vector<1x1x2x32xf32> to vector<2x32xf32>
    %c0_592 = arith.constant 0 : index
    %c1_593 = arith.constant 1 : index
    %c0_594 = arith.constant 0 : index
    %c0_595 = arith.constant 0 : index
    %1138 = vector.load %arg13[%c0_592, %c1_593, %c0_594, %c0_595] : memref<6x3x2x32xf32, #tpu.memory_space<vmem>>, vector<1x1x2x32xf32>
    %1139 = vector.shape_cast %1138 : vector<1x1x2x32xf32> to vector<2x32xf32>
    %c0_596 = arith.constant 0 : index
    %c2_597 = arith.constant 2 : index
    %c0_598 = arith.constant 0 : index
    %c0_599 = arith.constant 0 : index
    %1140 = vector.load %arg13[%c0_596, %c2_597, %c0_598, %c0_599] : memref<6x3x2x32xf32, #tpu.memory_space<vmem>>, vector<1x1x2x32xf32>
    %1141 = vector.shape_cast %1140 : vector<1x1x2x32xf32> to vector<2x32xf32>
    %cst_600 = arith.constant dense<0.000000e+00> : vector<2x32xf32>
    %1142 = tpu.matmul %1016, %1125, %cst_600 {dimension_numbers = #tpu.dot_dimension_numbers<[1], [0], [0], [1], [0, 0, 1, 1], [], []>} : vector<2x32xf32>, vector<32x32xf32>, vector<2x32xf32> -> vector<2x32xf32>
    %1143 = vector.broadcast %1131 : vector<1x32xf32> to vector<2x32xf32>
    %1144 = arith.addf %1142, %1143 : vector<2x32xf32>
    %cst_601 = arith.constant dense<0.000000e+00> : vector<2x32xf32>
    %1145 = tpu.matmul %1016, %1127, %cst_601 {dimension_numbers = #tpu.dot_dimension_numbers<[1], [0], [0], [1], [0, 0, 1, 1], [], []>} : vector<2x32xf32>, vector<32x32xf32>, vector<2x32xf32> -> vector<2x32xf32>
    %1146 = vector.broadcast %1133 : vector<1x32xf32> to vector<2x32xf32>
    %1147 = arith.addf %1145, %1146 : vector<2x32xf32>
    %cst_602 = arith.constant dense<0.000000e+00> : vector<2x32xf32>
    %1148 = tpu.matmul %1016, %1129, %cst_602 {dimension_numbers = #tpu.dot_dimension_numbers<[1], [0], [0], [1], [0, 0, 1, 1], [], []>} : vector<2x32xf32>, vector<32x32xf32>, vector<2x32xf32> -> vector<2x32xf32>
    %1149 = vector.broadcast %1135 : vector<1x32xf32> to vector<2x32xf32>
    %1150 = arith.addf %1148, %1149 : vector<2x32xf32>
    %1151 = arith.addf %1137, %1144 : vector<2x32xf32>
    %1152 = arith.negf %1151 : vector<2x32xf32>
    %1153 = math.exp %1152 : vector<2x32xf32>
    %cst_603 = arith.constant 1.000000e+00 : f32
    %1154 = vector.broadcast %cst_603 : f32 to vector<2x32xf32>
    %1155 = arith.addf %1154, %1153 : vector<2x32xf32>
    %1156 = arith.divf %1154, %1155 : vector<2x32xf32>
    %1157 = arith.addf %1139, %1147 : vector<2x32xf32>
    %1158 = arith.negf %1157 : vector<2x32xf32>
    %1159 = math.exp %1158 : vector<2x32xf32>
    %cst_604 = arith.constant 1.000000e+00 : f32
    %1160 = vector.broadcast %cst_604 : f32 to vector<2x32xf32>
    %1161 = arith.addf %1160, %1159 : vector<2x32xf32>
    %1162 = arith.divf %1160, %1161 : vector<2x32xf32>
    %1163 = arith.mulf %1156, %1150 : vector<2x32xf32>
    %1164 = arith.addf %1141, %1163 : vector<2x32xf32>
    %1165 = math.tanh %1164 : vector<2x32xf32>
    %cst_605 = arith.constant 1.000000e+00 : f32
    %1166 = vector.broadcast %cst_605 : f32 to vector<2x32xf32>
    %1167 = arith.subf %1166, %1162 : vector<2x32xf32>
    %1168 = arith.mulf %1167, %1165 : vector<2x32xf32>
    %1169 = arith.mulf %1162, %1016 : vector<2x32xf32>
    %1170 = arith.addf %1168, %1169 : vector<2x32xf32>
    %c0_606 = arith.constant 0 : index
    %c0_607 = arith.constant 0 : index
    %1171 = vector.load %arg36[%c0_606, %c0_607] : memref<12x32xf32, #tpu.memory_space<vmem>>, vector<2x32xf32>
    tpu.vector_store %arg36[%c0_606, %c0_607], %1170 {strides = array<i32>} : memref<12x32xf32, #tpu.memory_space<vmem>>, vector<2x32xf32>,
    %c1_608 = arith.constant 1 : index
    %c0_609 = arith.constant 0 : index
    %c0_610 = arith.constant 0 : index
    %c0_611 = arith.constant 0 : index
    %1172 = vector.load %arg13[%c1_608, %c0_609, %c0_610, %c0_611] : memref<6x3x2x32xf32, #tpu.memory_space<vmem>>, vector<1x1x2x32xf32>
    %1173 = vector.shape_cast %1172 : vector<1x1x2x32xf32> to vector<2x32xf32>
    %c1_612 = arith.constant 1 : index
    %c1_613 = arith.constant 1 : index
    %c0_614 = arith.constant 0 : index
    %c0_615 = arith.constant 0 : index
    %1174 = vector.load %arg13[%c1_612, %c1_613, %c0_614, %c0_615] : memref<6x3x2x32xf32, #tpu.memory_space<vmem>>, vector<1x1x2x32xf32>
    %1175 = vector.shape_cast %1174 : vector<1x1x2x32xf32> to vector<2x32xf32>
    %c1_616 = arith.constant 1 : index
    %c2_617 = arith.constant 2 : index
    %c0_618 = arith.constant 0 : index
    %c0_619 = arith.constant 0 : index
    %1176 = vector.load %arg13[%c1_616, %c2_617, %c0_618, %c0_619] : memref<6x3x2x32xf32, #tpu.memory_space<vmem>>, vector<1x1x2x32xf32>
    %1177 = vector.shape_cast %1176 : vector<1x1x2x32xf32> to vector<2x32xf32>
    %cst_620 = arith.constant dense<0.000000e+00> : vector<2x32xf32>
    %1178 = tpu.matmul %1170, %1125, %cst_620 {dimension_numbers = #tpu.dot_dimension_numbers<[1], [0], [0], [1], [0, 0, 1, 1], [], []>} : vector<2x32xf32>, vector<32x32xf32>, vector<2x32xf32> -> vector<2x32xf32>
    %1179 = vector.broadcast %1131 : vector<1x32xf32> to vector<2x32xf32>
    %1180 = arith.addf %1178, %1179 : vector<2x32xf32>
    %cst_621 = arith.constant dense<0.000000e+00> : vector<2x32xf32>
    %1181 = tpu.matmul %1170, %1127, %cst_621 {dimension_numbers = #tpu.dot_dimension_numbers<[1], [0], [0], [1], [0, 0, 1, 1], [], []>} : vector<2x32xf32>, vector<32x32xf32>, vector<2x32xf32> -> vector<2x32xf32>
    %1182 = vector.broadcast %1133 : vector<1x32xf32> to vector<2x32xf32>
    %1183 = arith.addf %1181, %1182 : vector<2x32xf32>
    %cst_622 = arith.constant dense<0.000000e+00> : vector<2x32xf32>
    %1184 = tpu.matmul %1170, %1129, %cst_622 {dimension_numbers = #tpu.dot_dimension_numbers<[1], [0], [0], [1], [0, 0, 1, 1], [], []>} : vector<2x32xf32>, vector<32x32xf32>, vector<2x32xf32> -> vector<2x32xf32>
    %1185 = vector.broadcast %1135 : vector<1x32xf32> to vector<2x32xf32>
    %1186 = arith.addf %1184, %1185 : vector<2x32xf32>
    %1187 = arith.addf %1173, %1180 : vector<2x32xf32>
    %1188 = arith.negf %1187 : vector<2x32xf32>
    %1189 = math.exp %1188 : vector<2x32xf32>
    %cst_623 = arith.constant 1.000000e+00 : f32
    %1190 = vector.broadcast %cst_623 : f32 to vector<2x32xf32>
    %1191 = arith.addf %1190, %1189 : vector<2x32xf32>
    %1192 = arith.divf %1190, %1191 : vector<2x32xf32>
    %1193 = arith.addf %1175, %1183 : vector<2x32xf32>
    %1194 = arith.negf %1193 : vector<2x32xf32>
    %1195 = math.exp %1194 : vector<2x32xf32>
    %cst_624 = arith.constant 1.000000e+00 : f32
    %1196 = vector.broadcast %cst_624 : f32 to vector<2x32xf32>
    %1197 = arith.addf %1196, %1195 : vector<2x32xf32>
    %1198 = arith.divf %1196, %1197 : vector<2x32xf32>
    %1199 = arith.mulf %1192, %1186 : vector<2x32xf32>
    %1200 = arith.addf %1177, %1199 : vector<2x32xf32>
    %1201 = math.tanh %1200 : vector<2x32xf32>
    %cst_625 = arith.constant 1.000000e+00 : f32
    %1202 = vector.broadcast %cst_625 : f32 to vector<2x32xf32>
    %1203 = arith.subf %1202, %1198 : vector<2x32xf32>
    %1204 = arith.mulf %1203, %1201 : vector<2x32xf32>
    %1205 = arith.mulf %1198, %1170 : vector<2x32xf32>
    %1206 = arith.addf %1204, %1205 : vector<2x32xf32>
    %c2_626 = arith.constant 2 : index
    %c0_627 = arith.constant 0 : index
    %1207 = vector.load %arg36[%c2_626, %c0_627] : memref<12x32xf32, #tpu.memory_space<vmem>>, vector<2x32xf32>
    tpu.vector_store %arg36[%c2_626, %c0_627], %1206 {strides = array<i32>} : memref<12x32xf32, #tpu.memory_space<vmem>>, vector<2x32xf32>,
    %c2_628 = arith.constant 2 : index
    %c0_629 = arith.constant 0 : index
    %c0_630 = arith.constant 0 : index
    %c0_631 = arith.constant 0 : index
    %1208 = vector.load %arg13[%c2_628, %c0_629, %c0_630, %c0_631] : memref<6x3x2x32xf32, #tpu.memory_space<vmem>>, vector<1x1x2x32xf32>
    %1209 = vector.shape_cast %1208 : vector<1x1x2x32xf32> to vector<2x32xf32>
    %c2_632 = arith.constant 2 : index
    %c1_633 = arith.constant 1 : index
    %c0_634 = arith.constant 0 : index
    %c0_635 = arith.constant 0 : index
    %1210 = vector.load %arg13[%c2_632, %c1_633, %c0_634, %c0_635] : memref<6x3x2x32xf32, #tpu.memory_space<vmem>>, vector<1x1x2x32xf32>
    %1211 = vector.shape_cast %1210 : vector<1x1x2x32xf32> to vector<2x32xf32>
    %c2_636 = arith.constant 2 : index
    %c2_637 = arith.constant 2 : index
    %c0_638 = arith.constant 0 : index
    %c0_639 = arith.constant 0 : index
    %1212 = vector.load %arg13[%c2_636, %c2_637, %c0_638, %c0_639] : memref<6x3x2x32xf32, #tpu.memory_space<vmem>>, vector<1x1x2x32xf32>
    %1213 = vector.shape_cast %1212 : vector<1x1x2x32xf32> to vector<2x32xf32>
    %cst_640 = arith.constant dense<0.000000e+00> : vector<2x32xf32>
    %1214 = tpu.matmul %1206, %1125, %cst_640 {dimension_numbers = #tpu.dot_dimension_numbers<[1], [0], [0], [1], [0, 0, 1, 1], [], []>} : vector<2x32xf32>, vector<32x32xf32>, vector<2x32xf32> -> vector<2x32xf32>
    %1215 = vector.broadcast %1131 : vector<1x32xf32> to vector<2x32xf32>
    %1216 = arith.addf %1214, %1215 : vector<2x32xf32>
    %cst_641 = arith.constant dense<0.000000e+00> : vector<2x32xf32>
    %1217 = tpu.matmul %1206, %1127, %cst_641 {dimension_numbers = #tpu.dot_dimension_numbers<[1], [0], [0], [1], [0, 0, 1, 1], [], []>} : vector<2x32xf32>, vector<32x32xf32>, vector<2x32xf32> -> vector<2x32xf32>
    %1218 = vector.broadcast %1133 : vector<1x32xf32> to vector<2x32xf32>
    %1219 = arith.addf %1217, %1218 : vector<2x32xf32>
    %cst_642 = arith.constant dense<0.000000e+00> : vector<2x32xf32>
    %1220 = tpu.matmul %1206, %1129, %cst_642 {dimension_numbers = #tpu.dot_dimension_numbers<[1], [0], [0], [1], [0, 0, 1, 1], [], []>} : vector<2x32xf32>, vector<32x32xf32>, vector<2x32xf32> -> vector<2x32xf32>
    %1221 = vector.broadcast %1135 : vector<1x32xf32> to vector<2x32xf32>
    %1222 = arith.addf %1220, %1221 : vector<2x32xf32>
    %1223 = arith.addf %1209, %1216 : vector<2x32xf32>
    %1224 = arith.negf %1223 : vector<2x32xf32>
    %1225 = math.exp %1224 : vector<2x32xf32>
    %cst_643 = arith.constant 1.000000e+00 : f32
    %1226 = vector.broadcast %cst_643 : f32 to vector<2x32xf32>
    %1227 = arith.addf %1226, %1225 : vector<2x32xf32>
    %1228 = arith.divf %1226, %1227 : vector<2x32xf32>
    %1229 = arith.addf %1211, %1219 : vector<2x32xf32>
    %1230 = arith.negf %1229 : vector<2x32xf32>
    %1231 = math.exp %1230 : vector<2x32xf32>
    %cst_644 = arith.constant 1.000000e+00 : f32
    %1232 = vector.broadcast %cst_644 : f32 to vector<2x32xf32>
    %1233 = arith.addf %1232, %1231 : vector<2x32xf32>
    %1234 = arith.divf %1232, %1233 : vector<2x32xf32>
    %1235 = arith.mulf %1228, %1222 : vector<2x32xf32>
    %1236 = arith.addf %1213, %1235 : vector<2x32xf32>
    %1237 = math.tanh %1236 : vector<2x32xf32>
    %cst_645 = arith.constant 1.000000e+00 : f32
    %1238 = vector.broadcast %cst_645 : f32 to vector<2x32xf32>
    %1239 = arith.subf %1238, %1234 : vector<2x32xf32>
    %1240 = arith.mulf %1239, %1237 : vector<2x32xf32>
    %1241 = arith.mulf %1234, %1206 : vector<2x32xf32>
    %1242 = arith.addf %1240, %1241 : vector<2x32xf32>
    %c4_646 = arith.constant 4 : index
    %c0_647 = arith.constant 0 : index
    %1243 = vector.load %arg36[%c4_646, %c0_647] : memref<12x32xf32, #tpu.memory_space<vmem>>, vector<2x32xf32>
    tpu.vector_store %arg36[%c4_646, %c0_647], %1242 {strides = array<i32>} : memref<12x32xf32, #tpu.memory_space<vmem>>, vector<2x32xf32>,
    %c3_648 = arith.constant 3 : index
    %c0_649 = arith.constant 0 : index
    %c0_650 = arith.constant 0 : index
    %c0_651 = arith.constant 0 : index
    %1244 = vector.load %arg13[%c3_648, %c0_649, %c0_650, %c0_651] : memref<6x3x2x32xf32, #tpu.memory_space<vmem>>, vector<1x1x2x32xf32>
    %1245 = vector.shape_cast %1244 : vector<1x1x2x32xf32> to vector<2x32xf32>
    %c3_652 = arith.constant 3 : index
    %c1_653 = arith.constant 1 : index
    %c0_654 = arith.constant 0 : index
    %c0_655 = arith.constant 0 : index
    %1246 = vector.load %arg13[%c3_652, %c1_653, %c0_654, %c0_655] : memref<6x3x2x32xf32, #tpu.memory_space<vmem>>, vector<1x1x2x32xf32>
    %1247 = vector.shape_cast %1246 : vector<1x1x2x32xf32> to vector<2x32xf32>
    %c3_656 = arith.constant 3 : index
    %c2_657 = arith.constant 2 : index
    %c0_658 = arith.constant 0 : index
    %c0_659 = arith.constant 0 : index
    %1248 = vector.load %arg13[%c3_656, %c2_657, %c0_658, %c0_659] : memref<6x3x2x32xf32, #tpu.memory_space<vmem>>, vector<1x1x2x32xf32>
    %1249 = vector.shape_cast %1248 : vector<1x1x2x32xf32> to vector<2x32xf32>
    %cst_660 = arith.constant dense<0.000000e+00> : vector<2x32xf32>
    %1250 = tpu.matmul %1242, %1125, %cst_660 {dimension_numbers = #tpu.dot_dimension_numbers<[1], [0], [0], [1], [0, 0, 1, 1], [], []>} : vector<2x32xf32>, vector<32x32xf32>, vector<2x32xf32> -> vector<2x32xf32>
    %1251 = vector.broadcast %1131 : vector<1x32xf32> to vector<2x32xf32>
    %1252 = arith.addf %1250, %1251 : vector<2x32xf32>
    %cst_661 = arith.constant dense<0.000000e+00> : vector<2x32xf32>
    %1253 = tpu.matmul %1242, %1127, %cst_661 {dimension_numbers = #tpu.dot_dimension_numbers<[1], [0], [0], [1], [0, 0, 1, 1], [], []>} : vector<2x32xf32>, vector<32x32xf32>, vector<2x32xf32> -> vector<2x32xf32>
    %1254 = vector.broadcast %1133 : vector<1x32xf32> to vector<2x32xf32>
    %1255 = arith.addf %1253, %1254 : vector<2x32xf32>
    %cst_662 = arith.constant dense<0.000000e+00> : vector<2x32xf32>
    %1256 = tpu.matmul %1242, %1129, %cst_662 {dimension_numbers = #tpu.dot_dimension_numbers<[1], [0], [0], [1], [0, 0, 1, 1], [], []>} : vector<2x32xf32>, vector<32x32xf32>, vector<2x32xf32> -> vector<2x32xf32>
    %1257 = vector.broadcast %1135 : vector<1x32xf32> to vector<2x32xf32>
    %1258 = arith.addf %1256, %1257 : vector<2x32xf32>
    %1259 = arith.addf %1245, %1252 : vector<2x32xf32>
    %1260 = arith.negf %1259 : vector<2x32xf32>
    %1261 = math.exp %1260 : vector<2x32xf32>
    %cst_663 = arith.constant 1.000000e+00 : f32
    %1262 = vector.broadcast %cst_663 : f32 to vector<2x32xf32>
    %1263 = arith.addf %1262, %1261 : vector<2x32xf32>
    %1264 = arith.divf %1262, %1263 : vector<2x32xf32>
    %1265 = arith.addf %1247, %1255 : vector<2x32xf32>
    %1266 = arith.negf %1265 : vector<2x32xf32>
    %1267 = math.exp %1266 : vector<2x32xf32>
    %cst_664 = arith.constant 1.000000e+00 : f32
    %1268 = vector.broadcast %cst_664 : f32 to vector<2x32xf32>
    %1269 = arith.addf %1268, %1267 : vector<2x32xf32>
    %1270 = arith.divf %1268, %1269 : vector<2x32xf32>
    %1271 = arith.mulf %1264, %1258 : vector<2x32xf32>
    %1272 = arith.addf %1249, %1271 : vector<2x32xf32>
    %1273 = math.tanh %1272 : vector<2x32xf32>
    %cst_665 = arith.constant 1.000000e+00 : f32
    %1274 = vector.broadcast %cst_665 : f32 to vector<2x32xf32>
    %1275 = arith.subf %1274, %1270 : vector<2x32xf32>
    %1276 = arith.mulf %1275, %1273 : vector<2x32xf32>
    %1277 = arith.mulf %1270, %1242 : vector<2x32xf32>
    %1278 = arith.addf %1276, %1277 : vector<2x32xf32>
    %c6_666 = arith.constant 6 : index
    %c0_667 = arith.constant 0 : index
    %1279 = vector.load %arg36[%c6_666, %c0_667] : memref<12x32xf32, #tpu.memory_space<vmem>>, vector<2x32xf32>
    tpu.vector_store %arg36[%c6_666, %c0_667], %1278 {strides = array<i32>} : memref<12x32xf32, #tpu.memory_space<vmem>>, vector<2x32xf32>,
    %c4_668 = arith.constant 4 : index
    %c0_669 = arith.constant 0 : index
    %c0_670 = arith.constant 0 : index
    %c0_671 = arith.constant 0 : index
    %1280 = vector.load %arg13[%c4_668, %c0_669, %c0_670, %c0_671] : memref<6x3x2x32xf32, #tpu.memory_space<vmem>>, vector<1x1x2x32xf32>
    %1281 = vector.shape_cast %1280 : vector<1x1x2x32xf32> to vector<2x32xf32>
    %c4_672 = arith.constant 4 : index
    %c1_673 = arith.constant 1 : index
    %c0_674 = arith.constant 0 : index
    %c0_675 = arith.constant 0 : index
    %1282 = vector.load %arg13[%c4_672, %c1_673, %c0_674, %c0_675] : memref<6x3x2x32xf32, #tpu.memory_space<vmem>>, vector<1x1x2x32xf32>
    %1283 = vector.shape_cast %1282 : vector<1x1x2x32xf32> to vector<2x32xf32>
    %c4_676 = arith.constant 4 : index
    %c2_677 = arith.constant 2 : index
    %c0_678 = arith.constant 0 : index
    %c0_679 = arith.constant 0 : index
    %1284 = vector.load %arg13[%c4_676, %c2_677, %c0_678, %c0_679] : memref<6x3x2x32xf32, #tpu.memory_space<vmem>>, vector<1x1x2x32xf32>
    %1285 = vector.shape_cast %1284 : vector<1x1x2x32xf32> to vector<2x32xf32>
    %cst_680 = arith.constant dense<0.000000e+00> : vector<2x32xf32>
    %1286 = tpu.matmul %1278, %1125, %cst_680 {dimension_numbers = #tpu.dot_dimension_numbers<[1], [0], [0], [1], [0, 0, 1, 1], [], []>} : vector<2x32xf32>, vector<32x32xf32>, vector<2x32xf32> -> vector<2x32xf32>
    %1287 = vector.broadcast %1131 : vector<1x32xf32> to vector<2x32xf32>
    %1288 = arith.addf %1286, %1287 : vector<2x32xf32>
    %cst_681 = arith.constant dense<0.000000e+00> : vector<2x32xf32>
    %1289 = tpu.matmul %1278, %1127, %cst_681 {dimension_numbers = #tpu.dot_dimension_numbers<[1], [0], [0], [1], [0, 0, 1, 1], [], []>} : vector<2x32xf32>, vector<32x32xf32>, vector<2x32xf32> -> vector<2x32xf32>
    %1290 = vector.broadcast %1133 : vector<1x32xf32> to vector<2x32xf32>
    %1291 = arith.addf %1289, %1290 : vector<2x32xf32>
    %cst_682 = arith.constant dense<0.000000e+00> : vector<2x32xf32>
    %1292 = tpu.matmul %1278, %1129, %cst_682 {dimension_numbers = #tpu.dot_dimension_numbers<[1], [0], [0], [1], [0, 0, 1, 1], [], []>} : vector<2x32xf32>, vector<32x32xf32>, vector<2x32xf32> -> vector<2x32xf32>
    %1293 = vector.broadcast %1135 : vector<1x32xf32> to vector<2x32xf32>
    %1294 = arith.addf %1292, %1293 : vector<2x32xf32>
    %1295 = arith.addf %1281, %1288 : vector<2x32xf32>
    %1296 = arith.negf %1295 : vector<2x32xf32>
    %1297 = math.exp %1296 : vector<2x32xf32>
    %cst_683 = arith.constant 1.000000e+00 : f32
    %1298 = vector.broadcast %cst_683 : f32 to vector<2x32xf32>
    %1299 = arith.addf %1298, %1297 : vector<2x32xf32>
    %1300 = arith.divf %1298, %1299 : vector<2x32xf32>
    %1301 = arith.addf %1283, %1291 : vector<2x32xf32>
    %1302 = arith.negf %1301 : vector<2x32xf32>
    %1303 = math.exp %1302 : vector<2x32xf32>
    %cst_684 = arith.constant 1.000000e+00 : f32
    %1304 = vector.broadcast %cst_684 : f32 to vector<2x32xf32>
    %1305 = arith.addf %1304, %1303 : vector<2x32xf32>
    %1306 = arith.divf %1304, %1305 : vector<2x32xf32>
    %1307 = arith.mulf %1300, %1294 : vector<2x32xf32>
    %1308 = arith.addf %1285, %1307 : vector<2x32xf32>
    %1309 = math.tanh %1308 : vector<2x32xf32>
    %cst_685 = arith.constant 1.000000e+00 : f32
    %1310 = vector.broadcast %cst_685 : f32 to vector<2x32xf32>
    %1311 = arith.subf %1310, %1306 : vector<2x32xf32>
    %1312 = arith.mulf %1311, %1309 : vector<2x32xf32>
    %1313 = arith.mulf %1306, %1278 : vector<2x32xf32>
    %1314 = arith.addf %1312, %1313 : vector<2x32xf32>
    %c8_686 = arith.constant 8 : index
    %c0_687 = arith.constant 0 : index
    %1315 = vector.load %arg36[%c8_686, %c0_687] : memref<12x32xf32, #tpu.memory_space<vmem>>, vector<2x32xf32>
    tpu.vector_store %arg36[%c8_686, %c0_687], %1314 {strides = array<i32>} : memref<12x32xf32, #tpu.memory_space<vmem>>, vector<2x32xf32>,
    %c5_688 = arith.constant 5 : index
    %c0_689 = arith.constant 0 : index
    %c0_690 = arith.constant 0 : index
    %c0_691 = arith.constant 0 : index
    %1316 = vector.load %arg13[%c5_688, %c0_689, %c0_690, %c0_691] : memref<6x3x2x32xf32, #tpu.memory_space<vmem>>, vector<1x1x2x32xf32>
    %1317 = vector.shape_cast %1316 : vector<1x1x2x32xf32> to vector<2x32xf32>
    %c5_692 = arith.constant 5 : index
    %c1_693 = arith.constant 1 : index
    %c0_694 = arith.constant 0 : index
    %c0_695 = arith.constant 0 : index
    %1318 = vector.load %arg13[%c5_692, %c1_693, %c0_694, %c0_695] : memref<6x3x2x32xf32, #tpu.memory_space<vmem>>, vector<1x1x2x32xf32>
    %1319 = vector.shape_cast %1318 : vector<1x1x2x32xf32> to vector<2x32xf32>
    %c5_696 = arith.constant 5 : index
    %c2_697 = arith.constant 2 : index
    %c0_698 = arith.constant 0 : index
    %c0_699 = arith.constant 0 : index
    %1320 = vector.load %arg13[%c5_696, %c2_697, %c0_698, %c0_699] : memref<6x3x2x32xf32, #tpu.memory_space<vmem>>, vector<1x1x2x32xf32>
    %1321 = vector.shape_cast %1320 : vector<1x1x2x32xf32> to vector<2x32xf32>
    %cst_700 = arith.constant dense<0.000000e+00> : vector<2x32xf32>
    %1322 = tpu.matmul %1314, %1125, %cst_700 {dimension_numbers = #tpu.dot_dimension_numbers<[1], [0], [0], [1], [0, 0, 1, 1], [], []>} : vector<2x32xf32>, vector<32x32xf32>, vector<2x32xf32> -> vector<2x32xf32>
    %1323 = vector.broadcast %1131 : vector<1x32xf32> to vector<2x32xf32>
    %1324 = arith.addf %1322, %1323 : vector<2x32xf32>
    %cst_701 = arith.constant dense<0.000000e+00> : vector<2x32xf32>
    %1325 = tpu.matmul %1314, %1127, %cst_701 {dimension_numbers = #tpu.dot_dimension_numbers<[1], [0], [0], [1], [0, 0, 1, 1], [], []>} : vector<2x32xf32>, vector<32x32xf32>, vector<2x32xf32> -> vector<2x32xf32>
    %1326 = vector.broadcast %1133 : vector<1x32xf32> to vector<2x32xf32>
    %1327 = arith.addf %1325, %1326 : vector<2x32xf32>
    %cst_702 = arith.constant dense<0.000000e+00> : vector<2x32xf32>
    %1328 = tpu.matmul %1314, %1129, %cst_702 {dimension_numbers = #tpu.dot_dimension_numbers<[1], [0], [0], [1], [0, 0, 1, 1], [], []>} : vector<2x32xf32>, vector<32x32xf32>, vector<2x32xf32> -> vector<2x32xf32>
    %1329 = vector.broadcast %1135 : vector<1x32xf32> to vector<2x32xf32>
    %1330 = arith.addf %1328, %1329 : vector<2x32xf32>
    %1331 = arith.addf %1317, %1324 : vector<2x32xf32>
    %1332 = arith.negf %1331 : vector<2x32xf32>
    %1333 = math.exp %1332 : vector<2x32xf32>
    %cst_703 = arith.constant 1.000000e+00 : f32
    %1334 = vector.broadcast %cst_703 : f32 to vector<2x32xf32>
    %1335 = arith.addf %1334, %1333 : vector<2x32xf32>
    %1336 = arith.divf %1334, %1335 : vector<2x32xf32>
    %1337 = arith.addf %1319, %1327 : vector<2x32xf32>
    %1338 = arith.negf %1337 : vector<2x32xf32>
    %1339 = math.exp %1338 : vector<2x32xf32>
    %cst_704 = arith.constant 1.000000e+00 : f32
    %1340 = vector.broadcast %cst_704 : f32 to vector<2x32xf32>
    %1341 = arith.addf %1340, %1339 : vector<2x32xf32>
    %1342 = arith.divf %1340, %1341 : vector<2x32xf32>
    %1343 = arith.mulf %1336, %1330 : vector<2x32xf32>
    %1344 = arith.addf %1321, %1343 : vector<2x32xf32>
    %1345 = math.tanh %1344 : vector<2x32xf32>
    %cst_705 = arith.constant 1.000000e+00 : f32
    %1346 = vector.broadcast %cst_705 : f32 to vector<2x32xf32>
    %1347 = arith.subf %1346, %1342 : vector<2x32xf32>
    %1348 = arith.mulf %1347, %1345 : vector<2x32xf32>
    %1349 = arith.mulf %1342, %1314 : vector<2x32xf32>
    %1350 = arith.addf %1348, %1349 : vector<2x32xf32>
    %c10_706 = arith.constant 10 : index
    %c0_707 = arith.constant 0 : index
    %1351 = vector.load %arg36[%c10_706, %c0_707] : memref<12x32xf32, #tpu.memory_space<vmem>>, vector<2x32xf32>
    tpu.vector_store %arg36[%c10_706, %c0_707], %1350 {strides = array<i32>} : memref<12x32xf32, #tpu.memory_space<vmem>>, vector<2x32xf32>,
    %c0_708 = arith.constant 0 : index
    %c0_709 = arith.constant 0 : index
    %1352 = vector.load %arg36[%c0_708, %c0_709] : memref<12x32xf32, #tpu.memory_space<vmem>>, vector<12x32xf32>
    %c0_710 = arith.constant 0 : index
    %c0_711 = arith.constant 0 : index
    %1353 = vector.load %arg33[%c0_710, %c0_711] : memref<16x32xf32, #tpu.memory_space<vmem>>, vector<16x32xf32>
    %c0_712 = arith.constant 0 : index
    %c0_713 = arith.constant 0 : index
    %1354 = vector.load %arg16[%c0_712, %c0_713] : memref<32x32xf32, #tpu.memory_space<vmem>>, vector<32x32xf32>
    %cst_714 = arith.constant dense<0.000000e+00> : vector<16x32xf32>
    %1355 = tpu.matmul %1353, %1354, %cst_714 {dimension_numbers = #tpu.dot_dimension_numbers<[1], [0], [0], [1], [0, 0, 1, 1], [], []>} : vector<16x32xf32>, vector<32x32xf32>, vector<16x32xf32> -> vector<16x32xf32>
    %c0_715 = arith.constant 0 : index
    %c0_716 = arith.constant 0 : index
    %1356 = vector.load %arg17[%c0_715, %c0_716] : memref<6x32xf32, #tpu.memory_space<vmem>>, vector<6x32xf32>
    %cst_717 = arith.constant dense<0.000000e+00> : vector<16x32xf32>
    %1357 = tpu.matmul %1113, %1356, %cst_717 {dimension_numbers = #tpu.dot_dimension_numbers<[1], [0], [0], [1], [0, 0, 1, 1], [], []>} : vector<16x6xf32>, vector<6x32xf32>, vector<16x32xf32> -> vector<16x32xf32>
    %c0_718 = arith.constant 0 : index
    %c0_719 = arith.constant 0 : index
    %1358 = vector.load %arg18[%c0_718, %c0_719] : memref<12x16xf32, #tpu.memory_space<vmem>>, vector<12x16xf32>
    %cst_720 = arith.constant dense<0.000000e+00> : vector<12x16xf32>
    %1359 = tpu.matmul %1352, %1355, %cst_720 {dimension_numbers = #tpu.dot_dimension_numbers<[1], [1], [0], [0], [0, 0, 1, 0], [], []>} : vector<12x32xf32>, vector<16x32xf32>, vector<12x16xf32> -> vector<12x16xf32>
    %cst_721 = arith.constant 0.000000e+00 : f32
    %1360 = vector.broadcast %cst_721 : f32 to vector<12x16xf32>
    %1361 = arith.cmpf ogt, %1358, %1360 : vector<12x16xf32>
    %cst_722 = arith.constant -1.000000e+09 : f32
    %1362 = vector.broadcast %cst_722 : f32 to vector<12x16xf32>
    %1363 = arith.select %1361, %1359, %1362 : vector<12x16xi1>, vector<12x16xf32>
    %cst_723 = arith.constant dense<0xFF800000> : vector<12xf32>
    %1364 = vector.multi_reduction <maximumf>, %1363, %cst_723 [1] : vector<12x16xf32> to vector<12xf32>
    %1365 = vector.shape_cast %1364 : vector<12xf32> to vector<12x1xf32>
    %1366 = vector.broadcast %1365 : vector<12x1xf32> to vector<12x16xf32>
    %1367 = arith.subf %1363, %1366 : vector<12x16xf32>
    %1368 = math.exp %1367 : vector<12x16xf32>
    %1369 = arith.mulf %1368, %1358 : vector<12x16xf32>
    %cst_724 = arith.constant dense<0.000000e+00> : vector<12xf32>
    %1370 = vector.multi_reduction <add>, %1369, %cst_724 [1] : vector<12x16xf32> to vector<12xf32>
    %1371 = vector.shape_cast %1370 : vector<12xf32> to vector<12x1xf32>
    %cst_725 = arith.constant 9.99999971E-10 : f32
    %1372 = vector.broadcast %cst_725 : f32 to vector<12x1xf32>
    %1373 = arith.addf %1371, %1372 : vector<12x1xf32>
    %1374 = tpu.reciprocal %1373 {approx = true} : vector<12x1xf32> -> vector<12x1xf32>
    %1375 = vector.broadcast %1374 : vector<12x1xf32> to vector<12x16xf32>
    %1376 = arith.mulf %1369, %1375 : vector<12x16xf32>
    %cst_726 = arith.constant dense<0.000000e+00> : vector<12x32xf32>
    %1377 = tpu.matmul %1376, %1353, %cst_726 {dimension_numbers = #tpu.dot_dimension_numbers<[1], [0], [0], [1], [0, 0, 1, 1], [], []>} : vector<12x16xf32>, vector<16x32xf32>, vector<12x32xf32> -> vector<12x32xf32>
    %cst_727 = arith.constant dense<0.000000e+00> : vector<12x16xf32>
    %1378 = tpu.matmul %1352, %1357, %cst_727 {dimension_numbers = #tpu.dot_dimension_numbers<[1], [1], [0], [0], [0, 0, 1, 0], [], []>} : vector<12x32xf32>, vector<16x32xf32>, vector<12x16xf32> -> vector<12x16xf32>
    %1379 = vector.broadcast %1123 : vector<1x16xf32> to vector<12x16xf32>
    %1380 = arith.addf %1378, %1379 : vector<12x16xf32>
    %cst_728 = arith.constant 0.000000e+00 : f32
    %1381 = vector.broadcast %cst_728 : f32 to vector<12x16xf32>
    %1382 = arith.cmpf ogt, %1358, %1381 : vector<12x16xf32>
    %cst_729 = arith.constant -1.000000e+09 : f32
    %1383 = vector.broadcast %cst_729 : f32 to vector<12x16xf32>
    %1384 = arith.select %1382, %1380, %1383 : vector<12x16xi1>, vector<12x16xf32>
    %cst_730 = arith.constant dense<0xFF800000> : vector<12xf32>
    %1385 = vector.multi_reduction <maximumf>, %1384, %cst_730 [1] : vector<12x16xf32> to vector<12xf32>
    %1386 = vector.shape_cast %1385 : vector<12xf32> to vector<12x1xf32>
    %1387 = vector.broadcast %1386 : vector<12x1xf32> to vector<12x16xf32>
    %1388 = arith.subf %1384, %1387 : vector<12x16xf32>
    %1389 = math.exp %1388 : vector<12x16xf32>
    %1390 = arith.mulf %1389, %1358 : vector<12x16xf32>
    %cst_731 = arith.constant dense<0.000000e+00> : vector<12xf32>
    %1391 = vector.multi_reduction <add>, %1390, %cst_731 [1] : vector<12x16xf32> to vector<12xf32>
    %1392 = vector.shape_cast %1391 : vector<12xf32> to vector<12x1xf32>
    %cst_732 = arith.constant 9.99999971E-10 : f32
    %1393 = vector.broadcast %cst_732 : f32 to vector<12x1xf32>
    %1394 = arith.addf %1392, %1393 : vector<12x1xf32>
    %1395 = tpu.reciprocal %1394 {approx = true} : vector<12x1xf32> -> vector<12x1xf32>
    %1396 = vector.broadcast %1395 : vector<12x1xf32> to vector<12x16xf32>
    %1397 = arith.mulf %1390, %1396 : vector<12x16xf32>
    %cst_733 = arith.constant dense<0.000000e+00> : vector<12x6xf32>
    %1398 = tpu.matmul %1397, %1113, %cst_733 {dimension_numbers = #tpu.dot_dimension_numbers<[1], [0], [0], [1], [0, 0, 1, 1], [], []>} : vector<12x16xf32>, vector<16x6xf32>, vector<12x6xf32> -> vector<12x6xf32>
    %c0_734 = arith.constant 0 : index
    %c0_735 = arith.constant 0 : index
    %1399 = vector.load %arg19[%c0_734, %c0_735] : memref<32x128xf32, #tpu.memory_space<vmem>>, vector<32x128xf32>
    %cst_736 = arith.constant dense<0.000000e+00> : vector<12x128xf32>
    %1400 = tpu.matmul %1352, %1399, %cst_736 {dimension_numbers = #tpu.dot_dimension_numbers<[1], [0], [0], [1], [0, 0, 1, 1], [], []>} : vector<12x32xf32>, vector<32x128xf32>, vector<12x128xf32> -> vector<12x128xf32>
    %c0_737 = arith.constant 0 : index
    %c0_738 = arith.constant 0 : index
    %1401 = vector.load %arg20[%c0_737, %c0_738] : memref<32x128xf32, #tpu.memory_space<vmem>>, vector<32x128xf32>
    %cst_739 = arith.constant dense<0.000000e+00> : vector<12x128xf32>
    %1402 = tpu.matmul %1377, %1401, %cst_739 {dimension_numbers = #tpu.dot_dimension_numbers<[1], [0], [0], [1], [0, 0, 1, 1], [], []>} : vector<12x32xf32>, vector<32x128xf32>, vector<12x128xf32> -> vector<12x128xf32>
    %1403 = arith.addf %1400, %1402 : vector<12x128xf32>
    %c0_740 = arith.constant 0 : index
    %c0_741 = arith.constant 0 : index
    %1404 = vector.load %arg21[%c0_740, %c0_741] : memref<6x128xf32, #tpu.memory_space<vmem>>, vector<6x128xf32>
    %cst_742 = arith.constant dense<0.000000e+00> : vector<12x128xf32>
    %1405 = tpu.matmul %1398, %1404, %cst_742 {dimension_numbers = #tpu.dot_dimension_numbers<[1], [0], [0], [1], [0, 0, 1, 1], [], []>} : vector<12x6xf32>, vector<6x128xf32>, vector<12x128xf32> -> vector<12x128xf32>
    %1406 = arith.addf %1403, %1405 : vector<12x128xf32>
    %c0_743 = arith.constant 0 : index
    %c0_744 = arith.constant 0 : index
    %1407 = vector.load %arg22[%c0_743, %c0_744] : memref<1x128xf32, #tpu.memory_space<vmem>>, vector<1x128xf32>
    %1408 = vector.broadcast %1407 : vector<1x128xf32> to vector<12x128xf32>
    %1409 = arith.addf %1406, %1408 : vector<12x128xf32>
    %cst_745 = arith.constant dense<0xFF800000> : vector<12xf32>
    %1410 = vector.multi_reduction <maximumf>, %1409, %cst_745 [1] : vector<12x128xf32> to vector<12xf32>
    %1411 = vector.shape_cast %1410 : vector<12xf32> to vector<12x1xf32>
    %1412 = vector.broadcast %1411 : vector<12x1xf32> to vector<12x128xf32>
    %1413 = arith.subf %1409, %1412 : vector<12x128xf32>
    %1414 = math.exp %1413 : vector<12x128xf32>
    %cst_746 = arith.constant dense<0.000000e+00> : vector<12xf32>
    %1415 = vector.multi_reduction <add>, %1414, %cst_746 [1] : vector<12x128xf32> to vector<12xf32>
    %1416 = vector.shape_cast %1415 : vector<12xf32> to vector<12x1xf32>
    %1417 = tpu.reciprocal %1416 {approx = true} : vector<12x1xf32> -> vector<12x1xf32>
    %1418 = vector.broadcast %1417 : vector<12x1xf32> to vector<12x128xf32>
    %1419 = arith.mulf %1414, %1418 : vector<12x128xf32>
    %c0_747 = arith.constant 0 : index
    %c0_748 = arith.constant 0 : index
    %1420 = vector.load %arg23[%c0_747, %c0_748] : memref<1x32xf32, #tpu.memory_space<vmem>>, vector<1x32xf32>
    %1421 = vector.broadcast %1420 : vector<1x32xf32> to vector<12x32xf32>
    %1422 = arith.mulf %1352, %1421 : vector<12x32xf32>
    %cst_749 = arith.constant dense<0.000000e+00> : vector<12xf32>
    %1423 = vector.multi_reduction <add>, %1422, %cst_749 [1] : vector<12x32xf32> to vector<12xf32>
    %1424 = vector.shape_cast %1423 : vector<12xf32> to vector<12x1xf32>
    %c0_750 = arith.constant 0 : index
    %c0_751 = arith.constant 0 : index
    %1425 = vector.load %arg24[%c0_750, %c0_751] : memref<1x32xf32, #tpu.memory_space<vmem>>, vector<1x32xf32>
    %1426 = vector.broadcast %1425 : vector<1x32xf32> to vector<12x32xf32>
    %1427 = arith.mulf %1377, %1426 : vector<12x32xf32>
    %cst_752 = arith.constant dense<0.000000e+00> : vector<12xf32>
    %1428 = vector.multi_reduction <add>, %1427, %cst_752 [1] : vector<12x32xf32> to vector<12xf32>
    %1429 = vector.shape_cast %1428 : vector<12xf32> to vector<12x1xf32>
    %1430 = arith.addf %1424, %1429 : vector<12x1xf32>
    %c0_753 = arith.constant 0 : index
    %c0_754 = arith.constant 0 : index
    %1431 = vector.load %arg25[%c0_753, %c0_754] : memref<1x6xf32, #tpu.memory_space<vmem>>, vector<1x6xf32>
    %1432 = vector.broadcast %1431 : vector<1x6xf32> to vector<12x6xf32>
    %1433 = arith.mulf %1398, %1432 : vector<12x6xf32>
    %cst_755 = arith.constant dense<0.000000e+00> : vector<12xf32>
    %1434 = vector.multi_reduction <add>, %1433, %cst_755 [1] : vector<12x6xf32> to vector<12xf32>
    %1435 = vector.shape_cast %1434 : vector<12xf32> to vector<12x1xf32>
    %1436 = arith.addf %1430, %1435 : vector<12x1xf32>
    %c0_756 = arith.constant 0 : index
    %c0_757 = arith.constant 0 : index
    %1437 = vector.load %arg27[%c0_756, %c0_757] : memref<12x1xf32, #tpu.memory_space<vmem>>, vector<12x1xf32>
    %1438 = arith.addf %1436, %1437 : vector<12x1xf32>
    %c0_758 = arith.constant 0 : index
    %c0_759 = arith.constant 0 : index
    %1439 = vector.load %arg26[%c0_758, %c0_759] : memref<1x1xf32, #tpu.memory_space<vmem>>, vector<1x1xf32>
    %1440 = vector.broadcast %1439 : vector<1x1xf32> to vector<12x1xf32>
    %1441 = arith.addf %1438, %1440 : vector<12x1xf32>
    %1442 = arith.negf %1441 : vector<12x1xf32>
    %1443 = math.exp %1442 : vector<12x1xf32>
    %cst_760 = arith.constant 1.000000e+00 : f32
    %1444 = vector.broadcast %cst_760 : f32 to vector<12x1xf32>
    %1445 = arith.addf %1444, %1443 : vector<12x1xf32>
    %1446 = arith.divf %1444, %1445 : vector<12x1xf32>
    %c0_761 = arith.constant 0 : index
    %c0_762 = arith.constant 0 : index
    %1447 = vector.load %arg29[%c0_761, %c0_762] : memref<12x128xf32, #tpu.memory_space<vmem>>, vector<12x128xf32>
    %1448 = arith.mulf %1419, %1447 : vector<12x128xf32>
    %cst_763 = arith.constant dense<0.000000e+00> : vector<12xf32>
    %1449 = vector.multi_reduction <add>, %1448, %cst_763 [1] : vector<12x128xf32> to vector<12xf32>
    %1450 = vector.shape_cast %1449 : vector<12xf32> to vector<12x1xf32>
    %c0_764 = arith.constant 0 : index
    %c0_765 = arith.constant 0 : index
    %1451 = vector.load %arg28[%c0_764, %c0_765] : memref<12x16xf32, #tpu.memory_space<vmem>>, vector<12x16xf32>
    %1452 = arith.mulf %1376, %1451 : vector<12x16xf32>
    %cst_766 = arith.constant dense<0.000000e+00> : vector<12xf32>
    %1453 = vector.multi_reduction <add>, %1452, %cst_766 [1] : vector<12x16xf32> to vector<12xf32>
    %1454 = vector.shape_cast %1453 : vector<12xf32> to vector<12x1xf32>
    %1455 = arith.mulf %1446, %1450 : vector<12x1xf32>
    %cst_767 = arith.constant 1.000000e+00 : f32
    %1456 = vector.broadcast %cst_767 : f32 to vector<12x1xf32>
    %1457 = arith.subf %1456, %1446 : vector<12x1xf32>
    %1458 = arith.mulf %1457, %1454 : vector<12x1xf32>
    %1459 = arith.addf %1455, %1458 : vector<12x1xf32>
    %cst_768 = arith.constant 1.000000e-10 : f32
    %1460 = vector.broadcast %cst_768 : f32 to vector<12x1xf32>
    %1461 = arith.addf %1459, %1460 : vector<12x1xf32>
    %1462 = math.log %1461 : vector<12x1xf32>
    %cst_769 = arith.constant 0.000000e+00 : f32
    %1463 = vector.broadcast %cst_769 : f32 to vector<12x1xf32>
    %1464 = arith.subf %1463, %1462 : vector<12x1xf32>
    %c0_770 = arith.constant 0 : index
    %c0_771 = arith.constant 0 : index
    %1465 = vector.load %arg30[%c0_770, %c0_771] : memref<12x1xf32, #tpu.memory_space<vmem>>, vector<12x1xf32>
    %1466 = arith.mulf %1464, %1465 : vector<12x1xf32>
    %cst_772 = arith.constant dense<0.000000e+00> : vector<1xf32>
    %1467 = vector.multi_reduction <add>, %1466, %cst_772 [0] : vector<12x1xf32> to vector<1xf32>
    %1468 = vector.shape_cast %1467 : vector<1xf32> to vector<1x1xf32>
    %c0_773 = arith.constant 0 : index
    %c0_774 = arith.constant 0 : index
    %1469 = vector.load %arg32[%c0_773, %c0_774] : memref<1x1xf32, #tpu.memory_space<vmem>>, vector<1x1xf32>
    tpu.vector_store %arg32[%c0_773, %c0_774], %1468 {strides = array<i32>} : memref<1x1xf32, #tpu.memory_space<vmem>>, vector<1x1xf32>,
    return
  }
}

</mosaic_0001>

<bundles_post_ra>
// kernel: dual_cat_seq_forward.1
= control target key start
LH: loop header
LB: loop body
LE: loop exit
PB: predicated region body
PF: predicated region fallthrough
CT: control target
= control target key end

     0   :  { %s5371_s6 = smov 1   ;;  %s5372_s10 = smov 2   ;;  %s7298_s0 = inlined_call_operand.smem [shape: u32[33], index: -1, kind: input, shape index: {}] }
   0x1   :  { %s5415_s5 = sld [smem:[%s7298_s0]]   ;;  %s5373_s14 = smov 3  }
   0x2   :  { %s5420_s9 = sld [smem:[%s7298_s0 + %s5371_s6]]   ;;  %s5374_s18 = smov 4  }
   0x3   :  { %s5425_s13 = sld [smem:[%s7298_s0 + %s5372_s10]]   ;;  %s5375_s22 = smov 5  }
   0x4   :  { %s5430_s17 = sld [smem:[%s7298_s0 + %s5373_s14]]   ;;  %s5376_s26 = smov 6  }
   0x5   :  { %s5435_s21 = sld [smem:[%s7298_s0 + %s5374_s18]]   ;;  %s5377_s30 = smov 7  }
   0x6   :  { %s5440_s25 = sld [smem:[%s7298_s0 + %s5375_s22]]   ;;  %s5378_s4 = smov 8  }
   0x7   :  { %s5445_s29 = sld [smem:[%s7298_s0 + %s5376_s26]]   ;;  %s5379_s10 = smov 9  }
   0x8   :  { %s5450_s3 = sld [smem:[%s7298_s0 + %s5377_s30]]   ;;  %s5380_s15 = smov 10  }
   0x9   :  { %s5455_s8 = sld [smem:[%s7298_s0 + %s5378_s4]]   ;;  %s5381_s20 = smov 11  }
   0xa   :  { %s5460_s14 = sld [smem:[%s7298_s0 + %s5379_s10]]   ;;  %s5382_s26 = smov 12  }
   0xb   :  { %s5465_s19 = sld [smem:[%s7298_s0 + %s5380_s15]]   ;;  %s5383_s1 = smov 13  }
   0xc   :  { %s5470_s24 = sld [smem:[%s7298_s0 + %s5381_s20]]   ;;  %s5384_s7 = smov 14  }
   0xd   :  { %s5475_s30 = sld [smem:[%s7298_s0 + %s5382_s26]]   ;;  %s5385_s15 = smov 15  }
   0xe   :  { %s5480_s6 = sld [smem:[%s7298_s0 + %s5383_s1]]   ;;  %s5386_s22 = smov 16  }
   0xf   :  { %s5485_s12 = sld [smem:[%s7298_s0 + %s5384_s7]]   ;;  %s5387_s28 = smov 17  }
  0x10   :  { %s5490_s20 = sld [smem:[%s7298_s0 + %s5385_s15]]   ;;  %s5388_s7 = smov 18  }
  0x11   :  { %s5495_s27 = sld [smem:[%s7298_s0 + %s5386_s22]]   ;;  %s5389_s15 = smov 19  }
  0x12   :  { %s5500_s4 = sld [smem:[%s7298_s0 + %s5387_s28]]   ;;  %s5390_s22 = smov 20  }
  0x13   :  { %7322 = sst [smem:[#allocation10_spill]] %s5475_s30  ;;  %s5391_s28 = smov 21  }
  0x14   :  { %7323 = sst [smem:[#allocation11_spill]] %s5480_s6  ;;  %s5397_s16 = smov 27  }
  0x15   :  { %s5505_s6 = sld [smem:[%s7298_s0 + %s5388_s7]]   ;;  %s5392_s7 = smov 22  }
  0x16   :  { %7324 = sst [smem:[#allocation12_spill]] %s5490_s20  ;;  %s5398_s23 = smov 28  }
  0x17   :  { %7325 = sst [smem:[#allocation13_spill]] %s5495_s27  ;;  %s5399_s1 = smov 29  }
  0x18   :  { %7326 = sst [smem:[#allocation14_spill]] %s5500_s4  ;;  %s5400_s10 = smov 30  }
  0x19   :  { %s5510_s20 = sld [smem:[%s7298_s0 + %s5389_s15]]   ;;  %s5393_s15 = smov 23  }
  0x1a   :  { %s5515_s27 = sld [smem:[%s7298_s0 + %s5390_s22]]   ;;  %s5394_s22 = smov 24  }
  0x1b   :  { %7327 = sst [smem:[#allocation15_spill]] %s5505_s6 }
  0x1c   :  { %s5520_s4 = sld [smem:[%s7298_s0 + %s5391_s28]]   ;;  %s5395_s28 = smov 25  }
  0x1d   :  { %s5525_s6 = sld [smem:[%s7298_s0 + %s5392_s7]]   ;;  %s5396_s7 = smov 26  }
  0x1e   :  { %s5563_s30 = sld [smem:[%s7298_s0 + %s5400_s10]]  }
  0x1f   :  { %7328 = sst [smem:[#allocation16_spill]] %s5510_s20 }
  0x20   :  { %7329 = sst [smem:[#allocation17_spill]] %s5515_s27 }
  0x21   :  { %s5530_s20 = sld [smem:[%s7298_s0 + %s5393_s15]]  }
  0x22   :  { %7330 = sst [smem:[#allocation18_spill]] %s5520_s4 }
  0x23   :  { %7331 = sst [smem:[#allocation19_spill]] %s5525_s6 }
  0x24   :  { %s5535_s27 = sld [smem:[%s7298_s0 + %s5394_s22]]  }
  0x25   :  { %s5540_s4 = sld [smem:[%s7298_s0 + %s5395_s28]]  }
  0x26   :  { %s4587_s6 = sld [smem:[%s7298_s0 + %s5396_s7]]  }
  0x27   :  { %7332 = sst [smem:[#allocation20_spill]] %s5530_s20 }
  0x28   :  { %s5548_s20 = sld [smem:[%s7298_s0 + %s5397_s16]]   ;;  %s5401_s16 = smov 31  }
  0x2a   :  { %7333 = sst [smem:[#allocation21_spill]] %s5535_s27 }
  0x2b   :  { %7334 = sst [smem:[#allocation22_spill]] %s5540_s4 }
  0x2c   :  { %s5553_s27 = sld [smem:[%s7298_s0 + %s5398_s23]]   ;;  %s5402_s23 = smov 32   ;;  %v71_v0 = vstv %s4587_s6 }
  0x2d   :  { %s5558_s4 = sld [smem:[%s7298_s0 + %s5399_s1]]   ;;  %72 = vst [vmem:[#allocation6] sm:$0x1] %v71_v0 }
  0x2e   :  { %7335 = sst [smem:[#allocation23_spill]] %s5548_s20 }
  0x2f   :  { %s5568_s20 = sld [smem:[%s7298_s0 + %s5401_s16]]  }
  0x32   :  { %7336 = sst [smem:[#allocation24_spill]] %s5553_s27 }
  0x33   :  { %s5573_s27 = sld [smem:[%s7298_s0 + %s5402_s23]]  }
  0x34   :  { %v5576_v1 = vld [vmem:[%s5420_s9 + $0x18] sm:$0xff]  ;;  %v5582_v3 = vld [vmem:[%s5435_s21 + $0x8] sm:$0xff]  ;;  %v5587_v4 = vld [vmem:[%s5420_s9 + $0x10] sm:$0xff]  ;;  %v5403_v8 = vmov 0   ;;  %v7307_v12 = vmov 0.0  }
  0x35   :  { %v5579_v2 = vld [vmem:[%s5420_s9 + $0x38] sm:$0xff]  ;;  %213 = vmatpush.msra.mxu0 %v5576_v1  ;;  %v5590_v5 = vld [vmem:[%s5420_s9 + $0x30] sm:$0xff]  ;;  %v5593_v6 = vld [vmem:[%s5435_s21] sm:$0xff]  ;;  %355 = vmatpush.msra.mxu3 %v5582_v3 }
  0x36   :  { %236 = vmatpush.msra.mxu1 %v5579_v2  ;;  %v5597_v7 = vld [vmem:[%s5420_s9 + $0x8] sm:$0xff]  ;;  %4922 = vset.pattern.permute.xlu0 %v5403_v8  ;;  %v5605_v10 = vld [vmem:[%s5435_s21 + $0x18] sm:$0xff]  ;;  %v5609_v11 = vld [vmem:[%s5420_s9] sm:$0xff] }
  0x37   :  { %214 = vmatpush.msra.mxu0 %v5587_v4  ;;  %v5602_v9 = vld [vmem:[%s5420_s9 + $0x28] sm:$0xff]  ;;  %356 = vmatpush.msra.mxu3 %v5593_v6  ;;  %v5614_v13 = vld [vmem:[%s5420_s9 + $0x20] sm:$0xff]  ;;  %v5620_v15 = vld [vmem:[%s5435_s21 + $0x10] sm:$0xff] }
  0x38   :  { %237 = vmatpush.msra.mxu1 %v5590_v5  ;;  %4923 = vset.pattern.permute.xlu1 %v5403_v8  ;;  %v181_v14 = vld [vmem:[%s5460_s14] sm:$0x3]  ;;  %v5624_v16 = vld [vmem:[%s5450_s3 + $0x8] sm:$0xff]  ;;  %v5627_v17 = vld [vmem:[%s5450_s3 + $0x18] sm:$0xff] }
  0x39   :  { %357 = vmatmul.f32.vlgmr.msra.gmra.mxu3 %v7307_v12  ;;  %215 = vmatpush.msra.mxu0 %v5597_v7  ;;  %v5632_v18 = vld [vmem:[%s5420_s9 + $0x58] sm:$0xff]  ;;  %v188_v19 = vld [vmem:[%s5460_s14 + $0xe] sm:$0x3]  ;;  %v5638_v20 = vld [vmem:[%s5450_s3] sm:$0xff]  ;;  %v320_v26 = vsub.f32 1.0, %v181_v14 }
  0x3a   :  { %238 = vmatpush.msra.mxu1 %v5602_v9  ;;  %378 = vmatpush.msrb.mxu3 %v5605_v10  ;;  %v5641_v21 = vld [vmem:[%s5450_s3 + $0x10] sm:$0xff]  ;;  %v5649_v23 = vld [vmem:[%s5420_s9 + $0x48] sm:$0xff]  ;;  %v5659_v27 = vld [vmem:[%s5450_s3 + $0x20] sm:$0xff]  ;;  %v586_v30 = vsub.f32 1.0, %v188_v19 }
  0x3b   :  { %216 = vmatpush.msra.mxu0 %v5609_v11  ;;  %316 = vperm.xlu0 %4922, %v181_v14   ;;  %v5644_v22 = vld [vmem:[%s5420_s9 + $0x50] sm:$0xff]  ;;  %v5652_v24 = vld [vmem:[%s5450_s3 + $0x28] sm:$0xff]  ;;  %v5662_v28 = vld [vmem:[%s5435_s21 + $0x20] sm:$0xff] }
  0x3c   :  { %239 = vmatpush.msra.mxu1 %v5614_v13  ;;  %217 = vmatmul.f32.vlgmr.msra.gmra.mxu0 %v7307_v12  ;;  %v5655_v25 = vld [vmem:[%s5435_s21 + $0x28] sm:$0xff]  ;;  %v5667_v29 = vld [vmem:[%s5420_s9 + $0x40] sm:$0xff] }
  0x3d   :  { %240 = vmatmul.f32.vlgmr.msra.gmra.mxu1 %v7307_v12  ;;  %379 = vmatpush.msrb.mxu3 %v5620_v15  ;;  %v182_v31 = vld [vmem:[%s5460_s14 + $0x2] sm:$0x3] }
  0x3e   :  { %481 = vmatpush.msrb.mxu1 %v5624_v16  ;;  %259 = vmatpush.msra.mxu2 %v5632_v18 }
  0x3f   :  { %504 = vmatpush.msra.mxu3 %v5627_v17  ;;  %582 = vperm.xlu1 %4923, %v188_v19  }
  0x40   :  { %482 = vmatpush.msrb.mxu1 %v5638_v20  ;;  %260 = vmatpush.msra.mxu2 %v5644_v22 }
  0x41   :  { %505 = vmatpush.msra.mxu3 %v5641_v21  ;;  %401 = vmatpush.msrb.mxu0 %v5655_v25 }
  0x42   :  { %380 = vmatmul.f32.vlgmr.msrb.gmra.mxu3 %v7307_v12  ;;  %261 = vmatpush.msra.mxu2 %v5649_v23 }
  0x43   :  { %527 = vmatpush.msrb.mxu3 %v5652_v24  ;;  %323 = vperm.xlu0 %4922, %v320_v26  }
  0x44   :  { %402 = vmatpush.msrb.mxu0 %v5662_v28  ;;  %262 = vmatpush.msra.mxu2 %v5667_v29 }
  0x45   :  { %528 = vmatpush.msrb.mxu3 %v5659_v27  ;;  %483 = vmatmul.f32.vlgmr.msrb.gmra.mxu1 %v7307_v12 }
  0x46   :  { %263 = vmatmul.f32.vlgmr.msra.gmra.mxu2 %v7307_v12  ;;  %403 = vmatmul.f32.vlgmr.msrb.gmra.mxu0 %v7307_v12 }
  0x47   :  { %73 = vsyncpa [#allocation8], 0  ;;  %589 = vperm.xlu1 %4923, %v586_v30   ;;  %4924 = vset.pattern.permute.xlu2 %v5403_v8  ;;  %v187_v32 = vld [vmem:[%s5460_s14 + $0xc] sm:$0x3]  ;;  %v183_v34 = vld [vmem:[%s5460_s14 + $0x4] sm:$0x3] }
  0x48   :  { %713 = vperm.xlu2 %4924, %v182_v31   ;;  %616 = vmatpush.msra.mxu0 %v5576_v1  ;;  %v968_v33 = vsub.f32 1.0, %v187_v32  ;;  %v717_v35 = vsub.f32 1.0, %v182_v31  ;;  %v1099_v36 = vsub.f32 1.0, %v183_v34  ;;  %v186_v37 = vld [vmem:[%s5460_s14 + $0xa] sm:$0x3]  ;;  %s7373_s0 = sld [smem:[#allocation10_spill]] }
  0x49   :  { %636 = vmatpush.msra.mxu1 %v5579_v2  ;;  %656 = vmatpush.msrb.mxu2 %v5632_v18  ;;  %v184_v38 = vld [vmem:[%s5460_s14 + $0x6] sm:$0x3]  ;;  %v1350_v40 = vsub.f32 1.0, %v186_v37  ;;  %v185_v41 = vld [vmem:[%s5460_s14 + $0x8] sm:$0x3]  ;;  %s7386_s14 = sld [smem:[#allocation20_spill]] }
  0x4a   :  { %506 = vmatmul.f32.vlgmr.msra.gmra.mxu3 %v7307_v12  ;;  %617 = vmatpush.msra.mxu0 %v5587_v4  ;;  %v1481_v39 = vsub.f32 1.0, %v184_v38  ;;  %v1732_v42 = vsub.f32 1.0, %v185_v41  ;;  %v5711_v43 = vld [vmem:[%s5425_s13] ss:$0 sm:$0xff]  ;;  %v5714_v44 = vld [vmem:[%s5425_s13 + $0x1] ss:$0 sm:$0xff] }
  0x4b   :  { %964 = vperm.xlu0 %4922, %v187_v32   ;;  %637 = vmatpush.msra.mxu1 %v5590_v5  ;;  %v189_v45 = vld [vmem:[%s5415_s5] sm:$0x3]  ;;  %v4616_v49 = vld [vmem:[%s5415_s5 + $0x2] sm:$0x3]  ;;  %v4624_v63 = vld [vmem:[%s5445_s29 + $0x2a] sm:$0x3] }
  0x4c   :  { %657 = vmatpush.msrb.mxu2 %v5644_v22  ;;  %618 = vmatpush.msra.mxu0 %v5597_v7  ;;  %v5718_v47 = vld [vmem:[%s5440_s25] ss:$0 sm:$0xff]  ;;  %v5729_v62 = vld [vmem:[%s5440_s25 + $0x1] ss:$0 sm:$0xff]  ;;  %v4620_v14 = vld [vmem:[%s5430_s17 + $0x2] sm:$0x3] }
  0x4d   :  { %638 = vmatpush.msra.mxu1 %v5602_v9  ;;  %749 = vmatpush.msra.mxu3 %v5582_v3  ;;  %v330_v53 = vld [vmem:[%s5430_s17] sm:$0x3]  ;;  %s7389_s6 = sld [smem:[#allocation24_spill]]  ;;  %s4551_s1 = sshll.u32 %s5573_s27, 4  ;;  %s4552_s1 = int_to_ptr.hbm [resolvable:$true] %s4551_s1 }
  0x4e   :  { %658 = vmatpush.msrb.mxu2 %v5649_v23  ;;  %619 = vmatpush.msra.mxu0 %v5609_v11  ;;  %v5726_v60 = vld [vmem:[%s5455_s8] ss:$0 sm:$0xff]  ;;  %s5361_s2 = scalar_lea.hbm %s5573_s27, 1 }
  0x4f   :  { %971 = vperm.xlu1 %4923, %v968_v33   ;;  %639 = vmatpush.msra.mxu1 %v5614_v13 }
  0x50   :  { %720 = vperm.xlu2 %4924, %v717_v35   ;;  %659 = vmatpush.msrb.mxu2 %v5667_v29 }
  0x51   :  { %750 = vmatpush.msra.mxu3 %v5593_v6  ;;  %769 = vmatpush.msrb.mxu0 %v5605_v10 }
  0x52   :  { %529 = vmatmul.f32.vlgmr.msrb.gmra.mxu3 %v7307_v12  ;;  %869 = vmatpush.msra.mxu2 %v5624_v16 }
  0x53   :  { %1102 = vperm.xlu0 %4922, %v1099_v36   ;;  %789 = vmatpush.msrb.mxu1 %v5655_v25 }
  0x54   :  { %870 = vmatpush.msra.mxu2 %v5638_v20  ;;  %770 = vmatpush.msrb.mxu0 %v5620_v15 }
  0x55   :  { %790 = vmatpush.msrb.mxu1 %v5662_v28  ;;  %889 = vmatpush.msrb.mxu3 %v5627_v17 }
  0x57   :  { %1346 = vperm.xlu1 %4923, %v186_v37   ;;  %890 = vmatpush.msrb.mxu3 %v5641_v21 }
  0x58   :  { %1095 = vperm.xlu2 %4924, %v183_v34  }
  0x5b   :  { %1477 = vperm.xlu0 %4922, %v184_v38  }
  0x5f   :  { %1484 = vperm.xlu1 %4923, %v1481_v39   ;;  %v5738_v39 = vld [vmem:[%s5455_s8 + $0x1] ss:$0 sm:$0xff] }
  0x60   :  { %1353 = vperm.xlu2 %4924, %v1350_v40  }
  0x63   :  { %1735 = vperm.xlu0 %4922, %v1732_v42  }
  0x68   :  { %1728 = vperm.xlu2 %4924, %v185_v41   ;;  %v4625_v41 = vld [vmem:[%s5445_s29 + $0x2c] sm:$0x3] }
  0xb9   :  { %v218_v46 = vpop.f32.mrf.mxu0 }
  0xba   :  { %v219_v48 = vadd.f32 %v5711_v43, %v218_v46  ;;  %v241_v50 = vpop.f32.mrf.mxu1 }
  0xbb   :  { %v242_v51 = vadd.f32 %v5714_v44, %v241_v50 }
  0xbc   :  { %v267_v52 = vadd.f32 %v219_v48, %v189_v45  ;;  %v358_v54 = vpop.f32.mrf.mxu3 }
  0xbd   :  { %v287_v55 = vadd.f32 %v4616_v49, %v242_v51  ;;  %v359_v56 = vadd.f32 %v5718_v47, %v358_v54 }
  0xbe   :  { %v4618_v57 = vmul.f32 -1.442695, %v267_v52 }
  0xbf   :  { %v4619_v58 = vmul.f32 -1.442695, %v287_v55  ;;  %v407_v59 = vadd.f32 %v359_v56, %v330_v53  ;;  %v5753_v56 = vld [vmem:[%s5425_s13 + $0x2] ss:$0 sm:$0xff] }
  0xc0   :  { %4943 = vpow2.f32 %v4618_v57 }
  0xc1   :  { %4945 = vpow2.f32 %v4619_v58  ;;  %v4622_v61 = vmul.f32 -1.442695, %v407_v59 }
  0xc2   :  { %v484_v0 = vpop.f32.mrf.mxu1 }
  0xc3   :  { %4947 = vpow2.f32 %v4622_v61  ;;  %v485_v8 = vadd.f32 %v5726_v60, %v484_v0 }
  0xc5   :  { %v381_v19 = vpop.f32.mrf.mxu3  ;;  %v533_v26 = vadd.f32 %v4624_v63, %v485_v8 }
  0xc6   :  { %v382_v30 = vadd.f32 %v5729_v62, %v381_v19  ;;  %v4944_v31 = vpop.eup %4943 }
  0xc7   :  { %v4946_v32 = vpop.eup %4945  ;;  %v271_v33 = vadd.f32 1.0, %v4944_v31  ;;  %v4627_v34 = vmul.f32 -1.442695, %v533_v26 }
  0xc8   :  { %v427_v35 = vadd.f32 %v4620_v14, %v382_v30  ;;  %v5735_v36 = vadd.f32 1.0, %v4946_v32 }
  0xc9   :  { %v4948_v37 = vpop.eup %4947  ;;  %4949 = vrcp.f32 %v271_v33  ;;  %v281_v58 = vand.u32 2147483647, %v271_v33  ;;  %v264_v63 = vpop.f32.mrf.mxu2  ;;  %v283_v0 = vand.u32 2147483648, %v271_v33  ;;  %vm277_vm1 = vweird.f32 %v271_v33 }
  0xca   :  { %v4623_v38 = vmul.f32 -1.442695, %v427_v35  ;;  %4951 = vrcp.f32 %v5735_v36  ;;  %v5741_v40 = vadd.f32 1.0, %v4948_v37  ;;  %v303_v30 = vand.u32 2147483648, %v5735_v36  ;;  %v5764_v35 = vld [vmem:[%s5440_s25 + $0x2] ss:$0 sm:$0xff] }
  0xcb   :  { %4953 = vpow2.f32 %v4627_v34  ;;  %v265_v32 = vadd.f32 %v5753_v56, %v264_v63  ;;  %vm282_vm2 = vcmp.eq.f32.partialorder %v281_v58, 8.507059e+37  ;;  %v284_v37 = vor.u32 1.1754944e-38, %v283_v0 }
  0xcc   :  { %4955 = vrcp.f32 %v5741_v40  ;;  %vm417_vm5 = vweird.f32 %v5741_v40  ;;  %vm297_vm7 = vweird.f32 %v5735_v36  ;;  %v304_v63 = vor.u32 1.1754944e-38, %v303_v30 }
  0xcd   :  { %v507_v42 = vpop.f32.mrf.mxu3  ;;  %4957 = vpow2.f32 %v4623_v38  ;;  %v404_v38 = vpop.f32.mrf.mxu0 }
  0xce   :  { %v508_v45 = vadd.f32 %v5738_v39, %v507_v42  ;;  %v423_v42 = vand.u32 2147483648, %v5741_v40 }
  0xcf   :  { %v4950_v46 = vpop.eup %4949 }
  0xd0   :  { %v553_v48 = vadd.f32 %v4625_v41, %v508_v45  ;;  %v5746_v49 = vpop.eup %4951  ;;  %v273_v50 = vmul.f32 %v4950_v46, %v271_v33  ;;  %vm278_vm0 = vweird.f32 %v4950_v46  ;;  %v301_v33 = vand.u32 2147483647, %v5735_v36 }
  0xd1   :  { %v4954_v51 = vpop.eup %4953  ;;  %v293_v52 = vmul.f32 %v5746_v49, %v5735_v36  ;;  %vm279_vm3 = vmor %vm277_vm1, %vm278_vm0  ;;  %vm298_vm6 = vweird.f32 %v5746_v49 }
  0xd2   :  { %v4628_v53 = vmul.f32 -1.442695, %v553_v48  ;;  %v4956_v54 = vpop.eup %4955  ;;  %v5750_v55 = vadd.f32 1.0, %v4954_v51  ;;  %v274_v57 = vsub.f32 1.0, %v273_v50  ;;  %v421_v48 = vand.u32 2147483647, %v5741_v40  ;;  %vm5787_vm9 = vmor %vm297_vm7, %vm298_vm6 }
  0xd3   :  { %v4958_v59 = vpop.eup %4957  ;;  %v294_v61 = vsub.f32 1.0, %v293_v52  ;;  %v413_v8 = vmul.f32 %v4956_v54, %v5741_v40  ;;  %vm418_vm4 = vweird.f32 %v4956_v54  ;;  %v4617_v51 = vld [vmem:[%s5415_s5 + $0x4] sm:$0x3]  ;;  %vm5792_vm10 = vcmp.eq.f32.partialorder %v301_v33, 8.507059e+37 }
  0xd4   :  { %4959 = vpow2.f32 %v4628_v53  ;;  %v5757_v14 = vadd.f32 1.0, %v4958_v59  ;;  %v275_v19 = vmul.f32 %v4950_v46, %v274_v57  ;;  %vm5778_vm8 = vmor %vm417_vm5, %vm418_vm4  ;;  %vm422_vm11 = vcmp.eq.f32.partialorder %v421_v48, 8.507059e+37 }
  0xd5   :  { %4961 = vrcp.f32 %v5750_v55  ;;  %v295_v26 = vmul.f32 %v5746_v49, %v294_v61  ;;  %v414_v31 = vsub.f32 1.0, %v413_v8  ;;  %v405_v61 = vadd.f32 %v5764_v35, %v404_v38  ;;  %v530_v33 = vpop.f32.mrf.mxu3 }
  0xd6   :  { %4963 = vrcp.f32 %v5757_v14  ;;  %v276_v34 = vadd.f32 %v4950_v46, %v275_v19  ;;  %v424_v8 = vor.u32 1.1754944e-38, %v423_v42  ;;  %v549_v48 = vand.u32 2147483648, %v5750_v55 }
  0xd7   :  { %v415_v41 = vmul.f32 %v4956_v54, %v414_v31  ;;  %v296_v53 = vadd.f32 %v5746_v49, %v295_v26  ;;  %vm543_vm12 = vweird.f32 %v5750_v55  ;;  %vm437_vm15 = vweird.f32 %v5757_v14 }
  0xd8   :  { %v280_v45 = vsel %vm279_vm3, %v4950_v46, %v276_v34  ;;  %vm197_vm7 = vcmask 261120  }
  0xd9   :  { %v285_v52 = vsel %vm282_vm2, %v284_v37, %v280_v45  ;;  %v416_v57 = vadd.f32 %v4956_v54, %v415_v41  ;;  %v300_v34 = vsel %vm5787_vm9, %v5746_v49, %v296_v53  ;;  %v4621_v37 = vld [vmem:[%s5430_s17 + $0x4] sm:$0x3]  ;;  %v5804_v41 = vld [vmem:[%s5455_s8 + $0x2] ss:$0 sm:$0xff]  ;;  %v441_v53 = vand.u32 2147483647, %v5757_v14 }
  0xda   :  { %v4960_v50 = vpop.eup %4959  ;;  %v307_v46 = vmul.f32 %v285_v52, %v265_v32  ;;  %v5796_v32 = vpop.permute.xlu0 %316  ;;  %v305_v49 = vsel %vm5792_vm10, %v304_v63, %v300_v34  ;;  %vm456_vm10 = vcmask 123904  }
  0xdb   :  { %v4962_v58 = vpop.eup %4961  ;;  %v5774_v59 = vadd.f32 1.0, %v4960_v50  ;;  %v420_v0 = vsel %vm5778_vm8, %v4956_v54, %v416_v57  ;;  %7343 = vst [vmem:[#allocation25_spill] sm:$0xff] %v5796_v32  ;;  %v547_v50 = vand.u32 2147483647, %v5750_v55  ;;  %v443_v57 = vand.u32 2147483648, %v5757_v14 }
  0xdc   :  { %v539_v19 = vmul.f32 %v4962_v58, %v5750_v55  ;;  %v4964_v36 = vpop.eup %4963  ;;  %v308_v30 = vadd.f32 %v4617_v51, %v307_v46  ;;  %v425_v38 = vsel %vm422_vm11, %v424_v8, %v420_v0  ;;  %vm544_vm13 = vweird.f32 %v4962_v58 }
  0xdd   :  { %4965 = vrcp.f32 %v5774_v59  ;;  %v433_v54 = vmul.f32 %v4964_v36, %v5757_v14  ;;  %v447_v45 = vmul.f32 %v425_v38, %v405_v61  ;;  %vm438_vm14 = vweird.f32 %v4964_v36  ;;  %vm545_vm0 = vmor %vm543_vm12, %vm544_vm13  ;;  %v4626_v14 = vld [vmem:[%s5445_s29 + $0x2e] sm:$0x3] }
  0xde   :  { %v540_v42 = vsub.f32 1.0, %v539_v19  ;;  %4967 = vtanh.f32 %v308_v30  ;;  %v531_v61 = vadd.f32 %v5804_v41, %v530_v33  ;;  %vm548_vm1 = vcmp.eq.f32.partialorder %v547_v50, 8.507059e+37  ;;  %vm439_vm2 = vmor %vm437_vm15, %vm438_vm14 }
  0xdf   :  { %v434_v51 = vsub.f32 1.0, %v433_v54  ;;  %v448_v46 = vadd.f32 %v4621_v37, %v447_v45  ;;  %v550_v55 = vor.u32 1.1754944e-38, %v549_v48  ;;  %v310_v26 = vsub.f32 1.0, %v305_v49 }
  0xe0   :  { %v541_v52 = vmul.f32 %v4962_v58, %v540_v42  ;;  %v444_v54 = vor.u32 1.1754944e-38, %v443_v57  ;;  %v312_v34 = vmul.f32 0.0, %v305_v49  ;;  %vm442_vm3 = vcmp.eq.f32.partialorder %v441_v53, 8.507059e+37 }
  0xe1   :  { %v435_v40 = vmul.f32 %v4964_v36, %v434_v51  ;;  %4969 = vtanh.f32 %v448_v46  ;;  %v569_v51 = vand.u32 2147483648, %v5774_v59  ;;  %v567_v48 = vand.u32 2147483647, %v5774_v59 }
  0xe2   :  { %v542_v0 = vadd.f32 %v4962_v58, %v541_v52  ;;  %v5819_v52 = vpop.permute.xlu0 %323  ;;  %vm563_vm5 = vweird.f32 %v5774_v59  ;;  %vm328_vm8 = vcmask 254976   ;;  %vm338_vm11 = vcmask 130048  }
  0xe3   :  { %v4966_v8 = vpop.eup %4965  ;;  %v436_v63 = vadd.f32 %v4964_v36, %v435_v40  ;;  %7344 = vst [vmem:[#allocation26_spill] sm:$0xff] %v5819_v52  ;;  %v326_v49 = vmul.f32 0.0, %v5819_v52  ;;  %vm568_vm9 = vcmp.eq.f32.partialorder %v567_v48, 8.507059e+37 }
  0xe4   :  { %v559_v19 = vmul.f32 %v4966_v8, %v5774_v59  ;;  %v546_v31 = vsel %vm545_vm0, %v4962_v58, %v542_v0  ;;  %v4968_v30 = vpop.eup %4967  ;;  %vm564_vm4 = vweird.f32 %v4966_v8 }
  0xe5   :  { %v551_v37 = vsel %vm548_vm1, %v550_v55, %v546_v31  ;;  %v311_v42 = vmul.f32 %v4968_v30, %v310_v26  ;;  %v440_v45 = vsel %vm439_vm2, %v4964_v36, %v436_v63  ;;  %vm565_vm6 = vmor %vm563_vm5, %vm564_vm4  ;;  %v570_v26 = vor.u32 1.1754944e-38, %v569_v51 }
  0xe6   :  { %v560_v38 = vsub.f32 1.0, %v559_v19  ;;  %v573_v33 = vmul.f32 %v551_v37, %v531_v61  ;;  %v445_v50 = vsel %vm442_vm3, %v444_v54, %v440_v45  ;;  %v5824_v19 = vpop.permute.xlu1 %582 }
  0xe7   :  { %v313_v58 = vadd.f32 %v312_v34, %v311_v42  ;;  %v450_v40 = vsub.f32 1.0, %v445_v50  ;;  %v4970_v57 = vpop.eup %4969  ;;  %v452_v0 = vmul.f32 0.0, %v445_v50  ;;  %7345 = vst [vmem:[#allocation27_spill] sm:$0xff] %v5824_v19 }
  0xe8   :  { %v561_v46 = vmul.f32 %v4966_v8, %v560_v38  ;;  %v574_v53 = vadd.f32 %v4626_v14, %v573_v33 }
  0xe9   :  { %v319_v36 = vmul.f32 %v5796_v32, %v313_v58  ;;  %v451_v61 = vmul.f32 %v4970_v57, %v450_v40  ;;  %v4645_v40 = vld [vmem:[%s5445_s29 + $0x24] sm:$0x3] }
  0xea   :  { %v562_v55 = vadd.f32 %v4966_v8, %v561_v46  ;;  %4971 = vtanh.f32 %v574_v53 }
  0xeb   :  { %v5826_v63 = vadd.f32 %v326_v49, %v319_v36  ;;  %v453_v31 = vadd.f32 %v452_v0, %v451_v61 }
  0xec   :  { %v566_v30 = vsel %vm565_vm6, %v4966_v8, %v562_v55 }
  0xed   :  { %v571_v54 = vsel %vm568_vm9, %v570_v26, %v566_v30  ;;  %v454_v59 = vmul.f32 %v453_v31, %v5796_v32  ;;  %4632 = vmatmul.msk.f32.vlgmr.msra.gmra.mxu0 %vm197_vm7, %v5826_v63  ;;  %4633 = vmatmul.msk.f32.vlgmr.msra.gmra.mxu1 %vm197_vm7, %v5826_v63  ;;  %329 = vst.msk [vmem:[#allocation2] sm:$0x3] %vm328_vm8, %v5826_v63 }
  0xee   :  { %v576_v34 = vsub.f32 1.0, %v571_v54  ;;  %4634 = vmatmul.msk.f32.vlgmr.msrb.gmra.mxu2 %vm197_vm7, %v5826_v63  ;;  %909 = vmatpush.msra.mxu0 %v5652_v24  ;;  %v578_v42 = vmul.f32 0.0, %v571_v54 }
  0xef   :  { %v5838_v8 = vadd.f32 %v454_v59, %v326_v49  ;;  %998 = vmatpush.msra.mxu1 %v5576_v1  ;;  %1018 = vmatpush.msrb.mxu2 %v5579_v2  ;;  %v5851_v2 = vpop.permute.xlu1 %589  ;;  %v4646_v49 = vld [vmem:[%s5445_s29 + $0x26] sm:$0x3] }
  0xf0   :  { %v4972_v37 = vpop.eup %4971  ;;  %910 = vmatpush.msra.mxu0 %v5659_v27  ;;  %7346 = vst [vmem:[#allocation28_spill] sm:$0xff] %v5851_v2  ;;  %v592_v45 = vmul.f32 0.0, %v5851_v2 }
  0xf1   :  { %457 = vst.msk [vmem:[#allocation3] sm:$0x3] %vm456_vm10, %v5838_v8  ;;  %v577_v38 = vmul.f32 %v4972_v37, %v576_v34  ;;  %4640 = vmatmul.msk.f32.vlgmr.msra.gmra.mxu3 %vm338_vm11, %v5838_v8  ;;  %999 = vmatpush.msra.mxu1 %v5587_v4 }
  0xf2   :  { %1038 = vmatpush.msra.mxu3 %v5632_v18  ;;  %1019 = vmatpush.msrb.mxu2 %v5590_v5 }
  0xf3   :  { %v579_v1 = vadd.f32 %v578_v42, %v577_v38  ;;  %1000 = vmatpush.msra.mxu1 %v5597_v7 }
  0xf4   :  { %1039 = vmatpush.msra.mxu3 %v5644_v22  ;;  %1020 = vmatpush.msrb.mxu2 %v5602_v9  ;;  %v4637_v22 = vld [vmem:[%s5430_s17 + $0x6] sm:$0x3] }
  0xf5   :  { %v585_v14 = vmul.f32 %v5824_v19, %v579_v1  ;;  %4641 = vmatmul.msk.f32.vlgmr.msrb.gmra.mxu0 %vm338_vm11, %v5838_v8  ;;  %4642 = vmatmul.msk.f32.vlgmr.msrb.gmra.mxu1 %vm338_vm11, %v5838_v8 }
  0xf6   :  { %1040 = vmatpush.msra.mxu3 %v5649_v23  ;;  %1001 = vmatpush.msra.mxu1 %v5609_v11 }
  0xf7   :  { %v5863_v4 = vadd.f32 %v592_v45, %v585_v14  ;;  %1021 = vmatpush.msrb.mxu2 %v5614_v13  ;;  %1131 = vmatpush.msrb.mxu0 %v5582_v3  ;;  %v4629_v3 = vld [vmem:[%s5415_s5 + $0x6] sm:$0x3] }
  0xf8   :  { %1041 = vmatpush.msra.mxu3 %v5667_v29  ;;  %1151 = vmatpush.msrb.mxu1 %v5605_v10 }
  0xf9   :  { %4648 = vmatmul.msk.f32.vlgmr.msra.gmra.mxu2 %vm338_vm11, %v5863_v4  ;;  %594 = vst.msk [vmem:[#allocation4 + $0xe] sm:$0x3] %vm456_vm10, %v5863_v4  ;;  %4649 = vmatmul.msk.f32.vlgmr.msrb.gmra.mxu3 %vm338_vm11, %v5863_v4 }
  0xfa   :  { %1171 = vmatpush.msra.mxu2 %v5655_v25  ;;  %1132 = vmatpush.msrb.mxu0 %v5593_v6  ;;  %v4630_v6 = vld [vmem:[%s5415_s5 + $0x8] sm:$0x3] }
  0xfb   :  { %1152 = vmatpush.msrb.mxu1 %v5620_v15  ;;  %1251 = vmatpush.msrb.mxu3 %v5624_v16 }
  0xfc   :  { %1172 = vmatpush.msra.mxu2 %v5662_v28 }
  0xfd   :  { %4650 = vmatmul.msk.f32.vlgmr.msra.gmra.mxu0 %vm338_vm11, %v5863_v4  ;;  %1252 = vmatpush.msrb.mxu3 %v5638_v20  ;;  %v4638_v20 = vld [vmem:[%s5430_s17 + $0x8] sm:$0x3] }
  0xfe   :  { %1271 = vmatpush.msra.mxu0 %v5627_v17 }
 0x100   :  { %1272 = vmatpush.msra.mxu0 %v5641_v21 }
 0x16a   :  { %v621_v5 = vpop.f32.mrf.mxu0  ;;  %v641_v7 = vpop.f32.mrf.mxu1 }
 0x16b   :  { %v622_v9 = vadd.f32 %v5711_v43, %v621_v5  ;;  %v642_v10 = vadd.f32 %v5714_v44, %v641_v7 }
 0x16d   :  { %v664_v11 = vadd.f32 %v4629_v3, %v622_v9  ;;  %v684_v13 = vadd.f32 %v4630_v6, %v642_v10 }
 0x16f   :  { %v4635_v15 = vmul.f32 -1.442695, %v664_v11  ;;  %v4636_v16 = vmul.f32 -1.442695, %v684_v13 }
 0x171   :  { %4973 = vpow2.f32 %v4635_v15  ;;  %v661_v18 = vpop.f32.mrf.mxu2 }
 0x172   :  { %4975 = vpow2.f32 %v4636_v16  ;;  %v772_v17 = vpop.f32.mrf.mxu0  ;;  %v662_v13 = vadd.f32 %v5753_v56, %v661_v18 }
 0x173   :  { %v773_v21 = vadd.f32 %v5729_v62, %v772_v17  ;;  %v4631_v17 = vld [vmem:[%s5415_s5 + $0xa] sm:$0x3] }
 0x174   :  { %v752_v23 = vpop.f32.mrf.mxu3 }
 0x175   :  { %v753_v25 = vadd.f32 %v5718_v47, %v752_v23  ;;  %v815_v28 = vadd.f32 %v4638_v20, %v773_v21 }
 0x177   :  { %v4974_v29 = vpop.eup %4973  ;;  %v795_v33 = vadd.f32 %v4637_v22, %v753_v25  ;;  %v4644_v51 = vmul.f32 -1.442695, %v815_v28 }
 0x178   :  { %v4976_v50 = vpop.eup %4975  ;;  %v668_v48 = vadd.f32 1.0, %v4974_v29 }
 0x179   :  { %v5893_v46 = vadd.f32 1.0, %v4976_v50  ;;  %v4643_v58 = vmul.f32 -1.442695, %v795_v33  ;;  %4977 = vpow2.f32 %v4644_v51  ;;  %v5914_v51 = vpop.permute.xlu2 %713 }
 0x17a   :  { %4979 = vrcp.f32 %v668_v48  ;;  %v680_v3 = vand.u32 2147483648, %v668_v48  ;;  %v678_v6 = vand.u32 2147483647, %v668_v48  ;;  %vm674_vm13 = vweird.f32 %v668_v48  ;;  %7347 = vst [vmem:[#allocation29_spill] sm:$0xff] %v5914_v51 }
 0x17b   :  { %4981 = vrcp.f32 %v5893_v46  ;;  %v700_v25 = vand.u32 2147483648, %v5893_v46  ;;  %v698_v28 = vand.u32 2147483647, %v5893_v46  ;;  %vm694_vm1 = vweird.f32 %v5893_v46 }
 0x17c   :  { %4983 = vpow2.f32 %v4643_v58  ;;  %v872_v57 = vpop.f32.mrf.mxu2  ;;  %v892_v53 = vpop.f32.mrf.mxu3  ;;  %v681_v11 = vor.u32 1.1754944e-38, %v680_v3  ;;  %vm679_vm15 = vcmp.eq.f32.partialorder %v678_v6, 8.507059e+37 }
 0x17d   :  { %v873_v36 = vadd.f32 %v5726_v60, %v872_v57  ;;  %v893_v61 = vadd.f32 %v5738_v39, %v892_v53  ;;  %vm699_vm3 = vcmp.eq.f32.partialorder %v698_v28, 8.507059e+37 }
 0x17f   :  { %v4978_v0 = vpop.eup %4977  ;;  %v915_v55 = vadd.f32 %v4645_v40, %v873_v36  ;;  %v935_v26 = vadd.f32 %v4646_v49, %v893_v61  ;;  %v701_v36 = vor.u32 1.1754944e-38, %v700_v25  ;;  %v792_v61 = vpop.f32.mrf.mxu1  ;;  %v6037_v25 = vld [vmem:[%s5420_s9 + $0x58] sm:$0xff] }
 0x180   :  { %v4980_v31 = vpop.eup %4979  ;;  %v5900_v30 = vadd.f32 1.0, %v4978_v0 }
 0x181   :  { %v4982_v54 = vpop.eup %4981  ;;  %v670_v59 = vmul.f32 %v4980_v31, %v668_v48  ;;  %v4651_v34 = vmul.f32 -1.442695, %v915_v55  ;;  %v4652_v45 = vmul.f32 -1.442695, %v935_v26  ;;  %vm675_vm12 = vweird.f32 %v4980_v31 }
 0x182   :  { %v4984_v37 = vpop.eup %4983  ;;  %v690_v38 = vmul.f32 %v4982_v54, %v5893_v46  ;;  %4985 = vrcp.f32 %v5900_v30  ;;  %vm676_vm14 = vmor %vm674_vm13, %vm675_vm12  ;;  %vm695_vm0 = vweird.f32 %v4982_v54  ;;  %vm825_vm6 = vweird.f32 %v5900_v30 }
 0x183   :  { %v671_v42 = vsub.f32 1.0, %v670_v59  ;;  %v799_v1 = vadd.f32 1.0, %v4984_v37  ;;  %4987 = vpow2.f32 %v4651_v34  ;;  %vm5917_vm2 = vmor %vm694_vm1, %vm695_vm0  ;;  %v793_v34 = vadd.f32 %v5764_v35, %v792_v61 }
 0x184   :  { %v691_v14 = vsub.f32 1.0, %v690_v38  ;;  %v831_v3 = vand.u32 2147483648, %v5900_v30 }
 0x185   :  { %v672_v5 = vmul.f32 %v4980_v31, %v671_v42  ;;  %4989 = vrcp.f32 %v799_v1  ;;  %v811_v46 = vand.u32 2147483648, %v799_v1  ;;  %v809_v55 = vand.u32 2147483647, %v799_v1 }
 0x186   :  { %v692_v7 = vmul.f32 %v4982_v54, %v691_v14  ;;  %4991 = vpow2.f32 %v4652_v45  ;;  %vm805_vm5 = vweird.f32 %v799_v1  ;;  %v832_v48 = vor.u32 1.1754944e-38, %v831_v3 }
 0x187   :  { %v673_v9 = vadd.f32 %v4980_v31, %v672_v5  ;;  %v812_v37 = vor.u32 1.1754944e-38, %v811_v46  ;;  %vm810_vm12 = vcmp.eq.f32.partialorder %v809_v55, 8.507059e+37  ;;  %v4639_v5 = vld [vmem:[%s5430_s17 + $0xa] sm:$0x3] }
 0x188   :  { %v5904_v10 = vpop.eup %4985  ;;  %v693_v22 = vadd.f32 %v4982_v54, %v692_v7 }
 0x189   :  { %v677_v15 = vsel %vm676_vm14, %v4980_v31, %v673_v9  ;;  %v821_v16 = vmul.f32 %v5904_v10, %v5900_v30  ;;  %v4988_v20 = vpop.eup %4987  ;;  %vm826_vm13 = vweird.f32 %v5904_v10  ;;  %v5937_v9 = vpop.permute.xlu2 %720 }
 0x18a   :  { %v682_v21 = vsel %vm679_vm15, %v681_v11, %v677_v15  ;;  %v5912_v33 = vadd.f32 1.0, %v4988_v20  ;;  %v697_v57 = vsel %vm5917_vm2, %v4982_v54, %v693_v22  ;;  %7350 = vst [vmem:[#allocation30_spill] sm:$0xff] %v5937_v9  ;;  %v829_v20 = vand.u32 2147483647, %v5900_v30  ;;  %vm5949_vm14 = vmor %vm825_vm6, %vm826_vm13 }
 0x18b   :  { %v4990_v23 = vpop.eup %4989  ;;  %v704_v29 = vmul.f32 %v682_v21, %v662_v13  ;;  %v822_v40 = vsub.f32 1.0, %v821_v16  ;;  %v702_v26 = vsel %vm699_vm3, %v701_v36, %v697_v57 }
 0x18c   :  { %v801_v18 = vmul.f32 %v4990_v23, %v799_v1  ;;  %v4992_v50 = vpop.eup %4991  ;;  %4993 = vrcp.f32 %v5912_v33  ;;  %vm806_vm4 = vweird.f32 %v4990_v23  ;;  %v707_v38 = vsub.f32 1.0, %v702_v26 }
 0x18d   :  { %v705_v58 = vadd.f32 %v4631_v17, %v704_v29  ;;  %v5924_v53 = vadd.f32 1.0, %v4992_v50  ;;  %v823_v31 = vmul.f32 %v5904_v10, %v822_v40  ;;  %vm807_vm9 = vmor %vm805_vm5, %vm806_vm4  ;;  %v709_v13 = vmul.f32 %v702_v26, %v5826_v63  ;;  %v912_v29 = vpop.f32.mrf.mxu0 }
 0x18e   :  { %v802_v49 = vsub.f32 1.0, %v801_v18  ;;  %v929_v21 = vand.u32 2147483647, %v5912_v33  ;;  %v931_v22 = vand.u32 2147483648, %v5912_v33  ;;  %v723_v50 = vmul.f32 %v5937_v9, %v5826_v63 }
 0x18f   :  { %4995 = vtanh.f32 %v705_v58  ;;  %v824_v1 = vadd.f32 %v5904_v10, %v823_v31  ;;  %vm925_vm0 = vweird.f32 %v5912_v33  ;;  %vm830_vm1 = vcmp.eq.f32.partialorder %v829_v20, 8.507059e+37  ;;  %v6022_v20 = vld [vmem:[%s5420_s9 + $0x20] sm:$0xff] }
 0x190   :  { %v803_v0 = vmul.f32 %v4990_v23, %v802_v49  ;;  %4997 = vrcp.f32 %v5924_v53  ;;  %v913_v36 = vadd.f32 %v5804_v41, %v912_v29  ;;  %v932_v63 = vor.u32 1.1754944e-38, %v931_v22  ;;  %v6041_v29 = vld [vmem:[%s5435_s21 + $0x8] sm:$0xff] }
 0x191   :  { %v828_v58 = vsel %vm5949_vm14, %v5904_v10, %v824_v1  ;;  %vm930_vm3 = vcmp.eq.f32.partialorder %v929_v21, 8.507059e+37  ;;  %v4647_v10 = vld [vmem:[%s5445_s29 + $0x28] sm:$0x3]  ;;  %vm945_vm5 = vweird.f32 %v5924_v53 }
 0x192   :  { %v804_v59 = vadd.f32 %v4990_v23, %v803_v0  ;;  %v4994_v54 = vpop.eup %4993  ;;  %v833_v46 = vsel %vm830_vm1, %v832_v48, %v828_v58  ;;  %v6050_v48 = vpop.permute.xlu1 %971  ;;  %v6053_v58 = vld [vmem:[%s5420_s9 + $0x50] sm:$0xff] }
 0x193   :  { %v921_v45 = vmul.f32 %v4994_v54, %v5912_v33  ;;  %vm926_vm15 = vweird.f32 %v4994_v54  ;;  %v951_v33 = vand.u32 2147483648, %v5924_v53  ;;  %7356 = vst [vmem:[#allocation32_spill] sm:$0xff] %v6050_v48 }
 0x194   :  { %v808_v42 = vsel %vm807_vm9, %v4990_v23, %v804_v59  ;;  %vm927_vm2 = vmor %vm925_vm0, %vm926_vm15  ;;  %v838_v59 = vsub.f32 1.0, %v833_v46 }
 0x195   :  { %v4996_v14 = vpop.eup %4995  ;;  %v813_v6 = vsel %vm810_vm12, %v812_v37, %v808_v42  ;;  %v922_v16 = vsub.f32 1.0, %v921_v45  ;;  %v5986_v42 = vld [vmem:[%s5420_s9 + $0x18] sm:$0xff]  ;;  %v840_v45 = vmul.f32 %v833_v46, %v5838_v8  ;;  %v952_v3 = vor.u32 1.1754944e-38, %v951_v33  ;;  %v6074_v46 = vld [vmem:[%s5420_s9 + $0x40] sm:$0xff]  ;;  %v6106_v33 = vld [vmem:[%s5450_s3 + $0x10] sm:$0xff] }
 0x196   :  { %v5935_v7 = vpop.eup %4997  ;;  %v708_v11 = vmul.f32 %v4996_v14, %v707_v38  ;;  %v835_v15 = vmul.f32 %v813_v6, %v793_v34  ;;  %v6003_v6 = vld [vmem:[%s5420_s9 + $0x30] sm:$0xff] }
 0x197   :  { %v941_v17 = vmul.f32 %v5935_v7, %v5924_v53  ;;  %v923_v18 = vmul.f32 %v4994_v54, %v922_v16  ;;  %vm946_vm4 = vweird.f32 %v5935_v7  ;;  %v6018_v16 = vld [vmem:[%s5420_s9] sm:$0xff] }
 0x198   :  { %v710_v23 = vadd.f32 %v709_v13, %v708_v11  ;;  %v836_v28 = vadd.f32 %v4639_v5, %v835_v15  ;;  %vm5981_vm6 = vmor %vm945_vm5, %vm946_vm4  ;;  %v5999_v5 = vld [vmem:[%s5420_s9 + $0x10] sm:$0xff]  ;;  %v6007_v13 = vld [vmem:[%s5420_s9 + $0x8] sm:$0xff] }
 0x199   :  { %v942_v40 = vsub.f32 1.0, %v941_v17  ;;  %v924_v57 = vadd.f32 %v4994_v54, %v923_v18  ;;  %v6045_v18 = vld [vmem:[%s5435_s21 + $0x18] sm:$0xff] }
 0x19a   :  { %v716_v30 = vmul.f32 %v5914_v51, %v710_v23  ;;  %4999 = vtanh.f32 %v836_v28 }
 0x19b   :  { %v943_v49 = vmul.f32 %v5935_v7, %v942_v40  ;;  %v928_v61 = vsel %vm927_vm2, %v4994_v54, %v924_v57  ;;  %v949_v54 = vand.u32 2147483647, %v5924_v53  ;;  %v5990_v53 = vld [vmem:[%s5420_s9 + $0x38] sm:$0xff]  ;;  %v6060_v57 = vld [vmem:[%s5435_s21] sm:$0xff] }
 0x19c   :  { %v5962_v0 = vadd.f32 %v723_v50, %v716_v30  ;;  %v933_v55 = vsel %vm930_vm3, %v932_v63, %v928_v61  ;;  %v6048_v50 = vpop.permute.xlu0 %964  ;;  %v974_v30 = vmul.f32 %v6050_v48, %v5863_v4  ;;  %v6090_v61 = vld [vmem:[%s5450_s3 + $0x8] sm:$0xff] }
 0x19d   :  { %v944_v26 = vadd.f32 %v5935_v7, %v943_v49  ;;  %v955_v31 = vmul.f32 %v933_v55, %v913_v36  ;;  %vm950_vm9 = vcmp.eq.f32.partialorder %v949_v54, 8.507059e+37  ;;  %7355 = vst [vmem:[#allocation31_spill] sm:$0xff] %v6048_v50  ;;  %v6064_v49 = vld [vmem:[%s5435_s21 + $0x10] sm:$0xff]  ;;  %v6068_v36 = vld [vmem:[%s5420_s9 + $0x48] sm:$0xff]  ;;  %v6098_v55 = vld [vmem:[%s5435_s21 + $0x20] sm:$0xff] }
 0x19e   :  { %4656 = vmatmul.msk.f32.vlgmr.msra.gmra.mxu1 %vm197_vm7, %v5962_v0  ;;  %4657 = vmatmul.msk.f32.vlgmr.msrb.gmra.mxu2 %vm197_vm7, %v5962_v0  ;;  %725 = vst.msk [vmem:[#allocation2 + $0x2] sm:$0x3] %vm328_vm8, %v5962_v0 }
 0x19f   :  { %4658 = vmatmul.msk.f32.vlgmr.msra.gmra.mxu3 %vm197_vm7, %v5962_v0  ;;  %1291 = vmatpush.msra.mxu1 %v5652_v24  ;;  %v956_v38 = vadd.f32 %v4647_v10, %v955_v31  ;;  %v948_v14 = vsel %vm5981_vm6, %v5935_v7, %v944_v26  ;;  %v843_v7 = vmul.f32 %v5937_v9, %v5838_v8  ;;  %v6094_v10 = vld [vmem:[%s5450_s3 + $0x18] sm:$0xff]  ;;  %v6102_v26 = vld [vmem:[%s5450_s3] sm:$0xff]  ;;  %v4653_v31 = vld [vmem:[%s5415_s5 + $0xc] sm:$0x3] }
 0x1a0   :  { %v5000_v34 = vpop.eup %4999  ;;  %1380 = vmatpush.msrb.mxu2 %v5986_v42  ;;  %1400 = vmatpush.msra.mxu3 %v5990_v53  ;;  %v953_v11 = vsel %vm950_vm9, %v952_v3, %v948_v14 }
 0x1a1   :  { %v839_v24 = vmul.f32 %v5000_v34, %v838_v59  ;;  %1292 = vmatpush.msra.mxu1 %v5659_v27  ;;  %5001 = vtanh.f32 %v956_v38  ;;  %v6011_v27 = vld [vmem:[%s5420_s9 + $0x28] sm:$0xff]  ;;  %v958_v17 = vsub.f32 1.0, %v953_v11  ;;  %v960_v8 = vmul.f32 %v953_v11, %v5863_v4 }
 0x1a2   :  { %1381 = vmatpush.msrb.mxu2 %v5999_v5  ;;  %1401 = vmatpush.msra.mxu3 %v6003_v6  ;;  %v6086_v4 = vld [vmem:[%s5435_s21 + $0x28] sm:$0xff] }
 0x1a3   :  { %v841_v1 = vadd.f32 %v840_v45, %v839_v24  ;;  %v4654_v38 = vld [vmem:[%s5415_s5 + $0xe] sm:$0x3] }
 0x1a4   :  { %1382 = vmatpush.msrb.mxu2 %v6007_v13  ;;  %1402 = vmatpush.msra.mxu3 %v6011_v27 }
 0x1a5   :  { %v842_v15 = vmul.f32 %v841_v1, %v5914_v51  ;;  %v4661_v1 = vld [vmem:[%s5430_s17 + $0xc] sm:$0x3] }
 0x1a6   :  { %1383 = vmatpush.msrb.mxu2 %v6018_v16  ;;  %1403 = vmatpush.msra.mxu3 %v6022_v20 }
 0x1a7   :  { %v6025_v21 = vadd.f32 %v843_v7, %v842_v15  ;;  %v5002_v22 = vpop.eup %5001  ;;  %v4662_v7 = vld [vmem:[%s5430_s17 + $0xe] sm:$0x3] }
 0x1a8   :  { %v959_v23 = vmul.f32 %v5002_v22, %v958_v17 }
 0x1a9   :  { %845 = vst.msk [vmem:[#allocation3 + $0x2] sm:$0x3] %vm456_vm10, %v6025_v21  ;;  %4664 = vmatmul.msk.f32.vlgmr.msrb.gmra.mxu0 %vm338_vm11, %v6025_v21  ;;  %4665 = vmatmul.msk.f32.vlgmr.msrb.gmra.mxu1 %vm338_vm11, %v6025_v21 }
 0x1aa   :  { %4666 = vmatmul.msk.f32.vlgmr.msra.gmra.mxu2 %vm338_vm11, %v6025_v21  ;;  %1420 = vmatpush.msrb.mxu0 %v6037_v25  ;;  %v961_v28 = vadd.f32 %v960_v8, %v959_v23 }
 0x1ab   :  { %1513 = vmatpush.msrb.mxu1 %v6041_v29  ;;  %1533 = vmatpush.msra.mxu2 %v6045_v18 }
 0x1ac   :  { %1421 = vmatpush.msrb.mxu0 %v6053_v58  ;;  %v967_v40 = vmul.f32 %v6048_v50, %v961_v28 }
 0x1ad   :  { %1514 = vmatpush.msrb.mxu1 %v6060_v57  ;;  %1534 = vmatpush.msra.mxu2 %v6064_v49 }
 0x1ae   :  { %1422 = vmatpush.msrb.mxu0 %v6068_v36  ;;  %v6071_v63 = vadd.f32 %v974_v30, %v967_v40 }
 0x1b0   :  { %1423 = vmatpush.msrb.mxu0 %v6074_v46  ;;  %976 = vst.msk [vmem:[#allocation4 + $0xc] sm:$0x3] %vm456_vm10, %v6071_v63  ;;  %4672 = vmatmul.msk.f32.vlgmr.msrb.gmra.mxu3 %vm338_vm11, %v6071_v63 }
 0x1b1   :  { %4673 = vmatmul.msk.f32.vlgmr.msra.gmra.mxu0 %vm338_vm11, %v6071_v63  ;;  %4674 = vmatmul.msk.f32.vlgmr.msra.gmra.mxu1 %vm338_vm11, %v6071_v63 }
 0x1b2   :  { %1553 = vmatpush.msrb.mxu3 %v6086_v4  ;;  %1633 = vmatpush.msra.mxu0 %v6090_v61 }
 0x1b3   :  { %1653 = vmatpush.msra.mxu1 %v6094_v10 }
 0x1b4   :  { %1554 = vmatpush.msrb.mxu3 %v6098_v55  ;;  %1634 = vmatpush.msra.mxu0 %v6102_v26 }
 0x1b5   :  { %1654 = vmatpush.msra.mxu1 %v6106_v33 }
 0x21b   :  { %v1003_v59 = vpop.f32.mrf.mxu1 }
 0x21c   :  { %v1004_v54 = vadd.f32 %v5711_v43, %v1003_v59 }
 0x21e   :  { %v1046_v34 = vadd.f32 %v4653_v31, %v1004_v54 }
 0x220   :  { %v4659_v37 = vmul.f32 -1.442695, %v1046_v34  ;;  %v4670_v34 = vld [vmem:[%s5445_s29 + $0x20] sm:$0x3] }
 0x221   :  { %v1023_v24 = vpop.f32.mrf.mxu2 }
 0x222   :  { %5003 = vpow2.f32 %v4659_v37  ;;  %v1024_v45 = vadd.f32 %v5714_v44, %v1023_v24  ;;  %v1043_v40 = vpop.f32.mrf.mxu3 }
 0x224   :  { %v1066_v14 = vadd.f32 %v4654_v38, %v1024_v45 }
 0x226   :  { %v4660_v3 = vmul.f32 -1.442695, %v1066_v14  ;;  %v1134_v11 = vpop.f32.mrf.mxu0  ;;  %v1154_v15 = vpop.f32.mrf.mxu1 }
 0x227   :  { %v1135_v17 = vadd.f32 %v5718_v47, %v1134_v11  ;;  %v1155_v22 = vadd.f32 %v5729_v62, %v1154_v15 }
 0x228   :  { %v5004_v23 = vpop.eup %5003  ;;  %5005 = vpow2.f32 %v4660_v3 }
 0x229   :  { %v1050_v43 = vadd.f32 1.0, %v5004_v23  ;;  %v1177_v8 = vadd.f32 %v4661_v1, %v1135_v17  ;;  %v1197_v28 = vadd.f32 %v4662_v7, %v1155_v22 }
 0x22b   :  { %5007 = vrcp.f32 %v1050_v43  ;;  %v4667_v30 = vmul.f32 -1.442695, %v1177_v8  ;;  %v4668_v44 = vmul.f32 -1.442695, %v1197_v28  ;;  %v1060_v11 = vand.u32 2147483647, %v1050_v43 }
 0x22c   :  { %v1062_v7 = vand.u32 2147483648, %v1050_v43  ;;  %v4669_v8 = vld [vmem:[%s5445_s29 + $0x1e] sm:$0x3]  ;;  %vm1056_vm13 = vweird.f32 %v1050_v43 }
 0x22d   :  { %5009 = vpow2.f32 %v4667_v30  ;;  %vm1061_vm15 = vcmp.eq.f32.partialorder %v1060_v11, 8.507059e+37 }
 0x22e   :  { %v5006_v31 = vpop.eup %5005  ;;  %v1274_v59 = vpop.f32.mrf.mxu0  ;;  %5011 = vpow2.f32 %v4668_v44  ;;  %v1044_v44 = vadd.f32 %v5753_v56, %v1043_v40 }
 0x22f   :  { %v1070_v54 = vadd.f32 1.0, %v5006_v31  ;;  %v1275_v47 = vadd.f32 %v5738_v39, %v1274_v59  ;;  %v1063_v31 = vor.u32 1.1754944e-38, %v1062_v7 }
 0x231   :  { %v5008_v37 = vpop.eup %5007  ;;  %5013 = vrcp.f32 %v1070_v54  ;;  %v1317_v38 = vadd.f32 %v4670_v34, %v1275_v47  ;;  %vm1076_vm1 = vweird.f32 %v1070_v54 }
 0x232   :  { %v1052_v62 = vmul.f32 %v5008_v37, %v1050_v43  ;;  %vm1057_vm12 = vweird.f32 %v5008_v37 }
 0x233   :  { %v5010_v24 = vpop.eup %5009  ;;  %v4676_v14 = vmul.f32 -1.442695, %v1317_v38  ;;  %v1254_v3 = vpop.f32.mrf.mxu3  ;;  %vm1058_vm14 = vmor %vm1056_vm13, %vm1057_vm12 }
 0x234   :  { %v1053_v45 = vsub.f32 1.0, %v1052_v62  ;;  %v5012_v1 = vpop.eup %5011  ;;  %v1181_v15 = vadd.f32 1.0, %v5010_v24  ;;  %v1255_v39 = vadd.f32 %v5726_v60, %v1254_v3  ;;  %v4655_v62 = vld [vmem:[%s5415_s5 + $0x10] sm:$0x3]  ;;  %v1080_v60 = vand.u32 2147483647, %v1070_v54 }
 0x235   :  { %v6119_v22 = vadd.f32 1.0, %v5012_v1  ;;  %5015 = vpow2.f32 %v4676_v14  ;;  %v1082_v14 = vand.u32 2147483648, %v1070_v54 }
 0x236   :  { %v1054_v17 = vmul.f32 %v5008_v37, %v1053_v45  ;;  %5017 = vrcp.f32 %v1181_v15  ;;  %v1297_v47 = vadd.f32 %v4669_v8, %v1255_v39  ;;  %vm1081_vm3 = vcmp.eq.f32.partialorder %v1080_v60, 8.507059e+37 }
 0x237   :  { %v5014_v23 = vpop.eup %5013  ;;  %5019 = vrcp.f32 %v6119_v22  ;;  %v1083_v7 = vor.u32 1.1754944e-38, %v1082_v14  ;;  %vm1187_vm5 = vweird.f32 %v1181_v15  ;;  %vm1207_vm13 = vweird.f32 %v6119_v22 }
 0x238   :  { %v1072_v28 = vmul.f32 %v5014_v23, %v1070_v54  ;;  %v1055_v30 = vadd.f32 %v5008_v37, %v1054_v17  ;;  %vm1077_vm0 = vweird.f32 %v5014_v23  ;;  %v4675_v1 = vmul.f32 -1.442695, %v1297_v47 }
 0x239   :  { %vm1078_vm2 = vmor %vm1076_vm1, %vm1077_vm0  ;;  %v1191_v54 = vand.u32 2147483647, %v1181_v15 }
 0x23a   :  { %v1073_v59 = vsub.f32 1.0, %v1072_v28  ;;  %v1059_v34 = vsel %vm1058_vm14, %v5008_v37, %v1055_v30  ;;  %v1193_v28 = vand.u32 2147483648, %v1181_v15 }
 0x23b   :  { %v1064_v38 = vsel %vm1061_vm15, %v1063_v31, %v1059_v34  ;;  %v5016_v24 = vpop.eup %5015  ;;  %v1174_v34 = vpop.f32.mrf.mxu2  ;;  %vm1192_vm12 = vcmp.eq.f32.partialorder %v1191_v54, 8.507059e+37 }
 0x23c   :  { %v1074_v45 = vmul.f32 %v5014_v23, %v1073_v59  ;;  %v1086_v3 = vmul.f32 %v1064_v38, %v1044_v44  ;;  %v5018_v43 = vpop.eup %5017  ;;  %v6128_v30 = vadd.f32 1.0, %v5016_v24  ;;  %v1175_v38 = vadd.f32 %v5764_v35, %v1174_v34  ;;  %v6139_v35 = vpop.permute.xlu2 %1095 }
 0x23d   :  { %v5020_v17 = vpop.eup %5019  ;;  %v1183_v12 = vmul.f32 %v5018_v43, %v1181_v15  ;;  %vm1188_vm4 = vweird.f32 %v5018_v43  ;;  %v1213_v15 = vand.u32 2147483648, %v6119_v22 }
 0x23e   :  { %v1075_v56 = vadd.f32 %v5014_v23, %v1074_v45  ;;  %v1087_v40 = vadd.f32 %v4655_v62, %v1086_v3  ;;  %v1203_v37 = vmul.f32 %v5020_v17, %v6119_v22  ;;  %vm1189_vm6 = vmor %vm1187_vm5, %vm1188_vm4  ;;  %vm1208_vm9 = vweird.f32 %v5020_v17  ;;  %v4663_v3 = vld [vmem:[%s5430_s17 + $0x10] sm:$0x3] }
 0x23f   :  { %v1184_v39 = vsub.f32 1.0, %v1183_v12  ;;  %vm1209_vm14 = vmor %vm1207_vm13, %vm1208_vm9  ;;  %v1214_v54 = vor.u32 1.1754944e-38, %v1213_v15  ;;  %vm1327_vm5 = vweird.f32 %v6128_v30 }
 0x240   :  { %v1079_v11 = vsel %vm1078_vm2, %v5014_v23, %v1075_v56  ;;  %5021 = vtanh.f32 %v1087_v40  ;;  %v1204_v8 = vsub.f32 1.0, %v1203_v37  ;;  %v1194_v23 = vor.u32 1.1754944e-38, %v1193_v28 }
 0x241   :  { %5023 = vpow2.f32 %v4675_v1  ;;  %v1084_v44 = vsel %vm1081_vm3, %v1083_v7, %v1079_v11  ;;  %v1185_v31 = vmul.f32 %v5018_v43, %v1184_v39  ;;  %v1211_v7 = vand.u32 2147483647, %v6119_v22  ;;  %v6137_v39 = vpop.permute.xlu0 %1102 }
 0x242   :  { %v1205_v59 = vmul.f32 %v5020_v17, %v1204_v8  ;;  %v1089_v62 = vsub.f32 1.0, %v1084_v44  ;;  %5025 = vrcp.f32 %v6128_v30  ;;  %v1091_v14 = vmul.f32 %v1084_v44, %v5962_v0  ;;  %7357 = vst [vmem:[#allocation33_spill] sm:$0xff] %v6137_v39 }
 0x243   :  { %v1186_v47 = vadd.f32 %v5018_v43, %v1185_v31  ;;  %v1105_v31 = vmul.f32 %v6137_v39, %v5962_v0  ;;  %vm1212_vm15 = vcmp.eq.f32.partialorder %v1211_v7, 8.507059e+37 }
 0x244   :  { %v1206_v56 = vadd.f32 %v5020_v17, %v1205_v59 }
 0x245   :  { %v1190_v60 = vsel %vm1189_vm6, %v5018_v43, %v1186_v47 }
 0x246   :  { %v5022_v12 = vpop.eup %5021  ;;  %v1195_v1 = vsel %vm1192_vm12, %v1194_v23, %v1190_v60  ;;  %v1210_v44 = vsel %vm1209_vm14, %v5020_v17, %v1206_v56  ;;  %v6160_v17 = vld [vmem:[%s5450_s3 + $0x28] sm:$0xff] }
 0x247   :  { %v5024_v24 = vpop.eup %5023  ;;  %v1090_v45 = vmul.f32 %v5022_v12, %v1089_v62  ;;  %v1217_v40 = vmul.f32 %v1195_v1, %v1175_v38  ;;  %v1215_v59 = vsel %vm1212_vm15, %v1214_v54, %v1210_v44  ;;  %v6166_v38 = vld [vmem:[%s5450_s3 + $0x20] sm:$0xff] }
 0x248   :  { %v1301_v37 = vadd.f32 1.0, %v5024_v24  ;;  %v6142_v8 = vpop.eup %5025  ;;  %v1220_v47 = vsub.f32 1.0, %v1215_v59  ;;  %v1222_v24 = vmul.f32 %v1215_v59, %v6025_v21 }
 0x249   :  { %v1092_v11 = vadd.f32 %v1091_v14, %v1090_v45  ;;  %v1218_v43 = vadd.f32 %v4663_v3, %v1217_v40  ;;  %v1323_v34 = vmul.f32 %v6142_v8, %v6128_v30  ;;  %v1294_v40 = vpop.f32.mrf.mxu1  ;;  %vm1328_vm4 = vweird.f32 %v6142_v8 }
 0x24a   :  { %5027 = vrcp.f32 %v1301_v37  ;;  %v1313_v14 = vand.u32 2147483648, %v1301_v37  ;;  %v1311_v56 = vand.u32 2147483647, %v1301_v37  ;;  %vm1307_vm1 = vweird.f32 %v1301_v37  ;;  %vm1329_vm6 = vmor %vm1327_vm5, %vm1328_vm4 }
 0x24b   :  { %v1098_v28 = vmul.f32 %v6139_v35, %v1092_v11  ;;  %5029 = vtanh.f32 %v1218_v43  ;;  %v1324_v12 = vsub.f32 1.0, %v1323_v34  ;;  %v1225_v43 = vmul.f32 %v6137_v39, %v6025_v21 }
 0x24c   :  { %v1295_v44 = vadd.f32 %v5804_v41, %v1294_v40  ;;  %vm1312_vm3 = vcmp.eq.f32.partialorder %v1311_v56, 8.507059e+37  ;;  %v1333_v21 = vand.u32 2147483648, %v6128_v30  ;;  %v1331_v41 = vand.u32 2147483647, %v6128_v30 }
 0x24d   :  { %v6147_v22 = vadd.f32 %v1105_v31, %v1098_v28  ;;  %v1325_v15 = vmul.f32 %v6142_v8, %v1324_v12  ;;  %v1314_v28 = vor.u32 1.1754944e-38, %v1313_v14  ;;  %v6207_v14 = vpop.permute.xlu1 %1346 }
 0x24e   :  { %vm1332_vm9 = vcmp.eq.f32.partialorder %v1331_v41, 8.507059e+37 }
 0x24f   :  { %4680 = vmatmul.msk.f32.vlgmr.msrb.gmra.mxu2 %vm197_vm7, %v6147_v22  ;;  %4681 = vmatmul.msk.f32.vlgmr.msra.gmra.mxu3 %vm197_vm7, %v6147_v22  ;;  %1107 = vst.msk [vmem:[#allocation2 + $0x4] sm:$0x3] %vm328_vm8, %v6147_v22  ;;  %v1326_v59 = vadd.f32 %v6142_v8, %v1325_v15 }
 0x250   :  { %v5028_v0 = vpop.eup %5027  ;;  %4682 = vmatmul.msk.f32.vlgmr.msrb.gmra.mxu0 %vm197_vm7, %v6147_v22  ;;  %1673 = vmatpush.msrb.mxu2 %v6160_v17 }
 0x251   :  { %v1303_v62 = vmul.f32 %v5028_v0, %v1301_v37  ;;  %1762 = vmatpush.msra.mxu3 %v5986_v42  ;;  %1782 = vmatpush.msrb.mxu0 %v5990_v53  ;;  %v5030_v23 = vpop.eup %5029  ;;  %vm1308_vm0 = vweird.f32 %v5028_v0  ;;  %v4671_v37 = vld [vmem:[%s5445_s29 + $0x22] sm:$0x3] }
 0x252   :  { %1674 = vmatpush.msrb.mxu2 %v6166_v38  ;;  %v1221_v60 = vmul.f32 %v5030_v23, %v1220_v47  ;;  %vm1309_vm2 = vmor %vm1307_vm1, %vm1308_vm0  ;;  %v1334_v23 = vor.u32 1.1754944e-38, %v1333_v21 }
 0x253   :  { %v1304_v45 = vsub.f32 1.0, %v1303_v62  ;;  %1763 = vmatpush.msra.mxu3 %v5999_v5  ;;  %1783 = vmatpush.msrb.mxu0 %v6003_v6  ;;  %v1330_v62 = vsel %vm1329_vm6, %v6142_v8, %v1326_v59 }
 0x254   :  { %v1223_v3 = vadd.f32 %v1222_v24, %v1221_v60  ;;  %v1335_v30 = vsel %vm1332_vm9, %v1334_v23, %v1330_v62 }
 0x255   :  { %v1305_v1 = vmul.f32 %v5028_v0, %v1304_v45  ;;  %1764 = vmatpush.msra.mxu3 %v6007_v13  ;;  %1784 = vmatpush.msrb.mxu0 %v6011_v27  ;;  %v1340_v12 = vsub.f32 1.0, %v1335_v30  ;;  %v1342_v24 = vmul.f32 %v1335_v30, %v6071_v63 }
 0x256   :  { %v1224_v11 = vmul.f32 %v1223_v3, %v6139_v35  ;;  %v6209_v3 = vpop.permute.xlu2 %1353 }
 0x257   :  { %v1306_v7 = vadd.f32 %v5028_v0, %v1305_v1  ;;  %1765 = vmatpush.msra.mxu3 %v6018_v16  ;;  %1785 = vmatpush.msrb.mxu0 %v6022_v20  ;;  %v1356_v1 = vmul.f32 %v6209_v3, %v6071_v63  ;;  %v4677_v63 = vld [vmem:[%s5415_s5 + $0x12] sm:$0x3] }
 0x258   :  { %v6181_v54 = vadd.f32 %v1225_v43, %v1224_v11  ;;  %v4678_v11 = vld [vmem:[%s5415_s5 + $0x14] sm:$0x3]  ;;  %v6233_v43 = vld [vmem:[%s5425_s13] ss:$0 sm:$0xff] }
 0x259   :  { %v1310_v31 = vsel %vm1309_vm2, %v5028_v0, %v1306_v7 }
 0x25a   :  { %v1315_v34 = vsel %vm1312_vm3, %v1314_v28, %v1310_v31  ;;  %1227 = vst.msk [vmem:[#allocation3 + $0x4] sm:$0x3] %vm456_vm10, %v6181_v54  ;;  %4688 = vmatmul.msk.f32.vlgmr.msrb.gmra.mxu1 %vm338_vm11, %v6181_v54  ;;  %4689 = vmatmul.msk.f32.vlgmr.msra.gmra.mxu2 %vm338_vm11, %v6181_v54 }
 0x25b   :  { %v1337_v47 = vmul.f32 %v1315_v34, %v1295_v44  ;;  %4690 = vmatmul.msk.f32.vlgmr.msrb.gmra.mxu3 %vm338_vm11, %v6181_v54  ;;  %1802 = vmatpush.msrb.mxu1 %v6037_v25  ;;  %v6237_v44 = vld [vmem:[%s5425_s13 + $0x1] ss:$0 sm:$0xff] }
 0x25c   :  { %1884 = vmatpush.msra.mxu2 %v6041_v29  ;;  %1904 = vmatpush.msrb.mxu3 %v6045_v18 }
 0x25d   :  { %v1338_v0 = vadd.f32 %v4671_v37, %v1337_v47  ;;  %1803 = vmatpush.msrb.mxu1 %v6053_v58  ;;  %v4685_v47 = vld [vmem:[%s5430_s17 + $0x12] sm:$0x3] }
 0x25e   :  { %1885 = vmatpush.msra.mxu2 %v6060_v57  ;;  %1905 = vmatpush.msrb.mxu3 %v6064_v49 }
 0x25f   :  { %5031 = vtanh.f32 %v1338_v0  ;;  %1804 = vmatpush.msrb.mxu1 %v6068_v36  ;;  %v6242_v0 = vld [vmem:[%s5440_s25] ss:$0 sm:$0xff] }
 0x261   :  { %1805 = vmatpush.msrb.mxu1 %v6074_v46 }
 0x265   :  { %v5032_v60 = vpop.eup %5031 }
 0x266   :  { %v1341_v45 = vmul.f32 %v5032_v60, %v1340_v12  ;;  %v4686_v12 = vld [vmem:[%s5430_s17 + $0x14] sm:$0x3] }
 0x268   :  { %v1343_v8 = vadd.f32 %v1342_v24, %v1341_v45  ;;  %v6247_v45 = vld [vmem:[%s5440_s25 + $0x1] ss:$0 sm:$0xff] }
 0x26a   :  { %v1349_v56 = vmul.f32 %v6207_v14, %v1343_v8 }
 0x26c   :  { %v6214_v15 = vadd.f32 %v1356_v1, %v1349_v56 }
 0x26e   :  { %4696 = vmatmul.msk.f32.vlgmr.msra.gmra.mxu0 %vm338_vm11, %v6214_v15  ;;  %1358 = vst.msk [vmem:[#allocation4 + $0xa] sm:$0x3] %vm456_vm10, %v6214_v15  ;;  %4697 = vmatmul.msk.f32.vlgmr.msra.gmra.mxu1 %vm338_vm11, %v6214_v15 }
 0x26f   :  { %4698 = vmatmul.msk.f32.vlgmr.msrb.gmra.mxu2 %vm338_vm11, %v6214_v15  ;;  %1924 = vmatpush.msra.mxu0 %v6086_v4 }
 0x270   :  { %2004 = vmatpush.msra.mxu1 %v6090_v61  ;;  %2024 = vmatpush.msrb.mxu2 %v6094_v10 }
 0x271   :  { %1925 = vmatpush.msra.mxu0 %v6098_v55 }
 0x272   :  { %2005 = vmatpush.msra.mxu1 %v6102_v26  ;;  %2025 = vmatpush.msrb.mxu2 %v6106_v33 }
 0x2d2   :  { %v1385_v40 = vpop.f32.mrf.mxu2  ;;  %v1405_v7 = vpop.f32.mrf.mxu3 }
 0x2d3   :  { %v1386_v28 = vadd.f32 %v6233_v43, %v1385_v40  ;;  %v1406_v31 = vadd.f32 %v6237_v44, %v1405_v7 }
 0x2d5   :  { %v1428_v59 = vadd.f32 %v4677_v63, %v1386_v28  ;;  %v1448_v37 = vadd.f32 %v4678_v11, %v1406_v31  ;;  %v1425_v11 = vpop.f32.mrf.mxu0 }
 0x2d7   :  { %v4683_v34 = vmul.f32 -1.442695, %v1428_v59  ;;  %v4684_v21 = vmul.f32 -1.442695, %v1448_v37  ;;  %v1516_v41 = vpop.f32.mrf.mxu1 }
 0x2d8   :  { %v1517_v62 = vadd.f32 %v6242_v0, %v1516_v41  ;;  %v4693_v41 = vld [vmem:[%s5445_s29 + $0x18] sm:$0x3] }
 0x2d9   :  { %5033 = vpow2.f32 %v4683_v34 }
 0x2da   :  { %5035 = vpow2.f32 %v4684_v21  ;;  %v1559_v23 = vadd.f32 %v4685_v47, %v1517_v62 }
 0x2dc   :  { %v4691_v30 = vmul.f32 -1.442695, %v1559_v23  ;;  %v4694_v23 = vld [vmem:[%s5445_s29 + $0x1a] sm:$0x3] }
 0x2dd   :  { %v1536_v60 = vpop.f32.mrf.mxu2 }
 0x2de   :  { %5037 = vpow2.f32 %v4691_v30  ;;  %v1537_v8 = vadd.f32 %v6247_v45, %v1536_v60  ;;  %v1556_v50 = vpop.f32.mrf.mxu3 }
 0x2df   :  { %v5034_v24 = vpop.eup %5033 }
 0x2e0   :  { %v5036_v1 = vpop.eup %5035  ;;  %v1432_v56 = vadd.f32 1.0, %v5034_v24  ;;  %v1579_v40 = vadd.f32 %v4686_v12, %v1537_v8  ;;  %v6263_v8 = vld [vmem:[%s5455_s8] ss:$0 sm:$0xff] }
 0x2e1   :  { %v6250_v63 = vadd.f32 1.0, %v5036_v1 }
 0x2e2   :  { %5039 = vrcp.f32 %v1432_v56  ;;  %v4692_v7 = vmul.f32 -1.442695, %v1579_v40  ;;  %v1444_v60 = vand.u32 2147483648, %v1432_v56  ;;  %v6267_v40 = vld [vmem:[%s5455_s8 + $0x1] ss:$0 sm:$0xff]  ;;  %vm1438_vm13 = vweird.f32 %v1432_v56 }
 0x2e3   :  { %5041 = vrcp.f32 %v6250_v63  ;;  %v1442_v52 = vand.u32 2147483647, %v1432_v56  ;;  %vm1458_vm15 = vweird.f32 %v6250_v63 }
 0x2e4   :  { %v5038_v28 = vpop.eup %5037  ;;  %5043 = vpow2.f32 %v4692_v7 }
 0x2e5   :  { %v6253_v31 = vadd.f32 1.0, %v5038_v28  ;;  %vm1443_vm0 = vcmp.eq.f32.partialorder %v1442_v52, 8.507059e+37 }
 0x2e7   :  { %5045 = vrcp.f32 %v6253_v31  ;;  %v1575_v48 = vand.u32 2147483648, %v6253_v31  ;;  %v1573_v52 = vand.u32 2147483647, %v6253_v31  ;;  %vm1569_vm4 = vweird.f32 %v6253_v31 }
 0x2e8   :  { %v5040_v59 = vpop.eup %5039 }
 0x2e9   :  { %v6256_v37 = vpop.eup %5041  ;;  %v1434_v34 = vmul.f32 %v5040_v59, %v1432_v56  ;;  %vm1439_vm12 = vweird.f32 %v5040_v59  ;;  %vm1574_vm9 = vcmp.eq.f32.partialorder %v1573_v52, 8.507059e+37 }
 0x2ea   :  { %v1454_v21 = vmul.f32 %v6256_v37, %v6250_v63  ;;  %v5044_v12 = vpop.eup %5043  ;;  %vm1440_vm14 = vmor %vm1438_vm13, %vm1439_vm12  ;;  %vm1459_vm1 = vweird.f32 %v6256_v37 }
 0x2eb   :  { %v1435_v47 = vsub.f32 1.0, %v1434_v34  ;;  %v1636_v62 = vpop.f32.mrf.mxu0  ;;  %v1656_v30 = vpop.f32.mrf.mxu1  ;;  %v6270_v34 = vadd.f32 1.0, %v5044_v12  ;;  %vm6289_vm3 = vmor %vm1458_vm15, %vm1459_vm1 }
 0x2ec   :  { %v1455_v24 = vsub.f32 1.0, %v1454_v21  ;;  %v1637_v1 = vadd.f32 %v6263_v8, %v1636_v62  ;;  %v1657_v7 = vadd.f32 %v6267_v40, %v1656_v30  ;;  %v6274_v21 = vld [vmem:[%s5425_s13 + $0x2] ss:$0 sm:$0xff]  ;;  %v1462_v30 = vand.u32 2147483647, %v6250_v63 }
 0x2ed   :  { %v1436_v28 = vmul.f32 %v5040_v59, %v1435_v47  ;;  %v5046_v32 = vpop.eup %5045  ;;  %v1426_v51 = vadd.f32 %v6274_v21, %v1425_v11  ;;  %5047 = vrcp.f32 %v6270_v34  ;;  %v1445_v47 = vor.u32 1.1754944e-38, %v1444_v60 }
 0x2ee   :  { %v1456_v2 = vmul.f32 %v6256_v37, %v1455_v24  ;;  %v1679_v19 = vadd.f32 %v4693_v41, %v1637_v1  ;;  %v1699_v9 = vadd.f32 %v4694_v23, %v1657_v7  ;;  %v1565_v12 = vmul.f32 %v5046_v32, %v6253_v31  ;;  %v4679_v1 = vld [vmem:[%s5415_s5 + $0x16] sm:$0x3] }
 0x2ef   :  { %v1437_v62 = vadd.f32 %v5040_v59, %v1436_v28  ;;  %v1464_v60 = vand.u32 2147483648, %v6250_v63  ;;  %vm1570_vm2 = vweird.f32 %v5046_v32  ;;  %vm1463_vm6 = vcmp.eq.f32.partialorder %v1462_v30, 8.507059e+37 }
 0x2f0   :  { %v4699_v41 = vmul.f32 -1.442695, %v1679_v19  ;;  %v4700_v23 = vmul.f32 -1.442695, %v1699_v9  ;;  %v1457_v11 = vadd.f32 %v6256_v37, %v1456_v2  ;;  %v1566_v56 = vsub.f32 1.0, %v1565_v12  ;;  %vm1571_vm5 = vmor %vm1569_vm4, %vm1570_vm2 }
 0x2f1   :  { %v1441_v24 = vsel %vm1440_vm14, %v5040_v59, %v1437_v62  ;;  %v6299_v12 = vld [vmem:[%s5440_s25 + $0x2] ss:$0 sm:$0xff]  ;;  %vm1589_vm13 = vweird.f32 %v6270_v34 }
 0x2f2   :  { %v1446_v7 = vsel %vm1443_vm0, %v1445_v47, %v1441_v24  ;;  %5049 = vpow2.f32 %v4699_v41  ;;  %v1567_v39 = vmul.f32 %v5046_v32, %v1566_v56  ;;  %v1465_v47 = vor.u32 1.1754944e-38, %v1464_v60 }
 0x2f3   :  { %v1468_v28 = vmul.f32 %v1446_v7, %v1426_v51  ;;  %5051 = vpow2.f32 %v4700_v23  ;;  %v5048_v19 = vpop.eup %5047  ;;  %v1461_v51 = vsel %vm6289_vm3, %v6256_v37, %v1457_v11  ;;  %v1557_v63 = vadd.f32 %v6299_v12, %v1556_v50  ;;  %v4687_v11 = vld [vmem:[%s5430_s17 + $0x16] sm:$0x3] }
 0x2f4   :  { %v1585_v59 = vmul.f32 %v5048_v19, %v6270_v34  ;;  %v1568_v62 = vadd.f32 %v5046_v32, %v1567_v39  ;;  %v1576_v24 = vor.u32 1.1754944e-38, %v1575_v48  ;;  %v1466_v37 = vsel %vm1463_vm6, %v1465_v47, %v1461_v51 }
 0x2f5   :  { %v1469_v9 = vadd.f32 %v4679_v1, %v1468_v28  ;;  %v1595_v7 = vand.u32 2147483648, %v6270_v34  ;;  %vm1590_vm12 = vweird.f32 %v5048_v19  ;;  %v1471_v52 = vsub.f32 1.0, %v1466_v37 }
 0x2f6   :  { %v1586_v41 = vsub.f32 1.0, %v1585_v59  ;;  %v1572_v23 = vsel %vm1571_vm5, %v5046_v32, %v1568_v62  ;;  %vm1591_vm14 = vmor %vm1589_vm13, %vm1590_vm12  ;;  %v1473_v59 = vmul.f32 %v1466_v37, %v6147_v22 }
 0x2f7   :  { %5053 = vtanh.f32 %v1469_v9  ;;  %v1577_v39 = vsel %vm1574_vm9, %v1576_v24, %v1572_v23  ;;  %v1593_v9 = vand.u32 2147483647, %v6270_v34  ;;  %v1596_v2 = vor.u32 1.1754944e-38, %v1595_v7  ;;  %v6312_v34 = vpop.permute.xlu1 %1484 }
 0x2f8   :  { %v5050_v1 = vpop.eup %5049  ;;  %v1587_v31 = vmul.f32 %v5048_v19, %v1586_v41  ;;  %v1599_v28 = vmul.f32 %v1577_v39, %v1557_v63  ;;  %v6310_v41 = vpop.permute.xlu0 %1477 }
 0x2f9   :  { %v5052_v56 = vpop.eup %5051  ;;  %v1683_v60 = vadd.f32 1.0, %v5050_v1  ;;  %vm1594_vm15 = vcmp.eq.f32.partialorder %v1593_v9, 8.507059e+37 }
 0x2fa   :  { %v6305_v50 = vadd.f32 1.0, %v5052_v56  ;;  %v1588_v48 = vadd.f32 %v5048_v19, %v1587_v31  ;;  %v1600_v32 = vadd.f32 %v4687_v11, %v1599_v28 }
 0x2fb   :  { %5055 = vrcp.f32 %v1683_v60  ;;  %vm1689_vm1 = vweird.f32 %v1683_v60 }
 0x2fc   :  { %5057 = vrcp.f32 %v6305_v50  ;;  %v1592_v51 = vsel %vm1591_vm14, %v5048_v19, %v1588_v48  ;;  %v1487_v19 = vmul.f32 %v6312_v34, %v6147_v22  ;;  %vm1709_vm5 = vweird.f32 %v6305_v50 }
 0x2fd   :  { %v5054_v30 = vpop.eup %5053  ;;  %5059 = vtanh.f32 %v1600_v32  ;;  %v1597_v47 = vsel %vm1594_vm15, %v1596_v2, %v1592_v51  ;;  %v1695_v32 = vand.u32 2147483648, %v1683_v60  ;;  %v1693_v2 = vand.u32 2147483647, %v1683_v60  ;;  %v1676_v51 = vpop.f32.mrf.mxu2 }
 0x2fe   :  { %v1472_v62 = vmul.f32 %v5054_v30, %v1471_v52  ;;  %v1602_v1 = vsub.f32 1.0, %v1597_v47  ;;  %v1604_v31 = vmul.f32 %v1597_v47, %v6181_v54  ;;  %v1607_v47 = vmul.f32 %v6312_v34, %v6181_v54 }
 0x2ff   :  { %vm1694_vm3 = vcmp.eq.f32.partialorder %v1693_v2, 8.507059e+37 }
 0x300   :  { %v1474_v63 = vadd.f32 %v1473_v59, %v1472_v62 }
 0x301   :  { %v5056_v24 = vpop.eup %5055 }
 0x302   :  { %v6314_v23 = vpop.eup %5057  ;;  %v1685_v11 = vmul.f32 %v5056_v24, %v1683_v60  ;;  %v1480_v39 = vmul.f32 %v6310_v41, %v1474_v63  ;;  %vm1690_vm0 = vweird.f32 %v5056_v24  ;;  %v1696_v63 = vor.u32 1.1754944e-38, %v1695_v32 }
 0x303   :  { %v5060_v7 = vpop.eup %5059  ;;  %v1705_v37 = vmul.f32 %v6314_v23, %v6305_v50  ;;  %vm1691_vm2 = vmor %vm1689_vm1, %vm1690_vm0  ;;  %vm1710_vm4 = vweird.f32 %v6314_v23  ;;  %v1715_v60 = vand.u32 2147483648, %v6305_v50 }
 0x304   :  { %v1603_v56 = vmul.f32 %v5060_v7, %v1602_v1  ;;  %v1686_v28 = vsub.f32 1.0, %v1685_v11  ;;  %v6322_v9 = vadd.f32 %v1487_v19, %v1480_v39  ;;  %v6342_v1 = vld [vmem:[%s5455_s8 + $0x2] ss:$0 sm:$0xff]  ;;  %vm1711_vm6 = vmor %vm1709_vm5, %vm1710_vm4 }
 0x305   :  { %v1706_v48 = vsub.f32 1.0, %v1705_v37  ;;  %v1677_v11 = vadd.f32 %v6342_v1, %v1676_v51 }
 0x306   :  { %v1605_v30 = vadd.f32 %v1604_v31, %v1603_v56  ;;  %v1687_v52 = vmul.f32 %v5056_v24, %v1686_v28  ;;  %4704 = vmatmul.msk.f32.vlgmr.msra.gmra.mxu3 %vm197_vm7, %v6322_v9  ;;  %4705 = vmatmul.msk.f32.vlgmr.msrb.gmra.mxu0 %vm197_vm7, %v6322_v9  ;;  %1489 = vst.msk [vmem:[#allocation2 + $0x6] sm:$0x3] %vm328_vm8, %v6322_v9  ;;  %v4701_v31 = vld [vmem:[%s5415_s5 + $0x18] sm:$0x3] }
 0x307   :  { %v1707_v22 = vmul.f32 %v6314_v23, %v1706_v48  ;;  %4706 = vmatmul.msk.f32.vlgmr.msrb.gmra.mxu1 %vm197_vm7, %v6322_v9  ;;  %2044 = vmatpush.msra.mxu3 %v6160_v17  ;;  %v4709_v48 = vld [vmem:[%s5430_s17 + $0x18] sm:$0x3] }
 0x308   :  { %v1606_v59 = vmul.f32 %v1605_v30, %v6310_v41  ;;  %v1688_v62 = vadd.f32 %v5056_v24, %v1687_v52  ;;  %2122 = vmatpush.msrb.mxu0 %v5986_v42  ;;  %2142 = vmatpush.msrb.mxu1 %v5990_v53  ;;  %v4695_v42 = vld [vmem:[%s5445_s29 + $0x1c] sm:$0x3]  ;;  %v4710_v30 = vld [vmem:[%s5430_s17 + $0x1a] sm:$0x3] }
 0x309   :  { %2045 = vmatpush.msra.mxu3 %v6166_v38  ;;  %v1708_v54 = vadd.f32 %v6314_v23, %v1707_v22 }
 0x30a   :  { %v1692_v39 = vsel %vm1691_vm2, %v5056_v24, %v1688_v62  ;;  %v6345_v19 = vadd.f32 %v1607_v47, %v1606_v59  ;;  %2123 = vmatpush.msrb.mxu0 %v5999_v5  ;;  %2143 = vmatpush.msrb.mxu1 %v6003_v6  ;;  %v1713_v5 = vand.u32 2147483647, %v6305_v50 }
 0x30b   :  { %v1697_v53 = vsel %vm1694_vm3, %v1696_v63, %v1692_v39  ;;  %v1712_v24 = vsel %vm1711_vm6, %v6314_v23, %v1708_v54  ;;  %v6379_v23 = vpop.permute.xlu2 %1728 }
 0x30c   :  { %v1719_v7 = vmul.f32 %v1697_v53, %v1677_v11  ;;  %1609 = vst.msk [vmem:[#allocation3 + $0x6] sm:$0x3] %vm456_vm10, %v6345_v19  ;;  %4712 = vmatmul.msk.f32.vlgmr.msra.gmra.mxu2 %vm338_vm11, %v6345_v19  ;;  %2124 = vmatpush.msrb.mxu0 %v6007_v13  ;;  %v1716_v13 = vor.u32 1.1754944e-38, %v1715_v60  ;;  %vm1714_vm9 = vcmp.eq.f32.partialorder %v1713_v5, 8.507059e+37 }
 0x30d   :  { %2162 = vmatpush.msra.mxu2 %v6037_v25  ;;  %2144 = vmatpush.msrb.mxu1 %v6011_v27 }
 0x30e   :  { %v1720_v6 = vadd.f32 %v4695_v42, %v1719_v7  ;;  %4713 = vmatmul.msk.f32.vlgmr.msrb.gmra.mxu3 %vm338_vm11, %v6345_v19  ;;  %4714 = vmatmul.msk.f32.vlgmr.msra.gmra.mxu0 %vm338_vm11, %v6345_v19  ;;  %v1717_v27 = vsel %vm1714_vm9, %v1716_v13, %v1712_v24 }
 0x30f   :  { %2163 = vmatpush.msra.mxu2 %v6053_v58  ;;  %2125 = vmatpush.msrb.mxu0 %v6018_v16  ;;  %v1722_v25 = vsub.f32 1.0, %v1717_v27  ;;  %v1724_v50 = vmul.f32 %v1717_v27, %v6214_v15 }
 0x310   :  { %5061 = vtanh.f32 %v1720_v6  ;;  %2145 = vmatpush.msrb.mxu1 %v6022_v20  ;;  %2244 = vmatpush.msrb.mxu3 %v6041_v29  ;;  %v6377_v29 = vpop.permute.xlu0 %1735  ;;  %v4717_v6 = vld [vmem:[%s5445_s29 + $0x12] sm:$0x3] }
 0x311   :  { %2164 = vmatpush.msra.mxu2 %v6068_v36  ;;  %2264 = vmatpush.msra.mxu0 %v6045_v18 }
 0x312   :  { %2245 = vmatpush.msrb.mxu3 %v6060_v57  ;;  %v1738_v57 = vmul.f32 %v6377_v29, %v6214_v15 }
 0x313   :  { %2165 = vmatpush.msra.mxu2 %v6074_v46  ;;  %2265 = vmatpush.msra.mxu0 %v6064_v49  ;;  %v4702_v49 = vld [vmem:[%s5415_s5 + $0x1a] sm:$0x3] }
 0x316   :  { %v5062_v16 = vpop.eup %5061 }
 0x317   :  { %v1723_v58 = vmul.f32 %v5062_v16, %v1722_v25 }
 0x319   :  { %v1725_v20 = vadd.f32 %v1724_v50, %v1723_v58  ;;  %v4718_v50 = vld [vmem:[%s5445_s29 + $0x14] sm:$0x3] }
 0x31b   :  { %v1731_v18 = vmul.f32 %v6379_v23, %v1725_v20 }
 0x31d   :  { %v6384_v36 = vadd.f32 %v1738_v57, %v1731_v18 }
 0x31f   :  { %4720 = vmatmul.msk.f32.vlgmr.msra.gmra.mxu1 %vm338_vm11, %v6384_v36  ;;  %1740 = vst.msk [vmem:[#allocation4 + $0x8] sm:$0x3] %vm456_vm10, %v6384_v36  ;;  %4721 = vmatmul.msk.f32.vlgmr.msrb.gmra.mxu2 %vm338_vm11, %v6384_v36 }
 0x320   :  { %4722 = vmatmul.msk.f32.vlgmr.msra.gmra.mxu3 %vm338_vm11, %v6384_v36  ;;  %2364 = vmatpush.msrb.mxu2 %v6090_v61 }
 0x321   :  { %2284 = vmatpush.msra.mxu1 %v6086_v4  ;;  %2384 = vmatpush.msra.mxu3 %v6094_v10 }
 0x322   :  { %2365 = vmatpush.msrb.mxu2 %v6102_v26 }
 0x323   :  { %2285 = vmatpush.msra.mxu1 %v6098_v55  ;;  %2385 = vmatpush.msra.mxu3 %v6106_v33 }
 0x383   :  { %v1787_v46 = vpop.f32.mrf.mxu0 }
 0x384   :  { %v1788_v15 = vadd.f32 %v6237_v44, %v1787_v46  ;;  %v1807_v51 = vpop.f32.mrf.mxu1 }
 0x386   :  { %v1830_v37 = vadd.f32 %v4702_v49, %v1788_v15 }
 0x388   :  { %v4708_v56 = vmul.f32 -1.442695, %v1830_v37 }
 0x389   :  { %v1767_v61 = vpop.f32.mrf.mxu3 }
 0x38a   :  { %5063 = vpow2.f32 %v4708_v56  ;;  %v1768_v4 = vadd.f32 %v6233_v43, %v1767_v61  ;;  %v1808_v61 = vadd.f32 %v6274_v21, %v1807_v51 }
 0x38c   :  { %v1810_v28 = vadd.f32 %v4701_v31, %v1768_v4 }
 0x38e   :  { %v4707_v10 = vmul.f32 -1.442695, %v1810_v28 }
 0x38f   :  { %v1887_v26 = vpop.f32.mrf.mxu2 }
 0x390   :  { %v5064_v32 = vpop.eup %5063  ;;  %5065 = vpow2.f32 %v4707_v10  ;;  %v1888_v55 = vadd.f32 %v6242_v0, %v1887_v26 }
 0x391   :  { %v6406_v33 = vadd.f32 1.0, %v5064_v32  ;;  %v1907_v52 = vpop.f32.mrf.mxu3 }
 0x392   :  { %v1930_v2 = vadd.f32 %v4709_v48, %v1888_v55  ;;  %v1908_v22 = vadd.f32 %v6247_v45, %v1907_v52 }
 0x393   :  { %5067 = vrcp.f32 %v6406_v33  ;;  %v1844_v31 = vand.u32 2147483647, %v6406_v33  ;;  %v1846_v48 = vand.u32 2147483648, %v6406_v33  ;;  %vm1840_vm2 = vweird.f32 %v6406_v33 }
 0x394   :  { %v4715_v59 = vmul.f32 -1.442695, %v1930_v2  ;;  %v1950_v62 = vadd.f32 %v4710_v30, %v1908_v22  ;;  %v1927_v30 = vpop.f32.mrf.mxu0 }
 0x395   :  { %vm1845_vm5 = vcmp.eq.f32.partialorder %v1844_v31, 8.507059e+37 }
 0x396   :  { %v5066_v47 = vpop.eup %5065  ;;  %5069 = vpow2.f32 %v4715_v59  ;;  %v4716_v63 = vmul.f32 -1.442695, %v1950_v62  ;;  %v4703_v59 = vld [vmem:[%s5415_s5 + $0x1c] sm:$0x3] }
 0x397   :  { %v1814_v11 = vadd.f32 1.0, %v5066_v47 }
 0x398   :  { %5071 = vpow2.f32 %v4716_v63 }
 0x399   :  { %5073 = vrcp.f32 %v1814_v11  ;;  %v6411_v39 = vpop.eup %5067  ;;  %v1824_v18 = vand.u32 2147483647, %v1814_v11  ;;  %v1826_v57 = vand.u32 2147483648, %v1814_v11  ;;  %vm1820_vm13 = vweird.f32 %v1814_v11 }
 0x39a   :  { %v1836_v54 = vmul.f32 %v6411_v39, %v6406_v33  ;;  %vm1841_vm14 = vweird.f32 %v6411_v39 }
 0x39b   :  { %vm1825_vm0 = vcmp.eq.f32.partialorder %v1824_v18, 8.507059e+37  ;;  %v1827_v26 = vor.u32 1.1754944e-38, %v1826_v57  ;;  %vm6440_vm3 = vmor %vm1840_vm2, %vm1841_vm14 }
 0x39c   :  { %v5070_v42 = vpop.eup %5069  ;;  %v2007_v53 = vpop.f32.mrf.mxu1  ;;  %v1837_v25 = vsub.f32 1.0, %v1836_v54  ;;  %v1928_v54 = vadd.f32 %v6299_v12, %v1927_v30 }
 0x39d   :  { %v6415_v60 = vadd.f32 1.0, %v5070_v42  ;;  %v2008_v7 = vadd.f32 %v6263_v8, %v2007_v53 }
 0x39e   :  { %v5072_v5 = vpop.eup %5071  ;;  %v1838_v56 = vmul.f32 %v6411_v39, %v1837_v25 }
 0x39f   :  { %v5074_v24 = vpop.eup %5073  ;;  %5075 = vrcp.f32 %v6415_v60  ;;  %v6420_v27 = vadd.f32 1.0, %v5072_v5  ;;  %v2050_v16 = vadd.f32 %v4717_v6, %v2008_v7  ;;  %v1944_v2 = vand.u32 2147483647, %v6415_v60 }
 0x3a0   :  { %v1816_v13 = vmul.f32 %v5074_v24, %v1814_v11  ;;  %vm1821_vm12 = vweird.f32 %v5074_v24  ;;  %v1839_v51 = vadd.f32 %v6411_v39, %v1838_v56  ;;  %v1946_v47 = vand.u32 2147483648, %v6415_v60 }
 0x3a1   :  { %5077 = vrcp.f32 %v6420_v27  ;;  %v4723_v49 = vmul.f32 -1.442695, %v2050_v16  ;;  %vm1822_vm15 = vmor %vm1820_vm13, %vm1821_vm12  ;;  %vm1940_vm4 = vweird.f32 %v6415_v60  ;;  %vm1945_vm9 = vcmp.eq.f32.partialorder %v1944_v2, 8.507059e+37 }
 0x3a2   :  { %v1817_v58 = vsub.f32 1.0, %v1816_v13  ;;  %v2027_v20 = vpop.f32.mrf.mxu2  ;;  %v1843_v33 = vsel %vm6440_vm3, %v6411_v39, %v1839_v51  ;;  %v1947_v25 = vor.u32 1.1754944e-38, %v1946_v47  ;;  %vm1960_vm13 = vweird.f32 %v6420_v27 }
 0x3a3   :  { %v2028_v15 = vadd.f32 %v6267_v40, %v2027_v20  ;;  %5079 = vpow2.f32 %v4723_v49  ;;  %v4711_v20 = vld [vmem:[%s5430_s17 + $0x1c] sm:$0x3]  ;;  %v1964_v39 = vand.u32 2147483647, %v6420_v27 }
 0x3a4   :  { %v1818_v46 = vmul.f32 %v5074_v24, %v1817_v58  ;;  %v1847_v58 = vor.u32 1.1754944e-38, %v1846_v48 }
 0x3a5   :  { %v5076_v37 = vpop.eup %5075  ;;  %v2070_v10 = vadd.f32 %v4718_v50, %v2028_v15  ;;  %v1966_v15 = vand.u32 2147483648, %v6420_v27 }
 0x3a6   :  { %v1819_v4 = vadd.f32 %v5074_v24, %v1818_v46  ;;  %v1936_v28 = vmul.f32 %v5076_v37, %v6415_v60  ;;  %vm1941_vm1 = vweird.f32 %v5076_v37  ;;  %v1848_v49 = vsel %vm1845_vm5, %v1847_v58, %v1843_v33 }
 0x3a7   :  { %v5078_v32 = vpop.eup %5077  ;;  %v4724_v22 = vmul.f32 -1.442695, %v2070_v10  ;;  %vm1942_vm6 = vmor %vm1940_vm4, %vm1941_vm1  ;;  %v1855_v48 = vmul.f32 %v1848_v49, %v6322_v9 }
 0x3a8   :  { %v1823_v55 = vsel %vm1822_vm15, %v5074_v24, %v1819_v4  ;;  %v1937_v52 = vsub.f32 1.0, %v1936_v28  ;;  %v1956_v63 = vmul.f32 %v5078_v32, %v6420_v27  ;;  %vm1961_vm12 = vweird.f32 %v5078_v32 }
 0x3a9   :  { %v1828_v62 = vsel %vm1825_vm0, %v1827_v26, %v1823_v55  ;;  %5081 = vpow2.f32 %v4724_v22  ;;  %v5080_v53 = vpop.eup %5079  ;;  %vm1962_vm14 = vmor %vm1960_vm13, %vm1961_vm12  ;;  %v1967_v28 = vor.u32 1.1754944e-38, %v1966_v15  ;;  %vm1965_vm15 = vcmp.eq.f32.partialorder %v1964_v39, 8.507059e+37 }
 0x3aa   :  { %v1850_v11 = vmul.f32 %v1828_v62, %v1808_v61  ;;  %v1938_v42 = vmul.f32 %v5076_v37, %v1937_v52  ;;  %v1957_v7 = vsub.f32 1.0, %v1956_v63  ;;  %v6445_v13 = vadd.f32 1.0, %v5080_v53  ;;  %v2047_v53 = vpop.f32.mrf.mxu3 }
 0x3ac   :  { %v1851_v6 = vadd.f32 %v4703_v59, %v1850_v11  ;;  %v1939_v24 = vadd.f32 %v5076_v37, %v1938_v42  ;;  %v1958_v16 = vmul.f32 %v5078_v32, %v1957_v7  ;;  %v1858_v59 = vmul.f32 %v6377_v29, %v6322_v9 }
 0x3ad   :  { %v2064_v11 = vand.u32 2147483647, %v6445_v13  ;;  %vm2060_vm1 = vweird.f32 %v6445_v13 }
 0x3ae   :  { %5083 = vtanh.f32 %v1851_v6  ;;  %v1943_v50 = vsel %vm1942_vm6, %v5076_v37, %v1939_v24  ;;  %v1959_v57 = vadd.f32 %v5078_v32, %v1958_v16  ;;  %v1853_v37 = vsub.f32 1.0, %v1848_v49 }
 0x3af   :  { %v1948_v18 = vsel %vm1945_vm9, %v1947_v25, %v1943_v50  ;;  %5085 = vrcp.f32 %v6445_v13  ;;  %v5082_v60 = vpop.eup %5081  ;;  %v2048_v25 = vadd.f32 %v6342_v1, %v2047_v53  ;;  %vm2065_vm3 = vcmp.eq.f32.partialorder %v2064_v11, 8.507059e+37  ;;  %v6608_v53 = vld [vmem:[%s5450_s3] sm:$0xff] }
 0x3b0   :  { %v1970_v46 = vmul.f32 %v1948_v18, %v1928_v54  ;;  %v6455_v56 = vadd.f32 1.0, %v5082_v60  ;;  %v1963_v61 = vsel %vm1962_vm14, %v5078_v32, %v1959_v57  ;;  %v2066_v32 = vand.u32 2147483648, %v6445_v13  ;;  %v6490_v18 = vld [vmem:[%s5420_s9 + $0x18] sm:$0xff] }
 0x3b1   :  { %v1968_v55 = vsel %vm1965_vm15, %v1967_v28, %v1963_v61  ;;  %v6494_v57 = vld [vmem:[%s5420_s9 + $0x38] sm:$0xff]  ;;  %v6534_v61 = vld [vmem:[%s5420_s9 + $0x28] sm:$0xff]  ;;  %v6542_v28 = vld [vmem:[%s5420_s9 + $0x50] sm:$0xff] }
 0x3b2   :  { %v1971_v31 = vadd.f32 %v4711_v20, %v1970_v46  ;;  %5087 = vrcp.f32 %v6455_v56  ;;  %v1973_v22 = vsub.f32 1.0, %v1968_v55  ;;  %v1975_v42 = vmul.f32 %v1968_v55, %v6345_v19  ;;  %v6509_v46 = vld [vmem:[%s5420_s9 + $0x30] sm:$0xff]  ;;  %v6558_v55 = vld [vmem:[%s5420_s9 + $0x48] sm:$0xff] }
 0x3b3   :  { %v2067_v9 = vor.u32 1.1754944e-38, %v2066_v32  ;;  %v1978_v20 = vmul.f32 %v6377_v29, %v6345_v19  ;;  %vm2080_vm5 = vweird.f32 %v6455_v56  ;;  %v2084_v19 = vand.u32 2147483647, %v6455_v56  ;;  %v6574_v32 = vld [vmem:[%s5435_s21 + $0x10] sm:$0xff] }
 0x3b4   :  { %v5084_v4 = vpop.eup %5083  ;;  %5089 = vtanh.f32 %v1971_v31 }
 0x3b5   :  { %v5086_v10 = vpop.eup %5085  ;;  %v1854_v26 = vmul.f32 %v5084_v4, %v1853_v37  ;;  %v6530_v37 = vld [vmem:[%s5420_s9 + $0x58] sm:$0xff]  ;;  %vm2085_vm9 = vcmp.eq.f32.partialorder %v2084_v19, 8.507059e+37 }
 0x3b6   :  { %v2056_v30 = vmul.f32 %v5086_v10, %v6445_v13  ;;  %vm2061_vm0 = vweird.f32 %v5086_v10  ;;  %v4719_v13 = vld [vmem:[%s5445_s29 + $0x16] sm:$0x3]  ;;  %v4733_v19 = vld [vmem:[%s5430_s17 + $0x1e] sm:$0x3] }
 0x3b7   :  { %v1856_v27 = vadd.f32 %v1855_v48, %v1854_v26  ;;  %vm2062_vm2 = vmor %vm2060_vm1, %vm2061_vm0  ;;  %v6550_v48 = vld [vmem:[%s5420_s9 + $0x20] sm:$0xff]  ;;  %v6554_v26 = vld [vmem:[%s5435_s21 + $0x8] sm:$0xff] }
 0x3b8   :  { %v2057_v52 = vsub.f32 1.0, %v2056_v30  ;;  %v6460_v2 = vpop.eup %5087  ;;  %v6562_v30 = vld [vmem:[%s5435_s21 + $0x18] sm:$0xff] }
 0x3b9   :  { %v1857_v51 = vmul.f32 %v1856_v27, %v6379_v23  ;;  %v2076_v47 = vmul.f32 %v6460_v2, %v6455_v56  ;;  %vm2081_vm4 = vweird.f32 %v6460_v2 }
 0x3ba   :  { %v5090_v62 = vpop.eup %5089  ;;  %v2058_v63 = vmul.f32 %v5086_v10, %v2057_v52  ;;  %vm6514_vm6 = vmor %vm2080_vm5, %vm2081_vm4  ;;  %v6566_v52 = vld [vmem:[%s5435_s21] sm:$0xff] }
 0x3bb   :  { %v6470_v54 = vadd.f32 %v1858_v59, %v1857_v51  ;;  %v1974_v7 = vmul.f32 %v5090_v62, %v1973_v22  ;;  %v2077_v5 = vsub.f32 1.0, %v2076_v47  ;;  %v6570_v22 = vld [vmem:[%s5420_s9 + $0x40] sm:$0xff] }
 0x3bc   :  { %v2059_v6 = vadd.f32 %v5086_v10, %v2058_v63  ;;  %v2098_v63 = vmul.f32 %v6384_v36, %v6312_v34  ;;  %v6596_v34 = vld [vmem:[%s5450_s3 + $0x8] sm:$0xff] }
 0x3bd   :  { %4728 = vmatmul.msk.f32.vlgmr.msrb.gmra.mxu0 %vm197_vm7, %v6470_v54  ;;  %4729 = vmatmul.msk.f32.vlgmr.msrb.gmra.mxu1 %vm197_vm7, %v6470_v54  ;;  %v1976_v24 = vadd.f32 %v1975_v42, %v1974_v7  ;;  %1860 = vst.msk [vmem:[#allocation2 + $0x8] sm:$0x3] %vm328_vm8, %v6470_v54  ;;  %v2078_v33 = vmul.f32 %v6460_v2, %v2077_v5  ;;  %v6604_v42 = vld [vmem:[%s5435_s21 + $0x20] sm:$0xff]  ;;  %v6612_v7 = vld [vmem:[%s5450_s3 + $0x10] sm:$0xff]  ;;  %v4725_v5 = vld [vmem:[%s5415_s5 + $0x1e] sm:$0x3] }
 0x3be   :  { %v2063_v16 = vsel %vm2062_vm2, %v5086_v10, %v2059_v6  ;;  %4730 = vmatmul.msk.f32.vlgmr.msra.gmra.mxu2 %vm197_vm7, %v6470_v54  ;;  %2404 = vmatpush.msrb.mxu0 %v6160_v17  ;;  %v2086_v17 = vand.u32 2147483648, %v6455_v56  ;;  %v6526_v56 = vld [vmem:[%s5420_s9 + $0x8] sm:$0xff]  ;;  %v6546_v10 = vld [vmem:[%s5420_s9] sm:$0xff] }
 0x3bf   :  { %v2068_v58 = vsel %vm2065_vm3, %v2067_v9, %v2063_v16  ;;  %v1977_v50 = vmul.f32 %v1976_v24, %v6379_v23  ;;  %2482 = vmatpush.msrb.mxu1 %v6490_v18  ;;  %2502 = vmatpush.msra.mxu2 %v6494_v57  ;;  %v2079_v60 = vadd.f32 %v6460_v2, %v2078_v33  ;;  %v6505_v23 = vld [vmem:[%s5420_s9 + $0x10] sm:$0xff]  ;;  %v4726_v9 = vld [vmem:[%s5415_s5 + $0x20] sm:$0x3]  ;;  %s7378_s9 = sld [smem:[#allocation11_spill]] }
 0x3c0   :  { %v2090_v49 = vmul.f32 %v2068_v58, %v2048_v25  ;;  %2405 = vmatpush.msrb.mxu0 %v6166_v38  ;;  %v2087_v31 = vor.u32 1.1754944e-38, %v2086_v17 }
 0x3c1   :  { %v6502_v29 = vadd.f32 %v1978_v20, %v1977_v50  ;;  %2483 = vmatpush.msrb.mxu1 %v6505_v23  ;;  %2503 = vmatpush.msra.mxu2 %v6509_v46  ;;  %v2083_v39 = vsel %vm6514_vm6, %v6460_v2, %v2079_v60  ;;  %v4734_v20 = vld [vmem:[%s5430_s17 + $0x20] sm:$0x3] }
 0x3c2   :  { %v2091_v15 = vadd.f32 %v4719_v13, %v2090_v49  ;;  %v2088_v4 = vsel %vm2085_vm9, %v2087_v31, %v2083_v39 }
 0x3c3   :  { %4736 = vmatmul.msk.f32.vlgmr.msrb.gmra.mxu3 %vm338_vm11, %v6502_v29  ;;  %1980 = vst.msk [vmem:[#allocation3 + $0x8] sm:$0x3] %vm456_vm10, %v6502_v29  ;;  %2484 = vmatpush.msrb.mxu1 %v6526_v56  ;;  %v2093_v27 = vsub.f32 1.0, %v2088_v4  ;;  %v2095_v59 = vmul.f32 %v2088_v4, %v6384_v36  ;;  %v6600_v36 = vld [vmem:[%s5450_s3 + $0x18] sm:$0xff] }
 0x3c4   :  { %5091 = vtanh.f32 %v2091_v15  ;;  %2522 = vmatpush.msrb.mxu3 %v6530_v37  ;;  %2504 = vmatpush.msra.mxu2 %v6534_v61 }
 0x3c5   :  { %4737 = vmatmul.msk.f32.vlgmr.msra.gmra.mxu0 %vm338_vm11, %v6502_v29  ;;  %4738 = vmatmul.msk.f32.vlgmr.msra.gmra.mxu1 %vm338_vm11, %v6502_v29 }
 0x3c6   :  { %2523 = vmatpush.msrb.mxu3 %v6542_v28  ;;  %2485 = vmatpush.msrb.mxu1 %v6546_v10 }
 0x3c7   :  { %2505 = vmatpush.msra.mxu2 %v6550_v48  ;;  %2604 = vmatpush.msra.mxu0 %v6554_v26 }
 0x3c8   :  { %2524 = vmatpush.msrb.mxu3 %v6558_v55  ;;  %2624 = vmatpush.msra.mxu1 %v6562_v30 }
 0x3c9   :  { %2605 = vmatpush.msra.mxu0 %v6566_v52 }
 0x3ca   :  { %v5092_v2 = vpop.eup %5091  ;;  %2525 = vmatpush.msrb.mxu3 %v6570_v22  ;;  %2625 = vmatpush.msra.mxu1 %v6574_v32 }
 0x3cb   :  { %v2094_v51 = vmul.f32 %v5092_v2, %v2093_v27 }
 0x3cd   :  { %v2096_v62 = vadd.f32 %v2095_v59, %v2094_v51 }
 0x3cf   :  { %v2097_v47 = vmul.f32 %v2096_v62, %v6310_v41  ;;  %v6592_v41 = vld [vmem:[%s5435_s21 + $0x28] sm:$0xff]  ;;  %s7381_s21 = sld [smem:[#allocation15_spill]] }
 0x3d1   :  { %v6581_v11 = vadd.f32 %v2098_v63, %v2097_v47 }
 0x3d3   :  { %2100 = vst.msk [vmem:[#allocation4 + $0x6] sm:$0x3] %vm456_vm10, %v6581_v11  ;;  %4744 = vmatmul.msk.f32.vlgmr.msrb.gmra.mxu2 %vm338_vm11, %v6581_v11  ;;  %4745 = vmatmul.msk.f32.vlgmr.msra.gmra.mxu3 %vm338_vm11, %v6581_v11 }
 0x3d4   :  { %4746 = vmatmul.msk.f32.vlgmr.msrb.gmra.mxu0 %vm338_vm11, %v6581_v11  ;;  %2644 = vmatpush.msrb.mxu2 %v6592_v41 }
 0x3d5   :  { %2724 = vmatpush.msra.mxu3 %v6596_v34  ;;  %2744 = vmatpush.msrb.mxu0 %v6600_v36 }
 0x3d6   :  { %2645 = vmatpush.msrb.mxu2 %v6604_v42 }
 0x3d7   :  { %2725 = vmatpush.msra.mxu3 %v6608_v53  ;;  %2745 = vmatpush.msrb.mxu0 %v6612_v7 }
 0x43a   :  { %v2127_v6 = vpop.f32.mrf.mxu0  ;;  %v2147_v24 = vpop.f32.mrf.mxu1 }
 0x43b   :  { %v2128_v33 = vadd.f32 %v6233_v43, %v2127_v6  ;;  %v2148_v25 = vadd.f32 %v6237_v44, %v2147_v24 }
 0x43d   :  { %v2170_v16 = vadd.f32 %v4725_v5, %v2128_v33  ;;  %v2190_v13 = vadd.f32 %v4726_v9, %v2148_v25 }
 0x43f   :  { %v4731_v58 = vmul.f32 -1.442695, %v2170_v16  ;;  %v4732_v50 = vmul.f32 -1.442695, %v2190_v13 }
 0x441   :  { %5093 = vpow2.f32 %v4731_v58  ;;  %v2167_v2 = vpop.f32.mrf.mxu2 }
 0x442   :  { %5095 = vpow2.f32 %v4732_v50  ;;  %v2267_v17 = vpop.f32.mrf.mxu0 }
 0x443   :  { %v2268_v60 = vadd.f32 %v6247_v45, %v2267_v17  ;;  %v4741_v17 = vld [vmem:[%s5445_s29 + $0xc] sm:$0x3] }
 0x445   :  { %v2310_v49 = vadd.f32 %v4734_v20, %v2268_v60 }
 0x446   :  { %v2247_v38 = vpop.f32.mrf.mxu3 }
 0x447   :  { %v5094_v15 = vpop.eup %5093  ;;  %v2248_v39 = vadd.f32 %v6242_v0, %v2247_v38  ;;  %v4740_v31 = vmul.f32 -1.442695, %v2310_v49  ;;  %v4742_v38 = vld [vmem:[%s5445_s29 + $0xe] sm:$0x3] }
 0x448   :  { %v5096_v43 = vpop.eup %5095  ;;  %v2174_v4 = vadd.f32 1.0, %v5094_v15 }
 0x449   :  { %v2194_v44 = vadd.f32 1.0, %v5096_v43  ;;  %v2290_v27 = vadd.f32 %v4733_v19, %v2248_v39  ;;  %5097 = vpow2.f32 %v4740_v31  ;;  %v2168_v39 = vadd.f32 %v6274_v21, %v2167_v2  ;;  %v4727_v43 = vld [vmem:[%s5415_s5 + $0x22] sm:$0x3] }
 0x44a   :  { %5099 = vrcp.f32 %v2174_v4  ;;  %v2186_v24 = vand.u32 2147483648, %v2174_v4  ;;  %v2184_v25 = vand.u32 2147483647, %v2174_v4  ;;  %vm2180_vm13 = vweird.f32 %v2174_v4 }
 0x44b   :  { %5101 = vrcp.f32 %v2194_v44  ;;  %v4739_v51 = vmul.f32 -1.442695, %v2290_v27  ;;  %vm2200_vm1 = vweird.f32 %v2194_v44 }
 0x44c   :  { %v2187_v49 = vor.u32 1.1754944e-38, %v2186_v24  ;;  %vm2185_vm15 = vcmp.eq.f32.partialorder %v2184_v25, 8.507059e+37 }
 0x44d   :  { %5103 = vpow2.f32 %v4739_v51 }
 0x44f   :  { %v5098_v59 = vpop.eup %5097 }
 0x450   :  { %v5100_v62 = vpop.eup %5099  ;;  %v6623_v45 = vadd.f32 1.0, %v5098_v59  ;;  %v2206_v59 = vand.u32 2147483648, %v2194_v44 }
 0x451   :  { %v5102_v47 = vpop.eup %5101  ;;  %v2176_v63 = vmul.f32 %v5100_v62, %v2174_v4  ;;  %vm2181_vm12 = vweird.f32 %v5100_v62 }
 0x452   :  { %v2196_v5 = vmul.f32 %v5102_v47, %v2194_v44  ;;  %5105 = vrcp.f32 %v6623_v45  ;;  %vm2182_vm14 = vmor %vm2180_vm13, %vm2181_vm12  ;;  %vm2201_vm0 = vweird.f32 %v5102_v47  ;;  %v2207_v24 = vor.u32 1.1754944e-38, %v2206_v59  ;;  %v4735_v59 = vld [vmem:[%s5430_s17 + $0x22] sm:$0x3] }
 0x453   :  { %v2177_v0 = vsub.f32 1.0, %v2176_v63  ;;  %v5104_v6 = vpop.eup %5103  ;;  %vm2202_vm2 = vmor %vm2200_vm1, %vm2201_vm0  ;;  %vm2320_vm13 = vweird.f32 %v6623_v45 }
 0x454   :  { %v2197_v9 = vsub.f32 1.0, %v2196_v5  ;;  %v6626_v16 = vadd.f32 1.0, %v5104_v6 }
 0x455   :  { %v2178_v33 = vmul.f32 %v5100_v62, %v2177_v0 }
 0x456   :  { %v2198_v13 = vmul.f32 %v5102_v47, %v2197_v9  ;;  %v2367_v58 = vpop.f32.mrf.mxu2  ;;  %v2387_v50 = vpop.f32.mrf.mxu3  ;;  %5107 = vrcp.f32 %v6626_v16  ;;  %vm2300_vm5 = vweird.f32 %v6626_v16 }
 0x457   :  { %v2179_v20 = vadd.f32 %v5100_v62, %v2178_v33  ;;  %v2368_v19 = vadd.f32 %v6263_v8, %v2367_v58  ;;  %v2388_v15 = vadd.f32 %v6267_v40, %v2387_v50  ;;  %v2204_v8 = vand.u32 2147483647, %v2194_v44  ;;  %v2287_v50 = vpop.f32.mrf.mxu1 }
 0x458   :  { %v6630_v60 = vpop.eup %5105  ;;  %v2199_v4 = vadd.f32 %v5102_v47, %v2198_v13  ;;  %v2306_v58 = vand.u32 2147483648, %v6626_v16 }
 0x459   :  { %v2183_v31 = vsel %vm2182_vm14, %v5100_v62, %v2179_v20  ;;  %v2410_v51 = vadd.f32 %v4741_v17, %v2368_v19  ;;  %v2316_v5 = vmul.f32 %v6630_v60, %v6623_v45  ;;  %v2430_v0 = vadd.f32 %v4742_v38, %v2388_v15 }
 0x45a   :  { %v2188_v27 = vsel %vm2185_vm15, %v2187_v49, %v2183_v31  ;;  %v2203_v2 = vsel %vm2202_vm2, %v5102_v47, %v2199_v4  ;;  %vm2205_vm3 = vcmp.eq.f32.partialorder %v2204_v8, 8.507059e+37  ;;  %v2304_v20 = vand.u32 2147483647, %v6626_v16 }
 0x45b   :  { %v2210_v63 = vmul.f32 %v2188_v27, %v2168_v39  ;;  %v4747_v6 = vmul.f32 -1.442695, %v2410_v51  ;;  %v4748_v21 = vmul.f32 -1.442695, %v2430_v0  ;;  %v2317_v33 = vsub.f32 1.0, %v2316_v5 }
 0x45c   :  { %v5108_v9 = vpop.eup %5107  ;;  %v2208_v13 = vsel %vm2205_vm3, %v2207_v24, %v2203_v2  ;;  %vm2321_vm6 = vweird.f32 %v6630_v60  ;;  %v2288_v15 = vadd.f32 %v6299_v12, %v2287_v50  ;;  %v2307_v39 = vor.u32 1.1754944e-38, %v2306_v58 }
 0x45d   :  { %v2211_v40 = vadd.f32 %v4727_v43, %v2210_v63  ;;  %v2296_v62 = vmul.f32 %v5108_v9, %v6626_v16  ;;  %5109 = vpow2.f32 %v4747_v6  ;;  %vm2301_vm4 = vweird.f32 %v5108_v9  ;;  %vm2322_vm14 = vmor %vm2320_vm13, %vm2321_vm6 }
 0x45e   :  { %v2318_v17 = vmul.f32 %v6630_v60, %v2317_v33  ;;  %v2213_v49 = vsub.f32 1.0, %v2208_v13  ;;  %vm2302_vm9 = vmor %vm2300_vm5, %vm2301_vm4  ;;  %v2215_v4 = vmul.f32 %v2208_v13, %v6470_v54  ;;  %vm2305_vm12 = vcmp.eq.f32.partialorder %v2304_v20, 8.507059e+37  ;;  %v6684_v20 = vld [vmem:[%s5450_s3 + $0x20] sm:$0xff] }
 0x45f   :  { %5111 = vtanh.f32 %v2211_v40  ;;  %v2297_v25 = vsub.f32 1.0, %v2296_v62  ;;  %v2326_v12 = vand.u32 2147483648, %v6623_v45  ;;  %v2324_v6 = vand.u32 2147483647, %v6623_v45 }
 0x460   :  { %5113 = vpow2.f32 %v4748_v21  ;;  %v2319_v5 = vadd.f32 %v6630_v60, %v2318_v17  ;;  %v2218_v21 = vmul.f32 %v6470_v54, %v6209_v3 }
 0x461   :  { %v2298_v44 = vmul.f32 %v5108_v9, %v2297_v25  ;;  %v2327_v62 = vor.u32 1.1754944e-38, %v2326_v12  ;;  %vm2325_vm15 = vcmp.eq.f32.partialorder %v2324_v6, 8.507059e+37  ;;  %v7364_v12 = vld [vmem:[#allocation33_spill] sm:$0xff] }
 0x462   :  { %v2323_v2 = vsel %vm2322_vm14, %v6630_v60, %v2319_v5  ;;  %v6676_v60 = vld [vmem:[%s5450_s3 + $0x28] sm:$0xff]  ;;  %s7384_s3 = sld [smem:[#allocation18_spill]] }
 0x463   :  { %v5110_v47 = vpop.eup %5109  ;;  %v2299_v19 = vadd.f32 %v5108_v9, %v2298_v44  ;;  %v2328_v45 = vsel %vm2325_vm15, %v2327_v62, %v2323_v2  ;;  %v4757_v2 = vld [vmem:[%s5430_s17 + $0x24] sm:$0x3]  ;;  %v6754_v62 = vld [vmem:[%s5440_s25] ss:$0 sm:$0xff] }
 0x464   :  { %v6646_v31 = vadd.f32 1.0, %v5110_v47  ;;  %v2333_v50 = vsub.f32 1.0, %v2328_v45 }
 0x465   :  { %v5112_v38 = vpop.eup %5111  ;;  %v2303_v51 = vsel %vm2302_vm9, %v5108_v9, %v2299_v19 }
 0x466   :  { %v5114_v43 = vpop.eup %5113  ;;  %v2214_v27 = vmul.f32 %v5112_v38, %v2213_v49  ;;  %v2308_v63 = vsel %vm2305_vm12, %v2307_v39, %v2303_v51  ;;  %5115 = vrcp.f32 %v6646_v31  ;;  %v2426_v44 = vand.u32 2147483648, %v6646_v31  ;;  %v2407_v38 = vpop.f32.mrf.mxu0 }
 0x467   :  { %v6652_v16 = vadd.f32 1.0, %v5114_v43  ;;  %v2330_v8 = vmul.f32 %v2308_v63, %v2288_v15  ;;  %v2424_v19 = vand.u32 2147483647, %v6646_v31  ;;  %vm2420_vm1 = vweird.f32 %v6646_v31 }
 0x468   :  { %v2216_v0 = vadd.f32 %v2215_v4, %v2214_v27  ;;  %v2427_v27 = vor.u32 1.1754944e-38, %v2426_v44 }
 0x469   :  { %5117 = vrcp.f32 %v6652_v16  ;;  %v2331_v40 = vadd.f32 %v4735_v59, %v2330_v8  ;;  %vm2425_vm3 = vcmp.eq.f32.partialorder %v2424_v19, 8.507059e+37  ;;  %v2446_v59 = vand.u32 2147483648, %v6652_v16 }
 0x46a   :  { %v2217_v9 = vmul.f32 %v2216_v0, %v6207_v14  ;;  %vm2440_vm5 = vweird.f32 %v6652_v16 }
 0x46b   :  { %5119 = vtanh.f32 %v2331_v40 }
 0x46c   :  { %v6664_v24 = vadd.f32 %v2218_v21, %v2217_v9  ;;  %v5116_v33 = vpop.eup %5115 }
 0x46d   :  { %v2416_v25 = vmul.f32 %v5116_v33, %v6646_v31  ;;  %vm2421_vm0 = vweird.f32 %v5116_v33 }
 0x46e   :  { %4752 = vmatmul.msk.f32.vlgmr.msrb.gmra.mxu1 %vm197_vm7, %v6664_v24  ;;  %4753 = vmatmul.msk.f32.vlgmr.msra.gmra.mxu2 %vm197_vm7, %v6664_v24  ;;  %2220 = vst.msk [vmem:[#allocation2 + $0xa] sm:$0x3] %vm328_vm8, %v6664_v24  ;;  %vm2422_vm2 = vmor %vm2420_vm1, %vm2421_vm0 }
 0x46f   :  { %v5118_v54 = vpop.eup %5117  ;;  %4754 = vmatmul.msk.f32.vlgmr.msrb.gmra.mxu3 %vm197_vm7, %v6664_v24  ;;  %2764 = vmatpush.msrb.mxu1 %v6676_v60  ;;  %v2417_v58 = vsub.f32 1.0, %v2416_v25  ;;  %v6759_v25 = vld [vmem:[%s5440_s25 + $0x1] ss:$0 sm:$0xff] }
 0x470   :  { %v2436_v13 = vmul.f32 %v5118_v54, %v6652_v16  ;;  %2842 = vmatpush.msra.mxu2 %v6490_v18  ;;  %2862 = vmatpush.msrb.mxu3 %v6494_v57  ;;  %v2335_v57 = vmul.f32 %v2328_v45, %v6502_v29  ;;  %vm2441_vm4 = vweird.f32 %v5118_v54  ;;  %v4758_v45 = vld [vmem:[%s5430_s17 + $0x26] sm:$0x3] }
 0x471   :  { %2765 = vmatpush.msrb.mxu1 %v6684_v20  ;;  %v5120_v17 = vpop.eup %5119  ;;  %v2418_v49 = vmul.f32 %v5116_v33, %v2417_v58  ;;  %vm2442_vm6 = vmor %vm2440_vm5, %vm2441_vm4 }
 0x472   :  { %v2437_v47 = vsub.f32 1.0, %v2436_v13  ;;  %2843 = vmatpush.msra.mxu2 %v6505_v23  ;;  %2863 = vmatpush.msrb.mxu3 %v6509_v46  ;;  %v2334_v18 = vmul.f32 %v5120_v17, %v2333_v50  ;;  %v2408_v23 = vadd.f32 %v6342_v1, %v2407_v38  ;;  %v2338_v46 = vmul.f32 %v6502_v29, %v6209_v3 }
 0x473   :  { %v2419_v39 = vadd.f32 %v5116_v33, %v2418_v49  ;;  %v2444_v1 = vand.u32 2147483647, %v6652_v16 }
 0x474   :  { %v2438_v15 = vmul.f32 %v5118_v54, %v2437_v47  ;;  %2844 = vmatpush.msra.mxu2 %v6526_v56  ;;  %2864 = vmatpush.msrb.mxu3 %v6534_v61  ;;  %v2336_v43 = vadd.f32 %v2335_v57, %v2334_v18  ;;  %v4743_v56 = vld [vmem:[%s5445_s29 + $0x10] sm:$0x3] }
 0x475   :  { %v2423_v4 = vsel %vm2422_vm2, %v5116_v33, %v2419_v39  ;;  %vm2445_vm9 = vcmp.eq.f32.partialorder %v2444_v1, 8.507059e+37 }
 0x476   :  { %2845 = vmatpush.msra.mxu2 %v6546_v10  ;;  %2865 = vmatpush.msrb.mxu3 %v6550_v48  ;;  %v2337_v31 = vmul.f32 %v2336_v43, %v6207_v14  ;;  %v2428_v51 = vsel %vm2425_vm3, %v2427_v27, %v2423_v4  ;;  %v2439_v61 = vadd.f32 %v5118_v54, %v2438_v15  ;;  %v2447_v14 = vor.u32 1.1754944e-38, %v2446_v59 }
 0x477   :  { %v2450_v63 = vmul.f32 %v2428_v51, %v2408_v23  ;;  %v6765_v51 = vld [vmem:[%s5425_s13 + $0x2] ss:$0 sm:$0xff] }
 0x478   :  { %v6704_v5 = vadd.f32 %v2338_v46, %v2337_v31  ;;  %v2443_v29 = vsel %vm2442_vm6, %v5118_v54, %v2439_v61 }
 0x479   :  { %v2451_v3 = vadd.f32 %v4743_v56, %v2450_v63  ;;  %v2448_v10 = vsel %vm2445_vm9, %v2447_v14, %v2443_v29  ;;  %v4766_v29 = vld [vmem:[%s5445_s29 + $0x8] sm:$0x3]  ;;  %v6773_v14 = vld [vmem:[%s5455_s8 + $0x1] ss:$0 sm:$0xff] }
 0x47a   :  { %4760 = vmatmul.msk.f32.vlgmr.msra.gmra.mxu0 %vm338_vm11, %v6704_v5  ;;  %2340 = vst.msk [vmem:[#allocation3 + $0xa] sm:$0x3] %vm456_vm10, %v6704_v5  ;;  %4761 = vmatmul.msk.f32.vlgmr.msra.gmra.mxu1 %vm338_vm11, %v6704_v5  ;;  %v2453_v48 = vsub.f32 1.0, %v2448_v10 }
 0x47b   :  { %5121 = vtanh.f32 %v2451_v3  ;;  %4762 = vmatmul.msk.f32.vlgmr.msrb.gmra.mxu2 %vm338_vm11, %v6704_v5  ;;  %2882 = vmatpush.msra.mxu0 %v6530_v37  ;;  %v2455_v37 = vmul.f32 %v2448_v10, %v6581_v11 }
 0x47c   :  { %2964 = vmatpush.msra.mxu1 %v6554_v26  ;;  %2984 = vmatpush.msrb.mxu2 %v6562_v30 }
 0x47d   :  { %2883 = vmatpush.msra.mxu0 %v6542_v28  ;;  %v2458_v28 = vmul.f32 %v6581_v11, %v7364_v12 }
 0x47e   :  { %2965 = vmatpush.msra.mxu1 %v6566_v52  ;;  %2985 = vmatpush.msrb.mxu2 %v6574_v32 }
 0x47f   :  { %2884 = vmatpush.msra.mxu0 %v6558_v55 }
 0x481   :  { %v5122_v16 = vpop.eup %5121  ;;  %2885 = vmatpush.msra.mxu0 %v6570_v22  ;;  %v6744_v22 = vld [vmem:[%s5425_s13] ss:$0 sm:$0xff] }
 0x482   :  { %v2454_v0 = vmul.f32 %v5122_v16, %v2453_v48  ;;  %v4751_v48 = vld [vmem:[%s5415_s5 + $0x28] sm:$0x3] }
 0x484   :  { %v2456_v26 = vadd.f32 %v2455_v37, %v2454_v0 }
 0x486   :  { %v2457_v30 = vmul.f32 %v2456_v26, %v6139_v35  ;;  %v4749_v35 = vld [vmem:[%s5415_s5 + $0x24] sm:$0x3] }
 0x488   :  { %v6726_v52 = vadd.f32 %v2458_v28, %v2457_v30 }
 0x48a   :  { %2460 = vst.msk [vmem:[#allocation4 + $0x4] sm:$0x3] %vm456_vm10, %v6726_v52  ;;  %4768 = vmatmul.msk.f32.vlgmr.msra.gmra.mxu3 %vm338_vm11, %v6726_v52  ;;  %4769 = vmatmul.msk.f32.vlgmr.msrb.gmra.mxu0 %vm338_vm11, %v6726_v52 }
 0x48b   :  { %4770 = vmatmul.msk.f32.vlgmr.msrb.gmra.mxu1 %vm338_vm11, %v6726_v52  ;;  %3004 = vmatpush.msra.mxu3 %v6592_v41 }
 0x48c   :  { %3083 = vmatpush.msrb.mxu0 %v6596_v34  ;;  %3103 = vmatpush.msrb.mxu1 %v6600_v36  ;;  %v4750_v34 = vld [vmem:[%s5415_s5 + $0x26] sm:$0x3] }
 0x48d   :  { %3005 = vmatpush.msra.mxu3 %v6604_v42  ;;  %v6749_v42 = vld [vmem:[%s5425_s13 + $0x1] ss:$0 sm:$0xff]  ;;  %s7379_s13 = sld [smem:[#allocation13_spill]] }
 0x48e   :  { %3084 = vmatpush.msrb.mxu0 %v6608_v53  ;;  %3104 = vmatpush.msrb.mxu1 %v6612_v7 }
 0x4eb   :  { %v2487_v55 = vpop.f32.mrf.mxu1 }
 0x4ec   :  { %v2488_v32 = vadd.f32 %v6744_v22, %v2487_v55  ;;  %v4765_v55 = vld [vmem:[%s5445_s29 + $0x6] sm:$0x3] }
 0x4ee   :  { %v2530_v11 = vadd.f32 %v4749_v35, %v2488_v32 }
 0x4f0   :  { %v4755_v41 = vmul.f32 -1.442695, %v2530_v11 }
 0x4f1   :  { %v2507_v36 = vpop.f32.mrf.mxu2 }
 0x4f2   :  { %5123 = vpow2.f32 %v4755_v41  ;;  %v2508_v53 = vadd.f32 %v6749_v42, %v2507_v36  ;;  %v2527_v15 = vpop.f32.mrf.mxu3 }
 0x4f3   :  { %v2528_v61 = vadd.f32 %v6765_v51, %v2527_v15 }
 0x4f4   :  { %v2550_v7 = vadd.f32 %v4750_v34, %v2508_v53  ;;  %v6780_v34 = vld [vmem:[%s5455_s8] ss:$0 sm:$0xff] }
 0x4f6   :  { %v4756_v8 = vmul.f32 -1.442695, %v2550_v7 }
 0x4f7   :  { %v2607_v9 = vpop.f32.mrf.mxu0  ;;  %v2627_v40 = vpop.f32.mrf.mxu1 }
 0x4f8   :  { %v5124_v6 = vpop.eup %5123  ;;  %5125 = vpow2.f32 %v4756_v8  ;;  %v2608_v33 = vadd.f32 %v6754_v62, %v2607_v9  ;;  %v2628_v54 = vadd.f32 %v6759_v25, %v2627_v40 }
 0x4f9   :  { %v2534_v21 = vadd.f32 1.0, %v5124_v6 }
 0x4fa   :  { %v2650_v13 = vadd.f32 %v4757_v2, %v2608_v33  ;;  %v2670_v58 = vadd.f32 %v4758_v45, %v2628_v54 }
 0x4fb   :  { %5127 = vrcp.f32 %v2534_v21  ;;  %v2546_v57 = vand.u32 2147483648, %v2534_v21  ;;  %v2544_v43 = vand.u32 2147483647, %v2534_v21  ;;  %vm2540_vm13 = vweird.f32 %v2534_v21 }
 0x4fc   :  { %v4763_v44 = vmul.f32 -1.442695, %v2650_v13  ;;  %v4764_v17 = vmul.f32 -1.442695, %v2670_v58 }
 0x4fd   :  { %v2547_v59 = vor.u32 1.1754944e-38, %v2546_v57  ;;  %vm2545_vm15 = vcmp.eq.f32.partialorder %v2544_v43, 8.507059e+37  ;;  %v6792_v43 = vld [vmem:[%s5440_s25 + $0x2] ss:$0 sm:$0xff]  ;;  %s7382_s25 = sld [smem:[#allocation17_spill]] }
 0x4fe   :  { %v5126_v50 = vpop.eup %5125  ;;  %5129 = vpow2.f32 %v4763_v44 }
 0x4ff   :  { %v2554_v47 = vadd.f32 1.0, %v5126_v50 }
 0x501   :  { %v5128_v49 = vpop.eup %5127  ;;  %5131 = vrcp.f32 %v2554_v47  ;;  %v2566_v37 = vand.u32 2147483648, %v2554_v47  ;;  %v2564_v30 = vand.u32 2147483647, %v2554_v47  ;;  %vm2560_vm1 = vweird.f32 %v2554_v47 }
 0x502   :  { %v2536_v19 = vmul.f32 %v5128_v49, %v2534_v21  ;;  %5133 = vpow2.f32 %v4764_v17  ;;  %vm2541_vm12 = vweird.f32 %v5128_v49 }
 0x503   :  { %vm2542_vm14 = vmor %vm2540_vm13, %vm2541_vm12  ;;  %v2567_v53 = vor.u32 1.1754944e-38, %v2566_v37  ;;  %vm2565_vm3 = vcmp.eq.f32.partialorder %v2564_v30, 8.507059e+37 }
 0x504   :  { %v2537_v18 = vsub.f32 1.0, %v2536_v19  ;;  %v5130_v38 = vpop.eup %5129 }
 0x505   :  { %v6762_v23 = vadd.f32 1.0, %v5130_v38 }
 0x506   :  { %v2538_v39 = vmul.f32 %v5128_v49, %v2537_v18 }
 0x507   :  { %v5132_v27 = vpop.eup %5131  ;;  %v2747_v56 = vpop.f32.mrf.mxu0  ;;  %5135 = vrcp.f32 %v6762_v23  ;;  %v2664_v54 = vand.u32 2147483647, %v6762_v23  ;;  %v2666_v13 = vand.u32 2147483648, %v6762_v23  ;;  %vm2660_vm5 = vweird.f32 %v6762_v23 }
 0x508   :  { %v5134_v4 = vpop.eup %5133  ;;  %v2556_v46 = vmul.f32 %v5132_v27, %v2554_v47  ;;  %v2539_v31 = vadd.f32 %v5128_v49, %v2538_v39  ;;  %v2748_v10 = vadd.f32 %v6773_v14, %v2747_v56  ;;  %vm2561_vm0 = vweird.f32 %v5132_v27  ;;  %v2647_v47 = vpop.f32.mrf.mxu2 }
 0x509   :  { %v6769_v63 = vadd.f32 1.0, %v5134_v4  ;;  %vm2562_vm2 = vmor %vm2560_vm1, %vm2561_vm0  ;;  %v2667_v38 = vor.u32 1.1754944e-38, %v2666_v13  ;;  %vm2665_vm9 = vcmp.eq.f32.partialorder %v2664_v54, 8.507059e+37 }
 0x50a   :  { %v2557_v1 = vsub.f32 1.0, %v2556_v46  ;;  %v2543_v3 = vsel %vm2542_vm14, %v5128_v49, %v2539_v31  ;;  %v2790_v12 = vadd.f32 %v4766_v29, %v2748_v10  ;;  %v4759_v46 = vld [vmem:[%s5430_s17 + $0x28] sm:$0x3]  ;;  %v7366_v29 = vld [vmem:[#allocation32_spill] sm:$0xff] }
 0x50b   :  { %v2548_v16 = vsel %vm2545_vm15, %v2547_v59, %v2543_v3  ;;  %5137 = vrcp.f32 %v6769_v63  ;;  %v7365_v59 = vld [vmem:[#allocation31_spill] sm:$0xff]  ;;  %v2578_v10 = vmul.f32 %v6664_v24, %v7366_v29  ;;  %vm2680_vm13 = vweird.f32 %v6769_v63 }
 0x50c   :  { %v2558_v0 = vmul.f32 %v5132_v27, %v2557_v1  ;;  %v2570_v26 = vmul.f32 %v2548_v16, %v2528_v61  ;;  %v4772_v41 = vmul.f32 -1.442695, %v2790_v12  ;;  %v2686_v1 = vand.u32 2147483648, %v6769_v63 }
 0x50d   :  { %v2727_v32 = vpop.f32.mrf.mxu3  ;;  %v5136_v11 = vpop.eup %5135 }
 0x50e   :  { %v2559_v28 = vadd.f32 %v5132_v27, %v2558_v0  ;;  %v2571_v35 = vadd.f32 %v4751_v48, %v2570_v26  ;;  %v2728_v36 = vadd.f32 %v6780_v34, %v2727_v32  ;;  %v2656_v8 = vmul.f32 %v5136_v11, %v6762_v23 }
 0x50f   :  { %vm2661_vm4 = vweird.f32 %v5136_v11  ;;  %v2684_v48 = vand.u32 2147483647, %v6769_v63  ;;  %v2687_v30 = vor.u32 1.1754944e-38, %v2686_v1  ;;  %v7368_v1 = vld [vmem:[#allocation30_spill] sm:$0xff] }
 0x510   :  { %v2563_v7 = vsel %vm2562_vm2, %v5132_v27, %v2559_v28  ;;  %5139 = vtanh.f32 %v2571_v35  ;;  %v2770_v9 = vadd.f32 %v4765_v55, %v2728_v36  ;;  %v2657_v2 = vsub.f32 1.0, %v2656_v8  ;;  %vm2662_vm6 = vmor %vm2660_vm5, %vm2661_vm4  ;;  %v3183_v28 = vld [vmem:[%s5465_s19 + $0x8] sm:$0xff]  ;;  %v3182_v35 = vld [vmem:[%s5465_s19] sm:$0xff]  ;;  %s7387_s19 = sld [smem:[#allocation21_spill]] }
 0x511   :  { %v5138_v6 = vpop.eup %5137  ;;  %5141 = vpow2.f32 %v4772_v41  ;;  %v2568_v40 = vsel %vm2565_vm3, %v2567_v53, %v2563_v7  ;;  %v2648_v27 = vadd.f32 %v6792_v43, %v2647_v47  ;;  %vm2685_vm15 = vcmp.eq.f32.partialorder %v2684_v48, 8.507059e+37  ;;  %v4767_v47 = vld [vmem:[%s5445_s29 + $0xa] sm:$0x3]  ;;  %v4774_v48 = vld [vmem:[%s5415_s5 + $0x2c] sm:$0x3] }
 0x512   :  { %v2676_v21 = vmul.f32 %v5138_v6, %v6769_v63  ;;  %v4771_v33 = vmul.f32 -1.442695, %v2770_v9  ;;  %v2573_v58 = vsub.f32 1.0, %v2568_v40  ;;  %v2658_v50 = vmul.f32 %v5136_v11, %v2657_v2  ;;  %v2767_v2 = vpop.f32.mrf.mxu1 }
 0x513   :  { %v2575_v18 = vmul.f32 %v2568_v40, %v6664_v24  ;;  %vm2681_vm12 = vweird.f32 %v5138_v6 }
 0x514   :  { %v2677_v45 = vsub.f32 1.0, %v2676_v21  ;;  %5143 = vpow2.f32 %v4771_v33  ;;  %v2659_v57 = vadd.f32 %v5136_v11, %v2658_v50  ;;  %vm2682_vm14 = vmor %vm2680_vm13, %vm2681_vm12  ;;  %v2698_v33 = vmul.f32 %v6704_v5, %v7366_v29  ;;  %v3180_v29 = vld [vmem:[#allocation3] sm:$0xff] }
 0x516   :  { %v5140_v44 = vpop.eup %5139  ;;  %v2678_v17 = vmul.f32 %v5138_v6, %v2677_v45  ;;  %v2663_v4 = vsel %vm2662_vm6, %v5136_v11, %v2659_v57 }
 0x517   :  { %v5142_v49 = vpop.eup %5141  ;;  %v2574_v19 = vmul.f32 %v5140_v44, %v2573_v58  ;;  %v2668_v31 = vsel %vm2665_vm9, %v2667_v38, %v2663_v4  ;;  %v6825_v58 = vld [vmem:[%s5455_s8 + $0x2] ss:$0 sm:$0xff]  ;;  %s7385_s8 = sld [smem:[#allocation19_spill]] }
 0x518   :  { %v6789_v15 = vadd.f32 1.0, %v5142_v49  ;;  %v2679_v56 = vadd.f32 %v5138_v6, %v2678_v17  ;;  %v2690_v3 = vmul.f32 %v2668_v31, %v2648_v27  ;;  %v2768_v50 = vadd.f32 %v6825_v58, %v2767_v2 }
 0x519   :  { %v2576_v39 = vadd.f32 %v2575_v18, %v2574_v19 }
 0x51a   :  { %5145 = vrcp.f32 %v6789_v15  ;;  %v5144_v61 = vpop.eup %5143  ;;  %v2691_v0 = vadd.f32 %v4759_v46, %v2690_v3  ;;  %v2683_v26 = vsel %vm2682_vm14, %v5138_v6, %v2679_v56  ;;  %vm2800_vm5 = vweird.f32 %v6789_v15 }
 0x51b   :  { %v2577_v23 = vmul.f32 %v2576_v39, %v7365_v59  ;;  %v2774_v16 = vadd.f32 1.0, %v5144_v61  ;;  %v2688_v63 = vsel %vm2685_vm15, %v2687_v30, %v2683_v26  ;;  %v2804_v18 = vand.u32 2147483647, %v6789_v15 }
 0x51c   :  { %v2693_v32 = vsub.f32 1.0, %v2688_v63  ;;  %v2695_v53 = vmul.f32 %v2688_v63, %v6704_v5  ;;  %v2806_v5 = vand.u32 2147483648, %v6789_v15 }
 0x51d   :  { %v6803_v37 = vadd.f32 %v2578_v10, %v2577_v23  ;;  %5147 = vrcp.f32 %v2774_v16  ;;  %v2786_v6 = vand.u32 2147483648, %v2774_v16  ;;  %v2784_v40 = vand.u32 2147483647, %v2774_v16  ;;  %v4773_v10 = vld [vmem:[%s5415_s5 + $0x2a] sm:$0x3] }
 0x51e   :  { %5149 = vtanh.f32 %v2691_v0  ;;  %vm2780_vm1 = vweird.f32 %v2774_v16  ;;  %v2807_v39 = vor.u32 1.1754944e-38, %v2806_v5  ;;  %vm2805_vm9 = vcmp.eq.f32.partialorder %v2804_v18, 8.507059e+37 }
 0x51f   :  { %4776 = vmatmul.msk.f32.vlgmr.msra.gmra.mxu2 %vm197_vm7, %v6803_v37  ;;  %4777 = vmatmul.msk.f32.vlgmr.msrb.gmra.mxu3 %vm197_vm7, %v6803_v37  ;;  %2580 = vst.msk [vmem:[#allocation2 + $0xc] sm:$0x3] %vm328_vm8, %v6803_v37  ;;  %v2787_v54 = vor.u32 1.1754944e-38, %v2786_v6  ;;  %vm2785_vm3 = vcmp.eq.f32.partialorder %v2784_v40, 8.507059e+37 }
 0x520   :  { %v5146_v24 = vpop.eup %5145  ;;  %4778 = vmatmul.msk.f32.vlgmr.msra.gmra.mxu0 %vm197_vm7, %v6803_v37  ;;  %3123 = vmatpush.msra.mxu2 %v6676_v60 }
 0x521   :  { %v2796_v12 = vmul.f32 %v5146_v24, %v6789_v15  ;;  %3237 = vmatpush.msra.mxu0 %v3183_v28  ;;  %vm2801_vm4 = vweird.f32 %v5146_v24  ;;  %v2818_v15 = vmul.f32 %v6726_v52, %v7368_v1  ;;  %v4781_v28 = vld [vmem:[%s5430_s17 + $0x2a] sm:$0x3] }
 0x522   :  { %3124 = vmatpush.msra.mxu2 %v6684_v20  ;;  %vm2802_vm6 = vmor %vm2800_vm5, %vm2801_vm4 }
 0x523   :  { %v5148_v55 = vpop.eup %5147  ;;  %v2797_v7 = vsub.f32 1.0, %v2796_v12  ;;  %3238 = vmatpush.msra.mxu0 %v3182_v35 }
 0x524   :  { %v5150_v11 = vpop.eup %5149  ;;  %v2776_v41 = vmul.f32 %v5148_v55, %v2774_v16  ;;  %vm2781_vm0 = vweird.f32 %v5148_v55 }
 0x525   :  { %v2694_v36 = vmul.f32 %v5150_v11, %v2693_v32  ;;  %v2798_v21 = vmul.f32 %v5146_v24, %v2797_v7  ;;  %vm2782_vm2 = vmor %vm2780_vm1, %vm2781_vm0 }
 0x526   :  { %v2777_v8 = vsub.f32 1.0, %v2776_v41 }
 0x527   :  { %v2696_v60 = vadd.f32 %v2695_v53, %v2694_v36  ;;  %v2799_v17 = vadd.f32 %v5146_v24, %v2798_v21 }
 0x528   :  { %v2778_v9 = vmul.f32 %v5148_v55, %v2777_v8 }
 0x529   :  { %v2697_v20 = vmul.f32 %v2696_v60, %v7365_v59  ;;  %v2803_v38 = vsel %vm2802_vm6, %v5146_v24, %v2799_v17  ;;  %v7367_v59 = vld [vmem:[#allocation29_spill] sm:$0xff] }
 0x52a   :  { %v2779_v45 = vadd.f32 %v5148_v55, %v2778_v9  ;;  %v2808_v27 = vsel %vm2805_vm9, %v2807_v39, %v2803_v38 }
 0x52b   :  { %v6822_v13 = vadd.f32 %v2698_v33, %v2697_v20  ;;  %v2813_v4 = vsub.f32 1.0, %v2808_v27  ;;  %v2815_v31 = vmul.f32 %v2808_v27, %v6726_v52 }
 0x52c   :  { %v2783_v44 = vsel %vm2782_vm2, %v5148_v55, %v2779_v45 }
 0x52d   :  { %v2788_v49 = vsel %vm2785_vm3, %v2787_v54, %v2783_v44  ;;  %4784 = vmatmul.msk.f32.vlgmr.msra.gmra.mxu1 %vm338_vm11, %v6822_v13  ;;  %2700 = vst.msk [vmem:[#allocation3 + $0xc] sm:$0x3] %vm456_vm10, %v6822_v13  ;;  %4785 = vmatmul.msk.f32.vlgmr.msrb.gmra.mxu2 %vm338_vm11, %v6822_v13 }
 0x52e   :  { %v2810_v19 = vmul.f32 %v2788_v49, %v2768_v50  ;;  %4786 = vmatmul.msk.f32.vlgmr.msra.gmra.mxu3 %vm338_vm11, %v6822_v13  ;;  %v3061_v49 = vld [vmem:[%s5445_s29] sm:$0x3] }
 0x530   :  { %v2811_v57 = vadd.f32 %v4767_v47, %v2810_v19  ;;  %v4789_v19 = vld [vmem:[%s5445_s29 + $0x2] sm:$0x3] }
 0x532   :  { %5151 = vtanh.f32 %v2811_v57  ;;  %v6877_v57 = vld [vmem:[%s5485_s12 + $0x18] sm:$0xff] }
 0x533   :  { %3337 = vmatpush.msrb.mxu2 %v6877_v57 }
 0x538   :  { %v5152_v46 = vpop.eup %5151 }
 0x539   :  { %v2814_v56 = vmul.f32 %v5152_v46, %v2813_v4 }
 0x53b   :  { %v2816_v61 = vadd.f32 %v2815_v31, %v2814_v56 }
 0x53d   :  { %v2817_v23 = vmul.f32 %v2816_v61, %v7367_v59  ;;  %v6887_v61 = vld [vmem:[%s5485_s12 + $0x10] sm:$0xff]  ;;  %v4775_v59 = vld [vmem:[%s5415_s5 + $0x2e] sm:$0x3]  ;;  %s7377_s5 = sld [smem:[#allocation12_spill]] }
 0x53e   :  { %3338 = vmatpush.msrb.mxu2 %v6887_v61 }
 0x53f   :  { %v6844_v3 = vadd.f32 %v2818_v15, %v2817_v23 }
 0x541   :  { %2820 = vst.msk [vmem:[#allocation4 + $0x2] sm:$0x3] %vm456_vm10, %v6844_v3  ;;  %4791 = vmatmul.msk.f32.vlgmr.msrb.gmra.mxu0 %vm338_vm11, %v6844_v3  ;;  %4792 = vmatmul.msk.f32.vlgmr.msrb.gmra.mxu1 %vm338_vm11, %v6844_v3 }
 0x542   :  { %4793 = vmatmul.msk.f32.vlgmr.msra.gmra.mxu2 %vm338_vm11, %v6844_v3 }
 0x549   :  { %4798 = vmatmul.msk.f32.vlgmr.msra.gmra.mxu0 %vm338_vm11, %v3180_v29 }
 0x59d   :  { %v2887_v6 = vpop.f32.mrf.mxu0 }
 0x59e   :  { %v2888_v39 = vadd.f32 %v6765_v51, %v2887_v6  ;;  %v6928_v6 = vld [vmem:[%s5485_s12 + $0x48] sm:$0xff] }
 0x5a2   :  { %v2847_v52 = vpop.f32.mrf.mxu2  ;;  %v2867_v16 = vpop.f32.mrf.mxu3 }
 0x5a3   :  { %v2848_v0 = vadd.f32 %v6744_v22, %v2847_v52  ;;  %v2868_v26 = vadd.f32 %v6749_v42, %v2867_v16  ;;  %v4782_v42 = vld [vmem:[%s5430_s17 + $0x2c] sm:$0x3] }
 0x5a4   :  { %v6896_v52 = vld [vmem:[%s5485_s12 + $0x8] sm:$0xff] }
 0x5a5   :  { %v2890_v30 = vadd.f32 %v4773_v10, %v2848_v0  ;;  %v2910_v24 = vadd.f32 %v4774_v48, %v2868_v26  ;;  %3339 = vmatpush.msrb.mxu2 %v6896_v52 }
 0x5a7   :  { %v4779_v63 = vmul.f32 -1.442695, %v2890_v30  ;;  %v4780_v12 = vmul.f32 -1.442695, %v2910_v24  ;;  %v6908_v24 = vld [vmem:[%s5485_s12] sm:$0xff] }
 0x5a8   :  { %3340 = vmatpush.msrb.mxu2 %v6908_v24 }
 0x5a9   :  { %5153 = vpow2.f32 %v4779_v63 }
 0x5aa   :  { %5155 = vpow2.f32 %v4780_v12  ;;  %v2967_v35 = vpop.f32.mrf.mxu1 }
 0x5ab   :  { %v2968_v55 = vadd.f32 %v6754_v62, %v2967_v35 }
 0x5ad   :  { %v3010_v32 = vadd.f32 %v4781_v28, %v2968_v55  ;;  %v6916_v55 = vld [vmem:[%s5485_s12 + $0x58] sm:$0xff] }
 0x5ae   :  { %3383 = vmatpush.msra.mxu2 %v6916_v55 }
 0x5af   :  { %v5154_v11 = vpop.eup %5153  ;;  %v4787_v53 = vmul.f32 -1.442695, %v3010_v32 }
 0x5b0   :  { %v5156_v41 = vpop.eup %5155  ;;  %v2894_v36 = vadd.f32 1.0, %v5154_v11  ;;  %v2987_v22 = vpop.f32.mrf.mxu2 }
 0x5b1   :  { %v6861_v7 = vadd.f32 1.0, %v5156_v41  ;;  %v2988_v8 = vadd.f32 %v6759_v25, %v2987_v22  ;;  %v3007_v32 = vpop.f32.mrf.mxu3 }
 0x5b2   :  { %5157 = vrcp.f32 %v2894_v36  ;;  %v2906_v54 = vand.u32 2147483648, %v2894_v36  ;;  %v2904_v44 = vand.u32 2147483647, %v2894_v36  ;;  %vm2900_vm13 = vweird.f32 %v2894_v36 }
 0x5b3   :  { %5159 = vrcp.f32 %v6861_v7  ;;  %v3030_v60 = vadd.f32 %v4782_v42, %v2988_v8  ;;  %v2924_v29 = vand.u32 2147483647, %v6861_v7  ;;  %v2926_v10 = vand.u32 2147483648, %v6861_v7 }
 0x5b4   :  { %5161 = vpow2.f32 %v4787_v53  ;;  %v2907_v27 = vor.u32 1.1754944e-38, %v2906_v54  ;;  %vm2905_vm15 = vcmp.eq.f32.partialorder %v2904_v44, 8.507059e+37  ;;  %vm2920_vm1 = vweird.f32 %v6861_v7 }
 0x5b5   :  { %v4788_v40 = vmul.f32 -1.442695, %v3030_v60  ;;  %vm2925_vm3 = vcmp.eq.f32.partialorder %v2924_v29, 8.507059e+37  ;;  %v2927_v28 = vor.u32 1.1754944e-38, %v2926_v10  ;;  %v3008_v8 = vadd.f32 %v6792_v43, %v3007_v32 }
 0x5b7   :  { %5163 = vpow2.f32 %v4788_v40 }
 0x5b8   :  { %v5158_v9 = vpop.eup %5157 }
 0x5b9   :  { %v6866_v62 = vpop.eup %5159  ;;  %v2896_v20 = vmul.f32 %v5158_v9, %v2894_v36  ;;  %vm2901_vm12 = vweird.f32 %v5158_v9 }
 0x5ba   :  { %v5162_v21 = vpop.eup %5161  ;;  %v2916_v2 = vmul.f32 %v6866_v62, %v6861_v7  ;;  %vm2902_vm14 = vmor %vm2900_vm13, %vm2901_vm12  ;;  %vm2921_vm0 = vweird.f32 %v6866_v62  ;;  %v6921_v7 = vld [vmem:[%s5485_s12 + $0x50] sm:$0xff] }
 0x5bb   :  { %v2897_v33 = vsub.f32 1.0, %v2896_v20  ;;  %v6870_v45 = vadd.f32 1.0, %v5162_v21  ;;  %vm6903_vm2 = vmor %vm2920_vm1, %vm2921_vm0  ;;  %3384 = vmatpush.msra.mxu2 %v6921_v7 }
 0x5bc   :  { %v2917_v25 = vsub.f32 1.0, %v2916_v2 }
 0x5bd   :  { %v2898_v50 = vmul.f32 %v5158_v9, %v2897_v33  ;;  %5165 = vrcp.f32 %v6870_v45  ;;  %v5164_v38 = vpop.eup %5163  ;;  %v3026_v35 = vand.u32 2147483648, %v6870_v45  ;;  %v3024_v41 = vand.u32 2147483647, %v6870_v45  ;;  %3385 = vmatpush.msra.mxu2 %v6928_v6  ;;  %v4783_v33 = vld [vmem:[%s5430_s17 + $0x2e] sm:$0x3]  ;;  %s7380_s17 = sld [smem:[#allocation14_spill]] }
 0x5be   :  { %v2918_v17 = vmul.f32 %v6866_v62, %v2917_v25  ;;  %v3086_v5 = vpop.f32.mrf.mxu0  ;;  %v3106_v18 = vpop.f32.mrf.mxu1  ;;  %v6884_v56 = vadd.f32 1.0, %v5164_v38  ;;  %vm3020_vm5 = vweird.f32 %v6870_v45  ;;  %v6937_v25 = vld [vmem:[%s5485_s12 + $0x40] sm:$0xff] }
 0x5bf   :  { %v2899_v47 = vadd.f32 %v5158_v9, %v2898_v50  ;;  %v3087_v4 = vadd.f32 %v6780_v34, %v3086_v5  ;;  %v3107_v46 = vadd.f32 %v6773_v14, %v3106_v18  ;;  %v3027_v60 = vor.u32 1.1754944e-38, %v3026_v35  ;;  %3386 = vmatpush.msra.mxu2 %v6937_v25 }
 0x5c0   :  { %v2919_v51 = vadd.f32 %v6866_v62, %v2918_v17  ;;  %5167 = vrcp.f32 %v6884_v56  ;;  %vm3025_vm9 = vcmp.eq.f32.partialorder %v3024_v41, 8.507059e+37  ;;  %v3046_v2 = vand.u32 2147483648, %v6884_v56 }
 0x5c1   :  { %v2903_v31 = vsel %vm2902_vm14, %v5158_v9, %v2899_v47  ;;  %v3129_v1 = vadd.f32 %v3087_v4, %v3061_v49  ;;  %v3149_v34 = vadd.f32 %v4789_v19, %v3107_v46  ;;  %v3044_v49 = vand.u32 2147483647, %v6884_v56  ;;  %v7371_v4 = vld [vmem:[#allocation27_spill] sm:$0xff] }
 0x5c2   :  { %v2908_v23 = vsel %vm2905_vm15, %v2907_v27, %v2903_v31  ;;  %v2923_v63 = vsel %vm6903_vm2, %v6866_v62, %v2919_v51  ;;  %vm3040_vm13 = vweird.f32 %v6884_v56  ;;  %v7372_v31 = vld [vmem:[#allocation28_spill] sm:$0xff] }
 0x5c3   :  { %v5166_v14 = vpop.eup %5165  ;;  %v2930_v15 = vmul.f32 %v2908_v23, %v2888_v39  ;;  %v4794_v16 = vmul.f32 -1.442695, %v3129_v1  ;;  %v4795_v30 = vmul.f32 -1.442695, %v3149_v34  ;;  %v2928_v53 = vsel %vm2925_vm3, %v2927_v28, %v2923_v63  ;;  %v3187_v23 = vld [vmem:[%s5470_s24 + $0x8] sm:$0xff]  ;;  %v3186_v51 = vld [vmem:[%s5470_s24] sm:$0xff] }
 0x5c4   :  { %v3016_v48 = vmul.f32 %v5166_v14, %v6870_v45  ;;  %vm3021_vm4 = vweird.f32 %v5166_v14  ;;  %v2933_v20 = vsub.f32 1.0, %v2928_v53  ;;  %v2935_v43 = vmul.f32 %v2928_v53, %v6803_v37  ;;  %3208 = vmatpush.msrb.mxu3 %v3187_v23  ;;  %s7388_s24 = sld [smem:[#allocation22_spill]] }
 0x5c5   :  { %v2931_v0 = vadd.f32 %v4775_v59, %v2930_v15  ;;  %5169 = vpow2.f32 %v4794_v16  ;;  %vm3022_vm6 = vmor %vm3020_vm5, %vm3021_vm4  ;;  %v3047_v39 = vor.u32 1.1754944e-38, %v3046_v2  ;;  %vm3045_vm15 = vcmp.eq.f32.partialorder %v3044_v49, 8.507059e+37  ;;  %v3126_v35 = vpop.f32.mrf.mxu2 }
 0x5c6   :  { %v3017_v12 = vsub.f32 1.0, %v3016_v48  ;;  %v5168_v36 = vpop.eup %5167  ;;  %v2938_v59 = vmul.f32 %v6803_v37, %v7372_v31  ;;  %3209 = vmatpush.msrb.mxu3 %v3186_v51 }
 0x5c7   :  { %5171 = vtanh.f32 %v2931_v0  ;;  %v3036_v22 = vmul.f32 %v5168_v36, %v6884_v56  ;;  %vm3041_vm12 = vweird.f32 %v5168_v36 }
 0x5c8   :  { %v3018_v11 = vmul.f32 %v5166_v14, %v3017_v12  ;;  %5173 = vpow2.f32 %v4795_v30  ;;  %vm3042_vm14 = vmor %vm3040_vm13, %vm3041_vm12  ;;  %3460 = vmatpush.msra.mxu3 %v6877_v57  ;;  %vm3252_vm12 = vcmask 48128  }
 0x5c9   :  { %v3037_v40 = vsub.f32 1.0, %v3036_v22  ;;  %v3127_v22 = vadd.f32 %v6825_v58, %v3126_v35 }
 0x5ca   :  { %v3019_v42 = vadd.f32 %v5166_v14, %v3018_v11  ;;  %3461 = vmatpush.msra.mxu3 %v6887_v61 }
 0x5cb   :  { %v5170_v9 = vpop.eup %5169  ;;  %v3038_v44 = vmul.f32 %v5168_v36, %v3037_v40 }
 0x5cc   :  { %v3023_v62 = vsel %vm3022_vm6, %v5166_v14, %v3019_v42  ;;  %v6933_v54 = vadd.f32 1.0, %v5170_v9  ;;  %3462 = vmatpush.msra.mxu3 %v6896_v52 }
 0x5cd   :  { %v5172_v21 = vpop.eup %5171  ;;  %v3028_v45 = vsel %vm3025_vm9, %v3027_v60, %v3023_v62  ;;  %v3039_v19 = vadd.f32 %v5168_v36, %v3038_v44  ;;  %v4790_v60 = vld [vmem:[%s5445_s29 + $0x4] sm:$0x3]  ;;  %s7383_s29 = sld [smem:[#allocation16_spill]] }
 0x5ce   :  { %v5174_v50 = vpop.eup %5173  ;;  %v3050_v17 = vmul.f32 %v3028_v45, %v3008_v8  ;;  %v2934_v47 = vmul.f32 %v5172_v21, %v2933_v20  ;;  %5175 = vrcp.f32 %v6933_v54  ;;  %v3145_v26 = vand.u32 2147483648, %v6933_v54  ;;  %3463 = vmatpush.msra.mxu3 %v6908_v24 }
 0x5cf   :  { %v6942_v5 = vadd.f32 1.0, %v5174_v50  ;;  %v3043_v27 = vsel %vm3042_vm14, %v5168_v36, %v3039_v19  ;;  %v3143_v12 = vand.u32 2147483647, %v6933_v54  ;;  %vm3139_vm1 = vweird.f32 %v6933_v54 }
 0x5d0   :  { %v3051_v18 = vadd.f32 %v4783_v33, %v3050_v17  ;;  %v2936_v38 = vadd.f32 %v2935_v43, %v2934_v47  ;;  %v3048_v1 = vsel %vm3045_vm15, %v3047_v39, %v3043_v27  ;;  %v3058_v36 = vmul.f32 %v6822_v13, %v7372_v31  ;;  %v7374_v47 = vld [vmem:[#allocation25_spill] sm:$0xff]  ;;  %v4936_v27 = vld [vmem:[%s7373_s0] ss:$0 sm:$0xff] }
 0x5d1   :  { %5177 = vrcp.f32 %v6942_v5  ;;  %v3053_v29 = vsub.f32 1.0, %v3048_v1  ;;  %v3055_v0 = vmul.f32 %v3048_v1, %v6822_v13  ;;  %v3146_v53 = vor.u32 1.1754944e-38, %v3145_v26  ;;  %v3185_v39 = vld [vmem:[#allocation4 + $0x8] sm:$0xff] }
 0x5d2   :  { %5179 = vtanh.f32 %v3051_v18  ;;  %v2937_v46 = vmul.f32 %v2936_v38, %v7371_v4  ;;  %vm3144_vm3 = vcmp.eq.f32.partialorder %v3143_v12, 8.507059e+37  ;;  %v3165_v13 = vand.u32 2147483648, %v6942_v5  ;;  %v7055_v12 = vld [vmem:[%s7377_s5] ss:$0 sm:$0xff] }
 0x5d3   :  { %vm3159_vm5 = vweird.f32 %v6942_v5  ;;  %v3163_v58 = vand.u32 2147483647, %v6942_v5 }
 0x5d4   :  { %v5176_v56 = vpop.eup %5175  ;;  %v6951_v34 = vadd.f32 %v2938_v59, %v2937_v46  ;;  %v3166_v2 = vor.u32 1.1754944e-38, %v3165_v13 }
 0x5d5   :  { %v3135_v14 = vmul.f32 %v5176_v56, %v6933_v54  ;;  %vm3140_vm0 = vweird.f32 %v5176_v56  ;;  %vm3164_vm9 = vcmp.eq.f32.partialorder %v3163_v58, 8.507059e+37 }
 0x5d6   :  { %2940 = vst.msk [vmem:[#allocation2 + $0xe] sm:$0x3] %vm328_vm8, %v6951_v34  ;;  %4815 = vmatmul.msk.f32.vlgmr.msrb.gmra.mxu2 %vm197_vm7, %v6951_v34  ;;  %vm3141_vm2 = vmor %vm3139_vm1, %vm3140_vm0 }
 0x5d7   :  { %v5178_v15 = vpop.eup %5177  ;;  %v3136_v48 = vsub.f32 1.0, %v3135_v14  ;;  %3577 = vmatpush.msrb.mxu2 %v6877_v57 }
 0x5d8   :  { %v5180_v37 = vpop.eup %5179  ;;  %v3155_v10 = vmul.f32 %v5178_v15, %v6942_v5  ;;  %vm3160_vm4 = vweird.f32 %v5178_v15  ;;  %v7375_v5 = vld [vmem:[#allocation26_spill] sm:$0xff] }
 0x5d9   :  { %v3054_v16 = vmul.f32 %v5180_v37, %v3053_v29  ;;  %v3137_v63 = vmul.f32 %v5176_v56, %v3136_v48  ;;  %3578 = vmatpush.msrb.mxu2 %v6887_v61  ;;  %vm3161_vm6 = vmor %vm3159_vm5, %vm3160_vm4  ;;  %v3177_v19 = vmul.f32 %v6844_v3, %v7375_v5  ;;  %v7011_v29 = vld [vmem:[%s5485_s12 + $0x30] sm:$0xff]  ;;  %v7017_v37 = vld [vmem:[%s5485_s12 + $0x28] sm:$0xff] }
 0x5da   :  { %v3156_v30 = vsub.f32 1.0, %v3155_v10  ;;  %v7023_v10 = vld [vmem:[%s5485_s12 + $0x20] sm:$0xff] }
 0x5db   :  { %v3056_v28 = vadd.f32 %v3055_v0, %v3054_v16  ;;  %v3138_v11 = vadd.f32 %v5176_v56, %v3137_v63  ;;  %3579 = vmatpush.msrb.mxu2 %v6896_v52  ;;  %v7376_v0 = vmov 0.0   ;;  %v5405_v63 = vmov 1.0  }
 0x5dc   :  { %v3157_v32 = vmul.f32 %v5178_v15, %v3156_v30 }
 0x5dd   :  { %v3057_v41 = vmul.f32 %v3056_v28, %v7371_v4  ;;  %v3142_v42 = vsel %vm3141_vm2, %v5176_v56, %v3138_v11  ;;  %3580 = vmatpush.msrb.mxu2 %v6908_v24  ;;  %v3240_v4 = vpop.f32.mrf.mxu0 }
 0x5de   :  { %v3147_v9 = vsel %vm3144_vm3, %v3146_v53, %v3142_v42  ;;  %v3158_v40 = vadd.f32 %v5178_v15, %v3157_v32  ;;  %4817 = vmatmul.msk.f32.vlgmr.msra.gmra.mxu2 %vm197_vm7, %v6951_v34  ;;  %v3314_v32 = vld [vmem:[%s7378_s9] sm:$0x3] }
 0x5df   :  { %v3059_v8 = vadd.f32 %v3058_v36, %v3057_v41  ;;  %v3169_v62 = vmul.f32 %v3147_v9, %v3127_v22  ;;  %v4813_v9 = vld [vmem:[%s7378_s9 + $0x2] sm:$0x3] }
 0x5e0   :  { %v3162_v21 = vsel %vm3161_vm6, %v5178_v15, %v3158_v40  ;;  %v7006_v15 = vld [vmem:[%s5485_s12 + $0x38] sm:$0xff]  ;;  %s7390_s12 = sld [smem:[#allocation23_spill]] }
 0x5e1   :  { %3060 = vst.msk [vmem:[#allocation3 + $0xe] sm:$0x3] %vm456_vm10, %v3059_v8  ;;  %v3170_v20 = vadd.f32 %v4790_v60, %v3169_v62  ;;  %v3167_v33 = vsel %vm3164_vm9, %v3166_v2, %v3162_v21  ;;  %3480 = vmatpush.msrb.mxu0 %v7006_v15  ;;  %3714 = vmatpush.msra.mxu2 %v7006_v15  ;;  %v7062_v8 = vld [vmem:[%s7377_s5 + $0x1] ss:$0 sm:$0xff] }
 0x5e2   :  { %v3172_v54 = vsub.f32 1.0, %v3167_v33  ;;  %v3174_v44 = vmul.f32 %v3167_v33, %v6844_v3 }
 0x5e3   :  { %5181 = vtanh.f32 %v3170_v20  ;;  %3481 = vmatpush.msrb.mxu0 %v7011_v29  ;;  %3715 = vmatpush.msra.mxu2 %v7011_v29 }
 0x5e5   :  { %3482 = vmatpush.msrb.mxu0 %v7017_v37  ;;  %3716 = vmatpush.msra.mxu2 %v7017_v37 }
 0x5e7   :  { %3483 = vmatpush.msrb.mxu0 %v7023_v10  ;;  %3717 = vmatpush.msra.mxu2 %v7023_v10 }
 0x5e8   :  { %v3181_v45 = vld [vmem:[#allocation3 + $0x8] sm:$0xff] }
 0x5e9   :  { %4799 = vmatmul.msk.f32.gmra.mxu0 %vm338_vm11, %v3181_v45  ;;  %v5182_v43 = vpop.eup %5181 }
 0x5ea   :  { %v3173_v50 = vmul.f32 %v5182_v43, %v3172_v54  ;;  %3617 = vmatpush.msra.mxu0 %v6916_v55  ;;  %v7067_v43 = vld [vmem:[%s7377_s5 + $0x2] ss:$0 sm:$0xff] }
 0x5ec   :  { %v3175_v17 = vadd.f32 %v3174_v44, %v3173_v50  ;;  %3618 = vmatpush.msra.mxu0 %v6921_v7 }
 0x5ee   :  { %v3176_v49 = vmul.f32 %v3175_v17, %v7374_v47  ;;  %3619 = vmatpush.msra.mxu0 %v6928_v6 }
 0x5f0   :  { %v3178_v18 = vadd.f32 %v3177_v19, %v3176_v49  ;;  %3620 = vmatpush.msra.mxu0 %v6937_v25 }
 0x5f2   :  { %3179 = vst.msk [vmem:[#allocation4] sm:$0x3] %vm456_vm10, %v3178_v18  ;;  %vm3265_vm10 = vcmask 7168   ;;  %v4814_v18 = vld [vmem:[%s7378_s9 + $0x4] sm:$0x3] }
 0x5f9   :  { %v3184_v38 = vld [vmem:[#allocation4] sm:$0xff] }
 0x5fa   :  { %4796 = vmatmul.msk.f32.vlgmr.msrb.gmra.mxu3 %vm338_vm11, %v3184_v38 }
 0x5fb   :  { %3597 = vmatpush.msrb.mxu3 %v7006_v15 }
 0x5fd   :  { %3598 = vmatpush.msrb.mxu3 %v7011_v29 }
 0x5ff   :  { %3599 = vmatpush.msrb.mxu3 %v7017_v37 }
 0x601   :  { %3600 = vmatpush.msrb.mxu3 %v7023_v10 }
 0x602   :  { %4797 = vmatmul.msk.f32.gmra.mxu3 %vm338_vm11, %v3185_v39 }
 0x659   :  { %v3342_v28 = vpop.f32.mrf.mxu2 }
 0x65a   :  { %v3343_v35 = vadd.f32 %v7055_v12, %v3342_v28 }
 0x65c   :  { %v3391_v11 = vadd.f32 %v3343_v35, %v3314_v32 }
 0x65e   :  { %v4818_v41 = vmul.f32 -1.442695, %v3391_v11  ;;  %v4820_v11 = vld [vmem:[%s7378_s9 + $0x6] sm:$0x3] }
 0x660   :  { %5183 = vpow2.f32 %v4818_v41 }
 0x661   :  { %v3388_v17 = vpop.f32.mrf.mxu2 }
 0x662   :  { %v3389_v5 = vadd.f32 %v7067_v43, %v3388_v17 }
 0x666   :  { %v3243_v23 = vpop.f32.mrf.mxu0  ;;  %v5184_v36 = vpop.eup %5183 }
 0x667   :  { %v3395_v53 = vadd.f32 1.0, %v5184_v36 }
 0x669   :  { %5185 = vrcp.f32 %v3395_v53  ;;  %v3407_v33 = vand.u32 2147483648, %v3395_v53  ;;  %vm3401_vm0 = vweird.f32 %v3395_v53  ;;  %v3405_v45 = vand.u32 2147483647, %v3395_v53 }
 0x66b   :  { %v3408_v47 = vor.u32 1.1754944e-38, %v3407_v33  ;;  %vm3406_vm2 = vcmp.eq.f32.partialorder %v3405_v45, 8.507059e+37 }
 0x66f   :  { %v5186_v42 = vpop.eup %5185 }
 0x670   :  { %v3397_v60 = vmul.f32 %v5186_v42, %v3395_v53  ;;  %vm3402_vm15 = vweird.f32 %v5186_v42 }
 0x671   :  { %vm3403_vm1 = vmor %vm3401_vm0, %vm3402_vm15 }
 0x672   :  { %v3398_v62 = vsub.f32 1.0, %v3397_v60 }
 0x674   :  { %v3399_v21 = vmul.f32 %v5186_v42, %v3398_v62 }
 0x676   :  { %v3400_v2 = vadd.f32 %v5186_v42, %v3399_v21 }
 0x678   :  { %v3404_v50 = vsel %vm3403_vm1, %v5186_v42, %v3400_v2 }
 0x679   :  { %v3409_v49 = vsel %vm3406_vm2, %v3408_v47, %v3404_v50 }
 0x67a   :  { %v3431_v19 = vmul.f32 %v3409_v49, %v3389_v5 }
 0x67d   :  { %v3211_v46 = vpop.f32.mrf.mxu3 }
 0x67e   :  { %v3241_v31 = vadd.f32 %v3240_v4, %v3211_v46 }
 0x680   :  { %v6991_v59 = vadd.f32 %v4936_v27, %v3241_v31 }
 0x682   :  { %3253 = vst.msk [vmem:[%s5568_s20] sm:$0xff] %vm3252_vm12, %v6991_v59  ;;  %v3255_v3 = vsel %vm3252_vm12, %v6991_v59, -inf }
 0x683   :  { %3256 = vmax.xlane.f32.xlu2 %v3255_v3 }
 0x685   :  { %v3214_v51 = vpop.f32.mrf.mxu3 }
 0x686   :  { %v3244_v1 = vadd.f32 %v3243_v23, %v3214_v51 }
 0x688   :  { %v6998_v56 = vadd.f32 %v4936_v27, %v3244_v1  ;;  %v3432_v27 = vadd.f32 %v4814_v18, %v3431_v19 }
 0x68a   :  { %3254 = vst.msk [vmem:[%s5568_s20 + $0x8] sm:$0xff] %vm3252_vm12, %v6998_v56  ;;  %v3258_v14 = vsel %vm3252_vm12, %v6998_v56, -inf  ;;  %s5406_s20 = smov [#allocation7]  }
 0x68b   :  { %3259 = vmax.xlane.f32.xlu1 %v3258_v14 }
 0x6f6   :  { %v3257_v48 = vpop.xlane.xlu2 %3256 }
 0x6f7   :  { %vm3261_vm14 = vcmp.gt.f32.partialorder %v3257_v48, %v6991_v59 }
 0x6f8   :  { %v3263_v30 = vsel %vm3261_vm14, 1.0, %v7376_v0 }
 0x6fe   :  { %v3260_v16 = vpop.xlane.xlu1 %3259 }
 0x6ff   :  { %vm3262_vm13 = vcmp.gt.f32.partialorder %v3260_v16, %v6998_v56 }
 0x700   :  { %v3264_v26 = vsel %vm3262_vm13, 1.0, %v7376_v0 }
 0x701   :  { %4800 = vmatpush.xpose.msk.msra.mxu1 %vm3265_vm10, %v3264_v26 }
 0x705   :  { %4801 = vmatpush.xpose.msk.msra.mxu1 %vm3265_vm10, %v3263_v30 }
 0x708   :  { %4802 = vmatmul.msk.f32.vlgmr.msra.gmra.mxu1 %vm3265_vm10, %v5405_v63 }
 0x709   :  { %3360 = vmatpush.msrb.mxu1 %v7006_v15 }
 0x70b   :  { %3361 = vmatpush.msrb.mxu1 %v7011_v29 }
 0x70d   :  { %3362 = vmatpush.msrb.mxu1 %v7017_v37 }
 0x70f   :  { %3363 = vmatpush.msrb.mxu1 %v7023_v10 }
 0x710   :  { %4816 = vmatmul.msk.f32.vlgmr.msrb.gmra.mxu1 %vm197_vm7, %v6951_v34 }
 0x711   :  { %3500 = vmatpush.msra.mxu1 %v6916_v55 }
 0x713   :  { %3501 = vmatpush.msra.mxu1 %v6921_v7 }
 0x715   :  { %3502 = vmatpush.msra.mxu1 %v6928_v6 }
 0x717   :  { %3503 = vmatpush.msra.mxu1 %v6937_v25 }
 0x719   :  { %3694 = vmatpush.msrb.mxu1 %v6877_v57 }
 0x71b   :  { %3695 = vmatpush.msrb.mxu1 %v6887_v61 }
 0x71d   :  { %3696 = vmatpush.msrb.mxu1 %v6896_v52 }
 0x71f   :  { %3697 = vmatpush.msrb.mxu1 %v6908_v24 }
 0x785   :  { %v7059_v22 = vpop.f32.mrf.mxu1 }
 0x78d   :  { %v3365_v40 = vpop.f32.mrf.mxu1 }
 0x78e   :  { %v3366_v13 = vadd.f32 %v7062_v8, %v3365_v40 }
 0x790   :  { %v3411_v58 = vadd.f32 %v4813_v9, %v3366_v13 }
 0x792   :  { %v4819_v20 = vmul.f32 -1.442695, %v3411_v58 }
 0x794   :  { %5187 = vpow2.f32 %v4819_v20 }
 0x79a   :  { %v5188_v54 = vpop.eup %5187 }
 0x79b   :  { %v3415_v44 = vadd.f32 1.0, %v5188_v54 }
 0x79d   :  { %5189 = vrcp.f32 %v3415_v44  ;;  %v3427_v46 = vand.u32 2147483648, %v3415_v44  ;;  %v3425_v3 = vand.u32 2147483647, %v3415_v44  ;;  %vm3421_vm4 = vweird.f32 %v3415_v44 }
 0x79e   :  { %5191 = vtanh.f32 %v3432_v27 }
 0x79f   :  { %v3428_v51 = vor.u32 1.1754944e-38, %v3427_v46  ;;  %vm3426_vm6 = vcmp.eq.f32.partialorder %v3425_v3, 8.507059e+37 }
 0x7a3   :  { %v5190_v38 = vpop.eup %5189 }
 0x7a4   :  { %v3417_v39 = vmul.f32 %v5190_v38, %v3415_v44  ;;  %vm3422_vm3 = vweird.f32 %v5190_v38  ;;  %v5192_v16 = vpop.eup %5191 }
 0x7a5   :  { %vm3423_vm5 = vmor %vm3421_vm4, %vm3422_vm3 }
 0x7a6   :  { %v3418_v4 = vsub.f32 1.0, %v3417_v39 }
 0x7a8   :  { %v3419_v31 = vmul.f32 %v5190_v38, %v3418_v4 }
 0x7aa   :  { %v3420_v23 = vadd.f32 %v5190_v38, %v3419_v31 }
 0x7ac   :  { %v3424_v1 = vsel %vm3423_vm5, %v5190_v38, %v3420_v23  ;;  %v4822_v38 = vld [vmem:[%s7378_s9 + $0xa] sm:$0x3] }
 0x7ad   :  { %v3429_v14 = vsel %vm3426_vm6, %v3428_v51, %v3424_v1 }
 0x7ae   :  { %v3434_v48 = vsub.f32 1.0, %v3429_v14  ;;  %v3436_v26 = vmul.f32 %v3429_v14, %v6951_v34  ;;  %v4821_v34 = vld [vmem:[%s7378_s9 + $0x8] sm:$0x3] }
 0x7b0   :  { %v3435_v0 = vmul.f32 %v5192_v16, %v3434_v48 }
 0x7b2   :  { %v7072_v30 = vadd.f32 %v3436_v26, %v3435_v0  ;;  %v4829_v26 = vld [vmem:[%s7378_s9 + $0xe] sm:$0x3] }
 0x7b4   :  { %3438 = vst.msk [vmem:[#allocation5] sm:$0x3] %vm328_vm8, %v7072_v30  ;;  %4823 = vmatmul.msk.f32.vlgmr.msra.gmra.mxu3 %vm197_vm7, %v7072_v30  ;;  %4824 = vmatmul.msk.f32.vlgmr.msrb.gmra.mxu0 %vm197_vm7, %v7072_v30 }
 0x7b5   :  { %4825 = vmatmul.msk.f32.vlgmr.msra.gmra.mxu1 %vm197_vm7, %v7072_v30  ;;  %3734 = vmatpush.msra.mxu3 %v6916_v55 }
 0x7b6   :  { %3831 = vmatpush.msra.mxu1 %v7006_v15  ;;  %3811 = vmatpush.msrb.mxu0 %v6877_v57 }
 0x7b7   :  { %3735 = vmatpush.msra.mxu3 %v6921_v7 }
 0x7b8   :  { %3832 = vmatpush.msra.mxu1 %v7011_v29  ;;  %3812 = vmatpush.msrb.mxu0 %v6887_v61 }
 0x7b9   :  { %3736 = vmatpush.msra.mxu3 %v6928_v6 }
 0x7ba   :  { %3833 = vmatpush.msra.mxu1 %v7017_v37  ;;  %3813 = vmatpush.msrb.mxu0 %v6896_v52 }
 0x7bb   :  { %3737 = vmatpush.msra.mxu3 %v6937_v25 }
 0x7bc   :  { %3834 = vmatpush.msra.mxu1 %v7023_v10  ;;  %3814 = vmatpush.msrb.mxu0 %v6908_v24 }
 0x831   :  { %v3485_v63 = vpop.f32.mrf.mxu0 }
 0x832   :  { %v3486_v28 = vadd.f32 %v7062_v8, %v3485_v63  ;;  %v3505_v17 = vpop.f32.mrf.mxu1 }
 0x833   :  { %v3506_v5 = vadd.f32 %v7067_v43, %v3505_v17 }
 0x834   :  { %v3528_v35 = vadd.f32 %v4821_v34, %v3486_v28 }
 0x836   :  { %v4827_v32 = vmul.f32 -1.442695, %v3528_v35 }
 0x837   :  { %v3465_v41 = vpop.f32.mrf.mxu3 }
 0x838   :  { %5193 = vpow2.f32 %v4827_v32  ;;  %v3466_v36 = vadd.f32 %v7055_v12, %v3465_v41 }
 0x83a   :  { %v3508_v53 = vadd.f32 %v4820_v11, %v3466_v36 }
 0x83c   :  { %v4826_v42 = vmul.f32 -1.442695, %v3508_v53 }
 0x83e   :  { %v5194_v60 = vpop.eup %5193  ;;  %5195 = vpow2.f32 %v4826_v42 }
 0x83f   :  { %v3532_v9 = vadd.f32 1.0, %v5194_v60 }
 0x841   :  { %5197 = vrcp.f32 %v3532_v9  ;;  %v3544_v27 = vand.u32 2147483648, %v3532_v9  ;;  %vm3538_vm1 = vweird.f32 %v3532_v9  ;;  %v3542_v46 = vand.u32 2147483647, %v3532_v9 }
 0x843   :  { %v3545_v23 = vor.u32 1.1754944e-38, %v3544_v27  ;;  %vm3543_vm3 = vcmp.eq.f32.partialorder %v3542_v46, 8.507059e+37  ;;  %v4836_v46 = vld [vmem:[%s7378_s9 + $0x12] sm:$0x3] }
 0x844   :  { %v5196_v40 = vpop.eup %5195 }
 0x845   :  { %v3512_v13 = vadd.f32 1.0, %v5196_v40 }
 0x847   :  { %5199 = vrcp.f32 %v3512_v13  ;;  %v5198_v62 = vpop.eup %5197  ;;  %v3524_v45 = vand.u32 2147483648, %v3512_v13  ;;  %v3522_v50 = vand.u32 2147483647, %v3512_v13  ;;  %vm3518_vm13 = vweird.f32 %v3512_v13 }
 0x848   :  { %v3534_v58 = vmul.f32 %v5198_v62, %v3532_v9  ;;  %vm3539_vm0 = vweird.f32 %v5198_v62 }
 0x849   :  { %v3525_v49 = vor.u32 1.1754944e-38, %v3524_v45  ;;  %vm3523_vm15 = vcmp.eq.f32.partialorder %v3522_v50, 8.507059e+37  ;;  %vm3540_vm2 = vmor %vm3538_vm1, %vm3539_vm0  ;;  %v4830_v45 = vld [vmem:[%s7378_s9 + $0x10] sm:$0x3] }
 0x84a   :  { %v3535_v2 = vsub.f32 1.0, %v3534_v58 }
 0x84c   :  { %v3536_v44 = vmul.f32 %v5198_v62, %v3535_v2 }
 0x84d   :  { %v5200_v20 = vpop.eup %5199 }
 0x84e   :  { %v3514_v21 = vmul.f32 %v5200_v20, %v3512_v13  ;;  %vm3519_vm9 = vweird.f32 %v5200_v20  ;;  %v3537_v39 = vadd.f32 %v5198_v62, %v3536_v44 }
 0x84f   :  { %vm3520_vm14 = vmor %vm3518_vm13, %vm3519_vm9 }
 0x850   :  { %v3515_v33 = vsub.f32 1.0, %v3514_v21  ;;  %v3541_v3 = vsel %vm3540_vm2, %v5198_v62, %v3537_v39 }
 0x851   :  { %v3546_v51 = vsel %vm3543_vm3, %v3545_v23, %v3541_v3 }
 0x852   :  { %v3516_v54 = vmul.f32 %v5200_v20, %v3515_v33  ;;  %v3551_v1 = vsub.f32 1.0, %v3546_v51  ;;  %v3553_v16 = vmul.f32 %v3546_v51, %v7072_v30 }
 0x854   :  { %v3517_v47 = vadd.f32 %v5200_v20, %v3516_v54 }
 0x856   :  { %v3521_v19 = vsel %vm3520_vm14, %v5200_v20, %v3517_v47 }
 0x857   :  { %v3526_v18 = vsel %vm3523_vm15, %v3525_v49, %v3521_v19 }
 0x858   :  { %v3548_v4 = vmul.f32 %v3526_v18, %v3506_v5 }
 0x85a   :  { %v3549_v31 = vadd.f32 %v4822_v38, %v3548_v4 }
 0x85c   :  { %5201 = vtanh.f32 %v3549_v31 }
 0x862   :  { %v5202_v14 = vpop.eup %5201 }
 0x863   :  { %v3552_v48 = vmul.f32 %v5202_v14, %v3551_v1  ;;  %v4837_v1 = vld [vmem:[%s7378_s9 + $0x14] sm:$0x3] }
 0x865   :  { %v7101_v0 = vadd.f32 %v3553_v16, %v3552_v48  ;;  %v4031_v16 = vld [vmem:[%s7379_s13 + $0x18] sm:$0xff] }
 0x867   :  { %3555 = vst.msk [vmem:[#allocation5 + $0x2] sm:$0x3] %vm328_vm8, %v7101_v0  ;;  %4831 = vmatmul.msk.f32.vlgmr.msrb.gmra.mxu2 %vm197_vm7, %v7101_v0  ;;  %4832 = vmatmul.msk.f32.vlgmr.msrb.gmra.mxu3 %vm197_vm7, %v7101_v0 }
 0x868   :  { %4833 = vmatmul.msk.f32.vlgmr.msra.gmra.mxu0 %vm197_vm7, %v7101_v0  ;;  %3851 = vmatpush.msrb.mxu2 %v6916_v55 }
 0x869   :  { %3948 = vmatpush.msra.mxu0 %v7006_v15  ;;  %3928 = vmatpush.msrb.mxu3 %v6877_v57  ;;  %v4828_v15 = vld [vmem:[%s7378_s9 + $0xc] sm:$0x3] }
 0x86a   :  { %3852 = vmatpush.msrb.mxu2 %v6921_v7 }
 0x86b   :  { %3949 = vmatpush.msra.mxu0 %v7011_v29  ;;  %3929 = vmatpush.msrb.mxu3 %v6887_v61 }
 0x86c   :  { %3853 = vmatpush.msrb.mxu2 %v6928_v6 }
 0x86d   :  { %3950 = vmatpush.msra.mxu0 %v7017_v37  ;;  %3930 = vmatpush.msrb.mxu3 %v6896_v52 }
 0x86e   :  { %3854 = vmatpush.msrb.mxu2 %v6937_v25 }
 0x86f   :  { %3951 = vmatpush.msra.mxu0 %v7023_v10  ;;  %3931 = vmatpush.msrb.mxu3 %v6908_v24 }
 0x8e5   :  { %v3622_v13 = vpop.f32.mrf.mxu0 }
 0x8e6   :  { %v3623_v21 = vadd.f32 %v7067_v43, %v3622_v13 }
 0x8ea   :  { %v3582_v57 = vpop.f32.mrf.mxu2  ;;  %v3602_v30 = vpop.f32.mrf.mxu3 }
 0x8eb   :  { %v3583_v29 = vadd.f32 %v7055_v12, %v3582_v57  ;;  %v3603_v61 = vadd.f32 %v7062_v8, %v3602_v30  ;;  %v4029_v57 = vld [vmem:[%s7379_s13 + $0x8] sm:$0xff]  ;;  %v4028_v30 = vld [vmem:[%s7379_s13] sm:$0xff] }
 0x8ed   :  { %v3625_v34 = vadd.f32 %v4828_v15, %v3583_v29  ;;  %v3645_v63 = vadd.f32 %v4829_v26, %v3603_v61  ;;  %v4030_v15 = vld [vmem:[%s7379_s13 + $0x10] sm:$0xff] }
 0x8ef   :  { %v4834_v28 = vmul.f32 -1.442695, %v3625_v34  ;;  %v4835_v37 = vmul.f32 -1.442695, %v3645_v63 }
 0x8f1   :  { %5203 = vpow2.f32 %v4834_v28 }
 0x8f2   :  { %5205 = vpow2.f32 %v4835_v37 }
 0x8f7   :  { %v5204_v52 = vpop.eup %5203 }
 0x8f8   :  { %v5206_v35 = vpop.eup %5205  ;;  %v3629_v32 = vadd.f32 1.0, %v5204_v52 }
 0x8f9   :  { %v3649_v10 = vadd.f32 1.0, %v5206_v35 }
 0x8fa   :  { %5207 = vrcp.f32 %v3629_v32  ;;  %v3641_v42 = vand.u32 2147483648, %v3629_v32  ;;  %v3639_v40 = vand.u32 2147483647, %v3629_v32  ;;  %vm3635_vm5 = vweird.f32 %v3629_v32 }
 0x8fb   :  { %5209 = vrcp.f32 %v3649_v10  ;;  %v3661_v44 = vand.u32 2147483648, %v3649_v10  ;;  %vm3655_vm14 = vweird.f32 %v3649_v10  ;;  %v3659_v17 = vand.u32 2147483647, %v3649_v10 }
 0x8fc   :  { %v3642_v20 = vor.u32 1.1754944e-38, %v3641_v42  ;;  %vm3640_vm9 = vcmp.eq.f32.partialorder %v3639_v40, 8.507059e+37 }
 0x8fd   :  { %v3662_v5 = vor.u32 1.1754944e-38, %v3661_v44  ;;  %vm3660_vm0 = vcmp.eq.f32.partialorder %v3659_v17, 8.507059e+37  ;;  %v4027_v17 = vld [vmem:[#allocation2 + $0x8] sm:$0xff] }
 0x900   :  { %v5208_v24 = vpop.eup %5207 }
 0x901   :  { %v5210_v11 = vpop.eup %5209  ;;  %v3631_v41 = vmul.f32 %v5208_v24, %v3629_v32  ;;  %vm3636_vm4 = vweird.f32 %v5208_v24 }
 0x902   :  { %v3651_v36 = vmul.f32 %v5210_v11, %v3649_v10  ;;  %vm3637_vm6 = vmor %vm3635_vm5, %vm3636_vm4  ;;  %vm3656_vm13 = vweird.f32 %v5210_v11 }
 0x903   :  { %v3632_v53 = vsub.f32 1.0, %v3631_v41  ;;  %vm3657_vm15 = vmor %vm3655_vm14, %vm3656_vm13  ;;  %vm4068_vm14 = vcmask 1045504  }
 0x904   :  { %v3652_v60 = vsub.f32 1.0, %v3651_v36 }
 0x905   :  { %v3633_v9 = vmul.f32 %v5208_v24, %v3632_v53  ;;  %v4838_v53 = vld [vmem:[%s7378_s9 + $0x16] sm:$0x3] }
 0x906   :  { %v3653_v62 = vmul.f32 %v5210_v11, %v3652_v60 }
 0x907   :  { %v3634_v58 = vadd.f32 %v5208_v24, %v3633_v9 }
 0x908   :  { %v3654_v54 = vadd.f32 %v5210_v11, %v3653_v62 }
 0x909   :  { %v3638_v2 = vsel %vm3637_vm6, %v5208_v24, %v3634_v58 }
 0x90a   :  { %v3643_v33 = vsel %vm3640_vm9, %v3642_v20, %v3638_v2  ;;  %v3658_v49 = vsel %vm3657_vm15, %v5210_v11, %v3654_v54 }
 0x90b   :  { %v3665_v50 = vmul.f32 %v3643_v33, %v3623_v21  ;;  %v3663_v19 = vsel %vm3660_vm0, %v3662_v5, %v3658_v49  ;;  %v4844_v49 = vld [vmem:[%s7378_s9 + $0x18] sm:$0x3] }
 0x90c   :  { %v3668_v18 = vsub.f32 1.0, %v3663_v19  ;;  %v3670_v27 = vmul.f32 %v3663_v19, %v7101_v0  ;;  %v4845_v19 = vld [vmem:[%s7378_s9 + $0x1a] sm:$0x3] }
 0x90d   :  { %v3666_v47 = vadd.f32 %v4830_v45, %v3665_v50 }
 0x90f   :  { %5211 = vtanh.f32 %v3666_v47  ;;  %v4026_v47 = vld [vmem:[#allocation2] sm:$0xff] }
 0x915   :  { %v5212_v38 = vpop.eup %5211 }
 0x916   :  { %v3669_v39 = vmul.f32 %v5212_v38, %v3668_v18 }
 0x918   :  { %v7130_v4 = vadd.f32 %v3670_v27, %v3669_v39 }
 0x91a   :  { %3672 = vst.msk [vmem:[#allocation5 + $0x4] sm:$0x3] %vm328_vm8, %v7130_v4  ;;  %4839 = vmatmul.msk.f32.vlgmr.msrb.gmra.mxu1 %vm197_vm7, %v7130_v4  ;;  %4840 = vmatmul.msk.f32.vlgmr.msra.gmra.mxu2 %vm197_vm7, %v7130_v4 }
 0x91b   :  { %4841 = vmatmul.msk.f32.vlgmr.msra.gmra.mxu3 %vm197_vm7, %v7130_v4  ;;  %3968 = vmatpush.msrb.mxu1 %v6916_v55 }
 0x91c   :  { %4050 = vmatpush.msra.mxu2 %v4031_v16 }
 0x91d   :  { %3969 = vmatpush.msrb.mxu1 %v6921_v7 }
 0x91e   :  { %4051 = vmatpush.msra.mxu2 %v4030_v15 }
 0x91f   :  { %3970 = vmatpush.msrb.mxu1 %v6928_v6 }
 0x920   :  { %4052 = vmatpush.msra.mxu2 %v4029_v57 }
 0x921   :  { %3971 = vmatpush.msrb.mxu1 %v6937_v25 }
 0x922   :  { %4053 = vmatpush.msra.mxu2 %v4028_v30 }
 0x997   :  { %v3699_v31 = vpop.f32.mrf.mxu1 }
 0x998   :  { %v3700_v3 = vadd.f32 %v7055_v12, %v3699_v31 }
 0x99a   :  { %v3742_v23 = vadd.f32 %v4836_v46, %v3700_v3 }
 0x99c   :  { %v4842_v51 = vmul.f32 -1.442695, %v3742_v23 }
 0x99d   :  { %v3719_v14 = vpop.f32.mrf.mxu2 }
 0x99e   :  { %5213 = vpow2.f32 %v4842_v51  ;;  %v3720_v55 = vadd.f32 %v7062_v8, %v3719_v14  ;;  %v3739_v35 = vpop.f32.mrf.mxu3 }
 0x99f   :  { %v3740_v41 = vadd.f32 %v7067_v43, %v3739_v35 }
 0x9a0   :  { %v3762_v7 = vadd.f32 %v4837_v1, %v3720_v55 }
 0x9a2   :  { %v4843_v48 = vmul.f32 -1.442695, %v3762_v7  ;;  %v4061_v7 = vld [vmem:[%s7380_s17] sm:$0x3f] }
 0x9a3   :  { %4862 = vmatpush.msk.msra.mxu3 %vm4068_vm14, %v4061_v7 }
 0x9a4   :  { %v5214_v6 = vpop.eup %5213  ;;  %5215 = vpow2.f32 %v4843_v48 }
 0x9a5   :  { %v3746_v25 = vadd.f32 1.0, %v5214_v6 }
 0x9a7   :  { %5217 = vrcp.f32 %v3746_v25  ;;  %v3758_v63 = vand.u32 2147483648, %v3746_v25  ;;  %v3756_v37 = vand.u32 2147483647, %v3746_v25  ;;  %vm3752_vm2 = vweird.f32 %v3746_v25 }
 0x9a9   :  { %v3759_v24 = vor.u32 1.1754944e-38, %v3758_v63  ;;  %vm3757_vm4 = vcmp.eq.f32.partialorder %v3756_v37, 8.507059e+37 }
 0x9aa   :  { %v5216_v0 = vpop.eup %5215 }
 0x9ab   :  { %v3766_v26 = vadd.f32 1.0, %v5216_v0 }
 0x9ad   :  { %v5218_v29 = vpop.eup %5217  ;;  %5219 = vrcp.f32 %v3766_v26  ;;  %v3778_v9 = vand.u32 2147483648, %v3766_v26  ;;  %v3776_v13 = vand.u32 2147483647, %v3766_v26  ;;  %vm3772_vm6 = vweird.f32 %v3766_v26 }
 0x9ae   :  { %v3748_v61 = vmul.f32 %v5218_v29, %v3746_v25  ;;  %vm3753_vm1 = vweird.f32 %v5218_v29 }
 0x9af   :  { %vm3754_vm3 = vmor %vm3752_vm2, %vm3753_vm1  ;;  %v3779_v20 = vor.u32 1.1754944e-38, %v3778_v9  ;;  %vm3777_vm13 = vcmp.eq.f32.partialorder %v3776_v13, 8.507059e+37 }
 0x9b0   :  { %v3749_v34 = vsub.f32 1.0, %v3748_v61 }
 0x9b2   :  { %v3750_v28 = vmul.f32 %v5218_v29, %v3749_v34 }
 0x9b3   :  { %v5220_v52 = vpop.eup %5219 }
 0x9b4   :  { %v3768_v32 = vmul.f32 %v5220_v52, %v3766_v26  ;;  %v3751_v10 = vadd.f32 %v5218_v29, %v3750_v28  ;;  %vm3773_vm5 = vweird.f32 %v5220_v52 }
 0x9b5   :  { %vm3774_vm9 = vmor %vm3772_vm6, %vm3773_vm5 }
 0x9b6   :  { %v3769_v11 = vsub.f32 1.0, %v3768_v32  ;;  %v3755_v36 = vsel %vm3754_vm3, %v5218_v29, %v3751_v10 }
 0x9b7   :  { %v3760_v42 = vsel %vm3757_vm4, %v3759_v24, %v3755_v36 }
 0x9b8   :  { %v3770_v60 = vmul.f32 %v5220_v52, %v3769_v11  ;;  %v3782_v40 = vmul.f32 %v3760_v42, %v3740_v41 }
 0x9ba   :  { %v3771_v62 = vadd.f32 %v5220_v52, %v3770_v60  ;;  %v3783_v58 = vadd.f32 %v4838_v53, %v3782_v40 }
 0x9bc   :  { %v3775_v21 = vsel %vm3774_vm9, %v5220_v52, %v3771_v62  ;;  %5221 = vtanh.f32 %v3783_v58  ;;  %v4846_v52 = vld [vmem:[%s7378_s9 + $0x1c] sm:$0x3] }
 0x9bd   :  { %v3780_v2 = vsel %vm3777_vm13, %v3779_v20, %v3775_v21  ;;  %v4853_v20 = vld [vmem:[%s7378_s9 + $0x20] sm:$0x3] }
 0x9be   :  { %v3785_v33 = vsub.f32 1.0, %v3780_v2  ;;  %v3787_v50 = vmul.f32 %v3780_v2, %v7130_v4 }
 0x9c2   :  { %v5222_v45 = vpop.eup %5221 }
 0x9c3   :  { %v3786_v54 = vmul.f32 %v5222_v45, %v3785_v33  ;;  %v7201_v45 = vld [vmem:[%s7381_s21] sm:$0xff] }
 0x9c4   :  { %vm4132_vm9 = vcmp.gt.f32.partialorder %v7201_v45, 0.0 }
 0x9c5   :  { %v7155_v44 = vadd.f32 %v3787_v50, %v3786_v54  ;;  %v4852_v50 = vld [vmem:[%s7378_s9 + $0x1e] sm:$0x3] }
 0x9c7   :  { %3789 = vst.msk [vmem:[#allocation5 + $0x6] sm:$0x3] %vm328_vm8, %v7155_v44  ;;  %4847 = vmatmul.msk.f32.vlgmr.msrb.gmra.mxu0 %vm197_vm7, %v7155_v44  ;;  %4848 = vmatmul.msk.f32.vlgmr.msra.gmra.mxu1 %vm197_vm7, %v7155_v44 }
 0x9c8   :  { %4849 = vmatmul.msk.f32.vlgmr.msrb.gmra.mxu2 %vm197_vm7, %v7155_v44  ;;  %4183 = vmatpush.msra.mxu1 %v4027_v17 }
 0x9ca   :  { %4184 = vmatpush.msra.mxu1 %v4026_v47 }
 0x9ce   :  { %v7190_v58 = vld [vmem:[#allocation5] sm:$0xff] }
 0x9d0   :  { %4860 = vmatmul.msk.f32.vlgmr.msra.gmra.mxu2 %vm197_vm7, %v4026_v47 }
 0x9d8   :  { %4861 = vmatmul.msk.f32.gmra.mxu2 %vm197_vm7, %v4027_v17 }
 0xa44   :  { %v3816_v5 = vpop.f32.mrf.mxu0  ;;  %v3836_v18 = vpop.f32.mrf.mxu1 }
 0xa45   :  { %v3817_v38 = vadd.f32 %v7055_v12, %v3816_v5  ;;  %v3837_v39 = vadd.f32 %v7062_v8, %v3836_v18 }
 0xa47   :  { %v3859_v27 = vadd.f32 %v4844_v49, %v3817_v38  ;;  %v3879_v4 = vadd.f32 %v4845_v19, %v3837_v39 }
 0xa49   :  { %v4850_v46 = vmul.f32 -1.442695, %v3859_v27  ;;  %v4851_v31 = vmul.f32 -1.442695, %v3879_v4 }
 0xa4b   :  { %5223 = vpow2.f32 %v4850_v46  ;;  %v3856_v3 = vpop.f32.mrf.mxu2 }
 0xa4c   :  { %5225 = vpow2.f32 %v4851_v31  ;;  %v3857_v28 = vadd.f32 %v7067_v43, %v3856_v3 }
 0xa51   :  { %v5224_v23 = vpop.eup %5223 }
 0xa52   :  { %v5226_v51 = vpop.eup %5225  ;;  %v3863_v1 = vadd.f32 1.0, %v5224_v23 }
 0xa53   :  { %v3883_v14 = vadd.f32 1.0, %v5226_v51  ;;  %v4055_v55 = vpop.f32.mrf.mxu2 }
 0xa54   :  { %5227 = vrcp.f32 %v3863_v1  ;;  %v3875_v26 = vand.u32 2147483648, %v3863_v1  ;;  %v3873_v29 = vand.u32 2147483647, %v3863_v1  ;;  %vm3869_vm0 = vweird.f32 %v3863_v1 }
 0xa55   :  { %5229 = vrcp.f32 %v3883_v14  ;;  %v3895_v10 = vand.u32 2147483648, %v3883_v14  ;;  %vm3889_vm4 = vweird.f32 %v3883_v14  ;;  %v3893_v11 = vand.u32 2147483647, %v3883_v14 }
 0xa56   :  { %v3876_v63 = vor.u32 1.1754944e-38, %v3875_v26  ;;  %vm3874_vm2 = vcmp.eq.f32.partialorder %v3873_v29, 8.507059e+37 }
 0xa57   :  { %v3896_v53 = vor.u32 1.1754944e-38, %v3895_v10  ;;  %vm3894_vm6 = vcmp.eq.f32.partialorder %v3893_v11, 8.507059e+37 }
 0xa5a   :  { %v5228_v48 = vpop.eup %5227 }
 0xa5b   :  { %v5230_v6 = vpop.eup %5229  ;;  %v3865_v25 = vmul.f32 %v5228_v48, %v3863_v1  ;;  %v4058_v16 = vpop.f32.mrf.mxu2  ;;  %vm3870_vm15 = vweird.f32 %v5228_v48 }
 0xa5c   :  { %v3885_v0 = vmul.f32 %v5230_v6, %v3883_v14  ;;  %4865 = vmatpush.xpose.msk.msrb.mxu0 %vm197_vm7, %v4058_v16  ;;  %vm3871_vm1 = vmor %vm3869_vm0, %vm3870_vm15  ;;  %vm3890_vm3 = vweird.f32 %v5230_v6 }
 0xa5d   :  { %v3866_v15 = vsub.f32 1.0, %v3865_v25  ;;  %vm3891_vm5 = vmor %vm3889_vm4, %vm3890_vm3 }
 0xa5e   :  { %v3886_v57 = vsub.f32 1.0, %v3885_v0 }
 0xa5f   :  { %v3867_v30 = vmul.f32 %v5228_v48, %v3866_v15  ;;  %v4854_v15 = vld [vmem:[%s7378_s9 + $0x22] sm:$0x3] }
 0xa60   :  { %v3887_v61 = vmul.f32 %v5230_v6, %v3886_v57  ;;  %4866 = vmatpush.xpose.msk.msrb.mxu0 %vm197_vm7, %v4055_v55 }
 0xa61   :  { %v3868_v34 = vadd.f32 %v5228_v48, %v3867_v30 }
 0xa62   :  { %v3888_v32 = vadd.f32 %v5230_v6, %v3887_v61 }
 0xa63   :  { %v3872_v37 = vsel %vm3871_vm1, %v5228_v48, %v3868_v34 }
 0xa64   :  { %v3877_v35 = vsel %vm3874_vm2, %v3876_v63, %v3872_v37  ;;  %v3892_v36 = vsel %vm3891_vm5, %v5230_v6, %v3888_v32 }
 0xa65   :  { %v3899_v24 = vmul.f32 %v3877_v35, %v3857_v28  ;;  %v3897_v42 = vsel %vm3894_vm6, %v3896_v53, %v3892_v36  ;;  %vm4139_vm6 = vcmask 125952  }
 0xa66   :  { %v3902_v60 = vsub.f32 1.0, %v3897_v42  ;;  %v3904_v13 = vmul.f32 %v3897_v42, %v7155_v44 }
 0xa67   :  { %v3900_v41 = vadd.f32 %v4846_v52, %v3899_v24  ;;  %v4192_v24 = vperm.slane %v7059_v22, 0 }
 0xa69   :  { %5231 = vtanh.f32 %v3900_v41 }
 0xa6f   :  { %v5232_v9 = vpop.eup %5231 }
 0xa70   :  { %v3903_v40 = vmul.f32 %v5232_v9, %v3902_v60  ;;  %v4096_v9 = vld [vmem:[%s7381_s21 + $0x8] sm:$0xf] }
 0xa72   :  { %v7178_v62 = vadd.f32 %v3904_v13, %v3903_v40 }
 0xa74   :  { %3906 = vst.msk [vmem:[#allocation5 + $0x8] sm:$0x3] %vm328_vm8, %v7178_v62  ;;  %4855 = vmatmul.msk.f32.vlgmr.msrb.gmra.mxu3 %vm197_vm7, %v7178_v62  ;;  %4856 = vmatmul.msk.f32.vlgmr.msra.gmra.mxu0 %vm197_vm7, %v7178_v62 }
 0xa75   :  { %4857 = vmatmul.msk.f32.vlgmr.msrb.gmra.mxu1 %vm197_vm7, %v7178_v62  ;;  %4270 = vmatpush.msrb.mxu3 %v6998_v56 }
 0xa77   :  { %4271 = vmatpush.msrb.mxu3 %v6991_v59 }
 0xa7c   :  { %4863 = vmatmul.msk.f32.vlgmr.msra.gmra.mxu3 %vm3252_vm12, %v6991_v59  ;;  %4867 = vmatmul.msk.f32.vlgmr.msrb.gmra.mxu0 %vm197_vm7, %v7190_v58 }
 0xa84   :  { %4864 = vmatmul.msk.f32.gmra.mxu3 %vm3252_vm12, %v6998_v56 }
 0xaf1   :  { %v3953_v21 = vpop.f32.mrf.mxu0 }
 0xaf2   :  { %v3954_v2 = vadd.f32 %v7062_v8, %v3953_v21  ;;  %v3973_v7 = vpop.f32.mrf.mxu1 }
 0xaf3   :  { %v3974_v25 = vadd.f32 %v7067_v43, %v3973_v7 }
 0xaf4   :  { %v3996_v33 = vadd.f32 %v4853_v20, %v3954_v2 }
 0xaf6   :  { %v4859_v54 = vmul.f32 -1.442695, %v3996_v33 }
 0xaf7   :  { %v3933_v44 = vpop.f32.mrf.mxu3 }
 0xaf8   :  { %5233 = vpow2.f32 %v4859_v54  ;;  %v3934_v59 = vadd.f32 %v7055_v12, %v3933_v44 }
 0xaf9   :  { %v4126_v17 = vpop.f32.mrf.mxu0 }
 0xafa   :  { %v3976_v47 = vadd.f32 %v4852_v50, %v3934_v59  ;;  %v7208_v56 = vsel %vm4132_vm9, %v4126_v17, -1e+09 }
 0xafb   :  { %v4136_v8 = vsel %vm338_vm11, %v7208_v56, -inf }
 0xafc   :  { %v4858_v49 = vmul.f32 -1.442695, %v3976_v47  ;;  %4137 = vmax.xlane.f32.xlu1 %v4136_v8 }
 0xafe   :  { %v5234_v5 = vpop.eup %5233  ;;  %5235 = vpow2.f32 %v4858_v49 }
 0xaff   :  { %v4000_v19 = vadd.f32 1.0, %v5234_v5  ;;  %v4089_v18 = vpop.f32.mrf.mxu3 }
 0xb01   :  { %5237 = vrcp.f32 %v4000_v19  ;;  %v4012_v26 = vand.u32 2147483648, %v4000_v19  ;;  %vm4006_vm3 = vweird.f32 %v4000_v19  ;;  %v4010_v29 = vand.u32 2147483647, %v4000_v19 }
 0xb03   :  { %v4013_v63 = vor.u32 1.1754944e-38, %v4012_v26  ;;  %vm4011_vm5 = vcmp.eq.f32.partialorder %v4010_v29, 8.507059e+37  ;;  %v4281_v26 = vld [vmem:[%s7383_s29 + $0x10] sm:$0xff]  ;;  %v4279_v29 = vld [vmem:[%s7383_s29] sm:$0xff] }
 0xb04   :  { %v5236_v38 = vpop.eup %5235 }
 0xb05   :  { %v3980_v39 = vadd.f32 1.0, %v5236_v38 }
 0xb07   :  { %5239 = vrcp.f32 %v3980_v39  ;;  %v4092_v12 = vpop.f32.mrf.mxu3  ;;  %v5238_v27 = vpop.eup %5237  ;;  %v3992_v51 = vand.u32 2147483648, %v3980_v39  ;;  %v3990_v14 = vand.u32 2147483647, %v3980_v39  ;;  %vm3986_vm15 = vweird.f32 %v3980_v39 }
 0xb08   :  { %4871 = vmatpush.xpose.msk.msrb.mxu2 %vm197_vm7, %v4092_v12  ;;  %v4002_v4 = vmul.f32 %v5238_v27, %v4000_v19  ;;  %vm4007_vm2 = vweird.f32 %v5238_v27 }
 0xb09   :  { %v3993_v6 = vor.u32 1.1754944e-38, %v3992_v51  ;;  %vm3991_vm1 = vcmp.eq.f32.partialorder %v3990_v14, 8.507059e+37  ;;  %vm4008_vm4 = vmor %vm4006_vm3, %vm4007_vm2 }
 0xb0a   :  { %v4003_v3 = vsub.f32 1.0, %v4002_v4 }
 0xb0c   :  { %4872 = vmatpush.xpose.msk.msrb.mxu2 %vm197_vm7, %v4089_v18  ;;  %v4004_v55 = vmul.f32 %v5238_v27, %v4003_v3 }
 0xb0d   :  { %v5240_v46 = vpop.eup %5239 }
 0xb0e   :  { %v3982_v31 = vmul.f32 %v5240_v46, %v3980_v39  ;;  %vm3987_vm13 = vweird.f32 %v5240_v46  ;;  %v4005_v0 = vadd.f32 %v5238_v27, %v4004_v55 }
 0xb0f   :  { %4873 = vmatmul.msk.f32.vlgmr.msrb.gmra.mxu2 %vm197_vm7, %v7190_v58  ;;  %vm3988_vm0 = vmor %vm3986_vm15, %vm3987_vm13  ;;  %vm4437_vm13 = vcmask 44032  }
 0xb10   :  { %v3983_v23 = vsub.f32 1.0, %v3982_v31  ;;  %v4009_v34 = vsel %vm4008_vm4, %v5238_v27, %v4005_v0  ;;  %v4284_v0 = vld [vmem:[%s7382_s25 + $0x8] sm:$0xff]  ;;  %vm4531_vm4 = vcmask 3072  }
 0xb11   :  { %v4014_v28 = vsel %vm4011_vm5, %v4013_v63, %v4009_v34  ;;  %vm4540_vm5 = vcmask 0  }
 0xb12   :  { %v3984_v1 = vmul.f32 %v5240_v46, %v3983_v23  ;;  %v4019_v37 = vsub.f32 1.0, %v4014_v28  ;;  %v4021_v43 = vmul.f32 %v4014_v28, %v7178_v62 }
 0xb14   :  { %v3985_v48 = vadd.f32 %v5240_v46, %v3984_v1 }
 0xb16   :  { %v3989_v16 = vsel %vm3988_vm0, %v5240_v46, %v3985_v48 }
 0xb17   :  { %v3994_v57 = vsel %vm3991_vm1, %v3993_v6, %v3989_v16  ;;  %v4285_v16 = vld [vmem:[%s7382_s25 + $0x10] sm:$0xff] }
 0xb18   :  { %v4016_v30 = vmul.f32 %v3994_v57, %v3974_v25  ;;  %v4286_v25 = vld [vmem:[%s7382_s25 + $0x18] sm:$0xff]  ;;  %v4283_v57 = vld [vmem:[%s7382_s25] sm:$0xff] }
 0xb19   :  { %4305 = vmatpush.msra.mxu0 %v4286_v25 }
 0xb1a   :  { %v4017_v61 = vadd.f32 %v4854_v15, %v4016_v30  ;;  %v4282_v15 = vld [vmem:[%s7383_s29 + $0x18] sm:$0xff]  ;;  %v4280_v30 = vld [vmem:[%s7383_s29 + $0x8] sm:$0xff] }
 0xb1b   :  { %4306 = vmatpush.msra.mxu0 %v4285_v16  ;;  %4328 = vmatpush.msrb.mxu1 %v4282_v15  ;;  %v4491_v16 = vld [vmem:[%s5558_s4] sm:$0xff] }
 0xb1c   :  { %5241 = vtanh.f32 %v4017_v61 }
 0xb1d   :  { %4307 = vmatpush.msra.mxu0 %v4284_v0  ;;  %4329 = vmatpush.msrb.mxu1 %v4281_v26 }
 0xb1f   :  { %4308 = vmatpush.msra.mxu0 %v4283_v57  ;;  %4330 = vmatpush.msrb.mxu1 %v4280_v30  ;;  %v4501_v57 = vld [vmem:[%s7389_s6 + $0x8] sm:$0xf] }
 0xb21   :  { %4331 = vmatpush.msrb.mxu1 %v4279_v29 }
 0xb22   :  { %v5242_v52 = vpop.eup %5241 }
 0xb23   :  { %v4020_v35 = vmul.f32 %v5242_v52, %v4019_v37 }
 0xb25   :  { %v4022_v32 = vadd.f32 %v4021_v43, %v4020_v35 }
 0xb27   :  { %4023 = vst.msk [vmem:[#allocation5 + $0xa] sm:$0x3] %vm328_vm8, %v4022_v32  ;;  %vm4133_vm8 = vcmp.gt.f32.partialorder %v4096_v9, 0.0 }
 0xb2e   :  { %v7220_v10 = vld [vmem:[#allocation5 + $0x8] sm:$0xf] }
 0xb2f   :  { %4868 = vmatmul.msk.f32.gmra.mxu0 %vm197_vm7, %v7220_v10  ;;  %4874 = vmatmul.msk.f32.gmra.mxu2 %vm197_vm7, %v7220_v10 }
 0xb6f   :  { %v4138_v42 = vpop.xlane.xlu1 %4137 }
 0xb70   :  { %v4143_v60 = vsub.f32 %v7208_v56, %v4138_v42 }
 0xb72   :  { %v4145_v62 = vmul.f32 1.442695, %v4143_v60 }
 0xb74   :  { %5243 = vpow2.f32 %v4145_v62 }
 0xb7a   :  { %v5244_v54 = vpop.eup %5243 }
 0xb7b   :  { %v4149_v50 = vmul.f32 %v5244_v54, %v7201_v45 }
 0xb7d   :  { %v4151_v44 = vsel %vm338_vm11, %v4149_v50, 0.0 }
 0xb92   :  { %v4216_v11 = vpop.f32.mrf.mxu2 }
 0xb93   :  { %v4217_v41 = vadd.f32 %v4216_v11, %v4192_v24 }
 0xb95   :  { %v4222_v36 = vsel %vm4132_vm9, %v4217_v41, -1e+09  ;;  %vm4382_vm9 = vcmask 1043456  }
 0xb96   :  { %v4224_v53 = vsel %vm338_vm11, %v4222_v36, -inf }
 0xb97   :  { %4225 = vmax.xlane.f32.xlu0 %v4224_v53 }
 0xbac   :  { %v4129_v21 = vpop.f32.mrf.mxu0 }
 0xbad   :  { %v4135_v2 = vsel %vm4133_vm8, %v4129_v21, -1e+09 }
 0xbae   :  { %v4140_v33 = vsel %vm4139_vm6, %v4135_v2, -inf }
 0xbb2   :  { %v4219_v40 = vpop.f32.mrf.mxu2 }
 0xbb3   :  { %v4220_v13 = vadd.f32 %v4219_v40, %v4192_v24  ;;  %v4339_v24 = vld [vmem:[%s7384_s3] sm:$0x3f] }
 0xbb4   :  { %4881 = vmatpush.msk.msra.mxu2 %vm4068_vm14, %v4339_v24  ;;  %vm4410_vm14 = vcmask 257024  }
 0xbb5   :  { %v4223_v20 = vsel %vm4133_vm8, %v4220_v13, -1e+09 }
 0xbb6   :  { %v4227_v22 = vsel %vm4139_vm6, %v4223_v20, -inf }
 0xbb7   :  { %4228 = vmax.xlane.f32.xlu2 %v4227_v22 }
 0xbbf   :  { %4141 = vmax.xlane.f32.xlu2 %v4140_v33 }
 0xbc7   :  { %4152 = vadd.xlane.f32.xlu2 %v4151_v44 }
 0xc0a   :  { %v4226_v59 = vpop.xlane.xlu0 %4225 }
 0xc0b   :  { %v4230_v17 = vsub.f32 %v4222_v36, %v4226_v59 }
 0xc0d   :  { %v4232_v47 = vmul.f32 1.442695, %v4230_v17 }
 0xc0f   :  { %5245 = vpow2.f32 %v4232_v47 }
 0xc15   :  { %v5246_v56 = vpop.eup %5245 }
 0xc16   :  { %v4236_v8 = vmul.f32 %v5246_v56, %v7201_v45 }
 0xc18   :  { %v4238_v49 = vsel %vm338_vm11, %v4236_v8, 0.0 }
 0xc19   :  { %4239 = vadd.xlane.f32.xlu0 %v4238_v49 }
 0xc2a   :  { %v4229_v5 = vpop.xlane.xlu2 %4228 }
 0xc2b   :  { %v4231_v19 = vsub.f32 %v4223_v20, %v4229_v5  ;;  %v4941_v20 = vld [vmem:[%s7386_s14] ss:$0 sm:$0xff] }
 0xc2c   :  { %v4405_v22 = vmul.f32 %v4941_v20, %v7190_v58 }
 0xc2d   :  { %v4234_v18 = vmul.f32 1.442695, %v4231_v19 }
 0xc2e   :  { %v4407_v21 = vsel %vm197_vm7, %v4405_v22, 0.0 }
 0xc2f   :  { %5247 = vpow2.f32 %v4234_v18 }
 0xc32   :  { %v4142_v38 = vpop.xlane.xlu2 %4141 }
 0xc33   :  { %v4144_v39 = vsub.f32 %v4135_v2, %v4142_v38  ;;  %v4938_v2 = vld [vmem:[%s7387_s19] ss:$0 sm:$0xff] }
 0xc35   :  { %v5248_v12 = vpop.eup %5247  ;;  %v4147_v27 = vmul.f32 1.442695, %v4144_v39  ;;  %v4939_v39 = vld [vmem:[%s7388_s24] ss:$0 sm:$0xff] }
 0xc36   :  { %v4237_v4 = vmul.f32 %v5248_v12, %v4096_v9 }
 0xc37   :  { %5249 = vpow2.f32 %v4147_v27 }
 0xc38   :  { %v4241_v46 = vsel %vm4139_vm6, %v4237_v4, 0.0 }
 0xc39   :  { %4242 = vadd.xlane.f32.xlu1 %v4241_v46 }
 0xc3a   :  { %v4153_v31 = vpop.xlane.xlu2 %4152 }
 0xc3b   :  { %v4157_v3 = vadd.f32 1e-09, %v4153_v31 }
 0xc3d   :  { %v5250_v45 = vpop.eup %5249  ;;  %5251 = vrcp.f32 %v4157_v3 }
 0xc3e   :  { %v4150_v23 = vmul.f32 %v5250_v45, %v4096_v9  ;;  %v4940_v9 = vld [vmem:[%s7385_s8] ss:$0 sm:$0xff] }
 0xc40   :  { %v4154_v51 = vsel %vm4139_vm6, %v4150_v23, 0.0 }
 0xc41   :  { %4155 = vadd.xlane.f32.xlu0 %v4154_v51 }
 0xc43   :  { %v5252_v1 = vpop.eup %5251 }
 0xc44   :  { %v7240_v14 = vmul.f32 %v5252_v1, %v4149_v50 }
 0xc46   :  { %4869 = vmatmul.msk.f32.vlgmr.msra.gmra.mxu1 %vm338_vm11, %v7240_v14 }
 0xc8c   :  { %v4240_v55 = vpop.xlane.xlu0 %4239 }
 0xc8d   :  { %v4244_v7 = vadd.f32 1e-09, %v4240_v55  ;;  %v4406_v55 = vmul.f32 %v4941_v20, %v7220_v10 }
 0xc8f   :  { %5253 = vrcp.f32 %v4244_v7  ;;  %v4411_v7 = vsel %vm4410_vm14, %v4406_v55, 0.0 }
 0xc95   :  { %v5254_v48 = vpop.eup %5253 }
 0xc96   :  { %v4248_v6 = vmul.f32 %v5254_v48, %v4236_v8 }
 0xc98   :  { %4875 = vmatmul.msk.f32.vlgmr.msrb.gmra.mxu3 %vm338_vm11, %v4248_v6 }
 0xcac   :  { %v4243_v61 = vpop.xlane.xlu1 %4242 }
 0xcad   :  { %v4245_v34 = vadd.f32 1e-09, %v4243_v61  ;;  %v4492_v61 = vld [vmem:[%s5558_s4 + $0x8] sm:$0xf]  ;;  %s4549_s4 = sshll.u32 %s5406_s20, 4  ;;  %s4550_s4 = int_to_ptr.vmem [resolvable:$true] %s4549_s4 }
 0xcaf   :  { %5255 = vrcp.f32 %v4245_v34 }
 0xcb4   :  { %v4156_v63 = vpop.xlane.xlu0 %4155 }
 0xcb5   :  { %v5256_v28 = vpop.eup %5255  ;;  %v4158_v37 = vadd.f32 1e-09, %v4156_v63 }
 0xcb6   :  { %v4249_v52 = vmul.f32 %v5256_v28, %v4237_v4  ;;  %v4500_v4 = vld [vmem:[%s7389_s6] sm:$0xff] }
 0xcb7   :  { %5257 = vrcp.f32 %v4158_v37  ;;  %v4502_v46 = vmul.f32 %v4500_v4, %v7240_v14 }
 0xcb8   :  { %4876 = vmatmul.msk.f32.gmra.mxu3 %vm338_vm11, %v4249_v52 }
 0xcb9   :  { %v4504_v45 = vsel %vm338_vm11, %v4502_v46, 0.0 }
 0xcbd   :  { %v5258_v43 = vpop.eup %5257 }
 0xcbe   :  { %v7254_v35 = vmul.f32 %v5258_v43, %v4150_v23 }
 0xcc0   :  { %4870 = vmatmul.msk.f32.gmra.mxu1 %vm338_vm11, %v7254_v35  ;;  %v4503_v26 = vmul.f32 %v4501_v57, %v7254_v35 }
 0xcc3   :  { %v4186_v32 = vpop.f32.mrf.mxu1 }
 0xcc4   :  { %4877 = vmatmul.msk.f32.vlgmr.msra.gmra.mxu0 %vm197_vm7, %v4186_v32  ;;  %v4418_v18 = vmul.f32 %v4938_v2, %v4186_v32 }
 0xcc6   :  { %v4420_v38 = vsel %vm197_vm7, %v4418_v18, 0.0 }
 0xcc8   :  { %4879 = vmatmul.msk.f32.vlgmr.msrb.gmra.mxu1 %vm197_vm7, %v7190_v58 }
 0xcd0   :  { %4880 = vmatmul.msk.f32.gmra.mxu1 %vm197_vm7, %v7220_v10  ;;  %v4507_v10 = vsel %vm4139_vm6, %v4503_v26, 0.0 }
 0xd1b   :  { %v4273_v11 = vpop.f32.mrf.mxu3 }
 0xd1c   :  { %4882 = vmatmul.msk.f32.vlgmr.msra.gmra.mxu2 %vm3252_vm12, %v4273_v11  ;;  %v4432_v48 = vmul.f32 %v4939_v39, %v4273_v11  ;;  %v4443_v11 = vld [vmem:[%s7390_s12] sm:$0xff] }
 0xd1e   :  { %v4434_v14 = vsel %vm3252_vm12, %v4432_v48, 0.0 }
 0xd3b   :  { %v4276_v41 = vpop.f32.mrf.mxu3 }
 0xd3c   :  { %4883 = vmatmul.msk.f32.gmra.mxu2 %vm3252_vm12, %v4276_v41  ;;  %v4433_v12 = vmul.f32 %v4939_v39, %v4276_v41 }
 0xd3d   :  { %v4189_v36 = vpop.f32.mrf.mxu1 }
 0xd3e   :  { %4878 = vmatmul.msk.f32.gmra.mxu0 %vm197_vm7, %v4189_v36  ;;  %v4419_v33 = vmul.f32 %v4938_v2, %v4189_v36  ;;  %v4438_v27 = vsel %vm4437_vm13, %v4433_v12, 0.0  ;;  %v4942_v36 = vld [vmem:[#allocation6] ss:$0 sm:$0xff] }
 0xd40   :  { %v4423_v54 = vsel %vm4410_vm14, %v4419_v33, 0.0 }
 0xd41   :  { %v4310_v42 = vpop.f32.mrf.mxu0 }
 0xd45   :  { %v4333_v53 = vpop.f32.mrf.mxu1 }
 0xd46   :  { %v4334_v60 = vadd.f32 %v4333_v53, %v4310_v42 }
 0xd4d   :  { %v4336_v44 = vpop.f32.mrf.mxu1 }
 0xd9f   :  { %v4366_v40 = vpop.f32.mrf.mxu2 }
 0xda0   :  { %v4372_v13 = vadd.f32 %v4366_v40, %v4334_v60 }
 0xda2   :  { %v4378_v62 = vadd.f32 %v4940_v9, %v4372_v13 }
 0xda4   :  { %4380 = vmax.xlane.f32.xlu2 %v4378_v62 }
 0xdac   :  { %4408 = vadd.xlane.f32.xlu2 %v4407_v21 }
 0xdb4   :  { %4424 = vadd.xlane.f32.xlu2 %v4423_v54 }
 0xdbb   :  { %v4313_v50 = vpop.f32.mrf.mxu0 }
 0xdbc   :  { %v4337_v59 = vadd.f32 %v4336_v44, %v4313_v50 }
 0xdbf   :  { %v4369_v17 = vpop.f32.mrf.mxu2 }
 0xdc0   :  { %v4373_v47 = vadd.f32 %v4369_v17, %v4337_v59 }
 0xdc2   :  { %v4379_v56 = vadd.f32 %v4940_v9, %v4373_v47 }
 0xdc4   :  { %v4383_v8 = vsel %vm4382_vm9, %v4379_v56, -inf }
 0xdc5   :  { %4384 = vmax.xlane.f32.xlu1 %v4383_v8 }
 0xe17   :  { %v4381_v58 = vpop.xlane.xlu2 %4380 }
 0xe18   :  { %v4386_v49 = vsub.f32 %v4378_v62, %v4381_v58  ;;  %v4444_v62 = vld [vmem:[%s7390_s12 + $0x8] sm:$0xf] }
 0xe1a   :  { %v4388_v5 = vmul.f32 1.442695, %v4386_v49 }
 0xe1c   :  { %5259 = vpow2.f32 %v4388_v5 }
 0xe1f   :  { %v4409_v43 = vpop.xlane.xlu2 %4408 }
 0xe22   :  { %v5260_v19 = vpop.eup %5259 }
 0xe23   :  { %4392 = vadd.xlane.f32.xlu1 %v5260_v19 }
 0xe27   :  { %v4425_v42 = vpop.xlane.xlu2 %4424 }
 0xe2b   :  { %4421 = vadd.xlane.f32.xlu1 %v4420_v38 }
 0xe33   :  { %4439 = vadd.xlane.f32.xlu1 %v4438_v27 }
 0xe38   :  { %v4385_v31 = vpop.xlane.xlu1 %4384 }
 0xe39   :  { %v4387_v3 = vsub.f32 %v4379_v56, %v4385_v31 }
 0xe3b   :  { %v4390_v23 = vmul.f32 1.442695, %v4387_v3  ;;  %4505 = vadd.xlane.f32.xlu1 %v4504_v45 }
 0xe3d   :  { %5261 = vpow2.f32 %v4390_v23 }
 0xe43   :  { %v5262_v51 = vpop.eup %5261 }
 0xe44   :  { %v4394_v1 = vsel %vm4382_vm9, %v5262_v51, 0.0 }
 0xe45   :  { %4395 = vadd.xlane.f32.xlu0 %v4394_v1 }
 0xe4d   :  { %4412 = vadd.xlane.f32.xlu0 %v4411_v7 }
 0xe55   :  { %4435 = vadd.xlane.f32.xlu0 %v4434_v14 }
 0xe96   :  { %v4393_v6 = vpop.xlane.xlu1 %4392 }
 0xe97   :  { %5263 = vrcp.f32 %v4393_v6 }
 0xe9d   :  { %v5264_v25 = vpop.eup %5263 }
 0xe9e   :  { %v4399_v0 = vmul.f32 %v5264_v25, %v5260_v19  ;;  %v4422_v52 = vpop.xlane.xlu1 %4421 }
 0xe9f   :  { %v4426_v24 = vadd.f32 %v4422_v52, %v4409_v43 }
 0xea0   :  { %v4493_v15 = vmul.f32 %v4491_v16, %v4399_v0 }
 0xea2   :  { %4495 = vadd.xlane.f32.xlu2 %v4493_v15 }
 0xea6   :  { %v4440_v40 = vpop.xlane.xlu1 %4439 }
 0xeaa   :  { %4508 = vadd.xlane.f32.xlu2 %v4507_v10 }
 0xeae   :  { %v4506_v31 = vpop.xlane.xlu1 %4505 }
 0xeb8   :  { %v4396_v30 = vpop.xlane.xlu0 %4395 }
 0xeb9   :  { %5265 = vrcp.f32 %v4396_v30 }
 0xebf   :  { %v5266_v29 = vpop.eup %5265 }
 0xec0   :  { %v4400_v34 = vmul.f32 %v5266_v29, %v5262_v51  ;;  %v4413_v37 = vpop.xlane.xlu0 %4412 }
 0xec1   :  { %v4427_v60 = vadd.f32 %v4425_v42, %v4413_v37 }
 0xec2   :  { %v4494_v63 = vmul.f32 %v4492_v61, %v4400_v34  ;;  %v4526_v34 = vld [vmem:[%s5563_s30] sm:$0xff] }
 0xec3   :  { %v4442_v13 = vadd.f32 %v4440_v40, %v4427_v60 }
 0xec4   :  { %v4497_v28 = vsel %vm4382_vm9, %v4494_v63, 0.0 }
 0xec5   :  { %4498 = vadd.xlane.f32.xlu0 %v4497_v28  ;;  %v4446_v20 = vadd.f32 %v4444_v62, %v4442_v13  ;;  %v4527_v28 = vld [vmem:[%s5563_s30 + $0x8] sm:$0xf]  ;;  %s5357_s30 = sshra.s32 %s4552_s1, 4  ;;  %s5358_s30 = int_to_ptr.hbm [resolvable:$true] %s5357_s30 }
 0xec6   :  { %s5359_s28 = scalar_lea.hbm %s5358_s30, 1  ;;  %p5362_p1 = scmp.lt.s32.totalorder %s5358_s30, %s5573_s27 }
 0xec7   :  { %v4452_v21 = vadd.f32 %v4942_v36, %v4446_v20  ;;  %p5360_p0 = scmp.ne.s32.totalorder %s5358_s30, %s5359_s28  ;;  %p5363_p2 = scmp.lt.s32.totalorder %s5361_s2, %s5359_s28 }
 0xec8   :  { %v4436_v32 = vpop.xlane.xlu0 %4435 }
 0xec9   :  { %v4441_v35 = vadd.f32 %v4436_v32, %v4426_v24  ;;  %v4885_v33 = vmul.f32 -1.442695, %v4452_v21  ;;  %p5364_p3 = por %p5363_p2, %p5362_p1 }
 0xecb   :  { %v4445_v41 = vadd.f32 %v4443_v11, %v4441_v35  ;;  %p5365_p4 = pnand %p5364_p3, %p5360_p0 }
 0xecd   :  { %v4451_v53 = vadd.f32 %v4942_v36, %v4445_v41 }
 0xecf   :  { %v4884_v9 = vmul.f32 -1.442695, %v4451_v53 }
 0xed1   :  { %5267 = vpow2.f32 %v4884_v9 }
 0xed7   :  { %v5268_v22 = vpop.eup %5267 }
 0xed8   :  { %v4459_v2 = vadd.f32 1.0, %v5268_v22 }
 0xeda   :  { %5269 = vrcp.f32 %v4459_v2  ;;  %v4472_v58 = vand.u32 2147483648, %v4459_v2  ;;  %vm4466_vm11 = vweird.f32 %v4459_v2  ;;  %v4470_v49 = vand.u32 2147483647, %v4459_v2 }
 0xedb   :  { %5271 = vpow2.f32 %v4885_v33 }
 0xedc   :  { %v4473_v18 = vor.u32 1.1754944e-38, %v4472_v58  ;;  %vm4471_vm15 = vcmp.eq.f32.partialorder %v4470_v49, 8.507059e+37 }
 0xee0   :  { %v5270_v54 = vpop.eup %5269 }
 0xee1   :  { %v5272_v50 = vpop.eup %5271  ;;  %v4462_v44 = vmul.f32 %v5270_v54, %v4459_v2  ;;  %vm4467_vm7 = vweird.f32 %v5270_v54 }
 0xee2   :  { %v4460_v59 = vadd.f32 1.0, %v5272_v50  ;;  %vm4468_vm12 = vmor %vm4466_vm11, %vm4467_vm7 }
 0xee3   :  { %v4463_v17 = vsub.f32 1.0, %v4462_v44 }
 0xee4   :  { %5273 = vrcp.f32 %v4460_v59  ;;  %v4487_v23 = vand.u32 2147483648, %v4460_v59  ;;  %vm4481_vm1 = vweird.f32 %v4460_v59  ;;  %v4485_v1 = vand.u32 2147483647, %v4460_v59 }
 0xee5   :  { %v4464_v47 = vmul.f32 %v5270_v54, %v4463_v17 }
 0xee6   :  { %v4488_v7 = vor.u32 1.1754944e-38, %v4487_v23  ;;  %vm4486_vm3 = vcmp.eq.f32.partialorder %v4485_v1, 8.507059e+37 }
 0xee7   :  { %v4465_v8 = vadd.f32 %v5270_v54, %v4464_v47 }
 0xee9   :  { %v4469_v19 = vsel %vm4468_vm12, %v5270_v54, %v4465_v8 }
 0xeea   :  { %v5274_v56 = vpop.eup %5273  ;;  %v4474_v39 = vsel %vm4471_vm15, %v4473_v18, %v4469_v19 }
 0xeeb   :  { %v4477_v5 = vmul.f32 %v5274_v56, %v4460_v59  ;;  %v4512_v27 = vsub.f32 1.0, %v4474_v39  ;;  %vm4482_vm0 = vweird.f32 %v5274_v56 }
 0xeec   :  { %vm4483_vm2 = vmor %vm4481_vm1, %vm4482_vm0 }
 0xeed   :  { %v4478_v38 = vsub.f32 1.0, %v4477_v5  ;;  %v4514_v3 = vmul.f32 %v4512_v27, %v4506_v31 }
 0xeef   :  { %v4479_v4 = vmul.f32 %v5274_v56, %v4478_v38 }
 0xef1   :  { %v4480_v45 = vadd.f32 %v5274_v56, %v4479_v4 }
 0xef3   :  { %v4484_v55 = vsel %vm4483_vm2, %v5274_v56, %v4480_v45 }
 0xef4   :  { %v4489_v14 = vsel %vm4486_vm3, %v4488_v7, %v4484_v55 }
 0xef5   :  { %v4513_v25 = vsub.f32 1.0, %v4489_v14 }
 0xf15   :  { %v4496_v12 = vpop.xlane.xlu2 %4495 }
 0xf16   :  { %v4510_v46 = vmul.f32 %v4496_v12, %v4474_v39 }
 0xf18   :  { %v4516_v51 = vadd.f32 %v4514_v3, %v4510_v46 }
 0xf1a   :  { %v4518_v48 = vadd.f32 1e-10, %v4516_v51 }
 0xf1c   :  { %5275 = vlog2.f32 %v4518_v48 }
 0xf1d   :  { %v4509_v6 = vpop.xlane.xlu2 %4508 }
 0xf1e   :  { %v4515_v0 = vmul.f32 %v4513_v25, %v4509_v6 }
 0xf22   :  { %v5276_v26 = vpop.eup %5275 }
 0xf23   :  { %v4521_v30 = vmul.f32 0.6931472, %v5276_v26 }
 0xf25   :  { %v4524_v29 = vsub.f32 0.0, %v4521_v30 }
 0xf27   :  { %v4528_v37 = vmul.f32 %v4526_v34, %v4524_v29 }
 0xf29   :  { %v4530_v32 = vsel %vm3265_vm10, %v4528_v37, 0.0 }
 0xf38   :  { %v4499_v16 = vpop.xlane.xlu0 %4498 }
 0xf39   :  { %v4511_v15 = vmul.f32 %v4499_v16, %v4489_v14 }
 0xf3b   :  { %v4517_v57 = vadd.f32 %v4515_v0, %v4511_v15 }
 0xf3d   :  { %v4519_v10 = vadd.f32 1e-10, %v4517_v57 }
 0xf3f   :  { %5277 = vlog2.f32 %v4519_v10 }
 0xf45   :  { %v5278_v61 = vpop.eup %5277 }
 0xf46   :  { %v4523_v63 = vmul.f32 0.6931472, %v5278_v61 }
 0xf48   :  { %v4525_v52 = vsub.f32 0.0, %v4523_v63 }
 0xf4a   :  { %v4529_v43 = vmul.f32 %v4527_v28, %v4525_v52 }
 0xf4c   :  { %v4532_v24 = vsel %vm4531_vm4, %v4529_v43, 0.0 }
 0xf4d   :  { %v4533_v35 = vadd.f32 %v4532_v24, %v4530_v32 }
 0xf4f   :  { %v4534_v11 = vrot.slane %v4533_v35, 4 }
 0xf51   :  { %v4535_v41 = vadd.f32 %v4534_v11, %v4533_v35 }
 0xf53   :  { %v4536_v36 = vrot.slane %v4535_v41, 2 }
 0xf55   :  { %v4537_v53 = vadd.f32 %v4536_v36, %v4535_v41 }
 0xf57   :  { %v4538_v42 = vrot.slane %v4537_v53, 1 }
 0xf59   :  { %v4539_v60 = vadd.f32 %v4538_v42, %v4537_v53 }
 0xf5b   :  { %4541 = vst.msk [vmem:[#allocation7] sm:$0x1] %vm4540_vm5, %v4539_v60 }
 0xf5c   :  { %5368 = shalt.err (!%p5365_p4)
}
 0xf5d   :  { %4554 = dma.vmem_to_hbm [thread:$0]  %s4550_s4, 16, %s4552_s1, [#allocation8]  }
 0xf5e   :  { %5369 = dma.done.wait [#allocation8], 16  }
 0xf5f   :  { %5370 = vsyncadd [#allocation8], 4294967280 }
 0xf60   :  { %4561 = vsyncpa [#allocation8], 1 }

</bundles_post_ra>
